<compile_context>
chip_gen: v5e
topology: v5e:2x2
jax: 0.10.0
libtpu: 0.0.40
codegen_flags: <defaults>
</compile_context>

<pallas_src>
import functools
import math

import jax
import jax.numpy as jnp
from jax.experimental import pallas as pl
from jax.experimental.pallas import tpu as pltpu


# ----------------------------------------------------------------------------
# Pallas kernels
# ----------------------------------------------------------------------------

def _round_up(x, m):
    return (x + m - 1) // m * m


def _matmul_bias_kernel(x_ref, w_ref, b_ref, o_ref, *, relu):
    # x_ref: [tm, K]   w_ref: [K, Np]   b_ref: [1, Np]   o_ref: [tm, Np]
    acc = jnp.dot(x_ref[...], w_ref[...], preferred_element_type=jnp.float32)
    acc = acc + b_ref[...]
    if relu:
        acc = jnp.maximum(acc, 0.0)
    o_ref[...] = acc


def grouped_matmul_bias(cols, w, b, relu=False):
    """Batched-over-group matmul: cols [G,M,K] @ w [G,K,Np] + b [G,1,Np].

    Returns [G, M, Np] float32.  The G axis is a parallel grid axis (one FCN
    per group), the M axis is tiled with tm = min(M, 512).
    """
    G, M, K = cols.shape
    Np = w.shape[-1]

    if M <= 512:
        tm = M                      # full dim -> no (8,128) constraint, no pad
        Mp = M
    else:
        tm = 512
        Mp = _round_up(M, tm)
        if Mp != M:
            cols = jnp.pad(cols, ((0, 0), (0, Mp - M), (0, 0)))

    out = pl.pallas_call(
        functools.partial(_matmul_bias_kernel, relu=relu),
        out_shape=jax.ShapeDtypeStruct((G, Mp, Np), jnp.float32),
        grid=(G, Mp // tm),
        in_specs=[
            pl.BlockSpec((None, tm, K), lambda g, i: (g, i, 0)),
            pl.BlockSpec((None, K, Np), lambda g, i: (g, 0, 0)),
            pl.BlockSpec((None, 1, Np), lambda g, i: (g, 0, 0)),
        ],
        out_specs=pl.BlockSpec((None, tm, Np), lambda g, i: (g, i, 0)),
        compiler_params=pltpu.CompilerParams(
            dimension_semantics=("parallel", "parallel")),
    )(cols, w, b)

    if Mp != M:
        out = out[:, :M, :]
    return out


def _lstm_fused_kernel(x_ref, w_ref, b_ref, pc_ref, h_ref, c_ref, *, hid):
    # gates conv matmul + bias, then the ConvLSTM gate math fused in-epilogue.
    gates = jnp.dot(x_ref[...], w_ref[...], preferred_element_type=jnp.float32)
    gates = gates + b_ref[...]
    i_g = jax.nn.sigmoid(gates[:, 0 * hid:1 * hid])   # in_gate
    r_g = jax.nn.sigmoid(gates[:, 1 * hid:2 * hid])   # remember_gate
    o_g = jax.nn.sigmoid(gates[:, 2 * hid:3 * hid])   # out_gate
    g_g = jnp.tanh(gates[:, 3 * hid:4 * hid])         # cell_gate
    cell = r_g * pc_ref[...] + i_g * g_g
    c_ref[...] = cell
    h_ref[...] = o_g * jnp.tanh(cell)


def lstm_step(cols, w, b, prev_c, hid):
    """cols [G,M,K], w [G,K,Np], b [G,1,Np], prev_c [G,M,hid] -> (h, c)."""
    G, M, K = cols.shape
    Np = w.shape[-1]
    h, c = pl.pallas_call(
        functools.partial(_lstm_fused_kernel, hid=hid),
        out_shape=(jax.ShapeDtypeStruct((G, M, hid), jnp.float32),
                   jax.ShapeDtypeStruct((G, M, hid), jnp.float32)),
        grid=(G,),
        in_specs=[
            pl.BlockSpec((None, M, K), lambda g: (g, 0, 0)),
            pl.BlockSpec((None, K, Np), lambda g: (g, 0, 0)),
            pl.BlockSpec((None, 1, Np), lambda g: (g, 0, 0)),
            pl.BlockSpec((None, M, hid), lambda g: (g, 0, 0)),
        ],
        out_specs=(pl.BlockSpec((None, M, hid), lambda g: (g, 0, 0)),
                   pl.BlockSpec((None, M, hid), lambda g: (g, 0, 0))),
        compiler_params=pltpu.CompilerParams(dimension_semantics=("parallel",)),
    )(cols, w, b, prev_c)
    return h, c


# ----------------------------------------------------------------------------
# im2col (channels-last) + conv wrappers
# ----------------------------------------------------------------------------

def im2col(x, k, stride, pad):
    """x: [G,B,D,H,W,C] -> cols [G, B*Do*Ho*Wo, k^3*C], K order (kd,kh,kw,c)."""
    G, B, D, H, W, C = x.shape
    if pad:
        x = jnp.pad(x, ((0, 0), (0, 0), (pad, pad), (pad, pad), (pad, pad), (0, 0)))
    Do = (D + 2 * pad - k) // stride + 1
    Ho = (H + 2 * pad - k) // stride + 1
    Wo = (W + 2 * pad - k) // stride + 1
    patches = []
    for kd in range(k):
        for kh in range(k):
            for kw in range(k):
                patches.append(
                    x[:, :,
                      kd:kd + (Do - 1) * stride + 1:stride,
                      kh:kh + (Ho - 1) * stride + 1:stride,
                      kw:kw + (Wo - 1) * stride + 1:stride, :])
    cols = jnp.stack(patches, axis=-2)                 # [G,B,Do,Ho,Wo,k^3,C]
    cols = cols.reshape(G, B * Do * Ho * Wo, k ** 3 * C)
    return cols, (Do, Ho, Wo)


def conv3d_cl(x, wmat, bmat, cout, k, stride, pad, relu):
    """Channels-last Conv3d.  x [G,B,D,H,W,Cin], wmat [G,k^3*Cin,Npad]."""
    G, B = x.shape[0], x.shape[1]
    cols, (Do, Ho, Wo) = im2col(x, k, stride, pad)
    y = grouped_matmul_bias(cols, wmat, bmat, relu=relu)   # [G, M, Npad]
    return y[:, :, :cout].reshape(G, B, Do, Ho, Wo, cout)


def conv_transpose3d_subpixel_cl(x, wmat, bmat, cout, relu):
    """ConvTranspose3d(k=4, s=2, p=1) as sub-pixel conv.

    x [G,B,D,H,W,Cin], wmat [G, 8*Cin, Npad] (Npad >= 8*cout) -> [G,B,2D,2H,2W,cout].
    """
    G, B, D, H, W, Cin = x.shape
    cols, (Do, Ho, Wo) = im2col(x, 2, 1, 1)            # Do=D+1, Ho=H+1, Wo=W+1
    y = grouped_matmul_bias(cols, wmat, bmat, relu=relu)
    y = y[:, :, :8 * cout].reshape(G, B, Do, Ho, Wo, 8, cout)
    # depth-to-space: class (rd,rh,rw) -> output offsets (rd::2, rh::2, rw::2)
    slices = []
    for rd in range(2):
        for rh in range(2):
            for rw in range(2):
                cls = rd * 4 + rh * 2 + rw
                slices.append(y[:, :, rd:rd + D, rh:rh + H, rw:rw + W, cls, :])
    out = jnp.stack(slices, axis=5)                    # [G,B,D,H,W,8,C]
    out = out.reshape(G, B, D, H, W, 2, 2, 2, cout)
    out = out.transpose(0, 1, 2, 5, 3, 6, 4, 7, 8)     # [G,B,D,2,H,2,W,2,C]
    return out.reshape(G, B, 2 * D, 2 * H, 2 * W, cout)


# ----------------------------------------------------------------------------
# Parameter init (PyTorch layouts) + one-time prep into matmul layouts
# ----------------------------------------------------------------------------

def _uniform(key, shape, bound):
    return jax.random.uniform(key, shape, jnp.float32, -bound, bound)


def init_conv_torch(key, cout, cin, k, bias=True):
    k1, k2 = jax.random.split(key)
    s = 1.0 / math.sqrt(cin * k ** 3)
    w = _uniform(k1, (cout, cin, k, k, k), s)
    b = _uniform(k2, (cout,), s) if bias else None
    return w, b


def init_convT_torch(key, cin, cout, k, bias=True):
    k1, k2 = jax.random.split(key)
    s = 1.0 / math.sqrt(cout * k ** 3)
    w = _uniform(k1, (cin, cout, k, k, k), s)           # PyTorch ConvTranspose layout
    b = _uniform(k2, (cout,), s) if bias else None
    return w, b


def prep_conv(w, b):
    """Conv3d weight [Cout,Cin,k,k,k] -> ([k^3*Cin, Npad], [1, Npad])."""
    Cout, Cin, k = w.shape[0], w.shape[1], w.shape[2]
    wmat = jnp.transpose(w, (2, 3, 4, 1, 0)).reshape(k ** 3 * Cin, Cout)
    Np = _round_up(Cout, 128)
    wmat = jnp.pad(wmat, ((0, 0), (0, Np - Cout)))
    bv = b if b is not None else jnp.zeros((Cout,), jnp.float32)
    bmat = jnp.pad(bv, (0, Np - Cout)).reshape(1, Np)
    return wmat, bmat


def prep_convT_subpixel(w, b):
    """ConvTranspose3d(k=4,s=2,p=1) weight [Cin,Cout,4,4,4] -> sub-pixel matmul.

    Output columns: n = (rd*4+rh*2+rw)*Cout + cout ; rows: (td,th,tw,cin).
    Sub-kernel tap for parity r, offset t is original index 3 - r - 2*t.
    """
    Cin, Cout, k = w.shape[0], w.shape[1], w.shape[2]
    assert k == 4, "sub-pixel lowering assumes kernel=4, stride=2, pad=1"
    blocks = []
    for rd in range(2):
        for rh in range(2):
            for rw in range(2):
                sub = w[:, :, 3 - rd::-2, 3 - rh::-2, 3 - rw::-2]   # [Cin,Cout,2,2,2]
                sub = jnp.transpose(sub, (2, 3, 4, 0, 1)).reshape(8 * Cin, Cout)
                blocks.append(sub)
    wmat = jnp.concatenate(blocks, axis=1)              # [8*Cin, 8*Cout]
    bv = b if b is not None else jnp.zeros((Cout,), jnp.float32)
    bbig = jnp.tile(bv, 8)                              # class-major bias
    N = 8 * Cout
    Np = _round_up(N, 128)
    wmat = jnp.pad(wmat, ((0, 0), (0, Np - N)))
    bmat = jnp.pad(bbig, (0, Np - N)).reshape(1, Np)
    return wmat, bmat


def init_fcn_torch(key, inc, outc, c0):
    keys = jax.random.split(key, 32)
    p = {}
    p["enc"] = [
        init_conv_torch(keys[0], c0, inc, 4),
        init_conv_torch(keys[1], 2 * c0, c0, 4),
        init_conv_torch(keys[2], 4 * c0, 2 * c0, 4),
        init_conv_torch(keys[3], 8 * c0, 4 * c0, 4),
    ]
    ki = 4
    p["res"] = []
    for _ in range(3):          # 3 ResidualBlocks, depth=2 -> 3 convs each, bias=False
        p["res"].append([init_conv_torch(keys[ki + j], 8 * c0, 8 * c0, 3, bias=False)
                         for j in range(3)])
        ki += 3
    p["lstm"] = init_conv_torch(keys[ki], 4 * 8 * c0, 16 * c0, 3)   # 16c0 -> 32c0
    ki += 1
    p["dec_t"] = [
        init_convT_torch(keys[ki + 0], 8 * c0, 4 * c0, 4),
        init_convT_torch(keys[ki + 1], 4 * c0, 2 * c0, 4),
        init_convT_torch(keys[ki + 2], 2 * c0, c0, 4),
        init_convT_torch(keys[ki + 3], c0, c0 // 2, 4),
    ]
    p["dec_final"] = init_conv_torch(keys[ki + 4], outc, c0 // 2, 3)
    return p


def stack_and_prep(fcns):
    """Stack the 3 FCNs' pre-reshaped weights into [3, K, Npad] per layer."""
    def sconv(pick):
        prepped = [prep_conv(*pick(p)) for p in fcns]
        return {"w": jnp.stack([w for w, _ in prepped]),
                "b": jnp.stack([b for _, b in prepped])}

    def sconvT(pick):
        prepped = [prep_convT_subpixel(*pick(p)) for p in fcns]
        return {"w": jnp.stack([w for w, _ in prepped]),
                "b": jnp.stack([b for _, b in prepped])}

    out = {}
    out["enc"] = [sconv(lambda p, i=i: p["enc"][i]) for i in range(4)]
    out["res"] = [[sconv(lambda p, i=i, j=j: p["res"][i][j]) for j in range(3)]
                  for i in range(3)]
    out["lstm"] = sconv(lambda p: p["lstm"])
    out["dec_t"] = [sconvT(lambda p, i=i: p["dec_t"][i]) for i in range(4)]
    out["dec_final"] = sconv(lambda p: p["dec_final"])
    return out


# ----------------------------------------------------------------------------
# Forward pass (all three FCNs batched along the leading group axis G=3)
# ----------------------------------------------------------------------------

def fcn_forward_grouped(p, x, num, c0, outc):
    """x: [G, B, D, H, W, inc] channels-last -> [G, B, outc, num, D, H, W]."""
    hid = 8 * c0
    h = x
    # encoder: 4x (Conv3d k4 s2 p1 + ReLU)
    enc_couts = [c0, 2 * c0, 4 * c0, 8 * c0]
    for layer, cout in zip(p["enc"], enc_couts):
        h = conv3d_cl(h, layer["w"], layer["b"], cout, 4, 2, 1, relu=True)
    # 3 residual blocks: (conv+relu, conv+relu, conv) + skip, bias=False
    for blk in p["res"]:
        r = conv3d_cl(h, blk[0]["w"], blk[0]["b"], 8 * c0, 3, 1, 1, relu=True)
        r = conv3d_cl(r, blk[1]["w"], blk[1]["b"], 8 * c0, 3, 1, 1, relu=True)
        r = conv3d_cl(r, blk[2]["w"], blk[2]["b"], 8 * c0, 3, 1, 1, relu=False)
        h = h + r

    G, B, D, H, W, _ = h.shape
    prev_h = jnp.zeros((G, B, D, H, W, hid), jnp.float32)
    prev_c = jnp.zeros((G, B * D * H * W, hid), jnp.float32)

    dec_couts = [4 * c0, 2 * c0, c0, c0 // 2]
    comps = []
    for _ in range(num):
        # ConvLSTM step: gates conv fused with gate nonlinearities + state update
        stacked = jnp.concatenate([h, prev_h], axis=-1)
        cols, _ = im2col(stacked, 3, 1, 1)
        new_h, prev_c = lstm_step(cols, p["lstm"]["w"], p["lstm"]["b"], prev_c, hid)
        prev_h = new_h.reshape(G, B, D, H, W, hid)

        # decoder: 4x sub-pixel ConvTranspose3d(k4,s2,p1)+ReLU, then Conv3d k3 p1
        d = prev_h
        for layer, cout in zip(p["dec_t"], dec_couts):
            d = conv_transpose3d_subpixel_cl(d, layer["w"], layer["b"], cout, relu=True)
        d = conv3d_cl(d, p["dec_final"]["w"], p["dec_final"]["b"], outc, 3, 1, 1,
                      relu=False)
        comps.append(d)

    comps = jnp.stack(comps, axis=0)                   # [num, G, B, Do, Ho, Wo, outc]
    # single layout conversion back to torch NCDHW-ish: [G, B, outc, num, D, H, W]
    return jnp.transpose(comps, (1, 2, 6, 0, 3, 4, 5))


def rinterp_forward(params, s, e, *, num, c0, outc):
    # u/v/w inputs: channel 0 = start component, channel 1 = end component
    u = jnp.stack([s[:, 0], e[:, 0]], axis=-1)          # [B, D, H, W, 2]
    v = jnp.stack([s[:, 1], e[:, 1]], axis=-1)
    w_ = jnp.stack([s[:, 2], e[:, 2]], axis=-1)
    x = jnp.stack([u, v, w_], axis=0)                   # [3, B, D, H, W, 2]

    out = fcn_forward_grouped(params, x, num, c0, outc)  # [3, B, outc, num, D, H, W]
    U, V, W = out[0], out[1], out[2]
    if U.shape[0] == 1:                                  # torch.squeeze(comps, 0)
        U, V, W = U[0], V[0], W[0]
    return U, V, W


# ----------------------------------------------------------------------------
# Main
# ----------------------------------------------------------------------------

if __name__ == "__main__":
    key = jax.random.PRNGKey(0)

    B, D, H, Wsp = 1, 16, 16, 16          # spatial must be divisible by 16
    inc, outc, init_channels, num = 2, 1, 4, 2

    k_u, k_v, k_w, k_s, k_e = jax.random.split(key, 5)
    fcn_torch_params = [
        init_fcn_torch(k_u, inc, outc, init_channels),
        init_fcn_torch(k_v, inc, outc, init_channels),
        init_fcn_torch(k_w, inc, outc, init_channels),
    ]
    params = stack_and_prep(fcn_torch_params)

    s = jax.random.normal(k_s, (B, 3, D, H, Wsp), jnp.float32)
    e = jax.random.normal(k_e, (B, 3, D, H, Wsp), jnp.float32)

    fwd = jax.jit(functools.partial(rinterp_forward, num=num, c0=init_channels,
                                    outc=outc))
    U, V, Wout = fwd(params, s, e)
    jax.block_until_ready((U, V, Wout))

    # expected shapes (B==1 squeezed): [outc, num, D, H, W]
    assert U.shape == (outc, num, D, H, Wsp)
    assert V.shape == (outc, num, D, H, Wsp)
    assert Wout.shape == (outc, num, D, H, Wsp)

    print("KERNEL_OK")
</pallas_src>

<mosaic_0001>
module attributes {stable_mosaic.version = 11 : i64} {
  func.func @_matmul_bias_kernel(%arg0: i32, %arg1: i32, %arg2: memref<1x512x128xf32, #tpu.memory_space<vmem>>, %arg3: memref<1x128x128xf32, #tpu.memory_space<vmem>>, %arg4: memref<1x1x128xf32, #tpu.memory_space<vmem>>, %arg5: memref<1x512x128xf32, #tpu.memory_space<vmem>>) attributes {dimension_semantics = [#tpu.dimension_semantics<parallel>, #tpu.dimension_semantics<parallel>], iteration_bounds = array<i64: 3, 1>, scalar_prefetch = 0 : i64, scratch_operands = 0 : i64, tpu.core_type = #tpu.core_type<tc>, window_params = [{transform_indices = @transform_0, window_bounds = array<i64: 1, 512, 128>}, {transform_indices = @transform_1, window_bounds = array<i64: 1, 128, 128>}, {transform_indices = @transform_2, window_bounds = array<i64: 1, 1, 128>}, {transform_indices = @transform_3, window_bounds = array<i64: 1, 512, 128>}]} {
    %c0 = arith.constant 0 : index
    %c0_0 = arith.constant 0 : index
    %c0_1 = arith.constant 0 : index
    %0 = vector.load %arg2[%c0, %c0_0, %c0_1] : memref<1x512x128xf32, #tpu.memory_space<vmem>>, vector<1x512x128xf32>
    %1 = vector.shape_cast %0 : vector<1x512x128xf32> to vector<512x128xf32>
    %c0_2 = arith.constant 0 : index
    %c0_3 = arith.constant 0 : index
    %c0_4 = arith.constant 0 : index
    %2 = vector.load %arg3[%c0_2, %c0_3, %c0_4] : memref<1x128x128xf32, #tpu.memory_space<vmem>>, vector<1x128x128xf32>
    %3 = vector.shape_cast %2 : vector<1x128x128xf32> to vector<128x128xf32>
    %cst = arith.constant dense<0.000000e+00> : vector<512x128xf32>
    %4 = tpu.matmul %1, %3, %cst {dimension_numbers = #tpu.dot_dimension_numbers<[1], [0], [0], [1], [0, 0, 1, 1], [], []>} : vector<512x128xf32>, vector<128x128xf32>, vector<512x128xf32> -> vector<512x128xf32>
    %c0_5 = arith.constant 0 : index
    %c0_6 = arith.constant 0 : index
    %c0_7 = arith.constant 0 : index
    %5 = vector.load %arg4[%c0_5, %c0_6, %c0_7] : memref<1x1x128xf32, #tpu.memory_space<vmem>>, vector<1x1x128xf32>
    %6 = vector.shape_cast %5 : vector<1x1x128xf32> to vector<1x128xf32>
    %7 = vector.broadcast %6 : vector<1x128xf32> to vector<512x128xf32>
    %8 = arith.addf %4, %7 : vector<512x128xf32>
    %cst_8 = arith.constant 0.000000e+00 : f32
    %9 = vector.broadcast %cst_8 : f32 to vector<512x128xf32>
    %10 = arith.maximumf %8, %9 : vector<512x128xf32>
    %c0_9 = arith.constant 0 : index
    %c0_10 = arith.constant 0 : index
    %c0_11 = arith.constant 0 : index
    %11 = vector.load %arg5[%c0_9, %c0_10, %c0_11] : memref<1x512x128xf32, #tpu.memory_space<vmem>>, vector<1x512x128xf32>
    %12 = vector.shape_cast %11 : vector<1x512x128xf32> to vector<512x128xf32>
    %13 = vector.shape_cast %10 : vector<512x128xf32> to vector<1x512x128xf32>
    tpu.vector_store %arg5[%c0_9, %c0_10, %c0_11], %13 {strides = array<i32>} : memref<1x512x128xf32, #tpu.memory_space<vmem>>, vector<1x512x128xf32>,
    return
  }
  func.func @transform_0(%arg0: i32, %arg1: i32) -> (i32, i32, i32) {
    %c0_i32 = arith.constant 0 : i32
    %c0_i32_0 = arith.constant 0 : i32
    return %arg0, %arg1, %c0_i32 : i32, i32, i32
  }
  func.func @transform_1(%arg0: i32, %arg1: i32) -> (i32, i32, i32) {
    %c0_i32 = arith.constant 0 : i32
    %c0_i32_0 = arith.constant 0 : i32
    %c0_i32_1 = arith.constant 0 : i32
    return %arg0, %c0_i32, %c0_i32_0 : i32, i32, i32
  }
  func.func @transform_2(%arg0: i32, %arg1: i32) -> (i32, i32, i32) {
    %c0_i32 = arith.constant 0 : i32
    %c0_i32_0 = arith.constant 0 : i32
    %c0_i32_1 = arith.constant 0 : i32
    return %arg0, %c0_i32, %c0_i32_0 : i32, i32, i32
  }
  func.func @transform_3(%arg0: i32, %arg1: i32) -> (i32, i32, i32) {
    %c0_i32 = arith.constant 0 : i32
    %c0_i32_0 = arith.constant 0 : i32
    return %arg0, %arg1, %c0_i32 : i32, i32, i32
  }
}

module attributes {stable_mosaic.version = 11 : i64} {
  func.func @_matmul_bias_kernel(%arg0: i32, %arg1: i32, %arg2: memref<1x64x256xf32, #tpu.memory_space<vmem>>, %arg3: memref<1x256x128xf32, #tpu.memory_space<vmem>>, %arg4: memref<1x1x128xf32, #tpu.memory_space<vmem>>, %arg5: memref<1x64x128xf32, #tpu.memory_space<vmem>>) attributes {dimension_semantics = [#tpu.dimension_semantics<parallel>, #tpu.dimension_semantics<parallel>], iteration_bounds = array<i64: 3, 1>, scalar_prefetch = 0 : i64, scratch_operands = 0 : i64, tpu.core_type = #tpu.core_type<tc>, window_params = [{transform_indices = @transform_0, window_bounds = array<i64: 1, 64, 256>}, {transform_indices = @transform_1, window_bounds = array<i64: 1, 256, 128>}, {transform_indices = @transform_2, window_bounds = array<i64: 1, 1, 128>}, {transform_indices = @transform_3, window_bounds = array<i64: 1, 64, 128>}]} {
    %c0 = arith.constant 0 : index
    %c0_0 = arith.constant 0 : index
    %c0_1 = arith.constant 0 : index
    %0 = vector.load %arg2[%c0, %c0_0, %c0_1] : memref<1x64x256xf32, #tpu.memory_space<vmem>>, vector<1x64x256xf32>
    %1 = vector.shape_cast %0 : vector<1x64x256xf32> to vector<64x256xf32>
    %c0_2 = arith.constant 0 : index
    %c0_3 = arith.constant 0 : index
    %c0_4 = arith.constant 0 : index
    %2 = vector.load %arg3[%c0_2, %c0_3, %c0_4] : memref<1x256x128xf32, #tpu.memory_space<vmem>>, vector<1x256x128xf32>
    %3 = vector.shape_cast %2 : vector<1x256x128xf32> to vector<256x128xf32>
    %cst = arith.constant dense<0.000000e+00> : vector<64x128xf32>
    %4 = tpu.matmul %1, %3, %cst {dimension_numbers = #tpu.dot_dimension_numbers<[1], [0], [0], [1], [0, 0, 1, 1], [], []>} : vector<64x256xf32>, vector<256x128xf32>, vector<64x128xf32> -> vector<64x128xf32>
    %c0_5 = arith.constant 0 : index
    %c0_6 = arith.constant 0 : index
    %c0_7 = arith.constant 0 : index
    %5 = vector.load %arg4[%c0_5, %c0_6, %c0_7] : memref<1x1x128xf32, #tpu.memory_space<vmem>>, vector<1x1x128xf32>
    %6 = vector.shape_cast %5 : vector<1x1x128xf32> to vector<1x128xf32>
    %7 = vector.broadcast %6 : vector<1x128xf32> to vector<64x128xf32>
    %8 = arith.addf %4, %7 : vector<64x128xf32>
    %cst_8 = arith.constant 0.000000e+00 : f32
    %9 = vector.broadcast %cst_8 : f32 to vector<64x128xf32>
    %10 = arith.maximumf %8, %9 : vector<64x128xf32>
    %c0_9 = arith.constant 0 : index
    %c0_10 = arith.constant 0 : index
    %c0_11 = arith.constant 0 : index
    %11 = vector.load %arg5[%c0_9, %c0_10, %c0_11] : memref<1x64x128xf32, #tpu.memory_space<vmem>>, vector<1x64x128xf32>
    %12 = vector.shape_cast %11 : vector<1x64x128xf32> to vector<64x128xf32>
    %13 = vector.shape_cast %10 : vector<64x128xf32> to vector<1x64x128xf32>
    tpu.vector_store %arg5[%c0_9, %c0_10, %c0_11], %13 {strides = array<i32>} : memref<1x64x128xf32, #tpu.memory_space<vmem>>, vector<1x64x128xf32>,
    return
  }
  func.func @transform_0(%arg0: i32, %arg1: i32) -> (i32, i32, i32) {
    %c0_i32 = arith.constant 0 : i32
    %c0_i32_0 = arith.constant 0 : i32
    return %arg0, %arg1, %c0_i32 : i32, i32, i32
  }
  func.func @transform_1(%arg0: i32, %arg1: i32) -> (i32, i32, i32) {
    %c0_i32 = arith.constant 0 : i32
    %c0_i32_0 = arith.constant 0 : i32
    %c0_i32_1 = arith.constant 0 : i32
    return %arg0, %c0_i32, %c0_i32_0 : i32, i32, i32
  }
  func.func @transform_2(%arg0: i32, %arg1: i32) -> (i32, i32, i32) {
    %c0_i32 = arith.constant 0 : i32
    %c0_i32_0 = arith.constant 0 : i32
    %c0_i32_1 = arith.constant 0 : i32
    return %arg0, %c0_i32, %c0_i32_0 : i32, i32, i32
  }
  func.func @transform_3(%arg0: i32, %arg1: i32) -> (i32, i32, i32) {
    %c0_i32 = arith.constant 0 : i32
    %c0_i32_0 = arith.constant 0 : i32
    return %arg0, %arg1, %c0_i32 : i32, i32, i32
  }
}

module attributes {stable_mosaic.version = 11 : i64} {
  func.func @_matmul_bias_kernel(%arg0: i32, %arg1: i32, %arg2: memref<1x8x512xf32, #tpu.memory_space<vmem>>, %arg3: memref<1x512x128xf32, #tpu.memory_space<vmem>>, %arg4: memref<1x1x128xf32, #tpu.memory_space<vmem>>, %arg5: memref<1x8x128xf32, #tpu.memory_space<vmem>>) attributes {dimension_semantics = [#tpu.dimension_semantics<parallel>, #tpu.dimension_semantics<parallel>], iteration_bounds = array<i64: 3, 1>, scalar_prefetch = 0 : i64, scratch_operands = 0 : i64, tpu.core_type = #tpu.core_type<tc>, window_params = [{transform_indices = @transform_0, window_bounds = array<i64: 1, 8, 512>}, {transform_indices = @transform_1, window_bounds = array<i64: 1, 512, 128>}, {transform_indices = @transform_2, window_bounds = array<i64: 1, 1, 128>}, {transform_indices = @transform_3, window_bounds = array<i64: 1, 8, 128>}]} {
    %c0 = arith.constant 0 : index
    %c0_0 = arith.constant 0 : index
    %c0_1 = arith.constant 0 : index
    %0 = vector.load %arg2[%c0, %c0_0, %c0_1] : memref<1x8x512xf32, #tpu.memory_space<vmem>>, vector<1x8x512xf32>
    %1 = vector.shape_cast %0 : vector<1x8x512xf32> to vector<8x512xf32>
    %c0_2 = arith.constant 0 : index
    %c0_3 = arith.constant 0 : index
    %c0_4 = arith.constant 0 : index
    %2 = vector.load %arg3[%c0_2, %c0_3, %c0_4] : memref<1x512x128xf32, #tpu.memory_space<vmem>>, vector<1x512x128xf32>
    %3 = vector.shape_cast %2 : vector<1x512x128xf32> to vector<512x128xf32>
    %cst = arith.constant dense<0.000000e+00> : vector<8x128xf32>
    %4 = tpu.matmul %1, %3, %cst {dimension_numbers = #tpu.dot_dimension_numbers<[1], [0], [0], [1], [0, 0, 1, 1], [], []>} : vector<8x512xf32>, vector<512x128xf32>, vector<8x128xf32> -> vector<8x128xf32>
    %c0_5 = arith.constant 0 : index
    %c0_6 = arith.constant 0 : index
    %c0_7 = arith.constant 0 : index
    %5 = vector.load %arg4[%c0_5, %c0_6, %c0_7] : memref<1x1x128xf32, #tpu.memory_space<vmem>>, vector<1x1x128xf32>
    %6 = vector.shape_cast %5 : vector<1x1x128xf32> to vector<1x128xf32>
    %7 = vector.broadcast %6 : vector<1x128xf32> to vector<8x128xf32>
    %8 = arith.addf %4, %7 : vector<8x128xf32>
    %cst_8 = arith.constant 0.000000e+00 : f32
    %9 = vector.broadcast %cst_8 : f32 to vector<8x128xf32>
    %10 = arith.maximumf %8, %9 : vector<8x128xf32>
    %c0_9 = arith.constant 0 : index
    %c0_10 = arith.constant 0 : index
    %c0_11 = arith.constant 0 : index
    %11 = vector.load %arg5[%c0_9, %c0_10, %c0_11] : memref<1x8x128xf32, #tpu.memory_space<vmem>>, vector<1x8x128xf32>
    %12 = vector.shape_cast %11 : vector<1x8x128xf32> to vector<8x128xf32>
    %13 = vector.shape_cast %10 : vector<8x128xf32> to vector<1x8x128xf32>
    tpu.vector_store %arg5[%c0_9, %c0_10, %c0_11], %13 {strides = array<i32>} : memref<1x8x128xf32, #tpu.memory_space<vmem>>, vector<1x8x128xf32>,
    return
  }
  func.func @transform_0(%arg0: i32, %arg1: i32) -> (i32, i32, i32) {
    %c0_i32 = arith.constant 0 : i32
    %c0_i32_0 = arith.constant 0 : i32
    return %arg0, %arg1, %c0_i32 : i32, i32, i32
  }
  func.func @transform_1(%arg0: i32, %arg1: i32) -> (i32, i32, i32) {
    %c0_i32 = arith.constant 0 : i32
    %c0_i32_0 = arith.constant 0 : i32
    %c0_i32_1 = arith.constant 0 : i32
    return %arg0, %c0_i32, %c0_i32_0 : i32, i32, i32
  }
  func.func @transform_2(%arg0: i32, %arg1: i32) -> (i32, i32, i32) {
    %c0_i32 = arith.constant 0 : i32
    %c0_i32_0 = arith.constant 0 : i32
    %c0_i32_1 = arith.constant 0 : i32
    return %arg0, %c0_i32, %c0_i32_0 : i32, i32, i32
  }
  func.func @transform_3(%arg0: i32, %arg1: i32) -> (i32, i32, i32) {
    %c0_i32 = arith.constant 0 : i32
    %c0_i32_0 = arith.constant 0 : i32
    return %arg0, %arg1, %c0_i32 : i32, i32, i32
  }
}

module attributes {stable_mosaic.version = 11 : i64} {
  func.func @_matmul_bias_kernel(%arg0: i32, %arg1: i32, %arg2: memref<1x1x1024xf32, #tpu.memory_space<vmem>>, %arg3: memref<1x1024x128xf32, #tpu.memory_space<vmem>>, %arg4: memref<1x1x128xf32, #tpu.memory_space<vmem>>, %arg5: memref<1x1x128xf32, #tpu.memory_space<vmem>>) attributes {dimension_semantics = [#tpu.dimension_semantics<parallel>, #tpu.dimension_semantics<parallel>], iteration_bounds = array<i64: 3, 1>, scalar_prefetch = 0 : i64, scratch_operands = 0 : i64, tpu.core_type = #tpu.core_type<tc>, window_params = [{transform_indices = @transform_0, window_bounds = array<i64: 1, 1, 1024>}, {transform_indices = @transform_1, window_bounds = array<i64: 1, 1024, 128>}, {transform_indices = @transform_2, window_bounds = array<i64: 1, 1, 128>}, {transform_indices = @transform_3, window_bounds = array<i64: 1, 1, 128>}]} {
    %c0 = arith.constant 0 : index
    %c0_0 = arith.constant 0 : index
    %c0_1 = arith.constant 0 : index
    %0 = vector.load %arg2[%c0, %c0_0, %c0_1] : memref<1x1x1024xf32, #tpu.memory_space<vmem>>, vector<1x1x1024xf32>
    %1 = vector.shape_cast %0 : vector<1x1x1024xf32> to vector<1x1024xf32>
    %c0_2 = arith.constant 0 : index
    %c0_3 = arith.constant 0 : index
    %c0_4 = arith.constant 0 : index
    %2 = vector.load %arg3[%c0_2, %c0_3, %c0_4] : memref<1x1024x128xf32, #tpu.memory_space<vmem>>, vector<1x1024x128xf32>
    %3 = vector.shape_cast %2 : vector<1x1024x128xf32> to vector<1024x128xf32>
    %cst = arith.constant dense<0.000000e+00> : vector<1x128xf32>
    %4 = tpu.matmul %1, %3, %cst {dimension_numbers = #tpu.dot_dimension_numbers<[1], [0], [0], [1], [0, 0, 1, 1], [], []>} : vector<1x1024xf32>, vector<1024x128xf32>, vector<1x128xf32> -> vector<1x128xf32>
    %c0_5 = arith.constant 0 : index
    %c0_6 = arith.constant 0 : index
    %c0_7 = arith.constant 0 : index
    %5 = vector.load %arg4[%c0_5, %c0_6, %c0_7] : memref<1x1x128xf32, #tpu.memory_space<vmem>>, vector<1x1x128xf32>
    %6 = vector.shape_cast %5 : vector<1x1x128xf32> to vector<1x128xf32>
    %7 = arith.addf %4, %6 : vector<1x128xf32>
    %cst_8 = arith.constant 0.000000e+00 : f32
    %8 = vector.broadcast %cst_8 : f32 to vector<1x128xf32>
    %9 = arith.maximumf %7, %8 : vector<1x128xf32>
    %c0_9 = arith.constant 0 : index
    %c0_10 = arith.constant 0 : index
    %c0_11 = arith.constant 0 : index
    %10 = vector.load %arg5[%c0_9, %c0_10, %c0_11] : memref<1x1x128xf32, #tpu.memory_space<vmem>>, vector<1x1x128xf32>
    %11 = vector.shape_cast %10 : vector<1x1x128xf32> to vector<1x128xf32>
    %12 = vector.shape_cast %9 : vector<1x128xf32> to vector<1x1x128xf32>
    tpu.vector_store %arg5[%c0_9, %c0_10, %c0_11], %12 {strides = array<i32>} : memref<1x1x128xf32, #tpu.memory_space<vmem>>, vector<1x1x128xf32>,
    return
  }
  func.func @transform_0(%arg0: i32, %arg1: i32) -> (i32, i32, i32) {
    %c0_i32 = arith.constant 0 : i32
    %c0_i32_0 = arith.constant 0 : i32
    return %arg0, %arg1, %c0_i32 : i32, i32, i32
  }
  func.func @transform_1(%arg0: i32, %arg1: i32) -> (i32, i32, i32) {
    %c0_i32 = arith.constant 0 : i32
    %c0_i32_0 = arith.constant 0 : i32
    %c0_i32_1 = arith.constant 0 : i32
    return %arg0, %c0_i32, %c0_i32_0 : i32, i32, i32
  }
  func.func @transform_2(%arg0: i32, %arg1: i32) -> (i32, i32, i32) {
    %c0_i32 = arith.constant 0 : i32
    %c0_i32_0 = arith.constant 0 : i32
    %c0_i32_1 = arith.constant 0 : i32
    return %arg0, %c0_i32, %c0_i32_0 : i32, i32, i32
  }
  func.func @transform_3(%arg0: i32, %arg1: i32) -> (i32, i32, i32) {
    %c0_i32 = arith.constant 0 : i32
    %c0_i32_0 = arith.constant 0 : i32
    return %arg0, %arg1, %c0_i32 : i32, i32, i32
  }
}

module attributes {stable_mosaic.version = 11 : i64} {
  func.func @_matmul_bias_kernel(%arg0: i32, %arg1: i32, %arg2: memref<1x1x864xf32, #tpu.memory_space<vmem>>, %arg3: memref<1x864x128xf32, #tpu.memory_space<vmem>>, %arg4: memref<1x1x128xf32, #tpu.memory_space<vmem>>, %arg5: memref<1x1x128xf32, #tpu.memory_space<vmem>>) attributes {dimension_semantics = [#tpu.dimension_semantics<parallel>, #tpu.dimension_semantics<parallel>], iteration_bounds = array<i64: 3, 1>, scalar_prefetch = 0 : i64, scratch_operands = 0 : i64, tpu.core_type = #tpu.core_type<tc>, window_params = [{transform_indices = @transform_0, window_bounds = array<i64: 1, 1, 864>}, {transform_indices = @transform_1, window_bounds = array<i64: 1, 864, 128>}, {transform_indices = @transform_2, window_bounds = array<i64: 1, 1, 128>}, {transform_indices = @transform_3, window_bounds = array<i64: 1, 1, 128>}]} {
    %c0 = arith.constant 0 : index
    %c0_0 = arith.constant 0 : index
    %c0_1 = arith.constant 0 : index
    %0 = vector.load %arg2[%c0, %c0_0, %c0_1] : memref<1x1x864xf32, #tpu.memory_space<vmem>>, vector<1x1x864xf32>
    %1 = vector.shape_cast %0 : vector<1x1x864xf32> to vector<1x864xf32>
    %c0_2 = arith.constant 0 : index
    %c0_3 = arith.constant 0 : index
    %c0_4 = arith.constant 0 : index
    %2 = vector.load %arg3[%c0_2, %c0_3, %c0_4] : memref<1x864x128xf32, #tpu.memory_space<vmem>>, vector<1x864x128xf32>
    %3 = vector.shape_cast %2 : vector<1x864x128xf32> to vector<864x128xf32>
    %cst = arith.constant dense<0.000000e+00> : vector<1x128xf32>
    %4 = tpu.matmul %1, %3, %cst {dimension_numbers = #tpu.dot_dimension_numbers<[1], [0], [0], [1], [0, 0, 1, 1], [], []>} : vector<1x864xf32>, vector<864x128xf32>, vector<1x128xf32> -> vector<1x128xf32>
    %c0_5 = arith.constant 0 : index
    %c0_6 = arith.constant 0 : index
    %c0_7 = arith.constant 0 : index
    %5 = vector.load %arg4[%c0_5, %c0_6, %c0_7] : memref<1x1x128xf32, #tpu.memory_space<vmem>>, vector<1x1x128xf32>
    %6 = vector.shape_cast %5 : vector<1x1x128xf32> to vector<1x128xf32>
    %7 = arith.addf %4, %6 : vector<1x128xf32>
    %cst_8 = arith.constant 0.000000e+00 : f32
    %8 = vector.broadcast %cst_8 : f32 to vector<1x128xf32>
    %9 = arith.maximumf %7, %8 : vector<1x128xf32>
    %c0_9 = arith.constant 0 : index
    %c0_10 = arith.constant 0 : index
    %c0_11 = arith.constant 0 : index
    %10 = vector.load %arg5[%c0_9, %c0_10, %c0_11] : memref<1x1x128xf32, #tpu.memory_space<vmem>>, vector<1x1x128xf32>
    %11 = vector.shape_cast %10 : vector<1x1x128xf32> to vector<1x128xf32>
    %12 = vector.shape_cast %9 : vector<1x128xf32> to vector<1x1x128xf32>
    tpu.vector_store %arg5[%c0_9, %c0_10, %c0_11], %12 {strides = array<i32>} : memref<1x1x128xf32, #tpu.memory_space<vmem>>, vector<1x1x128xf32>,
    return
  }
  func.func @transform_0(%arg0: i32, %arg1: i32) -> (i32, i32, i32) {
    %c0_i32 = arith.constant 0 : i32
    %c0_i32_0 = arith.constant 0 : i32
    return %arg0, %arg1, %c0_i32 : i32, i32, i32
  }
  func.func @transform_1(%arg0: i32, %arg1: i32) -> (i32, i32, i32) {
    %c0_i32 = arith.constant 0 : i32
    %c0_i32_0 = arith.constant 0 : i32
    %c0_i32_1 = arith.constant 0 : i32
    return %arg0, %c0_i32, %c0_i32_0 : i32, i32, i32
  }
  func.func @transform_2(%arg0: i32, %arg1: i32) -> (i32, i32, i32) {
    %c0_i32 = arith.constant 0 : i32
    %c0_i32_0 = arith.constant 0 : i32
    %c0_i32_1 = arith.constant 0 : i32
    return %arg0, %c0_i32, %c0_i32_0 : i32, i32, i32
  }
  func.func @transform_3(%arg0: i32, %arg1: i32) -> (i32, i32, i32) {
    %c0_i32 = arith.constant 0 : i32
    %c0_i32_0 = arith.constant 0 : i32
    return %arg0, %arg1, %c0_i32 : i32, i32, i32
  }
}

module attributes {stable_mosaic.version = 11 : i64} {
  func.func @_matmul_bias_kernel(%arg0: i32, %arg1: i32, %arg2: memref<1x1x864xf32, #tpu.memory_space<vmem>>, %arg3: memref<1x864x128xf32, #tpu.memory_space<vmem>>, %arg4: memref<1x1x128xf32, #tpu.memory_space<vmem>>, %arg5: memref<1x1x128xf32, #tpu.memory_space<vmem>>) attributes {dimension_semantics = [#tpu.dimension_semantics<parallel>, #tpu.dimension_semantics<parallel>], iteration_bounds = array<i64: 3, 1>, scalar_prefetch = 0 : i64, scratch_operands = 0 : i64, tpu.core_type = #tpu.core_type<tc>, window_params = [{transform_indices = @transform_0, window_bounds = array<i64: 1, 1, 864>}, {transform_indices = @transform_1, window_bounds = array<i64: 1, 864, 128>}, {transform_indices = @transform_2, window_bounds = array<i64: 1, 1, 128>}, {transform_indices = @transform_3, window_bounds = array<i64: 1, 1, 128>}]} {
    %c0 = arith.constant 0 : index
    %c0_0 = arith.constant 0 : index
    %c0_1 = arith.constant 0 : index
    %0 = vector.load %arg2[%c0, %c0_0, %c0_1] : memref<1x1x864xf32, #tpu.memory_space<vmem>>, vector<1x1x864xf32>
    %1 = vector.shape_cast %0 : vector<1x1x864xf32> to vector<1x864xf32>
    %c0_2 = arith.constant 0 : index
    %c0_3 = arith.constant 0 : index
    %c0_4 = arith.constant 0 : index
    %2 = vector.load %arg3[%c0_2, %c0_3, %c0_4] : memref<1x864x128xf32, #tpu.memory_space<vmem>>, vector<1x864x128xf32>
    %3 = vector.shape_cast %2 : vector<1x864x128xf32> to vector<864x128xf32>
    %cst = arith.constant dense<0.000000e+00> : vector<1x128xf32>
    %4 = tpu.matmul %1, %3, %cst {dimension_numbers = #tpu.dot_dimension_numbers<[1], [0], [0], [1], [0, 0, 1, 1], [], []>} : vector<1x864xf32>, vector<864x128xf32>, vector<1x128xf32> -> vector<1x128xf32>
    %c0_5 = arith.constant 0 : index
    %c0_6 = arith.constant 0 : index
    %c0_7 = arith.constant 0 : index
    %5 = vector.load %arg4[%c0_5, %c0_6, %c0_7] : memref<1x1x128xf32, #tpu.memory_space<vmem>>, vector<1x1x128xf32>
    %6 = vector.shape_cast %5 : vector<1x1x128xf32> to vector<1x128xf32>
    %7 = arith.addf %4, %6 : vector<1x128xf32>
    %c0_8 = arith.constant 0 : index
    %c0_9 = arith.constant 0 : index
    %c0_10 = arith.constant 0 : index
    %8 = vector.load %arg5[%c0_8, %c0_9, %c0_10] : memref<1x1x128xf32, #tpu.memory_space<vmem>>, vector<1x1x128xf32>
    %9 = vector.shape_cast %8 : vector<1x1x128xf32> to vector<1x128xf32>
    %10 = vector.shape_cast %7 : vector<1x128xf32> to vector<1x1x128xf32>
    tpu.vector_store %arg5[%c0_8, %c0_9, %c0_10], %10 {strides = array<i32>} : memref<1x1x128xf32, #tpu.memory_space<vmem>>, vector<1x1x128xf32>,
    return
  }
  func.func @transform_0(%arg0: i32, %arg1: i32) -> (i32, i32, i32) {
    %c0_i32 = arith.constant 0 : i32
    %c0_i32_0 = arith.constant 0 : i32
    return %arg0, %arg1, %c0_i32 : i32, i32, i32
  }
  func.func @transform_1(%arg0: i32, %arg1: i32) -> (i32, i32, i32) {
    %c0_i32 = arith.constant 0 : i32
    %c0_i32_0 = arith.constant 0 : i32
    %c0_i32_1 = arith.constant 0 : i32
    return %arg0, %c0_i32, %c0_i32_0 : i32, i32, i32
  }
  func.func @transform_2(%arg0: i32, %arg1: i32) -> (i32, i32, i32) {
    %c0_i32 = arith.constant 0 : i32
    %c0_i32_0 = arith.constant 0 : i32
    %c0_i32_1 = arith.constant 0 : i32
    return %arg0, %c0_i32, %c0_i32_0 : i32, i32, i32
  }
  func.func @transform_3(%arg0: i32, %arg1: i32) -> (i32, i32, i32) {
    %c0_i32 = arith.constant 0 : i32
    %c0_i32_0 = arith.constant 0 : i32
    return %arg0, %arg1, %c0_i32 : i32, i32, i32
  }
}

module attributes {stable_mosaic.version = 11 : i64} {
  func.func @_lstm_fused_kernel(%arg0: i32, %arg1: memref<1x1x1728xf32, #tpu.memory_space<vmem>>, %arg2: memref<1x1728x128xf32, #tpu.memory_space<vmem>>, %arg3: memref<1x1x128xf32, #tpu.memory_space<vmem>>, %arg4: memref<1x1x32xf32, #tpu.memory_space<vmem>>, %arg5: memref<1x1x32xf32, #tpu.memory_space<vmem>>, %arg6: memref<1x1x32xf32, #tpu.memory_space<vmem>>) attributes {dimension_semantics = [#tpu.dimension_semantics<parallel>], iteration_bounds = array<i64: 3>, scalar_prefetch = 0 : i64, scratch_operands = 0 : i64, tpu.core_type = #tpu.core_type<tc>, window_params = [{transform_indices = @transform_0, window_bounds = array<i64: 1, 1, 1728>}, {transform_indices = @transform_1, window_bounds = array<i64: 1, 1728, 128>}, {transform_indices = @transform_2, window_bounds = array<i64: 1, 1, 128>}, {transform_indices = @transform_3, window_bounds = array<i64: 1, 1, 32>}, {transform_indices = @transform_4, window_bounds = array<i64: 1, 1, 32>}, {transform_indices = @transform_5, window_bounds = array<i64: 1, 1, 32>}]} {
    %c0 = arith.constant 0 : index
    %c0_0 = arith.constant 0 : index
    %c0_1 = arith.constant 0 : index
    %0 = vector.load %arg1[%c0, %c0_0, %c0_1] : memref<1x1x1728xf32, #tpu.memory_space<vmem>>, vector<1x1x1728xf32>
    %1 = vector.shape_cast %0 : vector<1x1x1728xf32> to vector<1x1728xf32>
    %c0_2 = arith.constant 0 : index
    %c0_3 = arith.constant 0 : index
    %c0_4 = arith.constant 0 : index
    %2 = vector.load %arg2[%c0_2, %c0_3, %c0_4] : memref<1x1728x128xf32, #tpu.memory_space<vmem>>, vector<1x1728x128xf32>
    %3 = vector.shape_cast %2 : vector<1x1728x128xf32> to vector<1728x128xf32>
    %cst = arith.constant dense<0.000000e+00> : vector<1x128xf32>
    %4 = tpu.matmul %1, %3, %cst {dimension_numbers = #tpu.dot_dimension_numbers<[1], [0], [0], [1], [0, 0, 1, 1], [], []>} : vector<1x1728xf32>, vector<1728x128xf32>, vector<1x128xf32> -> vector<1x128xf32>
    %c0_5 = arith.constant 0 : index
    %c0_6 = arith.constant 0 : index
    %c0_7 = arith.constant 0 : index
    %5 = vector.load %arg3[%c0_5, %c0_6, %c0_7] : memref<1x1x128xf32, #tpu.memory_space<vmem>>, vector<1x1x128xf32>
    %6 = vector.shape_cast %5 : vector<1x1x128xf32> to vector<1x128xf32>
    %7 = arith.addf %4, %6 : vector<1x128xf32>
    %8 = vector.extract_strided_slice %7 {offsets = [0, 0], sizes = [1, 32], strides = [1, 1]} : vector<1x128xf32> to vector<1x32xf32>
    %9 = arith.negf %8 : vector<1x32xf32>
    %10 = math.exp %9 : vector<1x32xf32>
    %cst_8 = arith.constant 1.000000e+00 : f32
    %11 = vector.broadcast %cst_8 : f32 to vector<1x32xf32>
    %12 = arith.addf %11, %10 : vector<1x32xf32>
    %13 = arith.divf %11, %12 : vector<1x32xf32>
    %14 = vector.extract_strided_slice %7 {offsets = [0, 32], sizes = [1, 32], strides = [1, 1]} : vector<1x128xf32> to vector<1x32xf32>
    %15 = arith.negf %14 : vector<1x32xf32>
    %16 = math.exp %15 : vector<1x32xf32>
    %cst_9 = arith.constant 1.000000e+00 : f32
    %17 = vector.broadcast %cst_9 : f32 to vector<1x32xf32>
    %18 = arith.addf %17, %16 : vector<1x32xf32>
    %19 = arith.divf %17, %18 : vector<1x32xf32>
    %20 = vector.extract_strided_slice %7 {offsets = [0, 64], sizes = [1, 32], strides = [1, 1]} : vector<1x128xf32> to vector<1x32xf32>
    %21 = arith.negf %20 : vector<1x32xf32>
    %22 = math.exp %21 : vector<1x32xf32>
    %cst_10 = arith.constant 1.000000e+00 : f32
    %23 = vector.broadcast %cst_10 : f32 to vector<1x32xf32>
    %24 = arith.addf %23, %22 : vector<1x32xf32>
    %25 = arith.divf %23, %24 : vector<1x32xf32>
    %26 = vector.extract_strided_slice %7 {offsets = [0, 96], sizes = [1, 32], strides = [1, 1]} : vector<1x128xf32> to vector<1x32xf32>
    %27 = math.tanh %26 : vector<1x32xf32>
    %c0_11 = arith.constant 0 : index
    %c0_12 = arith.constant 0 : index
    %c0_13 = arith.constant 0 : index
    %28 = vector.load %arg4[%c0_11, %c0_12, %c0_13] : memref<1x1x32xf32, #tpu.memory_space<vmem>>, vector<1x1x32xf32>
    %29 = vector.shape_cast %28 : vector<1x1x32xf32> to vector<1x32xf32>
    %30 = arith.mulf %19, %29 : vector<1x32xf32>
    %31 = arith.mulf %13, %27 : vector<1x32xf32>
    %32 = arith.addf %30, %31 : vector<1x32xf32>
    %c0_14 = arith.constant 0 : index
    %c0_15 = arith.constant 0 : index
    %c0_16 = arith.constant 0 : index
    %33 = vector.load %arg6[%c0_14, %c0_15, %c0_16] : memref<1x1x32xf32, #tpu.memory_space<vmem>>, vector<1x1x32xf32>
    %34 = vector.shape_cast %33 : vector<1x1x32xf32> to vector<1x32xf32>
    %35 = vector.shape_cast %32 : vector<1x32xf32> to vector<1x1x32xf32>
    tpu.vector_store %arg6[%c0_14, %c0_15, %c0_16], %35 {strides = array<i32>} : memref<1x1x32xf32, #tpu.memory_space<vmem>>, vector<1x1x32xf32>,
    %36 = math.tanh %32 : vector<1x32xf32>
    %37 = arith.mulf %25, %36 : vector<1x32xf32>
    %c0_17 = arith.constant 0 : index
    %c0_18 = arith.constant 0 : index
    %c0_19 = arith.constant 0 : index
    %38 = vector.load %arg5[%c0_17, %c0_18, %c0_19] : memref<1x1x32xf32, #tpu.memory_space<vmem>>, vector<1x1x32xf32>
    %39 = vector.shape_cast %38 : vector<1x1x32xf32> to vector<1x32xf32>
    %40 = vector.shape_cast %37 : vector<1x32xf32> to vector<1x1x32xf32>
    tpu.vector_store %arg5[%c0_17, %c0_18, %c0_19], %40 {strides = array<i32>} : memref<1x1x32xf32, #tpu.memory_space<vmem>>, vector<1x1x32xf32>,
    return
  }
  func.func @transform_0(%arg0: i32) -> (i32, i32, i32) {
    %c0_i32 = arith.constant 0 : i32
    %c0_i32_0 = arith.constant 0 : i32
    %c0_i32_1 = arith.constant 0 : i32
    return %arg0, %c0_i32, %c0_i32_0 : i32, i32, i32
  }
  func.func @transform_1(%arg0: i32) -> (i32, i32, i32) {
    %c0_i32 = arith.constant 0 : i32
    %c0_i32_0 = arith.constant 0 : i32
    %c0_i32_1 = arith.constant 0 : i32
    return %arg0, %c0_i32, %c0_i32_0 : i32, i32, i32
  }
  func.func @transform_2(%arg0: i32) -> (i32, i32, i32) {
    %c0_i32 = arith.constant 0 : i32
    %c0_i32_0 = arith.constant 0 : i32
    %c0_i32_1 = arith.constant 0 : i32
    return %arg0, %c0_i32, %c0_i32_0 : i32, i32, i32
  }
  func.func @transform_3(%arg0: i32) -> (i32, i32, i32) {
    %c0_i32 = arith.constant 0 : i32
    %c0_i32_0 = arith.constant 0 : i32
    %c0_i32_1 = arith.constant 0 : i32
    return %arg0, %c0_i32, %c0_i32_0 : i32, i32, i32
  }
  func.func @transform_4(%arg0: i32) -> (i32, i32, i32) {
    %c0_i32 = arith.constant 0 : i32
    %c0_i32_0 = arith.constant 0 : i32
    %c0_i32_1 = arith.constant 0 : i32
    return %arg0, %c0_i32, %c0_i32_0 : i32, i32, i32
  }
  func.func @transform_5(%arg0: i32) -> (i32, i32, i32) {
    %c0_i32 = arith.constant 0 : i32
    %c0_i32_0 = arith.constant 0 : i32
    %c0_i32_1 = arith.constant 0 : i32
    return %arg0, %c0_i32, %c0_i32_0 : i32, i32, i32
  }
}

module attributes {stable_mosaic.version = 11 : i64} {
  func.func @_lstm_fused_kernel(%arg0: i32, %arg1: memref<1x1x1728xf32, #tpu.memory_space<vmem>>, %arg2: memref<1x1728x128xf32, #tpu.memory_space<vmem>>, %arg3: memref<1x1x128xf32, #tpu.memory_space<vmem>>, %arg4: memref<1x1x32xf32, #tpu.memory_space<vmem>>, %arg5: memref<1x1x32xf32, #tpu.memory_space<vmem>>, %arg6: memref<1x1x32xf32, #tpu.memory_space<vmem>>) attributes {dimension_semantics = [#tpu.dimension_semantics<parallel>], iteration_bounds = array<i64: 3>, scalar_prefetch = 0 : i64, scratch_operands = 0 : i64, tpu.core_type = #tpu.core_type<tc>, window_params = [{transform_indices = @transform_0, window_bounds = array<i64: 1, 1, 1728>}, {transform_indices = @transform_1, window_bounds = array<i64: 1, 1728, 128>}, {transform_indices = @transform_2, window_bounds = array<i64: 1, 1, 128>}, {transform_indices = @transform_3, window_bounds = array<i64: 1, 1, 32>}, {transform_indices = @transform_4, window_bounds = array<i64: 1, 1, 32>}, {transform_indices = @transform_5, window_bounds = array<i64: 1, 1, 32>}]} {
    %c0 = arith.constant 0 : index
    %c0_0 = arith.constant 0 : index
    %c0_1 = arith.constant 0 : index
    %0 = vector.load %arg1[%c0, %c0_0, %c0_1] : memref<1x1x1728xf32, #tpu.memory_space<vmem>>, vector<1x1x1728xf32>
    %1 = vector.shape_cast %0 : vector<1x1x1728xf32> to vector<1x1728xf32>
    %c0_2 = arith.constant 0 : index
    %c0_3 = arith.constant 0 : index
    %c0_4 = arith.constant 0 : index
    %2 = vector.load %arg2[%c0_2, %c0_3, %c0_4] : memref<1x1728x128xf32, #tpu.memory_space<vmem>>, vector<1x1728x128xf32>
    %3 = vector.shape_cast %2 : vector<1x1728x128xf32> to vector<1728x128xf32>
    %cst = arith.constant dense<0.000000e+00> : vector<1x128xf32>
    %4 = tpu.matmul %1, %3, %cst {dimension_numbers = #tpu.dot_dimension_numbers<[1], [0], [0], [1], [0, 0, 1, 1], [], []>} : vector<1x1728xf32>, vector<1728x128xf32>, vector<1x128xf32> -> vector<1x128xf32>
    %c0_5 = arith.constant 0 : index
    %c0_6 = arith.constant 0 : index
    %c0_7 = arith.constant 0 : index
    %5 = vector.load %arg3[%c0_5, %c0_6, %c0_7] : memref<1x1x128xf32, #tpu.memory_space<vmem>>, vector<1x1x128xf32>
    %6 = vector.shape_cast %5 : vector<1x1x128xf32> to vector<1x128xf32>
    %7 = arith.addf %4, %6 : vector<1x128xf32>
    %8 = vector.extract_strided_slice %7 {offsets = [0, 0], sizes = [1, 32], strides = [1, 1]} : vector<1x128xf32> to vector<1x32xf32>
    %9 = arith.negf %8 : vector<1x32xf32>
    %10 = math.exp %9 : vector<1x32xf32>
    %cst_8 = arith.constant 1.000000e+00 : f32
    %11 = vector.broadcast %cst_8 : f32 to vector<1x32xf32>
    %12 = arith.addf %11, %10 : vector<1x32xf32>
    %13 = arith.divf %11, %12 : vector<1x32xf32>
    %14 = vector.extract_strided_slice %7 {offsets = [0, 32], sizes = [1, 32], strides = [1, 1]} : vector<1x128xf32> to vector<1x32xf32>
    %15 = arith.negf %14 : vector<1x32xf32>
    %16 = math.exp %15 : vector<1x32xf32>
    %cst_9 = arith.constant 1.000000e+00 : f32
    %17 = vector.broadcast %cst_9 : f32 to vector<1x32xf32>
    %18 = arith.addf %17, %16 : vector<1x32xf32>
    %19 = arith.divf %17, %18 : vector<1x32xf32>
    %20 = vector.extract_strided_slice %7 {offsets = [0, 64], sizes = [1, 32], strides = [1, 1]} : vector<1x128xf32> to vector<1x32xf32>
    %21 = arith.negf %20 : vector<1x32xf32>
    %22 = math.exp %21 : vector<1x32xf32>
    %cst_10 = arith.constant 1.000000e+00 : f32
    %23 = vector.broadcast %cst_10 : f32 to vector<1x32xf32>
    %24 = arith.addf %23, %22 : vector<1x32xf32>
    %25 = arith.divf %23, %24 : vector<1x32xf32>
    %26 = vector.extract_strided_slice %7 {offsets = [0, 96], sizes = [1, 32], strides = [1, 1]} : vector<1x128xf32> to vector<1x32xf32>
    %27 = math.tanh %26 : vector<1x32xf32>
    %c0_11 = arith.constant 0 : index
    %c0_12 = arith.constant 0 : index
    %c0_13 = arith.constant 0 : index
    %28 = vector.load %arg4[%c0_11, %c0_12, %c0_13] : memref<1x1x32xf32, #tpu.memory_space<vmem>>, vector<1x1x32xf32>
    %29 = vector.shape_cast %28 : vector<1x1x32xf32> to vector<1x32xf32>
    %30 = arith.mulf %19, %29 : vector<1x32xf32>
    %31 = arith.mulf %13, %27 : vector<1x32xf32>
    %32 = arith.addf %30, %31 : vector<1x32xf32>
    %c0_14 = arith.constant 0 : index
    %c0_15 = arith.constant 0 : index
    %c0_16 = arith.constant 0 : index
    %33 = vector.load %arg6[%c0_14, %c0_15, %c0_16] : memref<1x1x32xf32, #tpu.memory_space<vmem>>, vector<1x1x32xf32>
    %34 = vector.shape_cast %33 : vector<1x1x32xf32> to vector<1x32xf32>
    %35 = vector.shape_cast %32 : vector<1x32xf32> to vector<1x1x32xf32>
    tpu.vector_store %arg6[%c0_14, %c0_15, %c0_16], %35 {strides = array<i32>} : memref<1x1x32xf32, #tpu.memory_space<vmem>>, vector<1x1x32xf32>,
    %36 = math.tanh %32 : vector<1x32xf32>
    %37 = arith.mulf %25, %36 : vector<1x32xf32>
    %c0_17 = arith.constant 0 : index
    %c0_18 = arith.constant 0 : index
    %c0_19 = arith.constant 0 : index
    %38 = vector.load %arg5[%c0_17, %c0_18, %c0_19] : memref<1x1x32xf32, #tpu.memory_space<vmem>>, vector<1x1x32xf32>
    %39 = vector.shape_cast %38 : vector<1x1x32xf32> to vector<1x32xf32>
    %40 = vector.shape_cast %37 : vector<1x32xf32> to vector<1x1x32xf32>
    tpu.vector_store %arg5[%c0_17, %c0_18, %c0_19], %40 {strides = array<i32>} : memref<1x1x32xf32, #tpu.memory_space<vmem>>, vector<1x1x32xf32>,
    return
  }
  func.func @transform_0(%arg0: i32) -> (i32, i32, i32) {
    %c0_i32 = arith.constant 0 : i32
    %c0_i32_0 = arith.constant 0 : i32
    %c0_i32_1 = arith.constant 0 : i32
    return %arg0, %c0_i32, %c0_i32_0 : i32, i32, i32
  }
  func.func @transform_1(%arg0: i32) -> (i32, i32, i32) {
    %c0_i32 = arith.constant 0 : i32
    %c0_i32_0 = arith.constant 0 : i32
    %c0_i32_1 = arith.constant 0 : i32
    return %arg0, %c0_i32, %c0_i32_0 : i32, i32, i32
  }
  func.func @transform_2(%arg0: i32) -> (i32, i32, i32) {
    %c0_i32 = arith.constant 0 : i32
    %c0_i32_0 = arith.constant 0 : i32
    %c0_i32_1 = arith.constant 0 : i32
    return %arg0, %c0_i32, %c0_i32_0 : i32, i32, i32
  }
  func.func @transform_3(%arg0: i32) -> (i32, i32, i32) {
    %c0_i32 = arith.constant 0 : i32
    %c0_i32_0 = arith.constant 0 : i32
    %c0_i32_1 = arith.constant 0 : i32
    return %arg0, %c0_i32, %c0_i32_0 : i32, i32, i32
  }
  func.func @transform_4(%arg0: i32) -> (i32, i32, i32) {
    %c0_i32 = arith.constant 0 : i32
    %c0_i32_0 = arith.constant 0 : i32
    %c0_i32_1 = arith.constant 0 : i32
    return %arg0, %c0_i32, %c0_i32_0 : i32, i32, i32
  }
  func.func @transform_5(%arg0: i32) -> (i32, i32, i32) {
    %c0_i32 = arith.constant 0 : i32
    %c0_i32_0 = arith.constant 0 : i32
    %c0_i32_1 = arith.constant 0 : i32
    return %arg0, %c0_i32, %c0_i32_0 : i32, i32, i32
  }
}

module attributes {stable_mosaic.version = 11 : i64} {
  func.func @_matmul_bias_kernel(%arg0: i32, %arg1: i32, %arg2: memref<1x8x256xf32, #tpu.memory_space<vmem>>, %arg3: memref<1x256x128xf32, #tpu.memory_space<vmem>>, %arg4: memref<1x1x128xf32, #tpu.memory_space<vmem>>, %arg5: memref<1x8x128xf32, #tpu.memory_space<vmem>>) attributes {dimension_semantics = [#tpu.dimension_semantics<parallel>, #tpu.dimension_semantics<parallel>], iteration_bounds = array<i64: 3, 1>, scalar_prefetch = 0 : i64, scratch_operands = 0 : i64, tpu.core_type = #tpu.core_type<tc>, window_params = [{transform_indices = @transform_0, window_bounds = array<i64: 1, 8, 256>}, {transform_indices = @transform_1, window_bounds = array<i64: 1, 256, 128>}, {transform_indices = @transform_2, window_bounds = array<i64: 1, 1, 128>}, {transform_indices = @transform_3, window_bounds = array<i64: 1, 8, 128>}]} {
    %c0 = arith.constant 0 : index
    %c0_0 = arith.constant 0 : index
    %c0_1 = arith.constant 0 : index
    %0 = vector.load %arg2[%c0, %c0_0, %c0_1] : memref<1x8x256xf32, #tpu.memory_space<vmem>>, vector<1x8x256xf32>
    %1 = vector.shape_cast %0 : vector<1x8x256xf32> to vector<8x256xf32>
    %c0_2 = arith.constant 0 : index
    %c0_3 = arith.constant 0 : index
    %c0_4 = arith.constant 0 : index
    %2 = vector.load %arg3[%c0_2, %c0_3, %c0_4] : memref<1x256x128xf32, #tpu.memory_space<vmem>>, vector<1x256x128xf32>
    %3 = vector.shape_cast %2 : vector<1x256x128xf32> to vector<256x128xf32>
    %cst = arith.constant dense<0.000000e+00> : vector<8x128xf32>
    %4 = tpu.matmul %1, %3, %cst {dimension_numbers = #tpu.dot_dimension_numbers<[1], [0], [0], [1], [0, 0, 1, 1], [], []>} : vector<8x256xf32>, vector<256x128xf32>, vector<8x128xf32> -> vector<8x128xf32>
    %c0_5 = arith.constant 0 : index
    %c0_6 = arith.constant 0 : index
    %c0_7 = arith.constant 0 : index
    %5 = vector.load %arg4[%c0_5, %c0_6, %c0_7] : memref<1x1x128xf32, #tpu.memory_space<vmem>>, vector<1x1x128xf32>
    %6 = vector.shape_cast %5 : vector<1x1x128xf32> to vector<1x128xf32>
    %7 = vector.broadcast %6 : vector<1x128xf32> to vector<8x128xf32>
    %8 = arith.addf %4, %7 : vector<8x128xf32>
    %cst_8 = arith.constant 0.000000e+00 : f32
    %9 = vector.broadcast %cst_8 : f32 to vector<8x128xf32>
    %10 = arith.maximumf %8, %9 : vector<8x128xf32>
    %c0_9 = arith.constant 0 : index
    %c0_10 = arith.constant 0 : index
    %c0_11 = arith.constant 0 : index
    %11 = vector.load %arg5[%c0_9, %c0_10, %c0_11] : memref<1x8x128xf32, #tpu.memory_space<vmem>>, vector<1x8x128xf32>
    %12 = vector.shape_cast %11 : vector<1x8x128xf32> to vector<8x128xf32>
    %13 = vector.shape_cast %10 : vector<8x128xf32> to vector<1x8x128xf32>
    tpu.vector_store %arg5[%c0_9, %c0_10, %c0_11], %13 {strides = array<i32>} : memref<1x8x128xf32, #tpu.memory_space<vmem>>, vector<1x8x128xf32>,
    return
  }
  func.func @transform_0(%arg0: i32, %arg1: i32) -> (i32, i32, i32) {
    %c0_i32 = arith.constant 0 : i32
    %c0_i32_0 = arith.constant 0 : i32
    return %arg0, %arg1, %c0_i32 : i32, i32, i32
  }
  func.func @transform_1(%arg0: i32, %arg1: i32) -> (i32, i32, i32) {
    %c0_i32 = arith.constant 0 : i32
    %c0_i32_0 = arith.constant 0 : i32
    %c0_i32_1 = arith.constant 0 : i32
    return %arg0, %c0_i32, %c0_i32_0 : i32, i32, i32
  }
  func.func @transform_2(%arg0: i32, %arg1: i32) -> (i32, i32, i32) {
    %c0_i32 = arith.constant 0 : i32
    %c0_i32_0 = arith.constant 0 : i32
    %c0_i32_1 = arith.constant 0 : i32
    return %arg0, %c0_i32, %c0_i32_0 : i32, i32, i32
  }
  func.func @transform_3(%arg0: i32, %arg1: i32) -> (i32, i32, i32) {
    %c0_i32 = arith.constant 0 : i32
    %c0_i32_0 = arith.constant 0 : i32
    return %arg0, %arg1, %c0_i32 : i32, i32, i32
  }
}

module attributes {stable_mosaic.version = 11 : i64} {
  func.func @_matmul_bias_kernel(%arg0: i32, %arg1: i32, %arg2: memref<1x27x128xf32, #tpu.memory_space<vmem>>, %arg3: memref<1x128x128xf32, #tpu.memory_space<vmem>>, %arg4: memref<1x1x128xf32, #tpu.memory_space<vmem>>, %arg5: memref<1x27x128xf32, #tpu.memory_space<vmem>>) attributes {dimension_semantics = [#tpu.dimension_semantics<parallel>, #tpu.dimension_semantics<parallel>], iteration_bounds = array<i64: 3, 1>, scalar_prefetch = 0 : i64, scratch_operands = 0 : i64, tpu.core_type = #tpu.core_type<tc>, window_params = [{transform_indices = @transform_0, window_bounds = array<i64: 1, 27, 128>}, {transform_indices = @transform_1, window_bounds = array<i64: 1, 128, 128>}, {transform_indices = @transform_2, window_bounds = array<i64: 1, 1, 128>}, {transform_indices = @transform_3, window_bounds = array<i64: 1, 27, 128>}]} {
    %c0 = arith.constant 0 : index
    %c0_0 = arith.constant 0 : index
    %c0_1 = arith.constant 0 : index
    %0 = vector.load %arg2[%c0, %c0_0, %c0_1] : memref<1x27x128xf32, #tpu.memory_space<vmem>>, vector<1x27x128xf32>
    %1 = vector.shape_cast %0 : vector<1x27x128xf32> to vector<27x128xf32>
    %c0_2 = arith.constant 0 : index
    %c0_3 = arith.constant 0 : index
    %c0_4 = arith.constant 0 : index
    %2 = vector.load %arg3[%c0_2, %c0_3, %c0_4] : memref<1x128x128xf32, #tpu.memory_space<vmem>>, vector<1x128x128xf32>
    %3 = vector.shape_cast %2 : vector<1x128x128xf32> to vector<128x128xf32>
    %cst = arith.constant dense<0.000000e+00> : vector<27x128xf32>
    %4 = tpu.matmul %1, %3, %cst {dimension_numbers = #tpu.dot_dimension_numbers<[1], [0], [0], [1], [0, 0, 1, 1], [], []>} : vector<27x128xf32>, vector<128x128xf32>, vector<27x128xf32> -> vector<27x128xf32>
    %c0_5 = arith.constant 0 : index
    %c0_6 = arith.constant 0 : index
    %c0_7 = arith.constant 0 : index
    %5 = vector.load %arg4[%c0_5, %c0_6, %c0_7] : memref<1x1x128xf32, #tpu.memory_space<vmem>>, vector<1x1x128xf32>
    %6 = vector.shape_cast %5 : vector<1x1x128xf32> to vector<1x128xf32>
    %7 = vector.broadcast %6 : vector<1x128xf32> to vector<27x128xf32>
    %8 = arith.addf %4, %7 : vector<27x128xf32>
    %cst_8 = arith.constant 0.000000e+00 : f32
    %9 = vector.broadcast %cst_8 : f32 to vector<27x128xf32>
    %10 = arith.maximumf %8, %9 : vector<27x128xf32>
    %c0_9 = arith.constant 0 : index
    %c0_10 = arith.constant 0 : index
    %c0_11 = arith.constant 0 : index
    %11 = vector.load %arg5[%c0_9, %c0_10, %c0_11] : memref<1x27x128xf32, #tpu.memory_space<vmem>>, vector<1x27x128xf32>
    %12 = vector.shape_cast %11 : vector<1x27x128xf32> to vector<27x128xf32>
    %13 = vector.shape_cast %10 : vector<27x128xf32> to vector<1x27x128xf32>
    tpu.vector_store %arg5[%c0_9, %c0_10, %c0_11], %13 {strides = array<i32>} : memref<1x27x128xf32, #tpu.memory_space<vmem>>, vector<1x27x128xf32>,
    return
  }
  func.func @transform_0(%arg0: i32, %arg1: i32) -> (i32, i32, i32) {
    %c0_i32 = arith.constant 0 : i32
    %c0_i32_0 = arith.constant 0 : i32
    return %arg0, %arg1, %c0_i32 : i32, i32, i32
  }
  func.func @transform_1(%arg0: i32, %arg1: i32) -> (i32, i32, i32) {
    %c0_i32 = arith.constant 0 : i32
    %c0_i32_0 = arith.constant 0 : i32
    %c0_i32_1 = arith.constant 0 : i32
    return %arg0, %c0_i32, %c0_i32_0 : i32, i32, i32
  }
  func.func @transform_2(%arg0: i32, %arg1: i32) -> (i32, i32, i32) {
    %c0_i32 = arith.constant 0 : i32
    %c0_i32_0 = arith.constant 0 : i32
    %c0_i32_1 = arith.constant 0 : i32
    return %arg0, %c0_i32, %c0_i32_0 : i32, i32, i32
  }
  func.func @transform_3(%arg0: i32, %arg1: i32) -> (i32, i32, i32) {
    %c0_i32 = arith.constant 0 : i32
    %c0_i32_0 = arith.constant 0 : i32
    return %arg0, %arg1, %c0_i32 : i32, i32, i32
  }
}

module attributes {stable_mosaic.version = 11 : i64} {
  func.func @_matmul_bias_kernel(%arg0: i32, %arg1: i32, %arg2: memref<1x27x128xf32, #tpu.memory_space<vmem>>, %arg3: memref<1x128x128xf32, #tpu.memory_space<vmem>>, %arg4: memref<1x1x128xf32, #tpu.memory_space<vmem>>, %arg5: memref<1x27x128xf32, #tpu.memory_space<vmem>>) attributes {dimension_semantics = [#tpu.dimension_semantics<parallel>, #tpu.dimension_semantics<parallel>], iteration_bounds = array<i64: 3, 1>, scalar_prefetch = 0 : i64, scratch_operands = 0 : i64, tpu.core_type = #tpu.core_type<tc>, window_params = [{transform_indices = @transform_0, window_bounds = array<i64: 1, 27, 128>}, {transform_indices = @transform_1, window_bounds = array<i64: 1, 128, 128>}, {transform_indices = @transform_2, window_bounds = array<i64: 1, 1, 128>}, {transform_indices = @transform_3, window_bounds = array<i64: 1, 27, 128>}]} {
    %c0 = arith.constant 0 : index
    %c0_0 = arith.constant 0 : index
    %c0_1 = arith.constant 0 : index
    %0 = vector.load %arg2[%c0, %c0_0, %c0_1] : memref<1x27x128xf32, #tpu.memory_space<vmem>>, vector<1x27x128xf32>
    %1 = vector.shape_cast %0 : vector<1x27x128xf32> to vector<27x128xf32>
    %c0_2 = arith.constant 0 : index
    %c0_3 = arith.constant 0 : index
    %c0_4 = arith.constant 0 : index
    %2 = vector.load %arg3[%c0_2, %c0_3, %c0_4] : memref<1x128x128xf32, #tpu.memory_space<vmem>>, vector<1x128x128xf32>
    %3 = vector.shape_cast %2 : vector<1x128x128xf32> to vector<128x128xf32>
    %cst = arith.constant dense<0.000000e+00> : vector<27x128xf32>
    %4 = tpu.matmul %1, %3, %cst {dimension_numbers = #tpu.dot_dimension_numbers<[1], [0], [0], [1], [0, 0, 1, 1], [], []>} : vector<27x128xf32>, vector<128x128xf32>, vector<27x128xf32> -> vector<27x128xf32>
    %c0_5 = arith.constant 0 : index
    %c0_6 = arith.constant 0 : index
    %c0_7 = arith.constant 0 : index
    %5 = vector.load %arg4[%c0_5, %c0_6, %c0_7] : memref<1x1x128xf32, #tpu.memory_space<vmem>>, vector<1x1x128xf32>
    %6 = vector.shape_cast %5 : vector<1x1x128xf32> to vector<1x128xf32>
    %7 = vector.broadcast %6 : vector<1x128xf32> to vector<27x128xf32>
    %8 = arith.addf %4, %7 : vector<27x128xf32>
    %cst_8 = arith.constant 0.000000e+00 : f32
    %9 = vector.broadcast %cst_8 : f32 to vector<27x128xf32>
    %10 = arith.maximumf %8, %9 : vector<27x128xf32>
    %c0_9 = arith.constant 0 : index
    %c0_10 = arith.constant 0 : index
    %c0_11 = arith.constant 0 : index
    %11 = vector.load %arg5[%c0_9, %c0_10, %c0_11] : memref<1x27x128xf32, #tpu.memory_space<vmem>>, vector<1x27x128xf32>
    %12 = vector.shape_cast %11 : vector<1x27x128xf32> to vector<27x128xf32>
    %13 = vector.shape_cast %10 : vector<27x128xf32> to vector<1x27x128xf32>
    tpu.vector_store %arg5[%c0_9, %c0_10, %c0_11], %13 {strides = array<i32>} : memref<1x27x128xf32, #tpu.memory_space<vmem>>, vector<1x27x128xf32>,
    return
  }
  func.func @transform_0(%arg0: i32, %arg1: i32) -> (i32, i32, i32) {
    %c0_i32 = arith.constant 0 : i32
    %c0_i32_0 = arith.constant 0 : i32
    return %arg0, %arg1, %c0_i32 : i32, i32, i32
  }
  func.func @transform_1(%arg0: i32, %arg1: i32) -> (i32, i32, i32) {
    %c0_i32 = arith.constant 0 : i32
    %c0_i32_0 = arith.constant 0 : i32
    %c0_i32_1 = arith.constant 0 : i32
    return %arg0, %c0_i32, %c0_i32_0 : i32, i32, i32
  }
  func.func @transform_2(%arg0: i32, %arg1: i32) -> (i32, i32, i32) {
    %c0_i32 = arith.constant 0 : i32
    %c0_i32_0 = arith.constant 0 : i32
    %c0_i32_1 = arith.constant 0 : i32
    return %arg0, %c0_i32, %c0_i32_0 : i32, i32, i32
  }
  func.func @transform_3(%arg0: i32, %arg1: i32) -> (i32, i32, i32) {
    %c0_i32 = arith.constant 0 : i32
    %c0_i32_0 = arith.constant 0 : i32
    return %arg0, %arg1, %c0_i32 : i32, i32, i32
  }
}

module attributes {stable_mosaic.version = 11 : i64} {
  func.func @_matmul_bias_kernel(%arg0: i32, %arg1: i32, %arg2: memref<1x125x64xf32, #tpu.memory_space<vmem>>, %arg3: memref<1x64x128xf32, #tpu.memory_space<vmem>>, %arg4: memref<1x1x128xf32, #tpu.memory_space<vmem>>, %arg5: memref<1x125x128xf32, #tpu.memory_space<vmem>>) attributes {dimension_semantics = [#tpu.dimension_semantics<parallel>, #tpu.dimension_semantics<parallel>], iteration_bounds = array<i64: 3, 1>, scalar_prefetch = 0 : i64, scratch_operands = 0 : i64, tpu.core_type = #tpu.core_type<tc>, window_params = [{transform_indices = @transform_0, window_bounds = array<i64: 1, 125, 64>}, {transform_indices = @transform_1, window_bounds = array<i64: 1, 64, 128>}, {transform_indices = @transform_2, window_bounds = array<i64: 1, 1, 128>}, {transform_indices = @transform_3, window_bounds = array<i64: 1, 125, 128>}]} {
    %c0 = arith.constant 0 : index
    %c0_0 = arith.constant 0 : index
    %c0_1 = arith.constant 0 : index
    %0 = vector.load %arg2[%c0, %c0_0, %c0_1] : memref<1x125x64xf32, #tpu.memory_space<vmem>>, vector<1x125x64xf32>
    %1 = vector.shape_cast %0 : vector<1x125x64xf32> to vector<125x64xf32>
    %c0_2 = arith.constant 0 : index
    %c0_3 = arith.constant 0 : index
    %c0_4 = arith.constant 0 : index
    %2 = vector.load %arg3[%c0_2, %c0_3, %c0_4] : memref<1x64x128xf32, #tpu.memory_space<vmem>>, vector<1x64x128xf32>
    %3 = vector.shape_cast %2 : vector<1x64x128xf32> to vector<64x128xf32>
    %cst = arith.constant dense<0.000000e+00> : vector<125x128xf32>
    %4 = tpu.matmul %1, %3, %cst {dimension_numbers = #tpu.dot_dimension_numbers<[1], [0], [0], [1], [0, 0, 1, 1], [], []>} : vector<125x64xf32>, vector<64x128xf32>, vector<125x128xf32> -> vector<125x128xf32>
    %c0_5 = arith.constant 0 : index
    %c0_6 = arith.constant 0 : index
    %c0_7 = arith.constant 0 : index
    %5 = vector.load %arg4[%c0_5, %c0_6, %c0_7] : memref<1x1x128xf32, #tpu.memory_space<vmem>>, vector<1x1x128xf32>
    %6 = vector.shape_cast %5 : vector<1x1x128xf32> to vector<1x128xf32>
    %7 = vector.broadcast %6 : vector<1x128xf32> to vector<125x128xf32>
    %8 = arith.addf %4, %7 : vector<125x128xf32>
    %cst_8 = arith.constant 0.000000e+00 : f32
    %9 = vector.broadcast %cst_8 : f32 to vector<125x128xf32>
    %10 = arith.maximumf %8, %9 : vector<125x128xf32>
    %c0_9 = arith.constant 0 : index
    %c0_10 = arith.constant 0 : index
    %c0_11 = arith.constant 0 : index
    %11 = vector.load %arg5[%c0_9, %c0_10, %c0_11] : memref<1x125x128xf32, #tpu.memory_space<vmem>>, vector<1x125x128xf32>
    %12 = vector.shape_cast %11 : vector<1x125x128xf32> to vector<125x128xf32>
    %13 = vector.shape_cast %10 : vector<125x128xf32> to vector<1x125x128xf32>
    tpu.vector_store %arg5[%c0_9, %c0_10, %c0_11], %13 {strides = array<i32>} : memref<1x125x128xf32, #tpu.memory_space<vmem>>, vector<1x125x128xf32>,
    return
  }
  func.func @transform_0(%arg0: i32, %arg1: i32) -> (i32, i32, i32) {
    %c0_i32 = arith.constant 0 : i32
    %c0_i32_0 = arith.constant 0 : i32
    return %arg0, %arg1, %c0_i32 : i32, i32, i32
  }
  func.func @transform_1(%arg0: i32, %arg1: i32) -> (i32, i32, i32) {
    %c0_i32 = arith.constant 0 : i32
    %c0_i32_0 = arith.constant 0 : i32
    %c0_i32_1 = arith.constant 0 : i32
    return %arg0, %c0_i32, %c0_i32_0 : i32, i32, i32
  }
  func.func @transform_2(%arg0: i32, %arg1: i32) -> (i32, i32, i32) {
    %c0_i32 = arith.constant 0 : i32
    %c0_i32_0 = arith.constant 0 : i32
    %c0_i32_1 = arith.constant 0 : i32
    return %arg0, %c0_i32, %c0_i32_0 : i32, i32, i32
  }
  func.func @transform_3(%arg0: i32, %arg1: i32) -> (i32, i32, i32) {
    %c0_i32 = arith.constant 0 : i32
    %c0_i32_0 = arith.constant 0 : i32
    return %arg0, %arg1, %c0_i32 : i32, i32, i32
  }
}

module attributes {stable_mosaic.version = 11 : i64} {
  func.func @_matmul_bias_kernel(%arg0: i32, %arg1: i32, %arg2: memref<1x512x32xf32, #tpu.memory_space<vmem>>, %arg3: memref<1x32x128xf32, #tpu.memory_space<vmem>>, %arg4: memref<1x1x128xf32, #tpu.memory_space<vmem>>, %arg5: memref<1x512x128xf32, #tpu.memory_space<vmem>>) attributes {dimension_semantics = [#tpu.dimension_semantics<parallel>, #tpu.dimension_semantics<parallel>], iteration_bounds = array<i64: 3, 2>, scalar_prefetch = 0 : i64, scratch_operands = 0 : i64, tpu.core_type = #tpu.core_type<tc>, window_params = [{transform_indices = @transform_0, window_bounds = array<i64: 1, 512, 32>}, {transform_indices = @transform_1, window_bounds = array<i64: 1, 32, 128>}, {transform_indices = @transform_2, window_bounds = array<i64: 1, 1, 128>}, {transform_indices = @transform_3, window_bounds = array<i64: 1, 512, 128>}]} {
    %c0 = arith.constant 0 : index
    %c0_0 = arith.constant 0 : index
    %c0_1 = arith.constant 0 : index
    %0 = vector.load %arg2[%c0, %c0_0, %c0_1] : memref<1x512x32xf32, #tpu.memory_space<vmem>>, vector<1x512x32xf32>
    %1 = vector.shape_cast %0 : vector<1x512x32xf32> to vector<512x32xf32>
    %c0_2 = arith.constant 0 : index
    %c0_3 = arith.constant 0 : index
    %c0_4 = arith.constant 0 : index
    %2 = vector.load %arg3[%c0_2, %c0_3, %c0_4] : memref<1x32x128xf32, #tpu.memory_space<vmem>>, vector<1x32x128xf32>
    %3 = vector.shape_cast %2 : vector<1x32x128xf32> to vector<32x128xf32>
    %cst = arith.constant dense<0.000000e+00> : vector<512x128xf32>
    %4 = tpu.matmul %1, %3, %cst {dimension_numbers = #tpu.dot_dimension_numbers<[1], [0], [0], [1], [0, 0, 1, 1], [], []>} : vector<512x32xf32>, vector<32x128xf32>, vector<512x128xf32> -> vector<512x128xf32>
    %c0_5 = arith.constant 0 : index
    %c0_6 = arith.constant 0 : index
    %c0_7 = arith.constant 0 : index
    %5 = vector.load %arg4[%c0_5, %c0_6, %c0_7] : memref<1x1x128xf32, #tpu.memory_space<vmem>>, vector<1x1x128xf32>
    %6 = vector.shape_cast %5 : vector<1x1x128xf32> to vector<1x128xf32>
    %7 = vector.broadcast %6 : vector<1x128xf32> to vector<512x128xf32>
    %8 = arith.addf %4, %7 : vector<512x128xf32>
    %cst_8 = arith.constant 0.000000e+00 : f32
    %9 = vector.broadcast %cst_8 : f32 to vector<512x128xf32>
    %10 = arith.maximumf %8, %9 : vector<512x128xf32>
    %c0_9 = arith.constant 0 : index
    %c0_10 = arith.constant 0 : index
    %c0_11 = arith.constant 0 : index
    %11 = vector.load %arg5[%c0_9, %c0_10, %c0_11] : memref<1x512x128xf32, #tpu.memory_space<vmem>>, vector<1x512x128xf32>
    %12 = vector.shape_cast %11 : vector<1x512x128xf32> to vector<512x128xf32>
    %13 = vector.shape_cast %10 : vector<512x128xf32> to vector<1x512x128xf32>
    tpu.vector_store %arg5[%c0_9, %c0_10, %c0_11], %13 {strides = array<i32>} : memref<1x512x128xf32, #tpu.memory_space<vmem>>, vector<1x512x128xf32>,
    return
  }
  func.func @transform_0(%arg0: i32, %arg1: i32) -> (i32, i32, i32) {
    %c0_i32 = arith.constant 0 : i32
    %c0_i32_0 = arith.constant 0 : i32
    return %arg0, %arg1, %c0_i32 : i32, i32, i32
  }
  func.func @transform_1(%arg0: i32, %arg1: i32) -> (i32, i32, i32) {
    %c0_i32 = arith.constant 0 : i32
    %c0_i32_0 = arith.constant 0 : i32
    %c0_i32_1 = arith.constant 0 : i32
    return %arg0, %c0_i32, %c0_i32_0 : i32, i32, i32
  }
  func.func @transform_2(%arg0: i32, %arg1: i32) -> (i32, i32, i32) {
    %c0_i32 = arith.constant 0 : i32
    %c0_i32_0 = arith.constant 0 : i32
    %c0_i32_1 = arith.constant 0 : i32
    return %arg0, %c0_i32, %c0_i32_0 : i32, i32, i32
  }
  func.func @transform_3(%arg0: i32, %arg1: i32) -> (i32, i32, i32) {
    %c0_i32 = arith.constant 0 : i32
    %c0_i32_0 = arith.constant 0 : i32
    return %arg0, %arg1, %c0_i32 : i32, i32, i32
  }
}

module attributes {stable_mosaic.version = 11 : i64} {
  func.func @_matmul_bias_kernel(%arg0: i32, %arg1: i32, %arg2: memref<1x512x54xf32, #tpu.memory_space<vmem>>, %arg3: memref<1x54x128xf32, #tpu.memory_space<vmem>>, %arg4: memref<1x1x128xf32, #tpu.memory_space<vmem>>, %arg5: memref<1x512x128xf32, #tpu.memory_space<vmem>>) attributes {dimension_semantics = [#tpu.dimension_semantics<parallel>, #tpu.dimension_semantics<parallel>], iteration_bounds = array<i64: 3, 8>, scalar_prefetch = 0 : i64, scratch_operands = 0 : i64, tpu.core_type = #tpu.core_type<tc>, window_params = [{transform_indices = @transform_0, window_bounds = array<i64: 1, 512, 54>}, {transform_indices = @transform_1, window_bounds = array<i64: 1, 54, 128>}, {transform_indices = @transform_2, window_bounds = array<i64: 1, 1, 128>}, {transform_indices = @transform_3, window_bounds = array<i64: 1, 512, 128>}]} {
    %c0 = arith.constant 0 : index
    %c0_0 = arith.constant 0 : index
    %c0_1 = arith.constant 0 : index
    %0 = vector.load %arg2[%c0, %c0_0, %c0_1] : memref<1x512x54xf32, #tpu.memory_space<vmem>>, vector<1x512x54xf32>
    %1 = vector.shape_cast %0 : vector<1x512x54xf32> to vector<512x54xf32>
    %c0_2 = arith.constant 0 : index
    %c0_3 = arith.constant 0 : index
    %c0_4 = arith.constant 0 : index
    %2 = vector.load %arg3[%c0_2, %c0_3, %c0_4] : memref<1x54x128xf32, #tpu.memory_space<vmem>>, vector<1x54x128xf32>
    %3 = vector.shape_cast %2 : vector<1x54x128xf32> to vector<54x128xf32>
    %cst = arith.constant dense<0.000000e+00> : vector<512x128xf32>
    %4 = tpu.matmul %1, %3, %cst {dimension_numbers = #tpu.dot_dimension_numbers<[1], [0], [0], [1], [0, 0, 1, 1], [], []>} : vector<512x54xf32>, vector<54x128xf32>, vector<512x128xf32> -> vector<512x128xf32>
    %c0_5 = arith.constant 0 : index
    %c0_6 = arith.constant 0 : index
    %c0_7 = arith.constant 0 : index
    %5 = vector.load %arg4[%c0_5, %c0_6, %c0_7] : memref<1x1x128xf32, #tpu.memory_space<vmem>>, vector<1x1x128xf32>
    %6 = vector.shape_cast %5 : vector<1x1x128xf32> to vector<1x128xf32>
    %7 = vector.broadcast %6 : vector<1x128xf32> to vector<512x128xf32>
    %8 = arith.addf %4, %7 : vector<512x128xf32>
    %c0_8 = arith.constant 0 : index
    %c0_9 = arith.constant 0 : index
    %c0_10 = arith.constant 0 : index
    %9 = vector.load %arg5[%c0_8, %c0_9, %c0_10] : memref<1x512x128xf32, #tpu.memory_space<vmem>>, vector<1x512x128xf32>
    %10 = vector.shape_cast %9 : vector<1x512x128xf32> to vector<512x128xf32>
    %11 = vector.shape_cast %8 : vector<512x128xf32> to vector<1x512x128xf32>
    tpu.vector_store %arg5[%c0_8, %c0_9, %c0_10], %11 {strides = array<i32>} : memref<1x512x128xf32, #tpu.memory_space<vmem>>, vector<1x512x128xf32>,
    return
  }
  func.func @transform_0(%arg0: i32, %arg1: i32) -> (i32, i32, i32) {
    %c0_i32 = arith.constant 0 : i32
    %c0_i32_0 = arith.constant 0 : i32
    return %arg0, %arg1, %c0_i32 : i32, i32, i32
  }
  func.func @transform_1(%arg0: i32, %arg1: i32) -> (i32, i32, i32) {
    %c0_i32 = arith.constant 0 : i32
    %c0_i32_0 = arith.constant 0 : i32
    %c0_i32_1 = arith.constant 0 : i32
    return %arg0, %c0_i32, %c0_i32_0 : i32, i32, i32
  }
  func.func @transform_2(%arg0: i32, %arg1: i32) -> (i32, i32, i32) {
    %c0_i32 = arith.constant 0 : i32
    %c0_i32_0 = arith.constant 0 : i32
    %c0_i32_1 = arith.constant 0 : i32
    return %arg0, %c0_i32, %c0_i32_0 : i32, i32, i32
  }
  func.func @transform_3(%arg0: i32, %arg1: i32) -> (i32, i32, i32) {
    %c0_i32 = arith.constant 0 : i32
    %c0_i32_0 = arith.constant 0 : i32
    return %arg0, %arg1, %c0_i32 : i32, i32, i32
  }
}

</mosaic_0001>

<bundles_post_ra>
// kernel: rinterp_forward.25
= control target key start
LH: loop header
LB: loop body
LE: loop exit
PB: predicated region body
PF: predicated region fallthrough
CT: control target
= control target key end

     0   :  { %s906_s12 = smov 0   ;;  %s908_s13 = smov 0   ;;  %s1175_s0 = inlined_call_operand.vmem [shape: f32[3,512,128], index: 0, kind: input, shape index: {}]   ;;  %s1176_s1 = inlined_call_operand.vmem [shape: f32[3,128,128], index: 1, kind: input, shape index: {}]   ;;  %s1177_s2 = inlined_call_operand.vmem [shape: f32[3,1,128], index: 2, kind: input, shape index: {}]   ;;  %s1178_s3 = inlined_call_operand.vmem [shape: f32[3,512,128], index: 3, kind: output, shape index: {}]  }
   0x1   :  { %s910_s14 = smov 0  }
   0x2 LB: > { %s25_s15 = sadd.s32 1, %s880_s13  ;;  %p777_p0 = scmp.ge.s32.totalorder %s884_s14, 1  ;;  %s884_s14 = sphi %s910_s14, %s13_s14   ;;  %s880_s13 = sphi %s908_s13, %s1180_s13   ;;  %s876_s12 = sphi %s906_s12, %s1179_s12  }
   0x3   : > { %p27_p1 = scmp.ge.s32.totalorder %s25_s15, 3  ;;  %p176_p2 = scmp.lt.s32.totalorder %s884_s14, 4 }
   0x5   : > { %s1182_s15 = smov (%p27_p1, %s25_s15), 0  ;;  %p177_p3 = pnand %p777_p0, %p176_p2 }
   0x6   : > { %p217_p4 = scmp.lt.s32.totalorder (!%p177_p3), %s876_s12, 2 }
   0x7   : > { %180 = sbr.rel (%p177_p3) target bundleno = 305 (0x131), region = 32 }
   0xc   : > { %s1184_s12 = smov (!%p217_p4, %s876_s12), 2 }
   0xd   : > { %s787_s16 = sshll.u32 %s1184_s12, 7  ;;  %s233_s22 = scalar_lea.vmem %s1177_s2, %s1184_s12 }
   0xe   : > { %s930_s19 = scalar_lea.vmem %s1176_s1, %s787_s16  ;;  %s786_s23 = sshll.u32 %s1184_s12, 9 }
   0xf   : > { %v323_v0 = vld [vmem:[%s930_s19 + $0x78] sm:$0xff]  ;;  %v322_v1 = vld [vmem:[%s930_s19 + $0x70] sm:$0xff]  ;;  %v321_v2 = vld [vmem:[%s930_s19 + $0x68] sm:$0xff]  ;;  %s956_s26 = scalar_lea.vmem %s1175_s0, %s786_s23  ;;  %s1038_s4 = scalar_lea.vmem %s1178_s3, %s786_s23 }
  0x10   : > { %790 = vmatpush.msra.mxu2 %v323_v0  ;;  %791 = vmatpush.msra.mxu3 %v323_v0  ;;  %v320_v3 = vld [vmem:[%s930_s19 + $0x60] sm:$0xff]  ;;  %v319_v4 = vld [vmem:[%s930_s19 + $0x58] sm:$0xff]  ;;  %v318_v5 = vld [vmem:[%s930_s19 + $0x50] sm:$0xff] }
  0x11   : > { %328 = vmatpush.msra.mxu0 %v323_v0  ;;  %789 = vmatpush.msra.mxu1 %v323_v0  ;;  %v317_v6 = vld [vmem:[%s930_s19 + $0x48] sm:$0xff]  ;;  %v316_v7 = vld [vmem:[%s930_s19 + $0x40] sm:$0xff]  ;;  %v315_v8 = vld [vmem:[%s930_s19 + $0x38] sm:$0xff] }
  0x12   : > { %793 = vmatpush.msra.mxu2 %v322_v1  ;;  %794 = vmatpush.msra.mxu3 %v322_v1  ;;  %v314_v9 = vld [vmem:[%s930_s19 + $0x30] sm:$0xff]  ;;  %v313_v10 = vld [vmem:[%s930_s19 + $0x28] sm:$0xff]  ;;  %v312_v11 = vld [vmem:[%s930_s19 + $0x20] sm:$0xff] }
  0x13   : > { %329 = vmatpush.msra.mxu0 %v322_v1  ;;  %792 = vmatpush.msra.mxu1 %v322_v1  ;;  %v311_v12 = vld [vmem:[%s930_s19 + $0x18] sm:$0xff]  ;;  %v310_v13 = vld [vmem:[%s930_s19 + $0x10] sm:$0xff]  ;;  %v309_v14 = vld [vmem:[%s930_s19 + $0x8] sm:$0xff] }
  0x14   : > { %796 = vmatpush.msra.mxu2 %v321_v2  ;;  %797 = vmatpush.msra.mxu3 %v321_v2  ;;  %v308_v15 = vld [vmem:[%s930_s19] sm:$0xff]  ;;  %v277_v20 = vld [vmem:[%s956_s26 + $0x108] sm:$0xff]  ;;  %v278_v24 = vld [vmem:[%s956_s26 + $0x110] sm:$0xff] }
  0x15   : > { %330 = vmatpush.msra.mxu0 %v321_v2  ;;  %795 = vmatpush.msra.mxu1 %v321_v2  ;;  %v276_v16 = vld [vmem:[%s956_s26 + $0x100] sm:$0xff]  ;;  %v293_v21 = vld [vmem:[%s956_s26 + $0x188] sm:$0xff]  ;;  %v294_v25 = vld [vmem:[%s956_s26 + $0x190] sm:$0xff] }
  0x16   : > { %799 = vmatpush.msra.mxu2 %v320_v3  ;;  %800 = vmatpush.msra.mxu3 %v320_v3  ;;  %v292_v17 = vld [vmem:[%s956_s26 + $0x180] sm:$0xff]  ;;  %v245_v22 = vld [vmem:[%s956_s26 + $0x8] sm:$0xff]  ;;  %v246_v26 = vld [vmem:[%s956_s26 + $0x10] sm:$0xff] }
  0x17   : > { %331 = vmatpush.msra.mxu0 %v320_v3  ;;  %798 = vmatpush.msra.mxu1 %v320_v3  ;;  %v244_v18 = vld [vmem:[%s956_s26] sm:$0xff]  ;;  %v261_v23 = vld [vmem:[%s956_s26 + $0x88] sm:$0xff]  ;;  %v262_v27 = vld [vmem:[%s956_s26 + $0x90] sm:$0xff] }
  0x18   : > { %802 = vmatpush.msra.mxu2 %v319_v4  ;;  %803 = vmatpush.msra.mxu3 %v319_v4  ;;  %v260_v19 = vld [vmem:[%s956_s26 + $0x80] sm:$0xff]  ;;  %v279_v28 = vld [vmem:[%s956_s26 + $0x118] sm:$0xff]  ;;  %v281_v36 = vld [vmem:[%s956_s26 + $0x128] sm:$0xff] }
  0x19   : > { %332 = vmatpush.msra.mxu0 %v319_v4  ;;  %801 = vmatpush.msra.mxu1 %v319_v4  ;;  %v295_v29 = vld [vmem:[%s956_s26 + $0x198] sm:$0xff]  ;;  %v280_v32 = vld [vmem:[%s956_s26 + $0x120] sm:$0xff]  ;;  %v297_v37 = vld [vmem:[%s956_s26 + $0x1a8] sm:$0xff] }
  0x1a   : > { %805 = vmatpush.msra.mxu2 %v318_v5  ;;  %806 = vmatpush.msra.mxu3 %v318_v5  ;;  %v247_v30 = vld [vmem:[%s956_s26 + $0x18] sm:$0xff]  ;;  %v296_v33 = vld [vmem:[%s956_s26 + $0x1a0] sm:$0xff]  ;;  %v249_v38 = vld [vmem:[%s956_s26 + $0x28] sm:$0xff] }
  0x1b   : > { %333 = vmatpush.msra.mxu0 %v318_v5  ;;  %804 = vmatpush.msra.mxu1 %v318_v5  ;;  %v263_v31 = vld [vmem:[%s956_s26 + $0x98] sm:$0xff]  ;;  %v248_v34 = vld [vmem:[%s956_s26 + $0x20] sm:$0xff]  ;;  %v265_v39 = vld [vmem:[%s956_s26 + $0xa8] sm:$0xff] }
  0x1c   : > { %808 = vmatpush.msra.mxu2 %v317_v6  ;;  %809 = vmatpush.msra.mxu3 %v317_v6  ;;  %v264_v35 = vld [vmem:[%s956_s26 + $0xa0] sm:$0xff]  ;;  %v282_v40 = vld [vmem:[%s956_s26 + $0x130] sm:$0xff]  ;;  %v283_v44 = vld [vmem:[%s956_s26 + $0x138] sm:$0xff] }
  0x1d   : > { %334 = vmatpush.msra.mxu0 %v317_v6  ;;  %807 = vmatpush.msra.mxu1 %v317_v6  ;;  %v298_v41 = vld [vmem:[%s956_s26 + $0x1b0] sm:$0xff]  ;;  %v299_v45 = vld [vmem:[%s956_s26 + $0x1b8] sm:$0xff]  ;;  %v284_v48 = vld [vmem:[%s956_s26 + $0x140] sm:$0xff] }
  0x1e   : > { %811 = vmatpush.msra.mxu2 %v316_v7  ;;  %812 = vmatpush.msra.mxu3 %v316_v7  ;;  %v250_v42 = vld [vmem:[%s956_s26 + $0x30] sm:$0xff]  ;;  %v251_v46 = vld [vmem:[%s956_s26 + $0x38] sm:$0xff]  ;;  %v300_v49 = vld [vmem:[%s956_s26 + $0x1c0] sm:$0xff] }
  0x1f   : > { %335 = vmatpush.msra.mxu0 %v316_v7  ;;  %810 = vmatpush.msra.mxu1 %v316_v7  ;;  %v266_v43 = vld [vmem:[%s956_s26 + $0xb0] sm:$0xff]  ;;  %v267_v47 = vld [vmem:[%s956_s26 + $0xb8] sm:$0xff]  ;;  %v252_v50 = vld [vmem:[%s956_s26 + $0x40] sm:$0xff] }
  0x20   : > { %814 = vmatpush.msra.mxu2 %v315_v8  ;;  %815 = vmatpush.msra.mxu3 %v315_v8  ;;  %v268_v51 = vld [vmem:[%s956_s26 + $0xc0] sm:$0xff]  ;;  %v285_v52 = vld [vmem:[%s956_s26 + $0x148] sm:$0xff]  ;;  %v286_v56 = vld [vmem:[%s956_s26 + $0x150] sm:$0xff] }
  0x21   : > { %336 = vmatpush.msra.mxu0 %v315_v8  ;;  %813 = vmatpush.msra.mxu1 %v315_v8  ;;  %v301_v53 = vld [vmem:[%s956_s26 + $0x1c8] sm:$0xff]  ;;  %v302_v57 = vld [vmem:[%s956_s26 + $0x1d0] sm:$0xff]  ;;  %v287_v60 = vld [vmem:[%s956_s26 + $0x158] sm:$0xff] }
  0x22   : > { %817 = vmatpush.msra.mxu2 %v314_v9  ;;  %818 = vmatpush.msra.mxu3 %v314_v9  ;;  %v253_v54 = vld [vmem:[%s956_s26 + $0x48] sm:$0xff]  ;;  %v254_v58 = vld [vmem:[%s956_s26 + $0x50] sm:$0xff]  ;;  %v303_v61 = vld [vmem:[%s956_s26 + $0x1d8] sm:$0xff] }
  0x23   : > { %337 = vmatpush.msra.mxu0 %v314_v9  ;;  %816 = vmatpush.msra.mxu1 %v314_v9  ;;  %v269_v55 = vld [vmem:[%s956_s26 + $0xc8] sm:$0xff]  ;;  %v270_v59 = vld [vmem:[%s956_s26 + $0xd0] sm:$0xff]  ;;  %v255_v62 = vld [vmem:[%s956_s26 + $0x58] sm:$0xff] }
  0x24   : > { %820 = vmatpush.msra.mxu2 %v313_v10  ;;  %821 = vmatpush.msra.mxu3 %v313_v10  ;;  %v271_v63 = vld [vmem:[%s956_s26 + $0xd8] sm:$0xff]  ;;  %v288_v0 = vld [vmem:[%s956_s26 + $0x160] sm:$0xff]  ;;  %v289_v4 = vld [vmem:[%s956_s26 + $0x168] sm:$0xff] }
  0x25   : > { %338 = vmatpush.msra.mxu0 %v313_v10  ;;  %819 = vmatpush.msra.mxu1 %v313_v10  ;;  %v304_v1 = vld [vmem:[%s956_s26 + $0x1e0] sm:$0xff]  ;;  %v305_v5 = vld [vmem:[%s956_s26 + $0x1e8] sm:$0xff]  ;;  %v290_v8 = vld [vmem:[%s956_s26 + $0x170] sm:$0xff] }
  0x26   : > { %823 = vmatpush.msra.mxu2 %v312_v11  ;;  %824 = vmatpush.msra.mxu3 %v312_v11  ;;  %v256_v2 = vld [vmem:[%s956_s26 + $0x60] sm:$0xff]  ;;  %v257_v6 = vld [vmem:[%s956_s26 + $0x68] sm:$0xff]  ;;  %v306_v9 = vld [vmem:[%s956_s26 + $0x1f0] sm:$0xff] }
  0x27   : > { %339 = vmatpush.msra.mxu0 %v312_v11  ;;  %822 = vmatpush.msra.mxu1 %v312_v11  ;;  %v272_v3 = vld [vmem:[%s956_s26 + $0xe0] sm:$0xff]  ;;  %v273_v7 = vld [vmem:[%s956_s26 + $0xe8] sm:$0xff]  ;;  %v258_v10 = vld [vmem:[%s956_s26 + $0x70] sm:$0xff] }
  0x28   : > { %826 = vmatpush.msra.mxu2 %v311_v12  ;;  %827 = vmatpush.msra.mxu3 %v311_v12  ;;  %v274_v11 = vld [vmem:[%s956_s26 + $0xf0] sm:$0xff] }
  0x29   : > { %340 = vmatpush.msra.mxu0 %v311_v12  ;;  %825 = vmatpush.msra.mxu1 %v311_v12  ;;  %v291_v12 = vld [vmem:[%s956_s26 + $0x178] sm:$0xff] }
  0x2a   : > { %829 = vmatpush.msra.mxu2 %v310_v13  ;;  %830 = vmatpush.msra.mxu3 %v310_v13 }
  0x2b   : > { %341 = vmatpush.msra.mxu0 %v310_v13  ;;  %828 = vmatpush.msra.mxu1 %v310_v13  ;;  %v307_v13 = vld [vmem:[%s956_s26 + $0x1f8] sm:$0xff] }
  0x2c   : > { %832 = vmatpush.msra.mxu2 %v309_v14  ;;  %833 = vmatpush.msra.mxu3 %v309_v14 }
  0x2d   : > { %342 = vmatpush.msra.mxu0 %v309_v14  ;;  %831 = vmatpush.msra.mxu1 %v309_v14  ;;  %v259_v14 = vld [vmem:[%s956_s26 + $0x78] sm:$0xff] }
  0x2e   : > { %835 = vmatpush.msra.mxu2 %v308_v15  ;;  %836 = vmatpush.msra.mxu3 %v308_v15 }
  0x2f   : > { %440 = vmatmul.f32.vlgmr.msra.gmra.mxu2 %v276_v16  ;;  %488 = vmatmul.f32.vlgmr.msra.gmra.mxu3 %v292_v17  ;;  %v1029_v16 = vld [vmem:[%s233_s22] ss:$0 sm:$0xff] }
  0x30   : > { %343 = vmatpush.msra.mxu0 %v308_v15  ;;  %834 = vmatpush.msra.mxu1 %v308_v15  ;;  %v275_v15 = vld [vmem:[%s956_s26 + $0xf8] sm:$0xff] }
  0x31   : > { %344 = vmatmul.f32.vlgmr.msra.gmra.mxu0 %v244_v18  ;;  %392 = vmatmul.f32.vlgmr.msra.gmra.mxu1 %v260_v19 }
  0x37   : > { %443 = vmatmul.f32.gmra.mxu2 %v277_v20  ;;  %491 = vmatmul.f32.gmra.mxu3 %v293_v21 }
  0x39   : > { %347 = vmatmul.f32.gmra.mxu0 %v245_v22  ;;  %395 = vmatmul.f32.gmra.mxu1 %v261_v23 }
  0x3f   : > { %446 = vmatmul.f32.gmra.mxu2 %v278_v24  ;;  %494 = vmatmul.f32.gmra.mxu3 %v294_v25 }
  0x41   : > { %350 = vmatmul.f32.gmra.mxu0 %v246_v26  ;;  %398 = vmatmul.f32.gmra.mxu1 %v262_v27 }
  0x47   : > { %449 = vmatmul.f32.gmra.mxu2 %v279_v28  ;;  %497 = vmatmul.f32.gmra.mxu3 %v295_v29 }
  0x49   : > { %353 = vmatmul.f32.gmra.mxu0 %v247_v30  ;;  %401 = vmatmul.f32.gmra.mxu1 %v263_v31 }
  0x4f   : > { %452 = vmatmul.f32.gmra.mxu2 %v280_v32  ;;  %500 = vmatmul.f32.gmra.mxu3 %v296_v33 }
  0x51   : > { %356 = vmatmul.f32.gmra.mxu0 %v248_v34  ;;  %404 = vmatmul.f32.gmra.mxu1 %v264_v35 }
  0x57   : > { %455 = vmatmul.f32.gmra.mxu2 %v281_v36  ;;  %503 = vmatmul.f32.gmra.mxu3 %v297_v37 }
  0x59   : > { %359 = vmatmul.f32.gmra.mxu0 %v249_v38  ;;  %407 = vmatmul.f32.gmra.mxu1 %v265_v39 }
  0x5f   : > { %458 = vmatmul.f32.gmra.mxu2 %v282_v40  ;;  %506 = vmatmul.f32.gmra.mxu3 %v298_v41 }
  0x61   : > { %362 = vmatmul.f32.gmra.mxu0 %v250_v42  ;;  %410 = vmatmul.f32.gmra.mxu1 %v266_v43 }
  0x67   : > { %461 = vmatmul.f32.gmra.mxu2 %v283_v44  ;;  %509 = vmatmul.f32.gmra.mxu3 %v299_v45 }
  0x69   : > { %365 = vmatmul.f32.gmra.mxu0 %v251_v46  ;;  %413 = vmatmul.f32.gmra.mxu1 %v267_v47 }
  0x6f   : > { %464 = vmatmul.f32.gmra.mxu2 %v284_v48  ;;  %512 = vmatmul.f32.gmra.mxu3 %v300_v49 }
  0x71   : > { %368 = vmatmul.f32.gmra.mxu0 %v252_v50  ;;  %416 = vmatmul.f32.gmra.mxu1 %v268_v51 }
  0x77   : > { %467 = vmatmul.f32.gmra.mxu2 %v285_v52  ;;  %515 = vmatmul.f32.gmra.mxu3 %v301_v53 }
  0x79   : > { %371 = vmatmul.f32.gmra.mxu0 %v253_v54  ;;  %419 = vmatmul.f32.gmra.mxu1 %v269_v55 }
  0x7f   : > { %470 = vmatmul.f32.gmra.mxu2 %v286_v56  ;;  %518 = vmatmul.f32.gmra.mxu3 %v302_v57 }
  0x81   : > { %374 = vmatmul.f32.gmra.mxu0 %v254_v58  ;;  %422 = vmatmul.f32.gmra.mxu1 %v270_v59 }
  0x87   : > { %473 = vmatmul.f32.gmra.mxu2 %v287_v60  ;;  %521 = vmatmul.f32.gmra.mxu3 %v303_v61 }
  0x89   : > { %377 = vmatmul.f32.gmra.mxu0 %v255_v62  ;;  %425 = vmatmul.f32.gmra.mxu1 %v271_v63 }
  0x8f   : > { %476 = vmatmul.f32.gmra.mxu2 %v288_v0  ;;  %524 = vmatmul.f32.gmra.mxu3 %v304_v1 }
  0x91   : > { %380 = vmatmul.f32.gmra.mxu0 %v256_v2  ;;  %428 = vmatmul.f32.gmra.mxu1 %v272_v3 }
  0x97   : > { %479 = vmatmul.f32.gmra.mxu2 %v289_v4  ;;  %527 = vmatmul.f32.gmra.mxu3 %v305_v5 }
  0x99   : > { %383 = vmatmul.f32.gmra.mxu0 %v257_v6  ;;  %431 = vmatmul.f32.gmra.mxu1 %v273_v7 }
  0x9f   : > { %482 = vmatmul.f32.gmra.mxu2 %v290_v8  ;;  %530 = vmatmul.f32.gmra.mxu3 %v306_v9 }
  0xa1   : > { %386 = vmatmul.f32.gmra.mxu0 %v258_v10  ;;  %434 = vmatmul.f32.gmra.mxu1 %v274_v11 }
  0xa7   : > { %485 = vmatmul.f32.gmra.mxu2 %v291_v12  ;;  %533 = vmatmul.f32.gmra.mxu3 %v307_v13 }
  0xa9   : > { %389 = vmatmul.f32.gmra.mxu0 %v259_v14  ;;  %437 = vmatmul.f32.gmra.mxu1 %v275_v15 }
  0xae   : > { %v345_v17 = vpop.f32.mrf.mxu0  ;;  %v393_v18 = vpop.f32.mrf.mxu1 }
  0xaf   : > { %v346_v19 = vadd.f32 %v1029_v16, %v345_v17  ;;  %v394_v20 = vadd.f32 %v1029_v16, %v393_v18 }
  0xb1   : > { %v537_v21 = vmax.f32 %v346_v19, 0.0  ;;  %v553_v22 = vmax.f32 %v394_v20, 0.0 }
  0xb2   : > { %v441_v23 = vpop.f32.mrf.mxu2  ;;  %v489_v24 = vpop.f32.mrf.mxu3 }
  0xb3   : > { %601 = vst [vmem:[%s1038_s4] sm:$0xff] %v537_v21  ;;  %v442_v25 = vadd.f32 %v1029_v16, %v441_v23  ;;  %v490_v26 = vadd.f32 %v1029_v16, %v489_v24 }
  0xb4   : > { %617 = vst [vmem:[%s1038_s4 + $0x80] sm:$0xff] %v553_v22 }
  0xb5   : > { %v569_v27 = vmax.f32 %v442_v25, 0.0  ;;  %v585_v28 = vmax.f32 %v490_v26, 0.0 }
  0xb6   : > { %v348_v29 = vpop.f32.mrf.mxu0  ;;  %v396_v30 = vpop.f32.mrf.mxu1 }
  0xb7   : > { %633 = vst [vmem:[%s1038_s4 + $0x100] sm:$0xff] %v569_v27  ;;  %v349_v31 = vadd.f32 %v1029_v16, %v348_v29  ;;  %v397_v32 = vadd.f32 %v1029_v16, %v396_v30 }
  0xb8   : > { %649 = vst [vmem:[%s1038_s4 + $0x180] sm:$0xff] %v585_v28 }
  0xb9   : > { %v538_v33 = vmax.f32 %v349_v31, 0.0  ;;  %v554_v34 = vmax.f32 %v397_v32, 0.0 }
  0xba   : > { %v444_v35 = vpop.f32.mrf.mxu2  ;;  %v492_v36 = vpop.f32.mrf.mxu3 }
  0xbb   : > { %602 = vst [vmem:[%s1038_s4 + $0x8] sm:$0xff] %v538_v33  ;;  %v445_v37 = vadd.f32 %v1029_v16, %v444_v35  ;;  %v493_v38 = vadd.f32 %v1029_v16, %v492_v36 }
  0xbc   : > { %618 = vst [vmem:[%s1038_s4 + $0x88] sm:$0xff] %v554_v34 }
  0xbd   : > { %v570_v39 = vmax.f32 %v445_v37, 0.0  ;;  %v586_v40 = vmax.f32 %v493_v38, 0.0 }
  0xbe   : > { %v351_v41 = vpop.f32.mrf.mxu0  ;;  %v399_v42 = vpop.f32.mrf.mxu1 }
  0xbf   : > { %634 = vst [vmem:[%s1038_s4 + $0x108] sm:$0xff] %v570_v39  ;;  %v352_v43 = vadd.f32 %v1029_v16, %v351_v41  ;;  %v400_v44 = vadd.f32 %v1029_v16, %v399_v42 }
  0xc0   : > { %650 = vst [vmem:[%s1038_s4 + $0x188] sm:$0xff] %v586_v40 }
  0xc1   : > { %v539_v45 = vmax.f32 %v352_v43, 0.0  ;;  %v555_v46 = vmax.f32 %v400_v44, 0.0 }
  0xc2   : > { %v447_v47 = vpop.f32.mrf.mxu2  ;;  %v495_v48 = vpop.f32.mrf.mxu3 }
  0xc3   : > { %603 = vst [vmem:[%s1038_s4 + $0x10] sm:$0xff] %v539_v45  ;;  %v448_v49 = vadd.f32 %v1029_v16, %v447_v47  ;;  %v496_v50 = vadd.f32 %v1029_v16, %v495_v48 }
  0xc4   : > { %619 = vst [vmem:[%s1038_s4 + $0x90] sm:$0xff] %v555_v46 }
  0xc5   : > { %v571_v51 = vmax.f32 %v448_v49, 0.0  ;;  %v587_v52 = vmax.f32 %v496_v50, 0.0 }
  0xc6   : > { %v354_v53 = vpop.f32.mrf.mxu0  ;;  %v402_v54 = vpop.f32.mrf.mxu1 }
  0xc7   : > { %635 = vst [vmem:[%s1038_s4 + $0x110] sm:$0xff] %v571_v51  ;;  %v355_v55 = vadd.f32 %v1029_v16, %v354_v53  ;;  %v403_v56 = vadd.f32 %v1029_v16, %v402_v54 }
  0xc8   : > { %651 = vst [vmem:[%s1038_s4 + $0x190] sm:$0xff] %v587_v52 }
  0xc9   : > { %v540_v57 = vmax.f32 %v355_v55, 0.0  ;;  %v556_v58 = vmax.f32 %v403_v56, 0.0 }
  0xca   : > { %v450_v59 = vpop.f32.mrf.mxu2  ;;  %v498_v60 = vpop.f32.mrf.mxu3 }
  0xcb   : > { %604 = vst [vmem:[%s1038_s4 + $0x18] sm:$0xff] %v540_v57  ;;  %v451_v61 = vadd.f32 %v1029_v16, %v450_v59  ;;  %v499_v62 = vadd.f32 %v1029_v16, %v498_v60 }
  0xcc   : > { %620 = vst [vmem:[%s1038_s4 + $0x98] sm:$0xff] %v556_v58 }
  0xcd   : > { %v572_v63 = vmax.f32 %v451_v61, 0.0  ;;  %v588_v0 = vmax.f32 %v499_v62, 0.0 }
  0xce   : > { %v357_v1 = vpop.f32.mrf.mxu0  ;;  %v405_v2 = vpop.f32.mrf.mxu1 }
  0xcf   : > { %636 = vst [vmem:[%s1038_s4 + $0x118] sm:$0xff] %v572_v63  ;;  %v358_v3 = vadd.f32 %v1029_v16, %v357_v1  ;;  %v406_v4 = vadd.f32 %v1029_v16, %v405_v2 }
  0xd0   : > { %652 = vst [vmem:[%s1038_s4 + $0x198] sm:$0xff] %v588_v0 }
  0xd1   : > { %v541_v5 = vmax.f32 %v358_v3, 0.0  ;;  %v557_v6 = vmax.f32 %v406_v4, 0.0 }
  0xd2   : > { %v453_v7 = vpop.f32.mrf.mxu2  ;;  %v501_v8 = vpop.f32.mrf.mxu3 }
  0xd3   : > { %605 = vst [vmem:[%s1038_s4 + $0x20] sm:$0xff] %v541_v5  ;;  %v454_v9 = vadd.f32 %v1029_v16, %v453_v7  ;;  %v502_v10 = vadd.f32 %v1029_v16, %v501_v8 }
  0xd4   : > { %621 = vst [vmem:[%s1038_s4 + $0xa0] sm:$0xff] %v557_v6 }
  0xd5   : > { %v573_v11 = vmax.f32 %v454_v9, 0.0  ;;  %v589_v12 = vmax.f32 %v502_v10, 0.0 }
  0xd6   : > { %v360_v13 = vpop.f32.mrf.mxu0  ;;  %v408_v14 = vpop.f32.mrf.mxu1 }
  0xd7   : > { %637 = vst [vmem:[%s1038_s4 + $0x120] sm:$0xff] %v573_v11  ;;  %v361_v15 = vadd.f32 %v1029_v16, %v360_v13  ;;  %v409_v17 = vadd.f32 %v1029_v16, %v408_v14 }
  0xd8   : > { %653 = vst [vmem:[%s1038_s4 + $0x1a0] sm:$0xff] %v589_v12 }
  0xd9   : > { %v542_v18 = vmax.f32 %v361_v15, 0.0  ;;  %v558_v19 = vmax.f32 %v409_v17, 0.0 }
  0xda   : > { %v456_v20 = vpop.f32.mrf.mxu2  ;;  %v504_v21 = vpop.f32.mrf.mxu3 }
  0xdb   : > { %606 = vst [vmem:[%s1038_s4 + $0x28] sm:$0xff] %v542_v18  ;;  %v457_v22 = vadd.f32 %v1029_v16, %v456_v20  ;;  %v505_v23 = vadd.f32 %v1029_v16, %v504_v21 }
  0xdc   : > { %622 = vst [vmem:[%s1038_s4 + $0xa8] sm:$0xff] %v558_v19 }
  0xdd   : > { %v574_v24 = vmax.f32 %v457_v22, 0.0  ;;  %v590_v25 = vmax.f32 %v505_v23, 0.0 }
  0xde   : > { %v363_v26 = vpop.f32.mrf.mxu0  ;;  %v411_v27 = vpop.f32.mrf.mxu1 }
  0xdf   : > { %638 = vst [vmem:[%s1038_s4 + $0x128] sm:$0xff] %v574_v24  ;;  %v364_v28 = vadd.f32 %v1029_v16, %v363_v26  ;;  %v412_v29 = vadd.f32 %v1029_v16, %v411_v27 }
  0xe0   : > { %654 = vst [vmem:[%s1038_s4 + $0x1a8] sm:$0xff] %v590_v25 }
  0xe1   : > { %v543_v30 = vmax.f32 %v364_v28, 0.0  ;;  %v559_v31 = vmax.f32 %v412_v29, 0.0 }
  0xe2   : > { %v459_v32 = vpop.f32.mrf.mxu2  ;;  %v507_v33 = vpop.f32.mrf.mxu3 }
  0xe3   : > { %607 = vst [vmem:[%s1038_s4 + $0x30] sm:$0xff] %v543_v30  ;;  %v460_v34 = vadd.f32 %v1029_v16, %v459_v32  ;;  %v508_v35 = vadd.f32 %v1029_v16, %v507_v33 }
  0xe4   : > { %623 = vst [vmem:[%s1038_s4 + $0xb0] sm:$0xff] %v559_v31 }
  0xe5   : > { %v575_v36 = vmax.f32 %v460_v34, 0.0  ;;  %v591_v37 = vmax.f32 %v508_v35, 0.0 }
  0xe6   : > { %v366_v38 = vpop.f32.mrf.mxu0  ;;  %v414_v39 = vpop.f32.mrf.mxu1 }
  0xe7   : > { %639 = vst [vmem:[%s1038_s4 + $0x130] sm:$0xff] %v575_v36  ;;  %v367_v40 = vadd.f32 %v1029_v16, %v366_v38  ;;  %v415_v41 = vadd.f32 %v1029_v16, %v414_v39 }
  0xe8   : > { %655 = vst [vmem:[%s1038_s4 + $0x1b0] sm:$0xff] %v591_v37 }
  0xe9   : > { %v544_v42 = vmax.f32 %v367_v40, 0.0  ;;  %v560_v43 = vmax.f32 %v415_v41, 0.0 }
  0xea   : > { %v462_v44 = vpop.f32.mrf.mxu2  ;;  %v510_v45 = vpop.f32.mrf.mxu3 }
  0xeb   : > { %608 = vst [vmem:[%s1038_s4 + $0x38] sm:$0xff] %v544_v42  ;;  %v463_v46 = vadd.f32 %v1029_v16, %v462_v44  ;;  %v511_v47 = vadd.f32 %v1029_v16, %v510_v45 }
  0xec   : > { %624 = vst [vmem:[%s1038_s4 + $0xb8] sm:$0xff] %v560_v43 }
  0xed   : > { %v576_v48 = vmax.f32 %v463_v46, 0.0  ;;  %v592_v49 = vmax.f32 %v511_v47, 0.0 }
  0xee   : > { %v369_v50 = vpop.f32.mrf.mxu0  ;;  %v417_v51 = vpop.f32.mrf.mxu1 }
  0xef   : > { %640 = vst [vmem:[%s1038_s4 + $0x138] sm:$0xff] %v576_v48  ;;  %v370_v52 = vadd.f32 %v1029_v16, %v369_v50  ;;  %v418_v53 = vadd.f32 %v1029_v16, %v417_v51 }
  0xf0   : > { %656 = vst [vmem:[%s1038_s4 + $0x1b8] sm:$0xff] %v592_v49 }
  0xf1   : > { %v545_v54 = vmax.f32 %v370_v52, 0.0  ;;  %v561_v55 = vmax.f32 %v418_v53, 0.0 }
  0xf2   : > { %v465_v56 = vpop.f32.mrf.mxu2  ;;  %v513_v57 = vpop.f32.mrf.mxu3 }
  0xf3   : > { %609 = vst [vmem:[%s1038_s4 + $0x40] sm:$0xff] %v545_v54  ;;  %v466_v58 = vadd.f32 %v1029_v16, %v465_v56  ;;  %v514_v59 = vadd.f32 %v1029_v16, %v513_v57 }
  0xf4   : > { %625 = vst [vmem:[%s1038_s4 + $0xc0] sm:$0xff] %v561_v55 }
  0xf5   : > { %v577_v60 = vmax.f32 %v466_v58, 0.0  ;;  %v593_v61 = vmax.f32 %v514_v59, 0.0 }
  0xf6   : > { %v372_v62 = vpop.f32.mrf.mxu0  ;;  %v420_v63 = vpop.f32.mrf.mxu1 }
  0xf7   : > { %641 = vst [vmem:[%s1038_s4 + $0x140] sm:$0xff] %v577_v60  ;;  %v373_v0 = vadd.f32 %v1029_v16, %v372_v62  ;;  %v421_v1 = vadd.f32 %v1029_v16, %v420_v63 }
  0xf8   : > { %657 = vst [vmem:[%s1038_s4 + $0x1c0] sm:$0xff] %v593_v61 }
  0xf9   : > { %v546_v2 = vmax.f32 %v373_v0, 0.0  ;;  %v562_v3 = vmax.f32 %v421_v1, 0.0 }
  0xfa   : > { %v468_v4 = vpop.f32.mrf.mxu2  ;;  %v516_v5 = vpop.f32.mrf.mxu3 }
  0xfb   : > { %610 = vst [vmem:[%s1038_s4 + $0x48] sm:$0xff] %v546_v2  ;;  %v469_v6 = vadd.f32 %v1029_v16, %v468_v4  ;;  %v517_v7 = vadd.f32 %v1029_v16, %v516_v5 }
  0xfc   : > { %626 = vst [vmem:[%s1038_s4 + $0xc8] sm:$0xff] %v562_v3 }
  0xfd   : > { %v578_v8 = vmax.f32 %v469_v6, 0.0  ;;  %v594_v9 = vmax.f32 %v517_v7, 0.0 }
  0xfe   : > { %v375_v10 = vpop.f32.mrf.mxu0  ;;  %v423_v11 = vpop.f32.mrf.mxu1 }
  0xff   : > { %642 = vst [vmem:[%s1038_s4 + $0x148] sm:$0xff] %v578_v8  ;;  %v376_v12 = vadd.f32 %v1029_v16, %v375_v10  ;;  %v424_v13 = vadd.f32 %v1029_v16, %v423_v11 }
 0x100   : > { %658 = vst [vmem:[%s1038_s4 + $0x1c8] sm:$0xff] %v594_v9 }
 0x101   : > { %v547_v14 = vmax.f32 %v376_v12, 0.0  ;;  %v563_v15 = vmax.f32 %v424_v13, 0.0 }
 0x102   : > { %v471_v17 = vpop.f32.mrf.mxu2  ;;  %v519_v18 = vpop.f32.mrf.mxu3 }
 0x103   : > { %611 = vst [vmem:[%s1038_s4 + $0x50] sm:$0xff] %v547_v14  ;;  %v472_v19 = vadd.f32 %v1029_v16, %v471_v17  ;;  %v520_v20 = vadd.f32 %v1029_v16, %v519_v18 }
 0x104   : > { %627 = vst [vmem:[%s1038_s4 + $0xd0] sm:$0xff] %v563_v15 }
 0x105   : > { %v579_v21 = vmax.f32 %v472_v19, 0.0  ;;  %v595_v22 = vmax.f32 %v520_v20, 0.0 }
 0x106   : > { %v378_v23 = vpop.f32.mrf.mxu0  ;;  %v426_v24 = vpop.f32.mrf.mxu1 }
 0x107   : > { %643 = vst [vmem:[%s1038_s4 + $0x150] sm:$0xff] %v579_v21  ;;  %v379_v25 = vadd.f32 %v1029_v16, %v378_v23  ;;  %v427_v26 = vadd.f32 %v1029_v16, %v426_v24 }
 0x108   : > { %659 = vst [vmem:[%s1038_s4 + $0x1d0] sm:$0xff] %v595_v22 }
 0x109   : > { %v548_v27 = vmax.f32 %v379_v25, 0.0  ;;  %v564_v28 = vmax.f32 %v427_v26, 0.0 }
 0x10a   : > { %v474_v29 = vpop.f32.mrf.mxu2  ;;  %v522_v30 = vpop.f32.mrf.mxu3 }
 0x10b   : > { %612 = vst [vmem:[%s1038_s4 + $0x58] sm:$0xff] %v548_v27  ;;  %v475_v31 = vadd.f32 %v1029_v16, %v474_v29  ;;  %v523_v32 = vadd.f32 %v1029_v16, %v522_v30 }
 0x10c   : > { %628 = vst [vmem:[%s1038_s4 + $0xd8] sm:$0xff] %v564_v28 }
 0x10d   : > { %v580_v33 = vmax.f32 %v475_v31, 0.0  ;;  %v596_v34 = vmax.f32 %v523_v32, 0.0 }
 0x10e   : > { %v381_v35 = vpop.f32.mrf.mxu0  ;;  %v429_v36 = vpop.f32.mrf.mxu1 }
 0x10f   : > { %644 = vst [vmem:[%s1038_s4 + $0x158] sm:$0xff] %v580_v33  ;;  %v382_v37 = vadd.f32 %v1029_v16, %v381_v35  ;;  %v430_v38 = vadd.f32 %v1029_v16, %v429_v36 }
 0x110   : > { %660 = vst [vmem:[%s1038_s4 + $0x1d8] sm:$0xff] %v596_v34 }
 0x111   : > { %v549_v39 = vmax.f32 %v382_v37, 0.0  ;;  %v565_v40 = vmax.f32 %v430_v38, 0.0 }
 0x112   : > { %v477_v41 = vpop.f32.mrf.mxu2  ;;  %v525_v42 = vpop.f32.mrf.mxu3 }
 0x113   : > { %613 = vst [vmem:[%s1038_s4 + $0x60] sm:$0xff] %v549_v39  ;;  %v478_v43 = vadd.f32 %v1029_v16, %v477_v41  ;;  %v526_v44 = vadd.f32 %v1029_v16, %v525_v42 }
 0x114   : > { %629 = vst [vmem:[%s1038_s4 + $0xe0] sm:$0xff] %v565_v40 }
 0x115   : > { %v581_v45 = vmax.f32 %v478_v43, 0.0  ;;  %v597_v46 = vmax.f32 %v526_v44, 0.0 }
 0x116   : > { %v384_v47 = vpop.f32.mrf.mxu0  ;;  %v432_v48 = vpop.f32.mrf.mxu1 }
 0x117   : > { %645 = vst [vmem:[%s1038_s4 + $0x160] sm:$0xff] %v581_v45  ;;  %v385_v49 = vadd.f32 %v1029_v16, %v384_v47  ;;  %v433_v50 = vadd.f32 %v1029_v16, %v432_v48 }
 0x118   : > { %661 = vst [vmem:[%s1038_s4 + $0x1e0] sm:$0xff] %v597_v46 }
 0x119   : > { %v550_v51 = vmax.f32 %v385_v49, 0.0  ;;  %v566_v52 = vmax.f32 %v433_v50, 0.0 }
 0x11a   : > { %v480_v53 = vpop.f32.mrf.mxu2  ;;  %v528_v54 = vpop.f32.mrf.mxu3 }
 0x11b   : > { %614 = vst [vmem:[%s1038_s4 + $0x68] sm:$0xff] %v550_v51  ;;  %v481_v55 = vadd.f32 %v1029_v16, %v480_v53  ;;  %v529_v56 = vadd.f32 %v1029_v16, %v528_v54 }
 0x11c   : > { %630 = vst [vmem:[%s1038_s4 + $0xe8] sm:$0xff] %v566_v52 }
 0x11d   : > { %v582_v57 = vmax.f32 %v481_v55, 0.0  ;;  %v598_v58 = vmax.f32 %v529_v56, 0.0 }
 0x11e   : > { %v387_v59 = vpop.f32.mrf.mxu0  ;;  %v435_v60 = vpop.f32.mrf.mxu1 }
 0x11f   : > { %646 = vst [vmem:[%s1038_s4 + $0x168] sm:$0xff] %v582_v57  ;;  %v388_v61 = vadd.f32 %v1029_v16, %v387_v59  ;;  %v436_v62 = vadd.f32 %v1029_v16, %v435_v60 }
 0x120   : > { %662 = vst [vmem:[%s1038_s4 + $0x1e8] sm:$0xff] %v598_v58 }
 0x121   : > { %v551_v63 = vmax.f32 %v388_v61, 0.0  ;;  %v567_v0 = vmax.f32 %v436_v62, 0.0 }
 0x122   : > { %v483_v1 = vpop.f32.mrf.mxu2  ;;  %v531_v2 = vpop.f32.mrf.mxu3 }
 0x123   : > { %615 = vst [vmem:[%s1038_s4 + $0x70] sm:$0xff] %v551_v63  ;;  %v484_v3 = vadd.f32 %v1029_v16, %v483_v1  ;;  %v532_v4 = vadd.f32 %v1029_v16, %v531_v2 }
 0x124   : > { %631 = vst [vmem:[%s1038_s4 + $0xf0] sm:$0xff] %v567_v0 }
 0x125   : > { %v583_v5 = vmax.f32 %v484_v3, 0.0  ;;  %v599_v6 = vmax.f32 %v532_v4, 0.0 }
 0x126   : > { %v390_v7 = vpop.f32.mrf.mxu0  ;;  %v438_v8 = vpop.f32.mrf.mxu1 }
 0x127   : > { %647 = vst [vmem:[%s1038_s4 + $0x170] sm:$0xff] %v583_v5  ;;  %v391_v9 = vadd.f32 %v1029_v16, %v390_v7  ;;  %v439_v10 = vadd.f32 %v1029_v16, %v438_v8 }
 0x128   : > { %663 = vst [vmem:[%s1038_s4 + $0x1f0] sm:$0xff] %v599_v6 }
 0x129   : > { %v552_v11 = vmax.f32 %v391_v9, 0.0  ;;  %v568_v12 = vmax.f32 %v439_v10, 0.0 }
 0x12a   : > { %v486_v13 = vpop.f32.mrf.mxu2  ;;  %v534_v14 = vpop.f32.mrf.mxu3 }
 0x12b   : > { %616 = vst [vmem:[%s1038_s4 + $0x78] sm:$0xff] %v552_v11  ;;  %v487_v15 = vadd.f32 %v1029_v16, %v486_v13  ;;  %v535_v17 = vadd.f32 %v1029_v16, %v534_v14 }
 0x12c   : > { %632 = vst [vmem:[%s1038_s4 + $0xf8] sm:$0xff] %v568_v12 }
 0x12d   : > { %v584_v18 = vmax.f32 %v487_v15, 0.0  ;;  %v600_v19 = vmax.f32 %v535_v17, 0.0 }
 0x12f   : > { %648 = vst [vmem:[%s1038_s4 + $0x178] sm:$0xff] %v584_v18 }
 0x130   : > { %664 = vst [vmem:[%s1038_s4 + $0x1f8] sm:$0xff] %v600_v19 }
 0x131 PF: > { %s13_s14 = sadd.s32 1, %s884_s14   ;;  %s1179_s12 = smov %s880_s13 }
 0x132   : > { %p10_p5 = scmp.ge.s32.totalorder %s13_s14, 5   ;;  %s1180_s13 = smov %s1182_s15 }
 0x134   :  { %12 = sbr.rel (!%p10_p5) target bundleno = 2 (0x2), region = 68 }

// kernel: rinterp_forward.26
= control target key start
LH: loop header
LB: loop body
LE: loop exit
PB: predicated region body
PF: predicated region fallthrough
CT: control target
= control target key end

     0   :  { %s625_s12 = smov 0   ;;  %s627_s13 = smov 0   ;;  %s737_s0 = inlined_call_operand.vmem [shape: f32[3,64,256], index: 0, kind: input, shape index: {}]   ;;  %s738_s1 = inlined_call_operand.vmem [shape: f32[3,256,128], index: 1, kind: input, shape index: {}]   ;;  %s739_s2 = inlined_call_operand.vmem [shape: f32[3,1,128], index: 2, kind: input, shape index: {}]   ;;  %s740_s3 = inlined_call_operand.vmem [shape: f32[3,64,128], index: 3, kind: output, shape index: {}]  }
   0x1   :  { %s629_s14 = smov 0  }
   0x2 LB: > { %s25_s15 = sadd.s32 1, %s599_s13  ;;  %p512_p0 = scmp.ge.s32.totalorder %s603_s14, 1  ;;  %s603_s14 = sphi %s629_s14, %s13_s14   ;;  %s599_s13 = sphi %s627_s13, %s742_s13   ;;  %s595_s12 = sphi %s625_s12, %s741_s12  }
   0x3   : > { %p27_p1 = scmp.ge.s32.totalorder %s25_s15, 3  ;;  %p177_p2 = scmp.lt.s32.totalorder %s603_s14, 4 }
   0x5   : > { %s744_s15 = smov (%p27_p1, %s25_s15), 0  ;;  %p178_p3 = pnand %p512_p0, %p177_p2 }
   0x6   : > { %p219_p4 = scmp.lt.s32.totalorder (!%p178_p3), %s595_s12, 2 }
   0x7   : > { %181 = sbr.rel (%p178_p3) target bundleno = 210 (0xd2), region = 32 }
   0xc   : > { %s746_s12 = smov (!%p219_p4, %s595_s12), 2 }
   0xd   : > { %s522_s16 = sshll.u32 %s746_s12, 8  ;;  %s236_s22 = scalar_lea.vmem %s739_s2, %s746_s12 }
   0xe   : > { %s649_s19 = scalar_lea.vmem %s738_s1, %s522_s16  ;;  %s521_s23 = sshll.u32 %s746_s12, 7  ;;  %v580_v48 = vld [vmem:[%s236_s22] ss:$0 sm:$0xff] }
   0xf   : > { %v278_v0 = vld [vmem:[%s649_s19 + $0x78] sm:$0xff]  ;;  %v277_v1 = vld [vmem:[%s649_s19 + $0x70] sm:$0xff]  ;;  %v276_v4 = vld [vmem:[%s649_s19 + $0x68] sm:$0xff]  ;;  %s689_s26 = scalar_lea.vmem %s737_s0, %s521_s23  ;;  %s523_s29 = sshll.u32 %s746_s12, 6 }
  0x10   : > { %v294_v2 = vld [vmem:[%s649_s19 + $0xf8] sm:$0xff]  ;;  %524 = vmatpush.msra.mxu2 %v278_v0  ;;  %v293_v3 = vld [vmem:[%s649_s19 + $0xf0] sm:$0xff]  ;;  %299 = vmatpush.msra.mxu0 %v278_v0  ;;  %v292_v5 = vld [vmem:[%s649_s19 + $0xe8] sm:$0xff]  ;;  %s718_s5 = scalar_lea.vmem %s740_s3, %s523_s29 }
  0x11   : > { %540 = vmatpush.msra.mxu3 %v294_v2  ;;  %340 = vmatpush.msra.mxu1 %v294_v2  ;;  %v275_v6 = vld [vmem:[%s649_s19 + $0x60] sm:$0xff]  ;;  %v274_v8 = vld [vmem:[%s649_s19 + $0x58] sm:$0xff]  ;;  %v273_v10 = vld [vmem:[%s649_s19 + $0x50] sm:$0xff] }
  0x12   : > { %525 = vmatpush.msra.mxu2 %v277_v1  ;;  %300 = vmatpush.msra.mxu0 %v277_v1  ;;  %v291_v7 = vld [vmem:[%s649_s19 + $0xe0] sm:$0xff]  ;;  %v290_v9 = vld [vmem:[%s649_s19 + $0xd8] sm:$0xff]  ;;  %v289_v11 = vld [vmem:[%s649_s19 + $0xd0] sm:$0xff] }
  0x13   : > { %541 = vmatpush.msra.mxu3 %v293_v3  ;;  %341 = vmatpush.msra.mxu1 %v293_v3  ;;  %v272_v12 = vld [vmem:[%s649_s19 + $0x48] sm:$0xff]  ;;  %v271_v14 = vld [vmem:[%s649_s19 + $0x40] sm:$0xff]  ;;  %v270_v16 = vld [vmem:[%s649_s19 + $0x38] sm:$0xff] }
  0x14   : > { %526 = vmatpush.msra.mxu2 %v276_v4  ;;  %301 = vmatpush.msra.mxu0 %v276_v4  ;;  %v288_v13 = vld [vmem:[%s649_s19 + $0xc8] sm:$0xff]  ;;  %v287_v15 = vld [vmem:[%s649_s19 + $0xc0] sm:$0xff]  ;;  %v286_v17 = vld [vmem:[%s649_s19 + $0xb8] sm:$0xff] }
  0x15   : > { %542 = vmatpush.msra.mxu3 %v292_v5  ;;  %342 = vmatpush.msra.mxu1 %v292_v5  ;;  %v269_v18 = vld [vmem:[%s649_s19 + $0x30] sm:$0xff]  ;;  %v268_v20 = vld [vmem:[%s649_s19 + $0x28] sm:$0xff]  ;;  %v267_v22 = vld [vmem:[%s649_s19 + $0x20] sm:$0xff] }
  0x16   : > { %527 = vmatpush.msra.mxu2 %v275_v6  ;;  %302 = vmatpush.msra.mxu0 %v275_v6  ;;  %v285_v19 = vld [vmem:[%s649_s19 + $0xb0] sm:$0xff]  ;;  %v284_v21 = vld [vmem:[%s649_s19 + $0xa8] sm:$0xff]  ;;  %v283_v23 = vld [vmem:[%s649_s19 + $0xa0] sm:$0xff] }
  0x17   : > { %543 = vmatpush.msra.mxu3 %v291_v7  ;;  %343 = vmatpush.msra.mxu1 %v291_v7  ;;  %v266_v24 = vld [vmem:[%s649_s19 + $0x18] sm:$0xff]  ;;  %v265_v26 = vld [vmem:[%s649_s19 + $0x10] sm:$0xff]  ;;  %v264_v28 = vld [vmem:[%s649_s19 + $0x8] sm:$0xff] }
  0x18   : > { %528 = vmatpush.msra.mxu2 %v274_v8  ;;  %303 = vmatpush.msra.mxu0 %v274_v8  ;;  %v282_v25 = vld [vmem:[%s649_s19 + $0x98] sm:$0xff]  ;;  %v281_v27 = vld [vmem:[%s649_s19 + $0x90] sm:$0xff]  ;;  %v280_v29 = vld [vmem:[%s649_s19 + $0x88] sm:$0xff] }
  0x19   : > { %544 = vmatpush.msra.mxu3 %v290_v9  ;;  %344 = vmatpush.msra.mxu1 %v290_v9  ;;  %v263_v30 = vld [vmem:[%s649_s19] sm:$0xff]  ;;  %v256_v33 = vld [vmem:[%s689_s26 + $0x48] sm:$0xff]  ;;  %v257_v36 = vld [vmem:[%s689_s26 + $0x50] sm:$0xff] }
  0x1a   : > { %529 = vmatpush.msra.mxu2 %v273_v10  ;;  %304 = vmatpush.msra.mxu0 %v273_v10  ;;  %v279_v31 = vld [vmem:[%s649_s19 + $0x80] sm:$0xff]  ;;  %v248_v35 = vld [vmem:[%s689_s26 + $0x8] sm:$0xff]  ;;  %v258_v37 = vld [vmem:[%s689_s26 + $0x58] sm:$0xff] }
  0x1b   : > { %545 = vmatpush.msra.mxu3 %v289_v11  ;;  %345 = vmatpush.msra.mxu1 %v289_v11  ;;  %v255_v32 = vld [vmem:[%s689_s26 + $0x40] sm:$0xff]  ;;  %v249_v38 = vld [vmem:[%s689_s26 + $0x10] sm:$0xff]  ;;  %v250_v39 = vld [vmem:[%s689_s26 + $0x18] sm:$0xff] }
  0x1c   : > { %530 = vmatpush.msra.mxu2 %v272_v12  ;;  %305 = vmatpush.msra.mxu0 %v272_v12  ;;  %v247_v34 = vld [vmem:[%s689_s26] sm:$0xff]  ;;  %v260_v41 = vld [vmem:[%s689_s26 + $0x68] sm:$0xff]  ;;  %v261_v44 = vld [vmem:[%s689_s26 + $0x70] sm:$0xff] }
  0x1d   : > { %546 = vmatpush.msra.mxu3 %v288_v13  ;;  %346 = vmatpush.msra.mxu1 %v288_v13  ;;  %v259_v40 = vld [vmem:[%s689_s26 + $0x60] sm:$0xff]  ;;  %v252_v43 = vld [vmem:[%s689_s26 + $0x28] sm:$0xff]  ;;  %v262_v45 = vld [vmem:[%s689_s26 + $0x78] sm:$0xff] }
  0x1e   : > { %531 = vmatpush.msra.mxu2 %v271_v14  ;;  %306 = vmatpush.msra.mxu0 %v271_v14  ;;  %v251_v42 = vld [vmem:[%s689_s26 + $0x20] sm:$0xff]  ;;  %v253_v46 = vld [vmem:[%s689_s26 + $0x30] sm:$0xff]  ;;  %v254_v47 = vld [vmem:[%s689_s26 + $0x38] sm:$0xff] }
  0x1f   : > { %547 = vmatpush.msra.mxu3 %v287_v15  ;;  %347 = vmatpush.msra.mxu1 %v287_v15 }
  0x20   : > { %532 = vmatpush.msra.mxu2 %v270_v16  ;;  %307 = vmatpush.msra.mxu0 %v270_v16 }
  0x21   : > { %548 = vmatpush.msra.mxu3 %v286_v17  ;;  %348 = vmatpush.msra.mxu1 %v286_v17 }
  0x22   : > { %533 = vmatpush.msra.mxu2 %v269_v18  ;;  %308 = vmatpush.msra.mxu0 %v269_v18 }
  0x23   : > { %549 = vmatpush.msra.mxu3 %v285_v19  ;;  %349 = vmatpush.msra.mxu1 %v285_v19 }
  0x24   : > { %534 = vmatpush.msra.mxu2 %v268_v20  ;;  %309 = vmatpush.msra.mxu0 %v268_v20 }
  0x25   : > { %550 = vmatpush.msra.mxu3 %v284_v21  ;;  %350 = vmatpush.msra.mxu1 %v284_v21 }
  0x26   : > { %535 = vmatpush.msra.mxu2 %v267_v22  ;;  %310 = vmatpush.msra.mxu0 %v267_v22 }
  0x27   : > { %551 = vmatpush.msra.mxu3 %v283_v23  ;;  %351 = vmatpush.msra.mxu1 %v283_v23 }
  0x28   : > { %536 = vmatpush.msra.mxu2 %v266_v24  ;;  %311 = vmatpush.msra.mxu0 %v266_v24 }
  0x29   : > { %552 = vmatpush.msra.mxu3 %v282_v25  ;;  %352 = vmatpush.msra.mxu1 %v282_v25 }
  0x2a   : > { %537 = vmatpush.msra.mxu2 %v265_v26  ;;  %312 = vmatpush.msra.mxu0 %v265_v26 }
  0x2b   : > { %553 = vmatpush.msra.mxu3 %v281_v27  ;;  %353 = vmatpush.msra.mxu1 %v281_v27 }
  0x2c   : > { %538 = vmatpush.msra.mxu2 %v264_v28  ;;  %313 = vmatpush.msra.mxu0 %v264_v28 }
  0x2d   : > { %554 = vmatpush.msra.mxu3 %v280_v29  ;;  %354 = vmatpush.msra.mxu1 %v280_v29 }
  0x2e   : > { %539 = vmatpush.msra.mxu2 %v263_v30  ;;  %314 = vmatpush.msra.mxu0 %v263_v30 }
  0x2f   : > { %555 = vmatpush.msra.mxu3 %v279_v31  ;;  %327 = vmatmul.f32.vlgmr.msra.gmra.mxu2 %v255_v32 }
  0x30   : > { %368 = vmatmul.f32.vlgmr.msra.gmra.mxu3 %v256_v33  ;;  %355 = vmatpush.msra.mxu1 %v279_v31 }
  0x31   : > { %315 = vmatmul.f32.vlgmr.msra.gmra.mxu0 %v247_v34  ;;  %356 = vmatmul.f32.vlgmr.msra.gmra.mxu1 %v248_v35 }
  0x37   : > { %330 = vmatmul.f32.gmra.mxu2 %v257_v36 }
  0x38   : > { %371 = vmatmul.f32.gmra.mxu3 %v258_v37 }
  0x39   : > { %318 = vmatmul.f32.gmra.mxu0 %v249_v38  ;;  %359 = vmatmul.f32.gmra.mxu1 %v250_v39 }
  0x3f   : > { %333 = vmatmul.f32.gmra.mxu2 %v259_v40 }
  0x40   : > { %374 = vmatmul.f32.gmra.mxu3 %v260_v41 }
  0x41   : > { %321 = vmatmul.f32.gmra.mxu0 %v251_v42  ;;  %362 = vmatmul.f32.gmra.mxu1 %v252_v43 }
  0x47   : > { %336 = vmatmul.f32.gmra.mxu2 %v261_v44 }
  0x48   : > { %377 = vmatmul.f32.gmra.mxu3 %v262_v45 }
  0x49   : > { %324 = vmatmul.f32.gmra.mxu0 %v253_v46  ;;  %365 = vmatmul.f32.gmra.mxu1 %v254_v47 }
  0xae   : > { %v316_v49 = vpop.f32.mrf.mxu0  ;;  %v357_v50 = vpop.f32.mrf.mxu1 }
  0xaf   : > { %v317_v51 = vadd.f32 %v580_v48, %v316_v49 }
  0xb1   : > { %v358_v52 = vadd.f32 %v357_v50, %v317_v51 }
  0xb2   : > { %v328_v53 = vpop.f32.mrf.mxu2 }
  0xb3   : > { %v369_v54 = vpop.f32.mrf.mxu3  ;;  %v329_v55 = vadd.f32 %v580_v48, %v328_v53  ;;  %v381_v56 = vmax.f32 %v358_v52, 0.0 }
  0xb5   : > { %389 = vst [vmem:[%s718_s5] sm:$0xff] %v381_v56  ;;  %v370_v57 = vadd.f32 %v369_v54, %v329_v55 }
  0xb6   : > { %v319_v58 = vpop.f32.mrf.mxu0  ;;  %v360_v59 = vpop.f32.mrf.mxu1 }
  0xb7   : > { %v385_v60 = vmax.f32 %v370_v57, 0.0  ;;  %v320_v61 = vadd.f32 %v580_v48, %v319_v58 }
  0xb9   : > { %393 = vst [vmem:[%s718_s5 + $0x20] sm:$0xff] %v385_v60  ;;  %v361_v62 = vadd.f32 %v360_v59, %v320_v61 }
  0xba   : > { %v331_v63 = vpop.f32.mrf.mxu2 }
  0xbb   : > { %v372_v0 = vpop.f32.mrf.mxu3  ;;  %v332_v1 = vadd.f32 %v580_v48, %v331_v63  ;;  %v382_v2 = vmax.f32 %v361_v62, 0.0 }
  0xbd   : > { %390 = vst [vmem:[%s718_s5 + $0x8] sm:$0xff] %v382_v2  ;;  %v373_v3 = vadd.f32 %v372_v0, %v332_v1 }
  0xbe   : > { %v322_v4 = vpop.f32.mrf.mxu0  ;;  %v363_v5 = vpop.f32.mrf.mxu1 }
  0xbf   : > { %v386_v6 = vmax.f32 %v373_v3, 0.0  ;;  %v323_v7 = vadd.f32 %v580_v48, %v322_v4 }
  0xc1   : > { %394 = vst [vmem:[%s718_s5 + $0x28] sm:$0xff] %v386_v6  ;;  %v364_v8 = vadd.f32 %v363_v5, %v323_v7 }
  0xc2   : > { %v334_v9 = vpop.f32.mrf.mxu2 }
  0xc3   : > { %v375_v10 = vpop.f32.mrf.mxu3  ;;  %v335_v11 = vadd.f32 %v580_v48, %v334_v9  ;;  %v383_v12 = vmax.f32 %v364_v8, 0.0 }
  0xc5   : > { %391 = vst [vmem:[%s718_s5 + $0x10] sm:$0xff] %v383_v12  ;;  %v376_v13 = vadd.f32 %v375_v10, %v335_v11 }
  0xc6   : > { %v325_v14 = vpop.f32.mrf.mxu0  ;;  %v366_v15 = vpop.f32.mrf.mxu1 }
  0xc7   : > { %v387_v16 = vmax.f32 %v376_v13, 0.0  ;;  %v326_v17 = vadd.f32 %v580_v48, %v325_v14 }
  0xc9   : > { %395 = vst [vmem:[%s718_s5 + $0x30] sm:$0xff] %v387_v16  ;;  %v367_v18 = vadd.f32 %v366_v15, %v326_v17 }
  0xca   : > { %v337_v19 = vpop.f32.mrf.mxu2 }
  0xcb   : > { %v378_v20 = vpop.f32.mrf.mxu3  ;;  %v338_v21 = vadd.f32 %v580_v48, %v337_v19  ;;  %v384_v22 = vmax.f32 %v367_v18, 0.0 }
  0xcd   : > { %392 = vst [vmem:[%s718_s5 + $0x18] sm:$0xff] %v384_v22  ;;  %v379_v23 = vadd.f32 %v378_v20, %v338_v21 }
  0xcf   : > { %v388_v24 = vmax.f32 %v379_v23, 0.0 }
  0xd1   : > { %396 = vst [vmem:[%s718_s5 + $0x38] sm:$0xff] %v388_v24 }
  0xd2 PF: > { %s13_s14 = sadd.s32 1, %s603_s14   ;;  %s741_s12 = smov %s599_s13 }
  0xd3   : > { %p10_p5 = scmp.ge.s32.totalorder %s13_s14, 5   ;;  %s742_s13 = smov %s744_s15 }
  0xd5   :  { %12 = sbr.rel (!%p10_p5) target bundleno = 2 (0x2), region = 68 }

// kernel: rinterp_forward.27
= control target key start
LH: loop header
LB: loop body
LE: loop exit
PB: predicated region body
PF: predicated region fallthrough
CT: control target
= control target key end

     0   :  { %8 = vsyncpa [#allocation3], 0  ;;  %s961_s0 = inlined_call_operand.vmem [shape: f32[3,8,512], index: 0, kind: input, shape index: {}]   ;;  %s962_s1 = inlined_call_operand.hbm [shape: f32[3,512,128], index: 1, kind: input, shape index: {}]   ;;  %s963_s2 = inlined_call_operand.hbm [shape: f32[3,1,128], index: 2, kind: input, shape index: {}]   ;;  %s964_s3 = inlined_call_operand.vmem [shape: f32[3,8,128], index: 3, kind: output, shape index: {}]  }
   0x1   :  { %10 = vsyncpa [#allocation3 + $0x1], 0 }
   0x2   :  { %11 = vsyncpa [#allocation5], 0 }
   0x3   :  { %13 = vsyncpa [#allocation5 + $0x1], 0  ;;  %s774_s12 = smov 0   ;;  %s776_s13 = smov 0  }
   0x4   :  { %s778_s14 = smov 0   ;;  %s780_s15 = smov 0  }
   0x5   :  { %s782_s16 = smov 0   ;;  %s784_s17 = smov 0  }
   0x6 LB: > { %s557_s18 = sadd.s32 4294967295, %s750_s17   ;;  %s31_s19 = sadd.s32 1, %s746_s16  ;;  %s750_s17 = sphi %s784_s17, %s19_s17   ;;  %s746_s16 = sphi %s782_s16, %s972_s16   ;;  %s742_s15 = sphi %s780_s15, %s971_s15   ;;  %s738_s14 = sphi %s778_s14, %s970_s14   ;;  %s734_s13 = sphi %s776_s13, %s969_s13   ;;  %s730_s12 = sphi %s774_s12, %s968_s12  }
   0x7   : > { %p33_p0 = scmp.ge.s32.totalorder %s31_s19, 3  ;;  %s66_s20 = sadd.s32 1, %s738_s14 }
   0x8   : > { %p73_p1 = scmp.ne.s32.totalorder %s738_s14, %s734_s13  ;;  %p74_p2 = scmp.eq.s32.totalorder %s750_s17, 0 }
   0x9   : > { %s974_s19 = smov (%p33_p0, %s31_s19), 0  ;;  %p79_p4 = scmp.ne.s32.totalorder %s734_s13, %s730_s12 }
   0xa   : > { %p810_p3 = por %p74_p2, %p73_p1  ;;  %s63_s22 = ssub.s32 %s746_s16, %s974_s19 }
   0xb   : > { %p80_p5 = scmp.eq.s32.totalorder %s557_s18, 0  ;;  %p64_p6 = scmp.eq.s32.totalorder %s63_s22, 0 }
   0xc   : > { %p584_p8 = scmp.lt.s32.totalorder %s750_s17, 3  ;;  %s169_s25 = sand.u32 1, %s738_s14  }
   0xd   : > { %p817_p7 = por %p80_p5, %p79_p4  ;;  %s571_s26 = sshll.u32 %s746_s16, 9 }
   0xe   : > { %s823_s24 = scalar_select %p64_p6, %s738_s14, %s66_s20  }
   0xf   : > { %s561_s27 = sshll.u32 %s169_s25, 9  ;;  %s178_s30 = scalar_lea.hbm %s962_s1, %s571_s26 }
  0x10   : > { %s179_s4 = sshll.u32 %s178_s30, 4  ;;  %s173_s5 = scalar_lea.vmem [#allocation2], %s561_s27  ;;  %s180_s4 = int_to_ptr.hbm [resolvable:$true] %s179_s4 }
  0x11   : > { %s181_s6 = sshll.u32 %s173_s5, 4  ;;  %p832_p9 = pnand %p584_p8, %p810_p3  ;;  %s182_s6 = int_to_ptr.vmem [resolvable:$true] %s181_s6 }
  0x12   : > { %p564_p10 = scmp.ge.s32.totalorder %s750_s17, 1  ;;  %p206_p11 = scmp.lt.s32.totalorder %s750_s17, 4 }
  0x13   : > { %s170_s8 = scalar_lea.sflag [#allocation3], %s169_s25  ;;  %s752_s9 = smov 128  }
  0x14   : > { %s753_s10 = smov 8   ;;  %p207_p12 = pnand %p564_p10, %p206_p11 }
  0x15   : > { %580 = dma.hbm_to_vmem [thread:$0]  (!%p832_p9), %s180_s4, 8192, %s182_s6, %s170_s8, %s752_s9, %s752_s9, %s753_s10  }
  0x16   : > { %s197_s18 = scalar_lea.hbm %s963_s2, %s746_s16  ;;  %s194_s21 = scalar_lea.vmem [#allocation4], %s169_s25 }
  0x17   : > { %s199_s20 = sshll.u32 %s197_s18, 4  ;;  %s201_s22 = sshll.u32 %s194_s21, 4  ;;  %s200_s20 = int_to_ptr.hbm [resolvable:$true] %s199_s20  ;;  %s202_s22 = int_to_ptr.vmem [resolvable:$true] %s201_s22 }
  0x18   : > { %s192_s26 = scalar_lea.sflag [#allocation5], %s169_s25  ;;  %210 = sbr.rel (%p207_p12) target bundleno = 204 (0xcc), region = 32 }
  0x19   : > { %583 = dma.hbm_to_vmem [thread:$0]  (!%p832_p9), %s200_s20, 16, %s202_s22, %s192_s26  }
  0x1a   : > { %s847_s27 = sand.u32 (!%p207_p12), 1, %s734_s13  }
  0x1b   : > { %s565_s28 = sshll.u32 (!%p207_p12), %s847_s27, 9  ;;  %s213_s29 = scalar_lea.sflag (!%p207_p12), [#allocation3], %s847_s27 }
  0x1c   : > { %s851_s30 = scalar_lea.vmem (!%p207_p12), [#allocation2], %s565_s28 }
  0x1d   : > { %721 = dma.done.wait (%p817_p7), %s213_s29, 8192  }
  0x1e   : > { %723 = vsyncadd (%p817_p7), %s213_s29, 4294959104  ;;  %s223_s25 = scalar_lea.sflag [#allocation5], %s847_s27  ;;  %s225_s4 = scalar_lea.vmem [#allocation4], %s847_s27 }
  0x1f   : > { %725 = dma.done.wait (%p817_p7), %s223_s25, 16  }
  0x20   : > { %727 = vsyncadd (%p817_p7), %s223_s25, 4294967280  ;;  %v331_v0 = vld [vmem:[%s851_s30 + $0x178] sm:$0xff]  ;;  %v330_v2 = vld [vmem:[%s851_s30 + $0x170] sm:$0xff]  ;;  %p264_p13 = scmp.lt.s32.totalorder %s742_s15, 2 }
  0x21   : > { %v299_v1 = vld [vmem:[%s851_s30 + $0x78] sm:$0xff]  ;;  %392 = vmatpush.msra.mxu2 %v331_v0  ;;  %v298_v4 = vld [vmem:[%s851_s30 + $0x70] sm:$0xff]  ;;  %v329_v6 = vld [vmem:[%s851_s30 + $0x168] sm:$0xff] }
  0x22   : > { %352 = vmatpush.msra.mxu0 %v299_v1  ;;  %v347_v3 = vld [vmem:[%s851_s30 + $0x1f8] sm:$0xff]  ;;  %v346_v7 = vld [vmem:[%s851_s30 + $0x1f0] sm:$0xff]  ;;  %v297_v8 = vld [vmem:[%s851_s30 + $0x68] sm:$0xff]  ;;  %s976_s15 = smov (!%p264_p13, %s742_s15), 2 }
  0x23   : > { %v315_v5 = vld [vmem:[%s851_s30 + $0xf8] sm:$0xff]  ;;  %412 = vmatpush.msra.mxu3 %v347_v3  ;;  %393 = vmatpush.msra.mxu2 %v330_v2  ;;  %v314_v9 = vld [vmem:[%s851_s30 + $0xf0] sm:$0xff]  ;;  %v345_v10 = vld [vmem:[%s851_s30 + $0x1e8] sm:$0xff]  ;;  %s572_s23 = sshll.u32 %s976_s15, 5  ;;  %s568_s8 = sshll.u32 %s976_s15, 3 }
  0x24   : > { %372 = vmatpush.msra.mxu1 %v315_v5  ;;  %353 = vmatpush.msra.mxu0 %v298_v4  ;;  %v328_v11 = vld [vmem:[%s851_s30 + $0x160] sm:$0xff]  ;;  %v313_v13 = vld [vmem:[%s851_s30 + $0xe8] sm:$0xff]  ;;  %v327_v16 = vld [vmem:[%s851_s30 + $0x158] sm:$0xff]  ;;  %s272_s7 = scalar_lea.vmem %s961_s0, %s572_s23  ;;  %s279_s11 = scalar_lea.vmem %s964_s3, %s568_s8 }
  0x25   : > { %413 = vmatpush.msra.mxu3 %v346_v7  ;;  %v296_v12 = vld [vmem:[%s851_s30 + $0x60] sm:$0xff]  ;;  %394 = vmatpush.msra.mxu2 %v329_v6  ;;  %v295_v17 = vld [vmem:[%s851_s30 + $0x58] sm:$0xff]  ;;  %v326_v20 = vld [vmem:[%s851_s30 + $0x150] sm:$0xff] }
  0x26   : > { %373 = vmatpush.msra.mxu1 %v314_v9  ;;  %354 = vmatpush.msra.mxu0 %v297_v8  ;;  %v344_v14 = vld [vmem:[%s851_s30 + $0x1e0] sm:$0xff]  ;;  %v343_v18 = vld [vmem:[%s851_s30 + $0x1d8] sm:$0xff]  ;;  %v294_v21 = vld [vmem:[%s851_s30 + $0x50] sm:$0xff] }
  0x27   : > { %v312_v15 = vld [vmem:[%s851_s30 + $0xe0] sm:$0xff]  ;;  %414 = vmatpush.msra.mxu3 %v345_v10  ;;  %395 = vmatpush.msra.mxu2 %v328_v11  ;;  %v311_v19 = vld [vmem:[%s851_s30 + $0xd8] sm:$0xff]  ;;  %v342_v22 = vld [vmem:[%s851_s30 + $0x1d0] sm:$0xff] }
  0x28   : > { %374 = vmatpush.msra.mxu1 %v313_v13  ;;  %355 = vmatpush.msra.mxu0 %v296_v12  ;;  %v310_v23 = vld [vmem:[%s851_s30 + $0xd0] sm:$0xff]  ;;  %v325_v24 = vld [vmem:[%s851_s30 + $0x148] sm:$0xff]  ;;  %v324_v28 = vld [vmem:[%s851_s30 + $0x140] sm:$0xff] }
  0x29   : > { %415 = vmatpush.msra.mxu3 %v344_v14  ;;  %396 = vmatpush.msra.mxu2 %v327_v16  ;;  %v293_v25 = vld [vmem:[%s851_s30 + $0x48] sm:$0xff]  ;;  %v292_v29 = vld [vmem:[%s851_s30 + $0x40] sm:$0xff]  ;;  %v323_v32 = vld [vmem:[%s851_s30 + $0x138] sm:$0xff] }
  0x2a   : > { %375 = vmatpush.msra.mxu1 %v312_v15  ;;  %356 = vmatpush.msra.mxu0 %v295_v17  ;;  %v341_v26 = vld [vmem:[%s851_s30 + $0x1c8] sm:$0xff]  ;;  %v340_v30 = vld [vmem:[%s851_s30 + $0x1c0] sm:$0xff]  ;;  %v291_v33 = vld [vmem:[%s851_s30 + $0x38] sm:$0xff] }
  0x2b   : > { %416 = vmatpush.msra.mxu3 %v343_v18  ;;  %397 = vmatpush.msra.mxu2 %v326_v20  ;;  %v309_v27 = vld [vmem:[%s851_s30 + $0xc8] sm:$0xff]  ;;  %v308_v31 = vld [vmem:[%s851_s30 + $0xc0] sm:$0xff]  ;;  %v339_v34 = vld [vmem:[%s851_s30 + $0x1b8] sm:$0xff] }
  0x2c   : > { %376 = vmatpush.msra.mxu1 %v311_v19  ;;  %357 = vmatpush.msra.mxu0 %v294_v21  ;;  %v307_v35 = vld [vmem:[%s851_s30 + $0xb8] sm:$0xff]  ;;  %v322_v36 = vld [vmem:[%s851_s30 + $0x130] sm:$0xff]  ;;  %v321_v40 = vld [vmem:[%s851_s30 + $0x128] sm:$0xff] }
  0x2d   : > { %417 = vmatpush.msra.mxu3 %v342_v22  ;;  %398 = vmatpush.msra.mxu2 %v325_v24  ;;  %v290_v37 = vld [vmem:[%s851_s30 + $0x30] sm:$0xff]  ;;  %v289_v41 = vld [vmem:[%s851_s30 + $0x28] sm:$0xff]  ;;  %v320_v44 = vld [vmem:[%s851_s30 + $0x120] sm:$0xff] }
  0x2e   : > { %377 = vmatpush.msra.mxu1 %v310_v23  ;;  %358 = vmatpush.msra.mxu0 %v293_v25  ;;  %v338_v38 = vld [vmem:[%s851_s30 + $0x1b0] sm:$0xff]  ;;  %v337_v42 = vld [vmem:[%s851_s30 + $0x1a8] sm:$0xff]  ;;  %v288_v45 = vld [vmem:[%s851_s30 + $0x20] sm:$0xff] }
  0x2f   : > { %418 = vmatpush.msra.mxu3 %v341_v26  ;;  %399 = vmatpush.msra.mxu2 %v324_v28  ;;  %v306_v39 = vld [vmem:[%s851_s30 + $0xb0] sm:$0xff]  ;;  %v305_v43 = vld [vmem:[%s851_s30 + $0xa8] sm:$0xff]  ;;  %v336_v46 = vld [vmem:[%s851_s30 + $0x1a0] sm:$0xff] }
  0x30   : > { %378 = vmatpush.msra.mxu1 %v309_v27  ;;  %359 = vmatpush.msra.mxu0 %v292_v29  ;;  %v304_v47 = vld [vmem:[%s851_s30 + $0xa0] sm:$0xff]  ;;  %v319_v48 = vld [vmem:[%s851_s30 + $0x118] sm:$0xff]  ;;  %v318_v52 = vld [vmem:[%s851_s30 + $0x110] sm:$0xff] }
  0x31   : > { %419 = vmatpush.msra.mxu3 %v340_v30  ;;  %400 = vmatpush.msra.mxu2 %v323_v32  ;;  %v287_v49 = vld [vmem:[%s851_s30 + $0x18] sm:$0xff]  ;;  %v286_v53 = vld [vmem:[%s851_s30 + $0x10] sm:$0xff]  ;;  %v317_v56 = vld [vmem:[%s851_s30 + $0x108] sm:$0xff] }
  0x32   : > { %379 = vmatpush.msra.mxu1 %v308_v31  ;;  %360 = vmatpush.msra.mxu0 %v291_v33  ;;  %v335_v50 = vld [vmem:[%s851_s30 + $0x198] sm:$0xff]  ;;  %v334_v54 = vld [vmem:[%s851_s30 + $0x190] sm:$0xff]  ;;  %v285_v57 = vld [vmem:[%s851_s30 + $0x8] sm:$0xff] }
  0x33   : > { %420 = vmatpush.msra.mxu3 %v339_v34  ;;  %401 = vmatpush.msra.mxu2 %v322_v36  ;;  %v303_v51 = vld [vmem:[%s851_s30 + $0x98] sm:$0xff]  ;;  %v302_v55 = vld [vmem:[%s851_s30 + $0x90] sm:$0xff]  ;;  %v333_v58 = vld [vmem:[%s851_s30 + $0x188] sm:$0xff] }
  0x34   : > { %380 = vmatpush.msra.mxu1 %v307_v35  ;;  %361 = vmatpush.msra.mxu0 %v290_v37  ;;  %v301_v59 = vld [vmem:[%s851_s30 + $0x88] sm:$0xff]  ;;  %v316_v60 = vld [vmem:[%s851_s30 + $0x100] sm:$0xff]  ;;  %v282_v62 = vld [vmem:[%s272_s7 + $0x10] sm:$0xff] }
  0x35   : > { %421 = vmatpush.msra.mxu3 %v338_v38  ;;  %402 = vmatpush.msra.mxu2 %v321_v40  ;;  %v284_v61 = vld [vmem:[%s851_s30] sm:$0xff]  ;;  %v283_v1 = vld [vmem:[%s272_s7 + $0x18] sm:$0xff]  ;;  %v281_v3 = vld [vmem:[%s272_s7 + $0x8] sm:$0xff] }
  0x36   : > { %381 = vmatpush.msra.mxu1 %v306_v39  ;;  %362 = vmatpush.msra.mxu0 %v289_v41  ;;  %v332_v63 = vld [vmem:[%s851_s30 + $0x180] sm:$0xff] }
  0x37   : > { %422 = vmatpush.msra.mxu3 %v337_v42  ;;  %403 = vmatpush.msra.mxu2 %v320_v44  ;;  %v280_v0 = vld [vmem:[%s272_s7] sm:$0xff] }
  0x38   : > { %382 = vmatpush.msra.mxu1 %v305_v43  ;;  %363 = vmatpush.msra.mxu0 %v288_v45  ;;  %v300_v2 = vld [vmem:[%s851_s30 + $0x80] sm:$0xff] }
  0x39   : > { %423 = vmatpush.msra.mxu3 %v336_v46  ;;  %404 = vmatpush.msra.mxu2 %v319_v48  ;;  %v635_v4 = vld [vmem:[%s225_s4] ss:$0 sm:$0xff] }
  0x3a   : > { %383 = vmatpush.msra.mxu1 %v304_v47  ;;  %364 = vmatpush.msra.mxu0 %v287_v49 }
  0x3b   : > { %424 = vmatpush.msra.mxu3 %v335_v50  ;;  %405 = vmatpush.msra.mxu2 %v318_v52 }
  0x3c   : > { %384 = vmatpush.msra.mxu1 %v303_v51  ;;  %365 = vmatpush.msra.mxu0 %v286_v53 }
  0x3d   : > { %425 = vmatpush.msra.mxu3 %v334_v54  ;;  %406 = vmatpush.msra.mxu2 %v317_v56 }
  0x3e   : > { %385 = vmatpush.msra.mxu1 %v302_v55  ;;  %366 = vmatpush.msra.mxu0 %v285_v57 }
  0x3f   : > { %426 = vmatpush.msra.mxu3 %v333_v58  ;;  %407 = vmatpush.msra.mxu2 %v316_v60 }
  0x40   : > { %386 = vmatpush.msra.mxu1 %v301_v59  ;;  %367 = vmatpush.msra.mxu0 %v284_v61 }
  0x41   : > { %408 = vmatmul.f32.vlgmr.msra.gmra.mxu2 %v282_v62  ;;  %427 = vmatpush.msra.mxu3 %v332_v63 }
  0x42   : > { %368 = vmatmul.f32.vlgmr.msra.gmra.mxu0 %v280_v0  ;;  %428 = vmatmul.f32.vlgmr.msra.gmra.mxu3 %v283_v1 }
  0x43   : > { %387 = vmatpush.msra.mxu1 %v300_v2 }
  0x44   : > { %388 = vmatmul.f32.vlgmr.msra.gmra.mxu1 %v281_v3 }
  0xbf   : > { %v369_v5 = vpop.f32.mrf.mxu0 }
  0xc0   : > { %v370_v6 = vadd.f32 %v635_v4, %v369_v5 }
  0xc1   : > { %v389_v7 = vpop.f32.mrf.mxu1 }
  0xc2   : > { %v390_v8 = vadd.f32 %v389_v7, %v370_v6 }
  0xc4   : > { %v409_v9 = vpop.f32.mrf.mxu2 }
  0xc5   : > { %v410_v10 = vadd.f32 %v409_v9, %v390_v8  ;;  %v429_v11 = vpop.f32.mrf.mxu3 }
  0xc7   : > { %v430_v12 = vadd.f32 %v429_v11, %v410_v10 }
  0xc9   : > { %v432_v13 = vmax.f32 %v430_v12, 0.0 }
  0xcb   : > { %433 = vst [vmem:[%s279_s11] sm:$0xff] %v432_v13 }
  0xcc PF: > { %s19_s17 = sadd.s32 1, %s750_s17   ;;  %s968_s12 = smov %s734_s13 }
  0xcd   : > { %p16_p0 = scmp.ge.s32.totalorder %s19_s17, 5   ;;  %s969_s13 = smov %s738_s14 }
  0xce   : > { %s970_s14 = smov %s823_s24  ;;  %s971_s15 = smov %s746_s16 }
  0xcf   : > { %s972_s16 = smov %s974_s19  ;;  %18 = sbr.rel (!%p16_p0) target bundleno = 6 (0x6), region = 88 }
  0xd4   :  { %459 = vsyncpa [#allocation3], 1 }
  0xd5   :  { %461 = vsyncpa [#allocation3 + $0x1], 1 }
  0xd6   :  { %462 = vsyncpa [#allocation5], 1 }
  0xd7   :  { %464 = vsyncpa [#allocation5 + $0x1], 1 }

// kernel: rinterp_forward.28
= control target key start
LH: loop header
LB: loop body
LE: loop exit
PB: predicated region body
PF: predicated region fallthrough
CT: control target
= control target key end

     0   :  { %8 = vsyncpa [#allocation3], 0  ;;  %s1075_s0 = inlined_call_operand.vmem [shape: f32[3,1,1024], index: 0, kind: input, shape index: {}]   ;;  %s1076_s1 = inlined_call_operand.vmem [shape: f32[3,1024,128], index: 1, kind: input, shape index: {}]   ;;  %s1077_s2 = inlined_call_operand.hbm [shape: f32[3,1,128], index: 2, kind: input, shape index: {}]   ;;  %s1078_s3 = inlined_call_operand.vmem [shape: f32[3,1,128], index: 3, kind: output, shape index: {}]  }
   0x1   :  { %10 = vsyncpa [#allocation3 + $0x1], 0  ;;  %s833_s12 = smov 0   ;;  %s835_s13 = smov 0  }
   0x2   :  { %s837_s14 = smov 0   ;;  %s839_s15 = smov 0  }
   0x3   :  { %s841_s16 = smov 0   ;;  %s843_s17 = smov 0  }
   0x4 LB: > { %s665_s18 = sadd.s32 4294967295, %s811_s17   ;;  %s28_s19 = sadd.s32 1, %s807_s16  ;;  %s811_s17 = sphi %s843_s17, %s16_s17   ;;  %s807_s16 = sphi %s841_s16, %s1085_s16   ;;  %s803_s15 = sphi %s839_s15, %s1084_s15   ;;  %s799_s14 = sphi %s837_s14, %s1083_s14   ;;  %s795_s13 = sphi %s835_s13, %s1082_s13   ;;  %s791_s12 = sphi %s833_s12, %s1081_s12  }
   0x5   : > { %p30_p0 = scmp.ge.s32.totalorder %s28_s19, 3  ;;  %s89_s20 = sadd.s32 1, %s799_s14 }
   0x6   : > { %p96_p1 = scmp.ne.s32.totalorder %s799_s14, %s795_s13  ;;  %p97_p2 = scmp.eq.s32.totalorder %s811_s17, 0 }
   0x7   : > { %s1087_s19 = smov (%p30_p0, %s28_s19), 0  ;;  %p102_p4 = scmp.ne.s32.totalorder %s795_s13, %s791_s12 }
   0x8   : > { %p869_p3 = por %p97_p2, %p96_p1  ;;  %s86_s22 = ssub.s32 %s807_s16, %s1087_s19 }
   0x9   : > { %p103_p5 = scmp.eq.s32.totalorder %s665_s18, 0  ;;  %p87_p6 = scmp.eq.s32.totalorder %s86_s22, 0 }
   0xa   : > { %p682_p8 = scmp.lt.s32.totalorder %s811_s17, 3  ;;  %s173_s25 = sand.u32 1, %s799_s14  }
   0xb   : > { %p876_p7 = por %p103_p5, %p102_p4  ;;  %s179_s28 = scalar_lea.hbm %s1077_s2, %s807_s16 }
   0xc   : > { %s882_s24 = scalar_select %p87_p6, %s799_s14, %s89_s20  }
   0xd   : > { %s181_s29 = sshll.u32 %s179_s28, 4  ;;  %s176_s30 = scalar_lea.vmem [#allocation2], %s173_s25  ;;  %s182_s29 = int_to_ptr.hbm [resolvable:$true] %s181_s29 }
   0xe   : > { %s183_s4 = sshll.u32 %s176_s30, 4  ;;  %p679_p9 = pnand %p682_p8, %p869_p3  ;;  %s184_s4 = int_to_ptr.vmem [resolvable:$true] %s183_s4 }
   0xf   : > { %p669_p10 = scmp.ge.s32.totalorder %s811_s17, 1  ;;  %p188_p11 = scmp.lt.s32.totalorder %s811_s17, 4 }
  0x10   : > { %s174_s5 = scalar_lea.sflag [#allocation3], %s173_s25 }
  0x11   : > { %681 = dma.hbm_to_vmem [thread:$0]  (!%p679_p9), %s182_s29, 16, %s184_s4, %s174_s5  }
  0x12   : > { %p189_p12 = pnand %p669_p10, %p188_p11 }
  0x13   : > { %s194_s6 = sand.u32 (!%p189_p12), 1, %s795_s13  }
  0x14   : > { %192 = sbr.rel (%p189_p12) target bundleno = 236 (0xec), region = 32  ;;  %s195_s7 = scalar_lea.sflag (!%p189_p12), [#allocation3], %s194_s6 }
  0x15   : > { %s894_s8 = scalar_lea.vmem (!%p189_p12), [#allocation2], %s194_s6 }
  0x19   : > { %786 = dma.done.wait (%p876_p7), %s195_s7, 16  }
  0x1a   : > { %788 = vsyncadd (%p876_p7), %s195_s7, 4294967280  ;;  %p234_p13 = scmp.lt.s32.totalorder %s803_s15, 2 }
  0x1c   : > { %s1089_s15 = smov (!%p234_p13, %s803_s15), 2 }
  0x1d   : > { %s675_s9 = sshll.u32 %s1089_s15, 10  ;;  %s670_s18 = sshll.u32 %s1089_s15, 3 }
  0x1e   : > { %s908_s12 = scalar_lea.vmem %s1076_s1, %s675_s9  ;;  %s241_s22 = scalar_lea.vmem %s1075_s0, %s670_s18 }
  0x1f   : > { %v301_v0 = vld [vmem:[%s908_s12 + $0x178] sm:$0xff]  ;;  %v300_v2 = vld [vmem:[%s908_s12 + $0x170] sm:$0xff]  ;;  %v299_v6 = vld [vmem:[%s908_s12 + $0x168] sm:$0xff]  ;;  %s252_s26 = scalar_lea.vmem %s1078_s3, %s1089_s15 }
  0x20   : > { %v269_v1 = vld [vmem:[%s908_s12 + $0x78] sm:$0xff]  ;;  %440 = vmatpush.msra.mxu2 %v301_v0  ;;  %v268_v4 = vld [vmem:[%s908_s12 + $0x70] sm:$0xff]  ;;  %v267_v8 = vld [vmem:[%s908_s12 + $0x68] sm:$0xff] }
  0x21   : > { %400 = vmatpush.msra.mxu0 %v269_v1  ;;  %v317_v3 = vld [vmem:[%s908_s12 + $0x1f8] sm:$0xff]  ;;  %v316_v7 = vld [vmem:[%s908_s12 + $0x1f0] sm:$0xff]  ;;  %v315_v10 = vld [vmem:[%s908_s12 + $0x1e8] sm:$0xff] }
  0x22   : > { %v285_v5 = vld [vmem:[%s908_s12 + $0xf8] sm:$0xff]  ;;  %460 = vmatpush.msra.mxu3 %v317_v3  ;;  %441 = vmatpush.msra.mxu2 %v300_v2  ;;  %v284_v9 = vld [vmem:[%s908_s12 + $0xf0] sm:$0xff]  ;;  %v298_v11 = vld [vmem:[%s908_s12 + $0x160] sm:$0xff] }
  0x23   : > { %420 = vmatpush.msra.mxu1 %v285_v5  ;;  %401 = vmatpush.msra.mxu0 %v268_v4  ;;  %v266_v12 = vld [vmem:[%s908_s12 + $0x60] sm:$0xff]  ;;  %v283_v13 = vld [vmem:[%s908_s12 + $0xe8] sm:$0xff]  ;;  %v297_v16 = vld [vmem:[%s908_s12 + $0x158] sm:$0xff] }
  0x24   : > { %461 = vmatpush.msra.mxu3 %v316_v7  ;;  %442 = vmatpush.msra.mxu2 %v299_v6  ;;  %v314_v14 = vld [vmem:[%s908_s12 + $0x1e0] sm:$0xff]  ;;  %v265_v17 = vld [vmem:[%s908_s12 + $0x58] sm:$0xff]  ;;  %v296_v20 = vld [vmem:[%s908_s12 + $0x150] sm:$0xff] }
  0x25   : > { %421 = vmatpush.msra.mxu1 %v284_v9  ;;  %402 = vmatpush.msra.mxu0 %v267_v8  ;;  %v282_v15 = vld [vmem:[%s908_s12 + $0xe0] sm:$0xff]  ;;  %v313_v18 = vld [vmem:[%s908_s12 + $0x1d8] sm:$0xff]  ;;  %v264_v21 = vld [vmem:[%s908_s12 + $0x50] sm:$0xff] }
  0x26   : > { %462 = vmatpush.msra.mxu3 %v315_v10  ;;  %443 = vmatpush.msra.mxu2 %v298_v11  ;;  %v281_v19 = vld [vmem:[%s908_s12 + $0xd8] sm:$0xff]  ;;  %v312_v22 = vld [vmem:[%s908_s12 + $0x1d0] sm:$0xff]  ;;  %v295_v24 = vld [vmem:[%s908_s12 + $0x148] sm:$0xff] }
  0x27   : > { %422 = vmatpush.msra.mxu1 %v283_v13  ;;  %403 = vmatpush.msra.mxu0 %v266_v12  ;;  %v280_v23 = vld [vmem:[%s908_s12 + $0xd0] sm:$0xff]  ;;  %v263_v25 = vld [vmem:[%s908_s12 + $0x48] sm:$0xff]  ;;  %v294_v28 = vld [vmem:[%s908_s12 + $0x140] sm:$0xff] }
  0x28   : > { %463 = vmatpush.msra.mxu3 %v314_v14  ;;  %444 = vmatpush.msra.mxu2 %v297_v16  ;;  %v311_v26 = vld [vmem:[%s908_s12 + $0x1c8] sm:$0xff]  ;;  %v262_v29 = vld [vmem:[%s908_s12 + $0x40] sm:$0xff]  ;;  %v293_v32 = vld [vmem:[%s908_s12 + $0x138] sm:$0xff] }
  0x29   : > { %423 = vmatpush.msra.mxu1 %v282_v15  ;;  %404 = vmatpush.msra.mxu0 %v265_v17  ;;  %v279_v27 = vld [vmem:[%s908_s12 + $0xc8] sm:$0xff]  ;;  %v310_v30 = vld [vmem:[%s908_s12 + $0x1c0] sm:$0xff]  ;;  %v261_v33 = vld [vmem:[%s908_s12 + $0x38] sm:$0xff] }
  0x2a   : > { %464 = vmatpush.msra.mxu3 %v313_v18  ;;  %445 = vmatpush.msra.mxu2 %v296_v20  ;;  %v278_v31 = vld [vmem:[%s908_s12 + $0xc0] sm:$0xff]  ;;  %v309_v34 = vld [vmem:[%s908_s12 + $0x1b8] sm:$0xff]  ;;  %v292_v36 = vld [vmem:[%s908_s12 + $0x130] sm:$0xff] }
  0x2b   : > { %424 = vmatpush.msra.mxu1 %v281_v19  ;;  %405 = vmatpush.msra.mxu0 %v264_v21  ;;  %v277_v35 = vld [vmem:[%s908_s12 + $0xb8] sm:$0xff]  ;;  %v260_v37 = vld [vmem:[%s908_s12 + $0x30] sm:$0xff]  ;;  %v291_v40 = vld [vmem:[%s908_s12 + $0x128] sm:$0xff] }
  0x2c   : > { %465 = vmatpush.msra.mxu3 %v312_v22  ;;  %446 = vmatpush.msra.mxu2 %v295_v24  ;;  %v308_v38 = vld [vmem:[%s908_s12 + $0x1b0] sm:$0xff]  ;;  %v259_v41 = vld [vmem:[%s908_s12 + $0x28] sm:$0xff]  ;;  %v290_v44 = vld [vmem:[%s908_s12 + $0x120] sm:$0xff] }
  0x2d   : > { %425 = vmatpush.msra.mxu1 %v280_v23  ;;  %406 = vmatpush.msra.mxu0 %v263_v25  ;;  %v276_v39 = vld [vmem:[%s908_s12 + $0xb0] sm:$0xff]  ;;  %v307_v42 = vld [vmem:[%s908_s12 + $0x1a8] sm:$0xff]  ;;  %v258_v45 = vld [vmem:[%s908_s12 + $0x20] sm:$0xff] }
  0x2e   : > { %466 = vmatpush.msra.mxu3 %v311_v26  ;;  %447 = vmatpush.msra.mxu2 %v294_v28  ;;  %v275_v43 = vld [vmem:[%s908_s12 + $0xa8] sm:$0xff]  ;;  %v306_v46 = vld [vmem:[%s908_s12 + $0x1a0] sm:$0xff]  ;;  %v289_v48 = vld [vmem:[%s908_s12 + $0x118] sm:$0xff] }
  0x2f   : > { %426 = vmatpush.msra.mxu1 %v279_v27  ;;  %407 = vmatpush.msra.mxu0 %v262_v29  ;;  %v274_v47 = vld [vmem:[%s908_s12 + $0xa0] sm:$0xff]  ;;  %v257_v49 = vld [vmem:[%s908_s12 + $0x18] sm:$0xff]  ;;  %v288_v52 = vld [vmem:[%s908_s12 + $0x110] sm:$0xff] }
  0x30   : > { %467 = vmatpush.msra.mxu3 %v310_v30  ;;  %448 = vmatpush.msra.mxu2 %v293_v32  ;;  %v305_v50 = vld [vmem:[%s908_s12 + $0x198] sm:$0xff]  ;;  %v256_v53 = vld [vmem:[%s908_s12 + $0x10] sm:$0xff]  ;;  %v287_v56 = vld [vmem:[%s908_s12 + $0x108] sm:$0xff] }
  0x31   : > { %427 = vmatpush.msra.mxu1 %v278_v31  ;;  %408 = vmatpush.msra.mxu0 %v261_v33  ;;  %v273_v51 = vld [vmem:[%s908_s12 + $0x98] sm:$0xff]  ;;  %v304_v54 = vld [vmem:[%s908_s12 + $0x190] sm:$0xff]  ;;  %v255_v57 = vld [vmem:[%s908_s12 + $0x8] sm:$0xff] }
  0x32   : > { %468 = vmatpush.msra.mxu3 %v309_v34  ;;  %449 = vmatpush.msra.mxu2 %v292_v36  ;;  %v272_v55 = vld [vmem:[%s908_s12 + $0x90] sm:$0xff]  ;;  %v303_v58 = vld [vmem:[%s908_s12 + $0x188] sm:$0xff]  ;;  %v286_v60 = vld [vmem:[%s908_s12 + $0x100] sm:$0xff] }
  0x33   : > { %428 = vmatpush.msra.mxu1 %v277_v35  ;;  %409 = vmatpush.msra.mxu0 %v260_v37  ;;  %v271_v59 = vld [vmem:[%s908_s12 + $0x88] sm:$0xff]  ;;  %v254_v61 = vld [vmem:[%s908_s12] sm:$0xff]  ;;  %v365_v62 = vld [vmem:[%s908_s12 + $0x378] sm:$0xff] }
  0x34   : > { %469 = vmatpush.msra.mxu3 %v308_v38  ;;  %450 = vmatpush.msra.mxu2 %v291_v40  ;;  %v302_v63 = vld [vmem:[%s908_s12 + $0x180] sm:$0xff]  ;;  %v333_v0 = vld [vmem:[%s908_s12 + $0x278] sm:$0xff]  ;;  %v364_v2 = vld [vmem:[%s908_s12 + $0x370] sm:$0xff] }
  0x35   : > { %429 = vmatpush.msra.mxu1 %v276_v39  ;;  %410 = vmatpush.msra.mxu0 %v259_v41  ;;  %v381_v1 = vld [vmem:[%s908_s12 + $0x3f8] sm:$0xff]  ;;  %v270_v3 = vld [vmem:[%s908_s12 + $0x80] sm:$0xff]  ;;  %v332_v4 = vld [vmem:[%s908_s12 + $0x270] sm:$0xff] }
  0x36   : > { %470 = vmatpush.msra.mxu3 %v307_v42  ;;  %451 = vmatpush.msra.mxu2 %v290_v44  ;;  %v349_v5 = vld [vmem:[%s908_s12 + $0x2f8] sm:$0xff]  ;;  %v363_v6 = vld [vmem:[%s908_s12 + $0x368] sm:$0xff]  ;;  %v380_v7 = vld [vmem:[%s908_s12 + $0x3f0] sm:$0xff] }
  0x37   : > { %430 = vmatpush.msra.mxu1 %v275_v43  ;;  %411 = vmatpush.msra.mxu0 %v258_v45  ;;  %v331_v8 = vld [vmem:[%s908_s12 + $0x268] sm:$0xff]  ;;  %v348_v9 = vld [vmem:[%s908_s12 + $0x2f0] sm:$0xff]  ;;  %v362_v10 = vld [vmem:[%s908_s12 + $0x360] sm:$0xff] }
  0x38   : > { %471 = vmatpush.msra.mxu3 %v306_v46  ;;  %452 = vmatpush.msra.mxu2 %v289_v48  ;;  %v379_v11 = vld [vmem:[%s908_s12 + $0x3e8] sm:$0xff]  ;;  %v330_v12 = vld [vmem:[%s908_s12 + $0x260] sm:$0xff]  ;;  %v361_v14 = vld [vmem:[%s908_s12 + $0x358] sm:$0xff] }
  0x39   : > { %431 = vmatpush.msra.mxu1 %v274_v47  ;;  %412 = vmatpush.msra.mxu0 %v257_v49  ;;  %v347_v13 = vld [vmem:[%s908_s12 + $0x2e8] sm:$0xff]  ;;  %v378_v15 = vld [vmem:[%s908_s12 + $0x3e0] sm:$0xff]  ;;  %v329_v16 = vld [vmem:[%s908_s12 + $0x258] sm:$0xff] }
  0x3a   : > { %472 = vmatpush.msra.mxu3 %v305_v50  ;;  %453 = vmatpush.msra.mxu2 %v288_v52  ;;  %v346_v17 = vld [vmem:[%s908_s12 + $0x2e0] sm:$0xff]  ;;  %v360_v18 = vld [vmem:[%s908_s12 + $0x350] sm:$0xff]  ;;  %v377_v19 = vld [vmem:[%s908_s12 + $0x3d8] sm:$0xff] }
  0x3b   : > { %432 = vmatpush.msra.mxu1 %v273_v51  ;;  %413 = vmatpush.msra.mxu0 %v256_v53  ;;  %v328_v20 = vld [vmem:[%s908_s12 + $0x250] sm:$0xff]  ;;  %v345_v21 = vld [vmem:[%s908_s12 + $0x2d8] sm:$0xff]  ;;  %v359_v22 = vld [vmem:[%s908_s12 + $0x348] sm:$0xff] }
  0x3c   : > { %473 = vmatpush.msra.mxu3 %v304_v54  ;;  %454 = vmatpush.msra.mxu2 %v287_v56  ;;  %v376_v23 = vld [vmem:[%s908_s12 + $0x3d0] sm:$0xff]  ;;  %v327_v24 = vld [vmem:[%s908_s12 + $0x248] sm:$0xff]  ;;  %v358_v26 = vld [vmem:[%s908_s12 + $0x340] sm:$0xff] }
  0x3d   : > { %433 = vmatpush.msra.mxu1 %v272_v55  ;;  %414 = vmatpush.msra.mxu0 %v255_v57  ;;  %v344_v25 = vld [vmem:[%s908_s12 + $0x2d0] sm:$0xff]  ;;  %v375_v27 = vld [vmem:[%s908_s12 + $0x3c8] sm:$0xff]  ;;  %v326_v28 = vld [vmem:[%s908_s12 + $0x240] sm:$0xff] }
  0x3e   : > { %474 = vmatpush.msra.mxu3 %v303_v58  ;;  %455 = vmatpush.msra.mxu2 %v286_v60  ;;  %v343_v29 = vld [vmem:[%s908_s12 + $0x2c8] sm:$0xff]  ;;  %v357_v30 = vld [vmem:[%s908_s12 + $0x338] sm:$0xff]  ;;  %v374_v31 = vld [vmem:[%s908_s12 + $0x3c0] sm:$0xff] }
  0x3f   : > { %434 = vmatpush.msra.mxu1 %v271_v59  ;;  %415 = vmatpush.msra.mxu0 %v254_v61  ;;  %v325_v32 = vld [vmem:[%s908_s12 + $0x238] sm:$0xff]  ;;  %v342_v33 = vld [vmem:[%s908_s12 + $0x2c0] sm:$0xff]  ;;  %v356_v34 = vld [vmem:[%s908_s12 + $0x330] sm:$0xff] }
  0x40   : > { %520 = vmatpush.msrb.mxu2 %v365_v62  ;;  %475 = vmatpush.msra.mxu3 %v302_v63  ;;  %v373_v35 = vld [vmem:[%s908_s12 + $0x3b8] sm:$0xff]  ;;  %v324_v36 = vld [vmem:[%s908_s12 + $0x230] sm:$0xff]  ;;  %v1016_v38 = vld [vmem:[%s241_s22] sm:$0xff] }
  0x41   : > { %480 = vmatpush.msrb.mxu0 %v333_v0  ;;  %435 = vmatpush.msra.mxu1 %v270_v3  ;;  %v341_v37 = vld [vmem:[%s908_s12 + $0x2b8] sm:$0xff]  ;;  %v355_v39 = vld [vmem:[%s908_s12 + $0x328] sm:$0xff]  ;;  %v372_v40 = vld [vmem:[%s908_s12 + $0x3b0] sm:$0xff]  ;;  %v386_v45 = vperm.slane %v1016_v38, 2  ;;  %v384_v49 = vperm.slane %v1016_v38, 0  ;;  %v387_v51 = vperm.slane %v1016_v38, 3 }
  0x42   : > { %540 = vmatpush.msrb.mxu3 %v381_v1  ;;  %521 = vmatpush.msrb.mxu2 %v364_v2  ;;  %v323_v41 = vld [vmem:[%s908_s12 + $0x228] sm:$0xff]  ;;  %v340_v42 = vld [vmem:[%s908_s12 + $0x2b0] sm:$0xff]  ;;  %v354_v43 = vld [vmem:[%s908_s12 + $0x320] sm:$0xff]  ;;  %v385_v55 = vperm.slane %v1016_v38, 1  ;;  %v390_v1 = vperm.slane %v1016_v38, 6 }
  0x43   : > { %481 = vmatpush.msrb.mxu0 %v332_v4  ;;  %500 = vmatpush.msrb.mxu1 %v349_v5  ;;  %v371_v44 = vld [vmem:[%s908_s12 + $0x3a8] sm:$0xff]  ;;  %v322_v46 = vld [vmem:[%s908_s12 + $0x220] sm:$0xff]  ;;  %v353_v48 = vld [vmem:[%s908_s12 + $0x318] sm:$0xff]  ;;  %v388_v5 = vperm.slane %v1016_v38, 4 }
  0x44   : > { %522 = vmatpush.msrb.mxu2 %v363_v6  ;;  %541 = vmatpush.msrb.mxu3 %v380_v7  ;;  %v339_v47 = vld [vmem:[%s908_s12 + $0x2a8] sm:$0xff]  ;;  %v370_v50 = vld [vmem:[%s908_s12 + $0x3a0] sm:$0xff]  ;;  %v321_v52 = vld [vmem:[%s908_s12 + $0x218] sm:$0xff]  ;;  %v391_v6 = vperm.slane %v1016_v38, 7 }
  0x45   : > { %482 = vmatpush.msrb.mxu0 %v331_v8  ;;  %501 = vmatpush.msrb.mxu1 %v348_v9  ;;  %v338_v53 = vld [vmem:[%s908_s12 + $0x2a0] sm:$0xff]  ;;  %v352_v54 = vld [vmem:[%s908_s12 + $0x310] sm:$0xff]  ;;  %v369_v56 = vld [vmem:[%s908_s12 + $0x398] sm:$0xff]  ;;  %v389_v8 = vperm.slane %v1016_v38, 5 }
  0x46   : > { %523 = vmatpush.msrb.mxu2 %v362_v10  ;;  %542 = vmatpush.msrb.mxu3 %v379_v11  ;;  %v320_v57 = vld [vmem:[%s908_s12 + $0x210] sm:$0xff]  ;;  %v337_v58 = vld [vmem:[%s908_s12 + $0x298] sm:$0xff]  ;;  %v351_v59 = vld [vmem:[%s908_s12 + $0x308] sm:$0xff] }
  0x47   : > { %483 = vmatpush.msrb.mxu0 %v330_v12  ;;  %502 = vmatpush.msrb.mxu1 %v347_v13  ;;  %v368_v60 = vld [vmem:[%s908_s12 + $0x390] sm:$0xff]  ;;  %v319_v61 = vld [vmem:[%s908_s12 + $0x208] sm:$0xff]  ;;  %v350_v63 = vld [vmem:[%s908_s12 + $0x300] sm:$0xff] }
  0x48   : > { %524 = vmatpush.msrb.mxu2 %v361_v14  ;;  %543 = vmatpush.msrb.mxu3 %v378_v15  ;;  %v336_v62 = vld [vmem:[%s908_s12 + $0x290] sm:$0xff]  ;;  %v367_v0 = vld [vmem:[%s908_s12 + $0x388] sm:$0xff]  ;;  %v318_v2 = vld [vmem:[%s908_s12 + $0x200] sm:$0xff] }
  0x49   : > { %484 = vmatpush.msrb.mxu0 %v329_v16  ;;  %503 = vmatpush.msrb.mxu1 %v346_v17  ;;  %v335_v3 = vld [vmem:[%s908_s12 + $0x288] sm:$0xff]  ;;  %v366_v4 = vld [vmem:[%s908_s12 + $0x380] sm:$0xff] }
  0x4a   : > { %525 = vmatpush.msrb.mxu2 %v360_v18  ;;  %544 = vmatpush.msrb.mxu3 %v377_v19  ;;  %v334_v7 = vld [vmem:[%s908_s12 + $0x280] sm:$0xff] }
  0x4b   : > { %485 = vmatpush.msrb.mxu0 %v328_v20  ;;  %504 = vmatpush.msrb.mxu1 %v345_v21  ;;  %v382_v9 = vld [vmem:[%s894_s8] sm:$0x1] }
  0x4c   : > { %526 = vmatpush.msrb.mxu2 %v359_v22  ;;  %545 = vmatpush.msrb.mxu3 %v376_v23 }
  0x4d   : > { %486 = vmatpush.msrb.mxu0 %v327_v24  ;;  %505 = vmatpush.msrb.mxu1 %v344_v25 }
  0x4e   : > { %527 = vmatpush.msrb.mxu2 %v358_v26  ;;  %546 = vmatpush.msrb.mxu3 %v375_v27 }
  0x4f   : > { %487 = vmatpush.msrb.mxu0 %v326_v28  ;;  %506 = vmatpush.msrb.mxu1 %v343_v29 }
  0x50   : > { %528 = vmatpush.msrb.mxu2 %v357_v30  ;;  %547 = vmatpush.msrb.mxu3 %v374_v31 }
  0x51   : > { %488 = vmatpush.msrb.mxu0 %v325_v32  ;;  %507 = vmatpush.msrb.mxu1 %v342_v33 }
  0x52   : > { %529 = vmatpush.msrb.mxu2 %v356_v34  ;;  %548 = vmatpush.msrb.mxu3 %v373_v35 }
  0x53   : > { %489 = vmatpush.msrb.mxu0 %v324_v36  ;;  %508 = vmatpush.msrb.mxu1 %v341_v37 }
  0x54   : > { %530 = vmatpush.msrb.mxu2 %v355_v39  ;;  %549 = vmatpush.msrb.mxu3 %v372_v40 }
  0x55   : > { %490 = vmatpush.msrb.mxu0 %v323_v41  ;;  %509 = vmatpush.msrb.mxu1 %v340_v42 }
  0x56   : > { %531 = vmatpush.msrb.mxu2 %v354_v43  ;;  %550 = vmatpush.msrb.mxu3 %v371_v44 }
  0x57   : > { %456 = vmatmul.f32.vlgmr.msra.gmra.mxu2 %v386_v45  ;;  %491 = vmatpush.msrb.mxu0 %v322_v46 }
  0x58   : > { %510 = vmatpush.msrb.mxu1 %v339_v47  ;;  %532 = vmatpush.msrb.mxu2 %v353_v48 }
  0x59   : > { %551 = vmatpush.msrb.mxu3 %v370_v50  ;;  %416 = vmatmul.f32.vlgmr.msra.gmra.mxu0 %v384_v49 }
  0x5a   : > { %476 = vmatmul.f32.vlgmr.msra.gmra.mxu3 %v387_v51  ;;  %492 = vmatpush.msrb.mxu0 %v321_v52 }
  0x5b   : > { %511 = vmatpush.msrb.mxu1 %v338_v53  ;;  %533 = vmatpush.msrb.mxu2 %v352_v54 }
  0x5c   : > { %552 = vmatpush.msrb.mxu3 %v369_v56  ;;  %436 = vmatmul.f32.vlgmr.msra.gmra.mxu1 %v385_v55 }
  0x5d   : > { %493 = vmatpush.msrb.mxu0 %v320_v57  ;;  %512 = vmatpush.msrb.mxu1 %v337_v58 }
  0x5e   : > { %534 = vmatpush.msrb.mxu2 %v351_v59  ;;  %553 = vmatpush.msrb.mxu3 %v368_v60 }
  0x5f   : > { %494 = vmatpush.msrb.mxu0 %v319_v61  ;;  %513 = vmatpush.msrb.mxu1 %v336_v62 }
  0x60   : > { %535 = vmatpush.msrb.mxu2 %v350_v63  ;;  %554 = vmatpush.msrb.mxu3 %v367_v0 }
  0x61   : > { %536 = vmatmul.f32.vlgmr.msrb.gmra.mxu2 %v390_v1  ;;  %495 = vmatpush.msrb.mxu0 %v318_v2 }
  0x62   : > { %514 = vmatpush.msrb.mxu1 %v335_v3  ;;  %555 = vmatpush.msrb.mxu3 %v366_v4 }
  0x63   : > { %496 = vmatmul.f32.vlgmr.msrb.gmra.mxu0 %v388_v5  ;;  %556 = vmatmul.f32.vlgmr.msrb.gmra.mxu3 %v391_v6 }
  0x64   : > { %515 = vmatpush.msrb.mxu1 %v334_v7 }
  0x65   : > { %516 = vmatmul.f32.vlgmr.msrb.gmra.mxu1 %v389_v8 }
  0xd6   : > { %v417_v10 = vpop.f32.mrf.mxu0 }
  0xd7   : > { %v418_v11 = vadd.f32 %v417_v10, %v382_v9 }
  0xd9   : > { %v437_v12 = vpop.f32.mrf.mxu1 }
  0xda   : > { %v438_v13 = vadd.f32 %v437_v12, %v418_v11  ;;  %v457_v14 = vpop.f32.mrf.mxu2 }
  0xdc   : > { %v458_v15 = vadd.f32 %v457_v14, %v438_v13 }
  0xdd   : > { %v477_v16 = vpop.f32.mrf.mxu3 }
  0xde   : > { %v478_v17 = vadd.f32 %v477_v16, %v458_v15 }
  0xe0   : > { %v497_v18 = vpop.f32.mrf.mxu0 }
  0xe1   : > { %v498_v19 = vadd.f32 %v497_v18, %v478_v17 }
  0xe2   : > { %v517_v20 = vpop.f32.mrf.mxu1 }
  0xe3   : > { %v518_v21 = vadd.f32 %v517_v20, %v498_v19 }
  0xe4   : > { %v537_v22 = vpop.f32.mrf.mxu2 }
  0xe5   : > { %v538_v23 = vadd.f32 %v537_v22, %v518_v21 }
  0xe6   : > { %v557_v24 = vpop.f32.mrf.mxu3 }
  0xe7   : > { %v558_v25 = vadd.f32 %v557_v24, %v538_v23 }
  0xe9   : > { %v560_v26 = vmax.f32 %v558_v25, 0.0 }
  0xeb   : > { %561 = vst [vmem:[%s252_s26] sm:$0x1] %v560_v26 }
  0xec PF: > { %s16_s17 = sadd.s32 1, %s811_s17   ;;  %s1081_s12 = smov %s795_s13 }
  0xed   : > { %p13_p0 = scmp.ge.s32.totalorder %s16_s17, 5   ;;  %s1082_s13 = smov %s799_s14 }
  0xee   : > { %s1083_s14 = smov %s882_s24  ;;  %s1084_s15 = smov %s807_s16 }
  0xef   : > { %s1085_s16 = smov %s1087_s19  ;;  %15 = sbr.rel (!%p13_p0) target bundleno = 4 (0x4), region = 78 }
  0xf4   :  { %585 = vsyncpa [#allocation3], 1 }
  0xf5   :  { %587 = vsyncpa [#allocation3 + $0x1], 1 }

// kernel: rinterp_forward.31
= control target key start
LH: loop header
LB: loop body
LE: loop exit
PB: predicated region body
PF: predicated region fallthrough
CT: control target
= control target key end

     0   :  { %8 = vsyncpa [#allocation3], 0  ;;  %s1013_s0 = inlined_call_operand.vmem [shape: f32[3,1,864], index: 0, kind: input, shape index: {}]   ;;  %s1014_s1 = inlined_call_operand.vmem [shape: f32[3,864,128], index: 1, kind: input, shape index: {}]   ;;  %s1015_s2 = inlined_call_operand.hbm [shape: f32[3,1,128], index: 2, kind: input, shape index: {}]   ;;  %s1016_s3 = inlined_call_operand.vmem [shape: f32[3,1,128], index: 3, kind: output, shape index: {}]  }
   0x1   :  { %10 = vsyncpa [#allocation3 + $0x1], 0  ;;  %s792_s12 = smov 0   ;;  %s794_s13 = smov 0  }
   0x2   :  { %s796_s14 = smov 0   ;;  %s798_s15 = smov 0  }
   0x3   :  { %s800_s16 = smov 0   ;;  %s802_s17 = smov 0  }
   0x4 LB: > { %s624_s18 = sadd.s32 4294967295, %s770_s17   ;;  %s28_s19 = sadd.s32 1, %s766_s16  ;;  %s770_s17 = sphi %s802_s17, %s16_s17   ;;  %s766_s16 = sphi %s800_s16, %s1023_s16   ;;  %s762_s15 = sphi %s798_s15, %s1022_s15   ;;  %s758_s14 = sphi %s796_s14, %s1021_s14   ;;  %s754_s13 = sphi %s794_s13, %s1020_s13   ;;  %s750_s12 = sphi %s792_s12, %s1019_s12  }
   0x5   : > { %p30_p0 = scmp.ge.s32.totalorder %s28_s19, 3  ;;  %s89_s20 = sadd.s32 1, %s758_s14 }
   0x6   : > { %p96_p1 = scmp.ne.s32.totalorder %s758_s14, %s754_s13  ;;  %p97_p2 = scmp.eq.s32.totalorder %s770_s17, 0 }
   0x7   : > { %s1025_s19 = smov (%p30_p0, %s28_s19), 0  ;;  %p102_p4 = scmp.ne.s32.totalorder %s754_s13, %s750_s12 }
   0x8   : > { %p828_p3 = por %p97_p2, %p96_p1  ;;  %s86_s22 = ssub.s32 %s766_s16, %s1025_s19 }
   0x9   : > { %p103_p5 = scmp.eq.s32.totalorder %s624_s18, 0  ;;  %p87_p6 = scmp.eq.s32.totalorder %s86_s22, 0 }
   0xa   : > { %p641_p8 = scmp.lt.s32.totalorder %s770_s17, 3  ;;  %s173_s25 = sand.u32 1, %s758_s14  }
   0xb   : > { %p835_p7 = por %p103_p5, %p102_p4  ;;  %s179_s28 = scalar_lea.hbm %s1015_s2, %s766_s16 }
   0xc   : > { %s841_s24 = scalar_select %p87_p6, %s758_s14, %s89_s20  }
   0xd   : > { %s181_s29 = sshll.u32 %s179_s28, 4  ;;  %s176_s30 = scalar_lea.vmem [#allocation2], %s173_s25  ;;  %s182_s29 = int_to_ptr.hbm [resolvable:$true] %s181_s29 }
   0xe   : > { %s183_s4 = sshll.u32 %s176_s30, 4  ;;  %p638_p9 = pnand %p641_p8, %p828_p3  ;;  %s184_s4 = int_to_ptr.vmem [resolvable:$true] %s183_s4 }
   0xf   : > { %p628_p10 = scmp.ge.s32.totalorder %s770_s17, 1  ;;  %p188_p11 = scmp.lt.s32.totalorder %s770_s17, 4 }
  0x10   : > { %s174_s5 = scalar_lea.sflag [#allocation3], %s173_s25 }
  0x11   : > { %640 = dma.hbm_to_vmem [thread:$0]  (!%p638_p9), %s182_s29, 16, %s184_s4, %s174_s5  }
  0x12   : > { %p189_p12 = pnand %p628_p10, %p188_p11 }
  0x13   : > { %s194_s6 = sand.u32 (!%p189_p12), 1, %s754_s13  }
  0x14   : > { %192 = sbr.rel (%p189_p12) target bundleno = 229 (0xe5), region = 32  ;;  %s195_s7 = scalar_lea.sflag (!%p189_p12), [#allocation3], %s194_s6 }
  0x15   : > { %s853_s8 = scalar_lea.vmem (!%p189_p12), [#allocation2], %s194_s6 }
  0x19   : > { %745 = dma.done.wait (%p835_p7), %s195_s7, 16  }
  0x1a   : > { %747 = vsyncadd (%p835_p7), %s195_s7, 4294967280  ;;  %p234_p13 = scmp.lt.s32.totalorder %s762_s15, 2  ;;  %vm377_vm0 = vcmask 785408  }
  0x1c   : > { %s1027_s15 = smov (!%p234_p13, %s762_s15), 2 }
  0x1d   : > { %s634_s9 = smul.u32 864, %s1027_s15  ;;  %s252_s26 = scalar_lea.vmem %s1016_s3, %s1027_s15 }
  0x1e   : > { %s633_s18 = smul.u32 7, %s1027_s15 }
  0x1f   : > { %s867_s12 = scalar_lea.vmem %s1014_s1, %s634_s9 }
  0x20   : > { %v269_v0 = vld [vmem:[%s867_s12 + $0x78] sm:$0xff]  ;;  %v268_v1 = vld [vmem:[%s867_s12 + $0x70] sm:$0xff]  ;;  %v267_v4 = vld [vmem:[%s867_s12 + $0x68] sm:$0xff]  ;;  %s241_s22 = scalar_lea.vmem %s1013_s0, %s633_s18 }
  0x21   : > { %v285_v2 = vld [vmem:[%s867_s12 + $0xf8] sm:$0xff]  ;;  %380 = vmatpush.msra.mxu0 %v269_v0  ;;  %v284_v3 = vld [vmem:[%s867_s12 + $0xf0] sm:$0xff]  ;;  %v283_v5 = vld [vmem:[%s867_s12 + $0xe8] sm:$0xff] }
  0x22   : > { %400 = vmatpush.msra.mxu1 %v285_v2  ;;  %v301_v6 = vld [vmem:[%s867_s12 + $0x178] sm:$0xff]  ;;  %v300_v7 = vld [vmem:[%s867_s12 + $0x170] sm:$0xff]  ;;  %v266_v8 = vld [vmem:[%s867_s12 + $0x60] sm:$0xff] }
  0x23   : > { %381 = vmatpush.msra.mxu0 %v268_v1  ;;  %420 = vmatpush.msra.mxu2 %v301_v6  ;;  %v282_v9 = vld [vmem:[%s867_s12 + $0xe0] sm:$0xff]  ;;  %v299_v10 = vld [vmem:[%s867_s12 + $0x168] sm:$0xff]  ;;  %v265_v11 = vld [vmem:[%s867_s12 + $0x58] sm:$0xff] }
  0x24   : > { %401 = vmatpush.msra.mxu1 %v284_v3  ;;  %v281_v12 = vld [vmem:[%s867_s12 + $0xd8] sm:$0xff]  ;;  %v298_v13 = vld [vmem:[%s867_s12 + $0x160] sm:$0xff]  ;;  %v264_v14 = vld [vmem:[%s867_s12 + $0x50] sm:$0xff] }
  0x25   : > { %382 = vmatpush.msra.mxu0 %v267_v4  ;;  %421 = vmatpush.msra.mxu2 %v300_v7  ;;  %v280_v15 = vld [vmem:[%s867_s12 + $0xd0] sm:$0xff]  ;;  %v297_v16 = vld [vmem:[%s867_s12 + $0x158] sm:$0xff]  ;;  %v263_v17 = vld [vmem:[%s867_s12 + $0x48] sm:$0xff] }
  0x26   : > { %402 = vmatpush.msra.mxu1 %v283_v5  ;;  %v279_v18 = vld [vmem:[%s867_s12 + $0xc8] sm:$0xff]  ;;  %v317_v19 = vld [vmem:[%s867_s12 + $0x1f8] sm:$0xff]  ;;  %v296_v20 = vld [vmem:[%s867_s12 + $0x150] sm:$0xff] }
  0x27   : > { %383 = vmatpush.msra.mxu0 %v266_v8  ;;  %422 = vmatpush.msra.mxu2 %v299_v10  ;;  %v262_v21 = vld [vmem:[%s867_s12 + $0x40] sm:$0xff]  ;;  %v316_v23 = vld [vmem:[%s867_s12 + $0x1f0] sm:$0xff]  ;;  %v295_v24 = vld [vmem:[%s867_s12 + $0x148] sm:$0xff] }
  0x28   : > { %403 = vmatpush.msra.mxu1 %v282_v9  ;;  %v278_v22 = vld [vmem:[%s867_s12 + $0xc0] sm:$0xff]  ;;  %440 = vmatpush.msra.mxu3 %v317_v19  ;;  %v315_v25 = vld [vmem:[%s867_s12 + $0x1e8] sm:$0xff]  ;;  %v261_v26 = vld [vmem:[%s867_s12 + $0x38] sm:$0xff] }
  0x29   : > { %384 = vmatpush.msra.mxu0 %v265_v11  ;;  %423 = vmatpush.msra.mxu2 %v298_v13  ;;  %v277_v27 = vld [vmem:[%s867_s12 + $0xb8] sm:$0xff]  ;;  %v294_v28 = vld [vmem:[%s867_s12 + $0x140] sm:$0xff]  ;;  %v260_v30 = vld [vmem:[%s867_s12 + $0x30] sm:$0xff] }
  0x2a   : > { %404 = vmatpush.msra.mxu1 %v281_v12  ;;  %441 = vmatpush.msra.mxu3 %v316_v23  ;;  %v314_v29 = vld [vmem:[%s867_s12 + $0x1e0] sm:$0xff]  ;;  %v276_v31 = vld [vmem:[%s867_s12 + $0xb0] sm:$0xff]  ;;  %v293_v32 = vld [vmem:[%s867_s12 + $0x138] sm:$0xff] }
  0x2b   : > { %385 = vmatpush.msra.mxu0 %v264_v14  ;;  %424 = vmatpush.msra.mxu2 %v297_v16  ;;  %v313_v33 = vld [vmem:[%s867_s12 + $0x1d8] sm:$0xff]  ;;  %v259_v34 = vld [vmem:[%s867_s12 + $0x28] sm:$0xff]  ;;  %v292_v36 = vld [vmem:[%s867_s12 + $0x130] sm:$0xff] }
  0x2c   : > { %405 = vmatpush.msra.mxu1 %v280_v15  ;;  %442 = vmatpush.msra.mxu3 %v315_v25  ;;  %v275_v35 = vld [vmem:[%s867_s12 + $0xa8] sm:$0xff]  ;;  %v312_v37 = vld [vmem:[%s867_s12 + $0x1d0] sm:$0xff]  ;;  %v258_v38 = vld [vmem:[%s867_s12 + $0x20] sm:$0xff] }
  0x2d   : > { %386 = vmatpush.msra.mxu0 %v263_v17  ;;  %425 = vmatpush.msra.mxu2 %v296_v20  ;;  %v274_v39 = vld [vmem:[%s867_s12 + $0xa0] sm:$0xff]  ;;  %v291_v40 = vld [vmem:[%s867_s12 + $0x128] sm:$0xff]  ;;  %v257_v42 = vld [vmem:[%s867_s12 + $0x18] sm:$0xff] }
  0x2e   : > { %406 = vmatpush.msra.mxu1 %v279_v18  ;;  %443 = vmatpush.msra.mxu3 %v314_v29  ;;  %v311_v41 = vld [vmem:[%s867_s12 + $0x1c8] sm:$0xff]  ;;  %v273_v43 = vld [vmem:[%s867_s12 + $0x98] sm:$0xff]  ;;  %v290_v44 = vld [vmem:[%s867_s12 + $0x120] sm:$0xff] }
  0x2f   : > { %387 = vmatpush.msra.mxu0 %v262_v21  ;;  %426 = vmatpush.msra.mxu2 %v295_v24  ;;  %v310_v45 = vld [vmem:[%s867_s12 + $0x1c0] sm:$0xff]  ;;  %v256_v46 = vld [vmem:[%s867_s12 + $0x10] sm:$0xff]  ;;  %v289_v48 = vld [vmem:[%s867_s12 + $0x118] sm:$0xff] }
  0x30   : > { %407 = vmatpush.msra.mxu1 %v278_v22  ;;  %444 = vmatpush.msra.mxu3 %v313_v33  ;;  %v272_v47 = vld [vmem:[%s867_s12 + $0x90] sm:$0xff]  ;;  %v309_v49 = vld [vmem:[%s867_s12 + $0x1b8] sm:$0xff]  ;;  %v255_v50 = vld [vmem:[%s867_s12 + $0x8] sm:$0xff] }
  0x31   : > { %388 = vmatpush.msra.mxu0 %v261_v26  ;;  %427 = vmatpush.msra.mxu2 %v294_v28  ;;  %v271_v51 = vld [vmem:[%s867_s12 + $0x88] sm:$0xff]  ;;  %v288_v52 = vld [vmem:[%s867_s12 + $0x110] sm:$0xff]  ;;  %v254_v54 = vld [vmem:[%s867_s12] sm:$0xff] }
  0x32   : > { %408 = vmatpush.msra.mxu1 %v277_v27  ;;  %445 = vmatpush.msra.mxu3 %v312_v37  ;;  %v308_v53 = vld [vmem:[%s867_s12 + $0x1b0] sm:$0xff]  ;;  %v270_v55 = vld [vmem:[%s867_s12 + $0x80] sm:$0xff]  ;;  %v333_v56 = vld [vmem:[%s867_s12 + $0x278] sm:$0xff] }
  0x33   : > { %389 = vmatpush.msra.mxu0 %v260_v30  ;;  %428 = vmatpush.msra.mxu2 %v293_v32  ;;  %v349_v57 = vld [vmem:[%s867_s12 + $0x2f8] sm:$0xff]  ;;  %v287_v58 = vld [vmem:[%s867_s12 + $0x108] sm:$0xff]  ;;  %v332_v60 = vld [vmem:[%s867_s12 + $0x270] sm:$0xff] }
  0x34   : > { %409 = vmatpush.msra.mxu1 %v276_v31  ;;  %446 = vmatpush.msra.mxu3 %v311_v41  ;;  %v307_v59 = vld [vmem:[%s867_s12 + $0x1a8] sm:$0xff]  ;;  %v348_v61 = vld [vmem:[%s867_s12 + $0x2f0] sm:$0xff]  ;;  %v286_v62 = vld [vmem:[%s867_s12 + $0x100] sm:$0xff] }
  0x35   : > { %390 = vmatpush.msra.mxu0 %v259_v34  ;;  %429 = vmatpush.msra.mxu2 %v292_v36  ;;  %v306_v63 = vld [vmem:[%s867_s12 + $0x1a0] sm:$0xff]  ;;  %v331_v0 = vld [vmem:[%s867_s12 + $0x268] sm:$0xff]  ;;  %v361_v2 = vld [vmem:[%s867_s12 + $0x358] sm:$0xff] }
  0x36   : > { %410 = vmatpush.msra.mxu1 %v275_v35  ;;  %447 = vmatpush.msra.mxu3 %v310_v45  ;;  %v347_v1 = vld [vmem:[%s867_s12 + $0x2e8] sm:$0xff]  ;;  %v305_v3 = vld [vmem:[%s867_s12 + $0x198] sm:$0xff]  ;;  %v330_v4 = vld [vmem:[%s867_s12 + $0x260] sm:$0xff] }
  0x37   : > { %391 = vmatpush.msra.mxu0 %v258_v38  ;;  %430 = vmatpush.msra.mxu2 %v291_v40  ;;  %v346_v5 = vld [vmem:[%s867_s12 + $0x2e0] sm:$0xff]  ;;  %v360_v6 = vld [vmem:[%s867_s12 + $0x350] sm:$0xff]  ;;  %v329_v8 = vld [vmem:[%s867_s12 + $0x258] sm:$0xff] }
  0x38   : > { %411 = vmatpush.msra.mxu1 %v274_v39  ;;  %448 = vmatpush.msra.mxu3 %v309_v49  ;;  %v304_v7 = vld [vmem:[%s867_s12 + $0x190] sm:$0xff]  ;;  %v345_v9 = vld [vmem:[%s867_s12 + $0x2d8] sm:$0xff]  ;;  %v359_v10 = vld [vmem:[%s867_s12 + $0x348] sm:$0xff] }
  0x39   : > { %392 = vmatpush.msra.mxu0 %v257_v42  ;;  %431 = vmatpush.msra.mxu2 %v290_v44  ;;  %v303_v11 = vld [vmem:[%s867_s12 + $0x188] sm:$0xff]  ;;  %v328_v12 = vld [vmem:[%s867_s12 + $0x250] sm:$0xff]  ;;  %v358_v14 = vld [vmem:[%s867_s12 + $0x340] sm:$0xff] }
  0x3a   : > { %412 = vmatpush.msra.mxu1 %v273_v43  ;;  %449 = vmatpush.msra.mxu3 %v308_v53  ;;  %v344_v13 = vld [vmem:[%s867_s12 + $0x2d0] sm:$0xff]  ;;  %v952_v15 = vld [vmem:[%s241_s22] sm:$0x7f]  ;;  %v327_v17 = vld [vmem:[%s867_s12 + $0x248] sm:$0xff] }
  0x3b   : > { %393 = vmatpush.msra.mxu0 %v256_v46  ;;  %432 = vmatpush.msra.mxu2 %v289_v48  ;;  %v302_v16 = vld [vmem:[%s867_s12 + $0x180] sm:$0xff]  ;;  %v343_v18 = vld [vmem:[%s867_s12 + $0x2c8] sm:$0xff]  ;;  %v364_v19 = vperm.slane %v952_v15, 0  ;;  %v357_v20 = vld [vmem:[%s867_s12 + $0x338] sm:$0xff]  ;;  %v367_v23 = vperm.slane %v952_v15, 3  ;;  %v365_v27 = vperm.slane %v952_v15, 1 }
  0x3c   : > { %413 = vmatpush.msra.mxu1 %v272_v47  ;;  %450 = vmatpush.msra.mxu3 %v307_v59  ;;  %v326_v21 = vld [vmem:[%s867_s12 + $0x240] sm:$0xff]  ;;  %v356_v24 = vld [vmem:[%s867_s12 + $0x330] sm:$0xff]  ;;  %v325_v25 = vld [vmem:[%s867_s12 + $0x238] sm:$0xff]  ;;  %v366_v32 = vperm.slane %v952_v15, 2  ;;  %v370_v45 = vperm.slane %v952_v15, 6  ;;  %v368_v49 = vperm.slane %v952_v15, 4 }
  0x3d   : > { %394 = vmatpush.msra.mxu0 %v255_v50  ;;  %433 = vmatpush.msra.mxu2 %v288_v52  ;;  %v342_v22 = vld [vmem:[%s867_s12 + $0x2c0] sm:$0xff]  ;;  %v341_v26 = vld [vmem:[%s867_s12 + $0x2b8] sm:$0xff]  ;;  %v355_v28 = vld [vmem:[%s867_s12 + $0x328] sm:$0xff] }
  0x3e   : > { %414 = vmatpush.msra.mxu1 %v271_v51  ;;  %451 = vmatpush.msra.mxu3 %v306_v63  ;;  %v324_v29 = vld [vmem:[%s867_s12 + $0x230] sm:$0xff]  ;;  %v354_v31 = vld [vmem:[%s867_s12 + $0x320] sm:$0xff]  ;;  %v323_v33 = vld [vmem:[%s867_s12 + $0x228] sm:$0xff]  ;;  %v369_v51 = vperm.slane %v952_v15, 5 }
  0x3f   : > { %395 = vmatpush.msra.mxu0 %v254_v54  ;;  %434 = vmatpush.msra.mxu2 %v287_v58  ;;  %v340_v30 = vld [vmem:[%s867_s12 + $0x2b0] sm:$0xff]  ;;  %v339_v34 = vld [vmem:[%s867_s12 + $0x2a8] sm:$0xff]  ;;  %v353_v35 = vld [vmem:[%s867_s12 + $0x318] sm:$0xff] }
  0x40   : > { %415 = vmatpush.msra.mxu1 %v270_v55  ;;  %452 = vmatpush.msra.mxu3 %v305_v3  ;;  %v322_v36 = vld [vmem:[%s867_s12 + $0x220] sm:$0xff]  ;;  %v352_v38 = vld [vmem:[%s867_s12 + $0x310] sm:$0xff]  ;;  %v321_v39 = vld [vmem:[%s867_s12 + $0x218] sm:$0xff] }
  0x41   : > { %460 = vmatpush.msrb.mxu0 %v333_v56  ;;  %435 = vmatpush.msra.mxu2 %v286_v62  ;;  %v338_v37 = vld [vmem:[%s867_s12 + $0x2a0] sm:$0xff]  ;;  %v337_v40 = vld [vmem:[%s867_s12 + $0x298] sm:$0xff]  ;;  %v351_v41 = vld [vmem:[%s867_s12 + $0x308] sm:$0xff] }
  0x42   : > { %480 = vmatpush.msrb.mxu1 %v349_v57  ;;  %453 = vmatpush.msra.mxu3 %v304_v7  ;;  %v320_v42 = vld [vmem:[%s867_s12 + $0x210] sm:$0xff]  ;;  %v350_v44 = vld [vmem:[%s867_s12 + $0x300] sm:$0xff]  ;;  %v319_v46 = vld [vmem:[%s867_s12 + $0x208] sm:$0xff] }
  0x43   : > { %461 = vmatpush.msrb.mxu0 %v332_v60  ;;  %504 = vmatpush.msrb.mxu2 %v361_v2  ;;  %v336_v43 = vld [vmem:[%s867_s12 + $0x290] sm:$0xff]  ;;  %v335_v47 = vld [vmem:[%s867_s12 + $0x288] sm:$0xff]  ;;  %v318_v48 = vld [vmem:[%s867_s12 + $0x200] sm:$0xff] }
  0x44   : > { %481 = vmatpush.msrb.mxu1 %v348_v61  ;;  %454 = vmatpush.msra.mxu3 %v303_v11  ;;  %v334_v50 = vld [vmem:[%s867_s12 + $0x280] sm:$0xff] }
  0x45   : > { %462 = vmatpush.msrb.mxu0 %v331_v0  ;;  %505 = vmatpush.msrb.mxu2 %v360_v6  ;;  %v362_v52 = vld [vmem:[%s853_s8] sm:$0x1] }
  0x46   : > { %482 = vmatpush.msrb.mxu1 %v347_v1  ;;  %455 = vmatpush.msra.mxu3 %v302_v16 }
  0x47   : > { %463 = vmatpush.msrb.mxu0 %v330_v4  ;;  %506 = vmatpush.msrb.mxu2 %v359_v10 }
  0x48   : > { %483 = vmatpush.msrb.mxu1 %v346_v5  ;;  %396 = vmatmul.f32.vlgmr.msra.gmra.mxu0 %v364_v19 }
  0x49   : > { %464 = vmatpush.msrb.mxu0 %v329_v8  ;;  %507 = vmatpush.msrb.mxu2 %v358_v14 }
  0x4a   : > { %484 = vmatpush.msrb.mxu1 %v345_v9  ;;  %456 = vmatmul.f32.vlgmr.msra.gmra.mxu3 %v367_v23 }
  0x4b   : > { %465 = vmatpush.msrb.mxu0 %v328_v12  ;;  %508 = vmatpush.msrb.mxu2 %v357_v20 }
  0x4c   : > { %485 = vmatpush.msrb.mxu1 %v344_v13  ;;  %436 = vmatmul.f32.vlgmr.msra.gmra.mxu2 %v366_v32 }
  0x4d   : > { %466 = vmatpush.msrb.mxu0 %v327_v17  ;;  %509 = vmatpush.msrb.mxu2 %v356_v24 }
  0x4e   : > { %486 = vmatpush.msrb.mxu1 %v343_v18 }
  0x4f   : > { %467 = vmatpush.msrb.mxu0 %v326_v21  ;;  %510 = vmatpush.msrb.mxu2 %v355_v28 }
  0x50   : > { %487 = vmatpush.msrb.mxu1 %v342_v22 }
  0x51   : > { %468 = vmatpush.msrb.mxu0 %v325_v25  ;;  %416 = vmatmul.f32.vlgmr.msra.gmra.mxu1 %v365_v27 }
  0x52   : > { %488 = vmatpush.msrb.mxu1 %v341_v26  ;;  %511 = vmatpush.msrb.mxu2 %v354_v31 }
  0x53   : > { %469 = vmatpush.msrb.mxu0 %v324_v29 }
  0x54   : > { %489 = vmatpush.msrb.mxu1 %v340_v30  ;;  %512 = vmatpush.msrb.mxu2 %v353_v35 }
  0x55   : > { %470 = vmatpush.msrb.mxu0 %v323_v33 }
  0x56   : > { %490 = vmatpush.msrb.mxu1 %v339_v34  ;;  %513 = vmatpush.msrb.mxu2 %v352_v38 }
  0x57   : > { %471 = vmatpush.msrb.mxu0 %v322_v36 }
  0x58   : > { %491 = vmatpush.msrb.mxu1 %v338_v37  ;;  %514 = vmatpush.msrb.mxu2 %v351_v41 }
  0x59   : > { %472 = vmatpush.msrb.mxu0 %v321_v39 }
  0x5a   : > { %492 = vmatpush.msrb.mxu1 %v337_v40  ;;  %515 = vmatpush.msrb.mxu2 %v350_v44 }
  0x5b   : > { %473 = vmatpush.msrb.mxu0 %v320_v42  ;;  %630 = vmatmul.msk.f32.vlgmr.msrb.gmra.mxu2 %vm377_vm0, %v370_v45 }
  0x5c   : > { %493 = vmatpush.msrb.mxu1 %v336_v43 }
  0x5d   : > { %474 = vmatpush.msrb.mxu0 %v319_v46 }
  0x5e   : > { %494 = vmatpush.msrb.mxu1 %v335_v47 }
  0x5f   : > { %475 = vmatpush.msrb.mxu0 %v318_v48 }
  0x60   : > { %476 = vmatmul.f32.vlgmr.msrb.gmra.mxu0 %v368_v49  ;;  %495 = vmatpush.msrb.mxu1 %v334_v50 }
  0x61   : > { %496 = vmatmul.f32.vlgmr.msrb.gmra.mxu1 %v369_v51 }
  0xc5   : > { %v397_v53 = vpop.f32.mrf.mxu0 }
  0xc6   : > { %v398_v54 = vadd.f32 %v397_v53, %v362_v52 }
  0xcd   : > { %v457_v58 = vpop.f32.mrf.mxu3 }
  0xce   : > { %v417_v55 = vpop.f32.mrf.mxu1 }
  0xcf   : > { %v418_v56 = vadd.f32 %v417_v55, %v398_v54  ;;  %v437_v57 = vpop.f32.mrf.mxu2 }
  0xd1   : > { %v438_v59 = vadd.f32 %v437_v57, %v418_v56 }
  0xd3   : > { %v458_v60 = vadd.f32 %v457_v58, %v438_v59 }
  0xdd   : > { %v477_v61 = vpop.f32.mrf.mxu0 }
  0xde   : > { %v478_v62 = vadd.f32 %v477_v61, %v458_v60  ;;  %v497_v63 = vpop.f32.mrf.mxu1  ;;  %v517_v1 = vpop.f32.mrf.mxu2 }
  0xe0   : > { %v498_v0 = vadd.f32 %v497_v63, %v478_v62 }
  0xe2   : > { %v518_v2 = vadd.f32 %v517_v1, %v498_v0 }
  0xe4   : > { %520 = vst [vmem:[%s252_s26] sm:$0x1] %v518_v2 }
  0xe5 PF: > { %s16_s17 = sadd.s32 1, %s770_s17   ;;  %s1019_s12 = smov %s754_s13 }
  0xe6   : > { %p13_p0 = scmp.ge.s32.totalorder %s16_s17, 5   ;;  %s1020_s13 = smov %s758_s14 }
  0xe7   : > { %s1021_s14 = smov %s841_s24  ;;  %s1022_s15 = smov %s766_s16 }
  0xe8   : > { %s1023_s16 = smov %s1025_s19  ;;  %15 = sbr.rel (!%p13_p0) target bundleno = 4 (0x4), region = 78 }
  0xed   :  { %544 = vsyncpa [#allocation3], 1 }
  0xee   :  { %546 = vsyncpa [#allocation3 + $0x1], 1 }

// kernel: rinterp_forward.29
= control target key start
LH: loop header
LB: loop body
LE: loop exit
PB: predicated region body
PF: predicated region fallthrough
CT: control target
= control target key end

     0   :  { %8 = vsyncpa [#allocation3], 0  ;;  %s1014_s0 = inlined_call_operand.vmem [shape: f32[3,1,864], index: 0, kind: input, shape index: {}]   ;;  %s1015_s1 = inlined_call_operand.vmem [shape: f32[3,864,128], index: 1, kind: input, shape index: {}]   ;;  %s1016_s2 = inlined_call_operand.hbm [shape: f32[3,1,128], index: 2, kind: input, shape index: {}]   ;;  %s1017_s3 = inlined_call_operand.vmem [shape: f32[3,1,128], index: 3, kind: output, shape index: {}]  }
   0x1   :  { %10 = vsyncpa [#allocation3 + $0x1], 0  ;;  %s793_s12 = smov 0   ;;  %s795_s13 = smov 0  }
   0x2   :  { %s797_s14 = smov 0   ;;  %s799_s15 = smov 0  }
   0x3   :  { %s801_s16 = smov 0   ;;  %s803_s17 = smov 0  }
   0x4 LB: > { %s625_s18 = sadd.s32 4294967295, %s771_s17   ;;  %s28_s19 = sadd.s32 1, %s767_s16  ;;  %s771_s17 = sphi %s803_s17, %s16_s17   ;;  %s767_s16 = sphi %s801_s16, %s1024_s16   ;;  %s763_s15 = sphi %s799_s15, %s1023_s15   ;;  %s759_s14 = sphi %s797_s14, %s1022_s14   ;;  %s755_s13 = sphi %s795_s13, %s1021_s13   ;;  %s751_s12 = sphi %s793_s12, %s1020_s12  }
   0x5   : > { %p30_p0 = scmp.ge.s32.totalorder %s28_s19, 3  ;;  %s89_s20 = sadd.s32 1, %s759_s14 }
   0x6   : > { %p96_p1 = scmp.ne.s32.totalorder %s759_s14, %s755_s13  ;;  %p97_p2 = scmp.eq.s32.totalorder %s771_s17, 0 }
   0x7   : > { %s1026_s19 = smov (%p30_p0, %s28_s19), 0  ;;  %p102_p4 = scmp.ne.s32.totalorder %s755_s13, %s751_s12 }
   0x8   : > { %p829_p3 = por %p97_p2, %p96_p1  ;;  %s86_s22 = ssub.s32 %s767_s16, %s1026_s19 }
   0x9   : > { %p103_p5 = scmp.eq.s32.totalorder %s625_s18, 0  ;;  %p87_p6 = scmp.eq.s32.totalorder %s86_s22, 0 }
   0xa   : > { %p642_p8 = scmp.lt.s32.totalorder %s771_s17, 3  ;;  %s173_s25 = sand.u32 1, %s759_s14  }
   0xb   : > { %p836_p7 = por %p103_p5, %p102_p4  ;;  %s179_s28 = scalar_lea.hbm %s1016_s2, %s767_s16 }
   0xc   : > { %s842_s24 = scalar_select %p87_p6, %s759_s14, %s89_s20  }
   0xd   : > { %s181_s29 = sshll.u32 %s179_s28, 4  ;;  %s176_s30 = scalar_lea.vmem [#allocation2], %s173_s25  ;;  %s182_s29 = int_to_ptr.hbm [resolvable:$true] %s181_s29 }
   0xe   : > { %s183_s4 = sshll.u32 %s176_s30, 4  ;;  %p639_p9 = pnand %p642_p8, %p829_p3  ;;  %s184_s4 = int_to_ptr.vmem [resolvable:$true] %s183_s4 }
   0xf   : > { %p629_p10 = scmp.ge.s32.totalorder %s771_s17, 1  ;;  %p188_p11 = scmp.lt.s32.totalorder %s771_s17, 4 }
  0x10   : > { %s174_s5 = scalar_lea.sflag [#allocation3], %s173_s25 }
  0x11   : > { %641 = dma.hbm_to_vmem [thread:$0]  (!%p639_p9), %s182_s29, 16, %s184_s4, %s174_s5  }
  0x12   : > { %p189_p12 = pnand %p629_p10, %p188_p11 }
  0x13   : > { %s194_s6 = sand.u32 (!%p189_p12), 1, %s755_s13  }
  0x14   : > { %192 = sbr.rel (%p189_p12) target bundleno = 231 (0xe7), region = 32  ;;  %s195_s7 = scalar_lea.sflag (!%p189_p12), [#allocation3], %s194_s6 }
  0x15   : > { %s854_s8 = scalar_lea.vmem (!%p189_p12), [#allocation2], %s194_s6 }
  0x19   : > { %746 = dma.done.wait (%p836_p7), %s195_s7, 16  }
  0x1a   : > { %748 = vsyncadd (%p836_p7), %s195_s7, 4294967280  ;;  %p234_p13 = scmp.lt.s32.totalorder %s763_s15, 2  ;;  %vm377_vm0 = vcmask 785408  }
  0x1c   : > { %s1028_s15 = smov (!%p234_p13, %s763_s15), 2 }
  0x1d   : > { %s635_s9 = smul.u32 864, %s1028_s15  ;;  %s252_s26 = scalar_lea.vmem %s1017_s3, %s1028_s15 }
  0x1e   : > { %s634_s18 = smul.u32 7, %s1028_s15 }
  0x1f   : > { %s868_s12 = scalar_lea.vmem %s1015_s1, %s635_s9 }
  0x20   : > { %v269_v0 = vld [vmem:[%s868_s12 + $0x78] sm:$0xff]  ;;  %v268_v1 = vld [vmem:[%s868_s12 + $0x70] sm:$0xff]  ;;  %v267_v4 = vld [vmem:[%s868_s12 + $0x68] sm:$0xff]  ;;  %s241_s22 = scalar_lea.vmem %s1014_s0, %s634_s18 }
  0x21   : > { %v285_v2 = vld [vmem:[%s868_s12 + $0xf8] sm:$0xff]  ;;  %380 = vmatpush.msra.mxu0 %v269_v0  ;;  %v284_v3 = vld [vmem:[%s868_s12 + $0xf0] sm:$0xff]  ;;  %v283_v5 = vld [vmem:[%s868_s12 + $0xe8] sm:$0xff] }
  0x22   : > { %400 = vmatpush.msra.mxu1 %v285_v2  ;;  %v301_v6 = vld [vmem:[%s868_s12 + $0x178] sm:$0xff]  ;;  %v300_v7 = vld [vmem:[%s868_s12 + $0x170] sm:$0xff]  ;;  %v266_v8 = vld [vmem:[%s868_s12 + $0x60] sm:$0xff] }
  0x23   : > { %381 = vmatpush.msra.mxu0 %v268_v1  ;;  %420 = vmatpush.msra.mxu2 %v301_v6  ;;  %v282_v9 = vld [vmem:[%s868_s12 + $0xe0] sm:$0xff]  ;;  %v299_v10 = vld [vmem:[%s868_s12 + $0x168] sm:$0xff]  ;;  %v265_v11 = vld [vmem:[%s868_s12 + $0x58] sm:$0xff] }
  0x24   : > { %401 = vmatpush.msra.mxu1 %v284_v3  ;;  %v281_v12 = vld [vmem:[%s868_s12 + $0xd8] sm:$0xff]  ;;  %v298_v13 = vld [vmem:[%s868_s12 + $0x160] sm:$0xff]  ;;  %v264_v14 = vld [vmem:[%s868_s12 + $0x50] sm:$0xff] }
  0x25   : > { %382 = vmatpush.msra.mxu0 %v267_v4  ;;  %421 = vmatpush.msra.mxu2 %v300_v7  ;;  %v280_v15 = vld [vmem:[%s868_s12 + $0xd0] sm:$0xff]  ;;  %v297_v16 = vld [vmem:[%s868_s12 + $0x158] sm:$0xff]  ;;  %v263_v17 = vld [vmem:[%s868_s12 + $0x48] sm:$0xff] }
  0x26   : > { %402 = vmatpush.msra.mxu1 %v283_v5  ;;  %v279_v18 = vld [vmem:[%s868_s12 + $0xc8] sm:$0xff]  ;;  %v317_v19 = vld [vmem:[%s868_s12 + $0x1f8] sm:$0xff]  ;;  %v296_v20 = vld [vmem:[%s868_s12 + $0x150] sm:$0xff] }
  0x27   : > { %383 = vmatpush.msra.mxu0 %v266_v8  ;;  %422 = vmatpush.msra.mxu2 %v299_v10  ;;  %v262_v21 = vld [vmem:[%s868_s12 + $0x40] sm:$0xff]  ;;  %v316_v23 = vld [vmem:[%s868_s12 + $0x1f0] sm:$0xff]  ;;  %v295_v24 = vld [vmem:[%s868_s12 + $0x148] sm:$0xff] }
  0x28   : > { %403 = vmatpush.msra.mxu1 %v282_v9  ;;  %v278_v22 = vld [vmem:[%s868_s12 + $0xc0] sm:$0xff]  ;;  %440 = vmatpush.msra.mxu3 %v317_v19  ;;  %v315_v25 = vld [vmem:[%s868_s12 + $0x1e8] sm:$0xff]  ;;  %v261_v26 = vld [vmem:[%s868_s12 + $0x38] sm:$0xff] }
  0x29   : > { %384 = vmatpush.msra.mxu0 %v265_v11  ;;  %423 = vmatpush.msra.mxu2 %v298_v13  ;;  %v277_v27 = vld [vmem:[%s868_s12 + $0xb8] sm:$0xff]  ;;  %v294_v28 = vld [vmem:[%s868_s12 + $0x140] sm:$0xff]  ;;  %v260_v30 = vld [vmem:[%s868_s12 + $0x30] sm:$0xff] }
  0x2a   : > { %404 = vmatpush.msra.mxu1 %v281_v12  ;;  %441 = vmatpush.msra.mxu3 %v316_v23  ;;  %v314_v29 = vld [vmem:[%s868_s12 + $0x1e0] sm:$0xff]  ;;  %v276_v31 = vld [vmem:[%s868_s12 + $0xb0] sm:$0xff]  ;;  %v293_v32 = vld [vmem:[%s868_s12 + $0x138] sm:$0xff] }
  0x2b   : > { %385 = vmatpush.msra.mxu0 %v264_v14  ;;  %424 = vmatpush.msra.mxu2 %v297_v16  ;;  %v313_v33 = vld [vmem:[%s868_s12 + $0x1d8] sm:$0xff]  ;;  %v259_v34 = vld [vmem:[%s868_s12 + $0x28] sm:$0xff]  ;;  %v292_v36 = vld [vmem:[%s868_s12 + $0x130] sm:$0xff] }
  0x2c   : > { %405 = vmatpush.msra.mxu1 %v280_v15  ;;  %442 = vmatpush.msra.mxu3 %v315_v25  ;;  %v275_v35 = vld [vmem:[%s868_s12 + $0xa8] sm:$0xff]  ;;  %v312_v37 = vld [vmem:[%s868_s12 + $0x1d0] sm:$0xff]  ;;  %v258_v38 = vld [vmem:[%s868_s12 + $0x20] sm:$0xff] }
  0x2d   : > { %386 = vmatpush.msra.mxu0 %v263_v17  ;;  %425 = vmatpush.msra.mxu2 %v296_v20  ;;  %v274_v39 = vld [vmem:[%s868_s12 + $0xa0] sm:$0xff]  ;;  %v291_v40 = vld [vmem:[%s868_s12 + $0x128] sm:$0xff]  ;;  %v257_v42 = vld [vmem:[%s868_s12 + $0x18] sm:$0xff] }
  0x2e   : > { %406 = vmatpush.msra.mxu1 %v279_v18  ;;  %443 = vmatpush.msra.mxu3 %v314_v29  ;;  %v311_v41 = vld [vmem:[%s868_s12 + $0x1c8] sm:$0xff]  ;;  %v273_v43 = vld [vmem:[%s868_s12 + $0x98] sm:$0xff]  ;;  %v290_v44 = vld [vmem:[%s868_s12 + $0x120] sm:$0xff] }
  0x2f   : > { %387 = vmatpush.msra.mxu0 %v262_v21  ;;  %426 = vmatpush.msra.mxu2 %v295_v24  ;;  %v310_v45 = vld [vmem:[%s868_s12 + $0x1c0] sm:$0xff]  ;;  %v256_v46 = vld [vmem:[%s868_s12 + $0x10] sm:$0xff]  ;;  %v289_v48 = vld [vmem:[%s868_s12 + $0x118] sm:$0xff] }
  0x30   : > { %407 = vmatpush.msra.mxu1 %v278_v22  ;;  %444 = vmatpush.msra.mxu3 %v313_v33  ;;  %v272_v47 = vld [vmem:[%s868_s12 + $0x90] sm:$0xff]  ;;  %v309_v49 = vld [vmem:[%s868_s12 + $0x1b8] sm:$0xff]  ;;  %v255_v50 = vld [vmem:[%s868_s12 + $0x8] sm:$0xff] }
  0x31   : > { %388 = vmatpush.msra.mxu0 %v261_v26  ;;  %427 = vmatpush.msra.mxu2 %v294_v28  ;;  %v271_v51 = vld [vmem:[%s868_s12 + $0x88] sm:$0xff]  ;;  %v288_v52 = vld [vmem:[%s868_s12 + $0x110] sm:$0xff]  ;;  %v254_v54 = vld [vmem:[%s868_s12] sm:$0xff] }
  0x32   : > { %408 = vmatpush.msra.mxu1 %v277_v27  ;;  %445 = vmatpush.msra.mxu3 %v312_v37  ;;  %v308_v53 = vld [vmem:[%s868_s12 + $0x1b0] sm:$0xff]  ;;  %v270_v55 = vld [vmem:[%s868_s12 + $0x80] sm:$0xff]  ;;  %v333_v56 = vld [vmem:[%s868_s12 + $0x278] sm:$0xff] }
  0x33   : > { %389 = vmatpush.msra.mxu0 %v260_v30  ;;  %428 = vmatpush.msra.mxu2 %v293_v32  ;;  %v349_v57 = vld [vmem:[%s868_s12 + $0x2f8] sm:$0xff]  ;;  %v287_v58 = vld [vmem:[%s868_s12 + $0x108] sm:$0xff]  ;;  %v332_v60 = vld [vmem:[%s868_s12 + $0x270] sm:$0xff] }
  0x34   : > { %409 = vmatpush.msra.mxu1 %v276_v31  ;;  %446 = vmatpush.msra.mxu3 %v311_v41  ;;  %v307_v59 = vld [vmem:[%s868_s12 + $0x1a8] sm:$0xff]  ;;  %v348_v61 = vld [vmem:[%s868_s12 + $0x2f0] sm:$0xff]  ;;  %v286_v62 = vld [vmem:[%s868_s12 + $0x100] sm:$0xff] }
  0x35   : > { %390 = vmatpush.msra.mxu0 %v259_v34  ;;  %429 = vmatpush.msra.mxu2 %v292_v36  ;;  %v306_v63 = vld [vmem:[%s868_s12 + $0x1a0] sm:$0xff]  ;;  %v331_v0 = vld [vmem:[%s868_s12 + $0x268] sm:$0xff]  ;;  %v361_v2 = vld [vmem:[%s868_s12 + $0x358] sm:$0xff] }
  0x36   : > { %410 = vmatpush.msra.mxu1 %v275_v35  ;;  %447 = vmatpush.msra.mxu3 %v310_v45  ;;  %v347_v1 = vld [vmem:[%s868_s12 + $0x2e8] sm:$0xff]  ;;  %v305_v3 = vld [vmem:[%s868_s12 + $0x198] sm:$0xff]  ;;  %v330_v4 = vld [vmem:[%s868_s12 + $0x260] sm:$0xff] }
  0x37   : > { %391 = vmatpush.msra.mxu0 %v258_v38  ;;  %430 = vmatpush.msra.mxu2 %v291_v40  ;;  %v346_v5 = vld [vmem:[%s868_s12 + $0x2e0] sm:$0xff]  ;;  %v360_v6 = vld [vmem:[%s868_s12 + $0x350] sm:$0xff]  ;;  %v329_v8 = vld [vmem:[%s868_s12 + $0x258] sm:$0xff] }
  0x38   : > { %411 = vmatpush.msra.mxu1 %v274_v39  ;;  %448 = vmatpush.msra.mxu3 %v309_v49  ;;  %v304_v7 = vld [vmem:[%s868_s12 + $0x190] sm:$0xff]  ;;  %v345_v9 = vld [vmem:[%s868_s12 + $0x2d8] sm:$0xff]  ;;  %v359_v10 = vld [vmem:[%s868_s12 + $0x348] sm:$0xff] }
  0x39   : > { %392 = vmatpush.msra.mxu0 %v257_v42  ;;  %431 = vmatpush.msra.mxu2 %v290_v44  ;;  %v303_v11 = vld [vmem:[%s868_s12 + $0x188] sm:$0xff]  ;;  %v328_v12 = vld [vmem:[%s868_s12 + $0x250] sm:$0xff]  ;;  %v358_v14 = vld [vmem:[%s868_s12 + $0x340] sm:$0xff] }
  0x3a   : > { %412 = vmatpush.msra.mxu1 %v273_v43  ;;  %449 = vmatpush.msra.mxu3 %v308_v53  ;;  %v344_v13 = vld [vmem:[%s868_s12 + $0x2d0] sm:$0xff]  ;;  %v953_v15 = vld [vmem:[%s241_s22] sm:$0x7f]  ;;  %v327_v17 = vld [vmem:[%s868_s12 + $0x248] sm:$0xff] }
  0x3b   : > { %393 = vmatpush.msra.mxu0 %v256_v46  ;;  %432 = vmatpush.msra.mxu2 %v289_v48  ;;  %v302_v16 = vld [vmem:[%s868_s12 + $0x180] sm:$0xff]  ;;  %v343_v18 = vld [vmem:[%s868_s12 + $0x2c8] sm:$0xff]  ;;  %v364_v19 = vperm.slane %v953_v15, 0  ;;  %v357_v20 = vld [vmem:[%s868_s12 + $0x338] sm:$0xff]  ;;  %v367_v23 = vperm.slane %v953_v15, 3  ;;  %v365_v27 = vperm.slane %v953_v15, 1 }
  0x3c   : > { %413 = vmatpush.msra.mxu1 %v272_v47  ;;  %450 = vmatpush.msra.mxu3 %v307_v59  ;;  %v326_v21 = vld [vmem:[%s868_s12 + $0x240] sm:$0xff]  ;;  %v356_v24 = vld [vmem:[%s868_s12 + $0x330] sm:$0xff]  ;;  %v325_v25 = vld [vmem:[%s868_s12 + $0x238] sm:$0xff]  ;;  %v366_v32 = vperm.slane %v953_v15, 2  ;;  %v370_v45 = vperm.slane %v953_v15, 6  ;;  %v368_v49 = vperm.slane %v953_v15, 4 }
  0x3d   : > { %394 = vmatpush.msra.mxu0 %v255_v50  ;;  %433 = vmatpush.msra.mxu2 %v288_v52  ;;  %v342_v22 = vld [vmem:[%s868_s12 + $0x2c0] sm:$0xff]  ;;  %v341_v26 = vld [vmem:[%s868_s12 + $0x2b8] sm:$0xff]  ;;  %v355_v28 = vld [vmem:[%s868_s12 + $0x328] sm:$0xff] }
  0x3e   : > { %414 = vmatpush.msra.mxu1 %v271_v51  ;;  %451 = vmatpush.msra.mxu3 %v306_v63  ;;  %v324_v29 = vld [vmem:[%s868_s12 + $0x230] sm:$0xff]  ;;  %v354_v31 = vld [vmem:[%s868_s12 + $0x320] sm:$0xff]  ;;  %v323_v33 = vld [vmem:[%s868_s12 + $0x228] sm:$0xff]  ;;  %v369_v51 = vperm.slane %v953_v15, 5 }
  0x3f   : > { %395 = vmatpush.msra.mxu0 %v254_v54  ;;  %434 = vmatpush.msra.mxu2 %v287_v58  ;;  %v340_v30 = vld [vmem:[%s868_s12 + $0x2b0] sm:$0xff]  ;;  %v339_v34 = vld [vmem:[%s868_s12 + $0x2a8] sm:$0xff]  ;;  %v353_v35 = vld [vmem:[%s868_s12 + $0x318] sm:$0xff] }
  0x40   : > { %415 = vmatpush.msra.mxu1 %v270_v55  ;;  %452 = vmatpush.msra.mxu3 %v305_v3  ;;  %v322_v36 = vld [vmem:[%s868_s12 + $0x220] sm:$0xff]  ;;  %v352_v38 = vld [vmem:[%s868_s12 + $0x310] sm:$0xff]  ;;  %v321_v39 = vld [vmem:[%s868_s12 + $0x218] sm:$0xff] }
  0x41   : > { %460 = vmatpush.msrb.mxu0 %v333_v56  ;;  %435 = vmatpush.msra.mxu2 %v286_v62  ;;  %v338_v37 = vld [vmem:[%s868_s12 + $0x2a0] sm:$0xff]  ;;  %v337_v40 = vld [vmem:[%s868_s12 + $0x298] sm:$0xff]  ;;  %v351_v41 = vld [vmem:[%s868_s12 + $0x308] sm:$0xff] }
  0x42   : > { %480 = vmatpush.msrb.mxu1 %v349_v57  ;;  %453 = vmatpush.msra.mxu3 %v304_v7  ;;  %v320_v42 = vld [vmem:[%s868_s12 + $0x210] sm:$0xff]  ;;  %v350_v44 = vld [vmem:[%s868_s12 + $0x300] sm:$0xff]  ;;  %v319_v46 = vld [vmem:[%s868_s12 + $0x208] sm:$0xff] }
  0x43   : > { %461 = vmatpush.msrb.mxu0 %v332_v60  ;;  %504 = vmatpush.msrb.mxu2 %v361_v2  ;;  %v336_v43 = vld [vmem:[%s868_s12 + $0x290] sm:$0xff]  ;;  %v335_v47 = vld [vmem:[%s868_s12 + $0x288] sm:$0xff]  ;;  %v318_v48 = vld [vmem:[%s868_s12 + $0x200] sm:$0xff] }
  0x44   : > { %481 = vmatpush.msrb.mxu1 %v348_v61  ;;  %454 = vmatpush.msra.mxu3 %v303_v11  ;;  %v334_v50 = vld [vmem:[%s868_s12 + $0x280] sm:$0xff] }
  0x45   : > { %462 = vmatpush.msrb.mxu0 %v331_v0  ;;  %505 = vmatpush.msrb.mxu2 %v360_v6  ;;  %v362_v52 = vld [vmem:[%s854_s8] sm:$0x1] }
  0x46   : > { %482 = vmatpush.msrb.mxu1 %v347_v1  ;;  %455 = vmatpush.msra.mxu3 %v302_v16 }
  0x47   : > { %463 = vmatpush.msrb.mxu0 %v330_v4  ;;  %506 = vmatpush.msrb.mxu2 %v359_v10 }
  0x48   : > { %483 = vmatpush.msrb.mxu1 %v346_v5  ;;  %396 = vmatmul.f32.vlgmr.msra.gmra.mxu0 %v364_v19 }
  0x49   : > { %464 = vmatpush.msrb.mxu0 %v329_v8  ;;  %507 = vmatpush.msrb.mxu2 %v358_v14 }
  0x4a   : > { %484 = vmatpush.msrb.mxu1 %v345_v9  ;;  %456 = vmatmul.f32.vlgmr.msra.gmra.mxu3 %v367_v23 }
  0x4b   : > { %465 = vmatpush.msrb.mxu0 %v328_v12  ;;  %508 = vmatpush.msrb.mxu2 %v357_v20 }
  0x4c   : > { %485 = vmatpush.msrb.mxu1 %v344_v13  ;;  %436 = vmatmul.f32.vlgmr.msra.gmra.mxu2 %v366_v32 }
  0x4d   : > { %466 = vmatpush.msrb.mxu0 %v327_v17  ;;  %509 = vmatpush.msrb.mxu2 %v356_v24 }
  0x4e   : > { %486 = vmatpush.msrb.mxu1 %v343_v18 }
  0x4f   : > { %467 = vmatpush.msrb.mxu0 %v326_v21  ;;  %510 = vmatpush.msrb.mxu2 %v355_v28 }
  0x50   : > { %487 = vmatpush.msrb.mxu1 %v342_v22 }
  0x51   : > { %468 = vmatpush.msrb.mxu0 %v325_v25  ;;  %416 = vmatmul.f32.vlgmr.msra.gmra.mxu1 %v365_v27 }
  0x52   : > { %488 = vmatpush.msrb.mxu1 %v341_v26  ;;  %511 = vmatpush.msrb.mxu2 %v354_v31 }
  0x53   : > { %469 = vmatpush.msrb.mxu0 %v324_v29 }
  0x54   : > { %489 = vmatpush.msrb.mxu1 %v340_v30  ;;  %512 = vmatpush.msrb.mxu2 %v353_v35 }
  0x55   : > { %470 = vmatpush.msrb.mxu0 %v323_v33 }
  0x56   : > { %490 = vmatpush.msrb.mxu1 %v339_v34  ;;  %513 = vmatpush.msrb.mxu2 %v352_v38 }
  0x57   : > { %471 = vmatpush.msrb.mxu0 %v322_v36 }
  0x58   : > { %491 = vmatpush.msrb.mxu1 %v338_v37  ;;  %514 = vmatpush.msrb.mxu2 %v351_v41 }
  0x59   : > { %472 = vmatpush.msrb.mxu0 %v321_v39 }
  0x5a   : > { %492 = vmatpush.msrb.mxu1 %v337_v40  ;;  %515 = vmatpush.msrb.mxu2 %v350_v44 }
  0x5b   : > { %473 = vmatpush.msrb.mxu0 %v320_v42  ;;  %631 = vmatmul.msk.f32.vlgmr.msrb.gmra.mxu2 %vm377_vm0, %v370_v45 }
  0x5c   : > { %493 = vmatpush.msrb.mxu1 %v336_v43 }
  0x5d   : > { %474 = vmatpush.msrb.mxu0 %v319_v46 }
  0x5e   : > { %494 = vmatpush.msrb.mxu1 %v335_v47 }
  0x5f   : > { %475 = vmatpush.msrb.mxu0 %v318_v48 }
  0x60   : > { %476 = vmatmul.f32.vlgmr.msrb.gmra.mxu0 %v368_v49  ;;  %495 = vmatpush.msrb.mxu1 %v334_v50 }
  0x61   : > { %496 = vmatmul.f32.vlgmr.msrb.gmra.mxu1 %v369_v51 }
  0xc5   : > { %v397_v53 = vpop.f32.mrf.mxu0 }
  0xc6   : > { %v398_v54 = vadd.f32 %v397_v53, %v362_v52 }
  0xcd   : > { %v457_v58 = vpop.f32.mrf.mxu3 }
  0xce   : > { %v417_v55 = vpop.f32.mrf.mxu1 }
  0xcf   : > { %v418_v56 = vadd.f32 %v417_v55, %v398_v54  ;;  %v437_v57 = vpop.f32.mrf.mxu2 }
  0xd1   : > { %v438_v59 = vadd.f32 %v437_v57, %v418_v56 }
  0xd3   : > { %v458_v60 = vadd.f32 %v457_v58, %v438_v59 }
  0xdd   : > { %v477_v61 = vpop.f32.mrf.mxu0 }
  0xde   : > { %v478_v62 = vadd.f32 %v477_v61, %v458_v60  ;;  %v497_v63 = vpop.f32.mrf.mxu1  ;;  %v517_v1 = vpop.f32.mrf.mxu2 }
  0xe0   : > { %v498_v0 = vadd.f32 %v497_v63, %v478_v62 }
  0xe2   : > { %v518_v2 = vadd.f32 %v517_v1, %v498_v0 }
  0xe4   : > { %v520_v3 = vmax.f32 %v518_v2, 0.0 }
  0xe6   : > { %521 = vst [vmem:[%s252_s26] sm:$0x1] %v520_v3 }
  0xe7 PF: > { %s16_s17 = sadd.s32 1, %s771_s17   ;;  %s1020_s12 = smov %s755_s13 }
  0xe8   : > { %p13_p0 = scmp.ge.s32.totalorder %s16_s17, 5   ;;  %s1021_s13 = smov %s759_s14 }
  0xe9   : > { %s1022_s14 = smov %s842_s24  ;;  %s1023_s15 = smov %s767_s16 }
  0xea   : > { %s1024_s16 = smov %s1026_s19  ;;  %15 = sbr.rel (!%p13_p0) target bundleno = 4 (0x4), region = 78 }
  0xef   :  { %545 = vsyncpa [#allocation3], 1 }
  0xf0   :  { %547 = vsyncpa [#allocation3 + $0x1], 1 }

// kernel: rinterp_forward.38
= control target key start
LH: loop header
LB: loop body
LE: loop exit
PB: predicated region body
PF: predicated region fallthrough
CT: control target
= control target key end

     0   :  { %11 = vsyncpa [#allocation3], 0  ;;  %s1514_s0 = inlined_call_operand.vmem [shape: f32[3,1,1728], index: 0, kind: input, shape index: {}]   ;;  %s1515_s1 = inlined_call_operand.vmem [shape: f32[3,1728,128], index: 1, kind: input, shape index: {}]   ;;  %s1516_s2 = inlined_call_operand.hbm [shape: f32[3,1,128], index: 2, kind: input, shape index: {}]   ;;  %s1517_s3 = inlined_call_operand.vmem [shape: f32[3,1,32], index: 3, kind: input, shape index: {}]   ;;  %s1518_s4 = inlined_call_operand.vmem [shape: f32[3,1,32], index: 4, kind: output, shape index: {0}]   ;;  %s1519_s5 = inlined_call_operand.vmem [shape: f32[3,1,32], index: 5, kind: output, shape index: {1}]  }
   0x1   :  { %13 = vsyncpa [#allocation3 + $0x1], 0  ;;  %s1155_s18 = smov 0   ;;  %s1157_s19 = smov 0  }
   0x2   :  { %s1159_s20 = smov 0   ;;  %s1161_s21 = smov 0  }
   0x3 LB: > { %s1174_s22 = sadd.s32 4294967295, %s1120_s21   ;;  %s1177_s23 = sadd.s32 1, %s1120_s21   ;;  %s1120_s21 = sphi %s1161_s21, %s1525_s21   ;;  %s1116_s20 = sphi %s1159_s20, %s1524_s20   ;;  %s1112_s19 = sphi %s1157_s19, %s1523_s19   ;;  %s1108_s18 = sphi %s1155_s18, %s1522_s18  }
   0x4   : > { %s75_s24 = ssub.s32 %s1120_s21, %s1177_s23  ;;  %s78_s25 = sadd.s32 1, %s1116_s20 }
   0x5   : > { %p76_p0 = scmp.eq.s32.totalorder %s75_s24, 0  ;;  %p85_p1 = scmp.ne.s32.totalorder %s1116_s20, %s1112_s19 }
   0x6   : > { %p86_p2 = scmp.eq.s32.totalorder %s1120_s21, 0  ;;  %p91_p3 = scmp.ne.s32.totalorder %s1112_s19, %s1108_s18 }
   0x7   : > { %s1187_s26 = scalar_select %p76_p0, %s1116_s20, %s78_s25  }
   0x8   : > { %p87_p4 = por %p86_p2, %p85_p1  ;;  %p92_p5 = scmp.eq.s32.totalorder %s1174_s22, 0 }
   0x9   : > { %p1011_p6 = scmp.lt.s32.totalorder %s1120_s21, 3  ;;  %s208_s28 = sand.u32 1, %s1116_s20  }
   0xa   : > { %p1191_p7 = por %p92_p5, %p91_p3  ;;  %s214_s6 = scalar_lea.hbm %s1516_s2, %s1120_s21 }
   0xb   : > { %s211_s7 = scalar_lea.vmem [#allocation2], %s208_s28  ;;  %s216_s9 = sshll.u32 %s214_s6, 4  ;;  %s217_s9 = int_to_ptr.hbm [resolvable:$true] %s216_s9 }
   0xc   : > { %s218_s8 = sshll.u32 %s211_s7, 4  ;;  %p1200_p8 = pnand %p1011_p6, %p87_p4  ;;  %s219_s8 = int_to_ptr.vmem [resolvable:$true] %s218_s8 }
   0xd   : > { %p997_p9 = scmp.ge.s32.totalorder %s1120_s21, 1  ;;  %p229_p10 = scmp.lt.s32.totalorder %s1120_s21, 4 }
   0xe   : > { %s209_s11 = scalar_lea.sflag [#allocation3], %s208_s28  ;;  %s1056_s12 = sshra.s32 %s217_s9, 4  ;;  %s1057_s12 = int_to_ptr.hbm [resolvable:$true] %s1056_s12 }
   0xf   : > { %s1058_s13 = scalar_lea.hbm %s1057_s12, 1  ;;  %p1060_p12 = pneg %p1200_p8 }
  0x10   : > { %p1059_p11 = scmp.ne.s32.totalorder %s1057_s12, %s1058_s13  ;;  %s1063_s16 = scalar_lea.hbm %s1516_s2, 3 }
  0x11   : > { %p1064_p1 = scmp.lt.s32.totalorder %s1057_s12, %s1516_s2  ;;  %p1065_p2 = scmp.lt.s32.totalorder %s1063_s16, %s1058_s13 }
  0x12   : > { %p1061_p13 = pnand %p1060_p12, %p1059_p11 }
  0x13   : > { %p1066_p3 = por %p1065_p2, %p1064_p1 }
  0x14   : > { %p1062_p0 = pneg %p1061_p13 }
  0x16   : > { %p1067_p4 = pnand %p1066_p3, %p1062_p0 }
  0x18   : > { %1070 = shalt.err (!%p1067_p4)
}
  0x19   : > { %1010 = dma.hbm_to_vmem [thread:$0]  (!%p1200_p8), %s217_s9, 16, %s219_s8, %s209_s11  }
  0x1a   : > { %p230_p5 = pnand %p997_p9, %p229_p10 }
  0x1b   : > { %s235_s24 = sand.u32 (!%p230_p5), 1, %s1112_s19  }
  0x1c   : > { %233 = sbr.rel (%p230_p5) target bundleno = 760 (0x2f8), region = 36  ;;  %s236_s25 = scalar_lea.sflag (!%p230_p5), [#allocation3], %s235_s24 }
  0x1d   : > { %s1221_s28 = scalar_lea.vmem (!%p230_p5), [#allocation2], %s235_s24 }
  0x21   : > { %1103 = dma.done.wait (%p1191_p7), %s236_s25, 16  }
  0x22   : > { %1105 = vsyncadd (%p1191_p7), %s236_s25, 4294967280  ;;  %p278_p6 = scmp.lt.s32.totalorder %s1174_s22, 2  ;;  %vm544_vm0 = vcmask 523264   ;;  %s1122_s13 = smov 32   ;;  %vm868_vm5 = vcmask 253952  }
  0x23   : > { %s1123_s16 = smov 96   ;;  %s1124_s25 = smov 64  }
  0x24   : > { %s1527_s22 = smov (!%p278_p6, %s1174_s22), 2 }
  0x25   : > { %s1004_s21 = smul.u32 1728, %s1527_s22  ;;  %s289_s12 = scalar_lea.vmem %s1517_s3, %s1527_s22 }
  0x26   : > { %s1003_s27 = smul.u32 14, %s1527_s22  ;;  %s295_s24 = scalar_lea.vmem %s1519_s5, %s1527_s22 }
  0x27   : > { %s1235_s6 = scalar_lea.vmem %s1515_s1, %s1004_s21  ;;  %s292_s29 = scalar_lea.vmem %s1518_s4, %s1527_s22 }
  0x28   : > { %v313_v0 = vld [vmem:[%s1235_s6 + $0x78] sm:$0xff]  ;;  %v312_v2 = vld [vmem:[%s1235_s6 + $0x70] sm:$0xff]  ;;  %v311_v6 = vld [vmem:[%s1235_s6 + $0x68] sm:$0xff]  ;;  %s1351_s9 = scalar_lea.vmem %s1514_s0, %s1003_s27 }
  0x29   : > { %v345_v1 = vld [vmem:[%s1235_s6 + $0x178] sm:$0xff]  ;;  %547 = vmatpush.msra.mxu0 %v313_v0  ;;  %v344_v4 = vld [vmem:[%s1235_s6 + $0x170] sm:$0xff]  ;;  %v343_v8 = vld [vmem:[%s1235_s6 + $0x168] sm:$0xff] }
  0x2a   : > { %587 = vmatpush.msra.mxu2 %v345_v1  ;;  %v329_v3 = vld [vmem:[%s1235_s6 + $0xf8] sm:$0xff]  ;;  %v328_v7 = vld [vmem:[%s1235_s6 + $0xf0] sm:$0xff]  ;;  %v327_v10 = vld [vmem:[%s1235_s6 + $0xe8] sm:$0xff] }
  0x2b   : > { %v361_v5 = vld [vmem:[%s1235_s6 + $0x1f8] sm:$0xff]  ;;  %567 = vmatpush.msra.mxu1 %v329_v3  ;;  %548 = vmatpush.msra.mxu0 %v312_v2  ;;  %v360_v9 = vld [vmem:[%s1235_s6 + $0x1f0] sm:$0xff]  ;;  %v310_v11 = vld [vmem:[%s1235_s6 + $0x60] sm:$0xff] }
  0x2c   : > { %607 = vmatpush.msra.mxu3 %v361_v5  ;;  %588 = vmatpush.msra.mxu2 %v344_v4  ;;  %v342_v12 = vld [vmem:[%s1235_s6 + $0x160] sm:$0xff]  ;;  %v359_v13 = vld [vmem:[%s1235_s6 + $0x1e8] sm:$0xff]  ;;  %v309_v16 = vld [vmem:[%s1235_s6 + $0x58] sm:$0xff] }
  0x2d   : > { %568 = vmatpush.msra.mxu1 %v328_v7  ;;  %549 = vmatpush.msra.mxu0 %v311_v6  ;;  %v326_v14 = vld [vmem:[%s1235_s6 + $0xe0] sm:$0xff]  ;;  %v341_v17 = vld [vmem:[%s1235_s6 + $0x158] sm:$0xff]  ;;  %v308_v20 = vld [vmem:[%s1235_s6 + $0x50] sm:$0xff] }
  0x2e   : > { %608 = vmatpush.msra.mxu3 %v360_v9  ;;  %589 = vmatpush.msra.mxu2 %v343_v8  ;;  %v358_v15 = vld [vmem:[%s1235_s6 + $0x1e0] sm:$0xff]  ;;  %v325_v18 = vld [vmem:[%s1235_s6 + $0xd8] sm:$0xff]  ;;  %v340_v21 = vld [vmem:[%s1235_s6 + $0x150] sm:$0xff] }
  0x2f   : > { %569 = vmatpush.msra.mxu1 %v327_v10  ;;  %550 = vmatpush.msra.mxu0 %v310_v11  ;;  %v357_v19 = vld [vmem:[%s1235_s6 + $0x1d8] sm:$0xff]  ;;  %v324_v22 = vld [vmem:[%s1235_s6 + $0xd0] sm:$0xff]  ;;  %v307_v24 = vld [vmem:[%s1235_s6 + $0x48] sm:$0xff] }
  0x30   : > { %609 = vmatpush.msra.mxu3 %v359_v13  ;;  %590 = vmatpush.msra.mxu2 %v342_v12  ;;  %v356_v23 = vld [vmem:[%s1235_s6 + $0x1d0] sm:$0xff]  ;;  %v339_v25 = vld [vmem:[%s1235_s6 + $0x148] sm:$0xff]  ;;  %v306_v28 = vld [vmem:[%s1235_s6 + $0x40] sm:$0xff] }
  0x31   : > { %570 = vmatpush.msra.mxu1 %v326_v14  ;;  %551 = vmatpush.msra.mxu0 %v309_v16  ;;  %v323_v26 = vld [vmem:[%s1235_s6 + $0xc8] sm:$0xff]  ;;  %v338_v29 = vld [vmem:[%s1235_s6 + $0x140] sm:$0xff]  ;;  %v305_v32 = vld [vmem:[%s1235_s6 + $0x38] sm:$0xff] }
  0x32   : > { %610 = vmatpush.msra.mxu3 %v358_v15  ;;  %591 = vmatpush.msra.mxu2 %v341_v17  ;;  %v355_v27 = vld [vmem:[%s1235_s6 + $0x1c8] sm:$0xff]  ;;  %v322_v30 = vld [vmem:[%s1235_s6 + $0xc0] sm:$0xff]  ;;  %v337_v33 = vld [vmem:[%s1235_s6 + $0x138] sm:$0xff] }
  0x33   : > { %571 = vmatpush.msra.mxu1 %v325_v18  ;;  %552 = vmatpush.msra.mxu0 %v308_v20  ;;  %v354_v31 = vld [vmem:[%s1235_s6 + $0x1c0] sm:$0xff]  ;;  %v321_v34 = vld [vmem:[%s1235_s6 + $0xb8] sm:$0xff]  ;;  %v304_v36 = vld [vmem:[%s1235_s6 + $0x30] sm:$0xff] }
  0x34   : > { %611 = vmatpush.msra.mxu3 %v357_v19  ;;  %592 = vmatpush.msra.mxu2 %v340_v21  ;;  %v353_v35 = vld [vmem:[%s1235_s6 + $0x1b8] sm:$0xff]  ;;  %v336_v37 = vld [vmem:[%s1235_s6 + $0x130] sm:$0xff]  ;;  %v303_v40 = vld [vmem:[%s1235_s6 + $0x28] sm:$0xff] }
  0x35   : > { %572 = vmatpush.msra.mxu1 %v324_v22  ;;  %553 = vmatpush.msra.mxu0 %v307_v24  ;;  %v320_v38 = vld [vmem:[%s1235_s6 + $0xb0] sm:$0xff]  ;;  %v335_v41 = vld [vmem:[%s1235_s6 + $0x128] sm:$0xff]  ;;  %v302_v44 = vld [vmem:[%s1235_s6 + $0x20] sm:$0xff] }
  0x36   : > { %612 = vmatpush.msra.mxu3 %v356_v23  ;;  %593 = vmatpush.msra.mxu2 %v339_v25  ;;  %v352_v39 = vld [vmem:[%s1235_s6 + $0x1b0] sm:$0xff]  ;;  %v319_v42 = vld [vmem:[%s1235_s6 + $0xa8] sm:$0xff]  ;;  %v334_v45 = vld [vmem:[%s1235_s6 + $0x120] sm:$0xff] }
  0x37   : > { %573 = vmatpush.msra.mxu1 %v323_v26  ;;  %554 = vmatpush.msra.mxu0 %v306_v28  ;;  %v351_v43 = vld [vmem:[%s1235_s6 + $0x1a8] sm:$0xff]  ;;  %v318_v46 = vld [vmem:[%s1235_s6 + $0xa0] sm:$0xff]  ;;  %v301_v48 = vld [vmem:[%s1235_s6 + $0x18] sm:$0xff] }
  0x38   : > { %613 = vmatpush.msra.mxu3 %v355_v27  ;;  %594 = vmatpush.msra.mxu2 %v338_v29  ;;  %v350_v47 = vld [vmem:[%s1235_s6 + $0x1a0] sm:$0xff]  ;;  %v333_v49 = vld [vmem:[%s1235_s6 + $0x118] sm:$0xff]  ;;  %v300_v52 = vld [vmem:[%s1235_s6 + $0x10] sm:$0xff] }
  0x39   : > { %574 = vmatpush.msra.mxu1 %v322_v30  ;;  %555 = vmatpush.msra.mxu0 %v305_v32  ;;  %v317_v50 = vld [vmem:[%s1235_s6 + $0x98] sm:$0xff]  ;;  %v332_v53 = vld [vmem:[%s1235_s6 + $0x110] sm:$0xff]  ;;  %v299_v56 = vld [vmem:[%s1235_s6 + $0x8] sm:$0xff] }
  0x3a   : > { %614 = vmatpush.msra.mxu3 %v354_v31  ;;  %595 = vmatpush.msra.mxu2 %v337_v33  ;;  %v349_v51 = vld [vmem:[%s1235_s6 + $0x198] sm:$0xff]  ;;  %v316_v54 = vld [vmem:[%s1235_s6 + $0x90] sm:$0xff]  ;;  %v331_v57 = vld [vmem:[%s1235_s6 + $0x108] sm:$0xff] }
  0x3b   : > { %575 = vmatpush.msra.mxu1 %v321_v34  ;;  %556 = vmatpush.msra.mxu0 %v304_v36  ;;  %v348_v55 = vld [vmem:[%s1235_s6 + $0x190] sm:$0xff]  ;;  %v315_v58 = vld [vmem:[%s1235_s6 + $0x88] sm:$0xff]  ;;  %v298_v60 = vld [vmem:[%s1235_s6] sm:$0xff] }
  0x3c   : > { %615 = vmatpush.msra.mxu3 %v353_v35  ;;  %596 = vmatpush.msra.mxu2 %v336_v37  ;;  %v347_v59 = vld [vmem:[%s1235_s6 + $0x188] sm:$0xff]  ;;  %v330_v61 = vld [vmem:[%s1235_s6 + $0x100] sm:$0xff]  ;;  %v377_v62 = vld [vmem:[%s1235_s6 + $0x278] sm:$0xff] }
  0x3d   : > { %576 = vmatpush.msra.mxu1 %v320_v38  ;;  %557 = vmatpush.msra.mxu0 %v303_v40  ;;  %v409_v63 = vld [vmem:[%s1235_s6 + $0x378] sm:$0xff]  ;;  %v314_v0 = vld [vmem:[%s1235_s6 + $0x80] sm:$0xff]  ;;  %v376_v2 = vld [vmem:[%s1235_s6 + $0x270] sm:$0xff] }
  0x3e   : > { %616 = vmatpush.msra.mxu3 %v352_v39  ;;  %597 = vmatpush.msra.mxu2 %v335_v41  ;;  %v346_v1 = vld [vmem:[%s1235_s6 + $0x180] sm:$0xff]  ;;  %v393_v3 = vld [vmem:[%s1235_s6 + $0x2f8] sm:$0xff]  ;;  %v408_v4 = vld [vmem:[%s1235_s6 + $0x370] sm:$0xff] }
  0x3f   : > { %577 = vmatpush.msra.mxu1 %v319_v42  ;;  %558 = vmatpush.msra.mxu0 %v302_v44  ;;  %v425_v5 = vld [vmem:[%s1235_s6 + $0x3f8] sm:$0xff]  ;;  %v375_v6 = vld [vmem:[%s1235_s6 + $0x268] sm:$0xff]  ;;  %v392_v7 = vld [vmem:[%s1235_s6 + $0x2f0] sm:$0xff] }
  0x40   : > { %617 = vmatpush.msra.mxu3 %v351_v43  ;;  %598 = vmatpush.msra.mxu2 %v334_v45  ;;  %v407_v8 = vld [vmem:[%s1235_s6 + $0x368] sm:$0xff]  ;;  %v424_v9 = vld [vmem:[%s1235_s6 + $0x3f0] sm:$0xff]  ;;  %v374_v10 = vld [vmem:[%s1235_s6 + $0x260] sm:$0xff] }
  0x41   : > { %578 = vmatpush.msra.mxu1 %v318_v46  ;;  %559 = vmatpush.msra.mxu0 %v301_v48  ;;  %v391_v11 = vld [vmem:[%s1235_s6 + $0x2e8] sm:$0xff]  ;;  %v406_v12 = vld [vmem:[%s1235_s6 + $0x360] sm:$0xff]  ;;  %v373_v14 = vld [vmem:[%s1235_s6 + $0x258] sm:$0xff] }
  0x42   : > { %618 = vmatpush.msra.mxu3 %v350_v47  ;;  %599 = vmatpush.msra.mxu2 %v333_v49  ;;  %v423_v13 = vld [vmem:[%s1235_s6 + $0x3e8] sm:$0xff]  ;;  %v390_v15 = vld [vmem:[%s1235_s6 + $0x2e0] sm:$0xff]  ;;  %v405_v16 = vld [vmem:[%s1235_s6 + $0x358] sm:$0xff] }
  0x43   : > { %579 = vmatpush.msra.mxu1 %v317_v50  ;;  %560 = vmatpush.msra.mxu0 %v300_v52  ;;  %v422_v17 = vld [vmem:[%s1235_s6 + $0x3e0] sm:$0xff]  ;;  %v372_v18 = vld [vmem:[%s1235_s6 + $0x250] sm:$0xff]  ;;  %v389_v19 = vld [vmem:[%s1235_s6 + $0x2d8] sm:$0xff] }
  0x44   : > { %619 = vmatpush.msra.mxu3 %v349_v51  ;;  %600 = vmatpush.msra.mxu2 %v332_v53  ;;  %v404_v20 = vld [vmem:[%s1235_s6 + $0x350] sm:$0xff]  ;;  %v421_v21 = vld [vmem:[%s1235_s6 + $0x3d8] sm:$0xff]  ;;  %v371_v22 = vld [vmem:[%s1235_s6 + $0x248] sm:$0xff] }
  0x45   : > { %580 = vmatpush.msra.mxu1 %v316_v54  ;;  %561 = vmatpush.msra.mxu0 %v299_v56  ;;  %v388_v23 = vld [vmem:[%s1235_s6 + $0x2d0] sm:$0xff]  ;;  %v403_v24 = vld [vmem:[%s1235_s6 + $0x348] sm:$0xff]  ;;  %v370_v26 = vld [vmem:[%s1235_s6 + $0x240] sm:$0xff] }
  0x46   : > { %620 = vmatpush.msra.mxu3 %v348_v55  ;;  %601 = vmatpush.msra.mxu2 %v331_v57  ;;  %v420_v25 = vld [vmem:[%s1235_s6 + $0x3d0] sm:$0xff]  ;;  %v387_v27 = vld [vmem:[%s1235_s6 + $0x2c8] sm:$0xff]  ;;  %v402_v28 = vld [vmem:[%s1235_s6 + $0x340] sm:$0xff] }
  0x47   : > { %581 = vmatpush.msra.mxu1 %v315_v58  ;;  %562 = vmatpush.msra.mxu0 %v298_v60  ;;  %v419_v29 = vld [vmem:[%s1235_s6 + $0x3c8] sm:$0xff]  ;;  %v369_v30 = vld [vmem:[%s1235_s6 + $0x238] sm:$0xff]  ;;  %v386_v31 = vld [vmem:[%s1235_s6 + $0x2c0] sm:$0xff] }
  0x48   : > { %621 = vmatpush.msra.mxu3 %v347_v59  ;;  %602 = vmatpush.msra.mxu2 %v330_v61  ;;  %v401_v32 = vld [vmem:[%s1235_s6 + $0x338] sm:$0xff]  ;;  %v418_v33 = vld [vmem:[%s1235_s6 + $0x3c0] sm:$0xff]  ;;  %v368_v34 = vld [vmem:[%s1235_s6 + $0x230] sm:$0xff] }
  0x49   : > { %627 = vmatpush.msrb.mxu0 %v377_v62  ;;  %582 = vmatpush.msra.mxu1 %v314_v0  ;;  %v385_v35 = vld [vmem:[%s1235_s6 + $0x2b8] sm:$0xff]  ;;  %v400_v36 = vld [vmem:[%s1235_s6 + $0x330] sm:$0xff]  ;;  %v367_v38 = vld [vmem:[%s1235_s6 + $0x228] sm:$0xff] }
  0x4a   : > { %667 = vmatpush.msrb.mxu2 %v409_v63  ;;  %622 = vmatpush.msra.mxu3 %v346_v1  ;;  %v417_v37 = vld [vmem:[%s1235_s6 + $0x3b8] sm:$0xff]  ;;  %v384_v39 = vld [vmem:[%s1235_s6 + $0x2b0] sm:$0xff]  ;;  %v399_v40 = vld [vmem:[%s1235_s6 + $0x328] sm:$0xff] }
  0x4b   : > { %628 = vmatpush.msrb.mxu0 %v376_v2  ;;  %647 = vmatpush.msrb.mxu1 %v393_v3  ;;  %v416_v41 = vld [vmem:[%s1235_s6 + $0x3b0] sm:$0xff]  ;;  %v366_v42 = vld [vmem:[%s1235_s6 + $0x220] sm:$0xff]  ;;  %v383_v43 = vld [vmem:[%s1235_s6 + $0x2a8] sm:$0xff] }
  0x4c   : > { %668 = vmatpush.msrb.mxu2 %v408_v4  ;;  %687 = vmatpush.msrb.mxu3 %v425_v5  ;;  %v398_v44 = vld [vmem:[%s1235_s6 + $0x320] sm:$0xff]  ;;  %v415_v45 = vld [vmem:[%s1235_s6 + $0x3a8] sm:$0xff]  ;;  %v365_v46 = vld [vmem:[%s1235_s6 + $0x218] sm:$0xff] }
  0x4d   : > { %629 = vmatpush.msrb.mxu0 %v375_v6  ;;  %648 = vmatpush.msrb.mxu1 %v392_v7  ;;  %v382_v47 = vld [vmem:[%s1235_s6 + $0x2a0] sm:$0xff]  ;;  %v397_v48 = vld [vmem:[%s1235_s6 + $0x318] sm:$0xff]  ;;  %v364_v50 = vld [vmem:[%s1235_s6 + $0x210] sm:$0xff] }
  0x4e   : > { %669 = vmatpush.msrb.mxu2 %v407_v8  ;;  %688 = vmatpush.msrb.mxu3 %v424_v9  ;;  %v414_v49 = vld [vmem:[%s1235_s6 + $0x3a0] sm:$0xff]  ;;  %v381_v51 = vld [vmem:[%s1235_s6 + $0x298] sm:$0xff]  ;;  %v396_v53 = vld [vmem:[%s1235_s6 + $0x310] sm:$0xff] }
  0x4f   : > { %630 = vmatpush.msrb.mxu0 %v374_v10  ;;  %649 = vmatpush.msrb.mxu1 %v391_v11  ;;  %v1360_v52 = vld [vmem:[%s1351_s9] sm:$0xff]  ;;  %v413_v54 = vld [vmem:[%s1235_s6 + $0x398] sm:$0xff]  ;;  %v363_v55 = vld [vmem:[%s1235_s6 + $0x208] sm:$0xff] }
  0x50   : > { %670 = vmatpush.msrb.mxu2 %v406_v12  ;;  %689 = vmatpush.msrb.mxu3 %v423_v13  ;;  %v380_v56 = vld [vmem:[%s1235_s6 + $0x290] sm:$0xff]  ;;  %v395_v57 = vld [vmem:[%s1235_s6 + $0x308] sm:$0xff]  ;;  %v519_v59 = vperm.slane %v1360_v52, 2  ;;  %v362_v60 = vld [vmem:[%s1235_s6 + $0x200] sm:$0xff]  ;;  %v517_v63 = vperm.slane %v1360_v52, 0  ;;  %v520_v1 = vperm.slane %v1360_v52, 3 }
  0x51   : > { %631 = vmatpush.msrb.mxu0 %v373_v14  ;;  %650 = vmatpush.msrb.mxu1 %v390_v15  ;;  %v412_v58 = vld [vmem:[%s1235_s6 + $0x390] sm:$0xff]  ;;  %v379_v61 = vld [vmem:[%s1235_s6 + $0x288] sm:$0xff]  ;;  %v394_v62 = vld [vmem:[%s1235_s6 + $0x300] sm:$0xff]  ;;  %v518_v5 = vperm.slane %v1360_v52, 1  ;;  %v523_v15 = vperm.slane %v1360_v52, 6 }
  0x52   : > { %671 = vmatpush.msrb.mxu2 %v405_v16  ;;  %690 = vmatpush.msrb.mxu3 %v422_v17  ;;  %v411_v0 = vld [vmem:[%s1235_s6 + $0x388] sm:$0xff]  ;;  %v441_v2 = vld [vmem:[%s1235_s6 + $0x478] sm:$0xff]  ;;  %v378_v4 = vld [vmem:[%s1235_s6 + $0x280] sm:$0xff] }
  0x53   : > { %632 = vmatpush.msrb.mxu0 %v372_v18  ;;  %651 = vmatpush.msrb.mxu1 %v389_v19  ;;  %v473_v3 = vld [vmem:[%s1235_s6 + $0x578] sm:$0xff]  ;;  %v410_v6 = vld [vmem:[%s1235_s6 + $0x380] sm:$0xff]  ;;  %v440_v7 = vld [vmem:[%s1235_s6 + $0x470] sm:$0xff]  ;;  %v521_v19 = vperm.slane %v1360_v52, 4 }
  0x54   : > { %672 = vmatpush.msrb.mxu2 %v404_v20  ;;  %691 = vmatpush.msrb.mxu3 %v421_v21  ;;  %v457_v8 = vld [vmem:[%s1235_s6 + $0x4f8] sm:$0xff]  ;;  %v472_v9 = vld [vmem:[%s1235_s6 + $0x570] sm:$0xff]  ;;  %v439_v11 = vld [vmem:[%s1235_s6 + $0x468] sm:$0xff]  ;;  %v524_v21 = vperm.slane %v1360_v52, 7 }
  0x55   : > { %633 = vmatpush.msrb.mxu0 %v371_v22  ;;  %652 = vmatpush.msrb.mxu1 %v388_v23  ;;  %v489_v10 = vld [vmem:[%s1235_s6 + $0x5f8] sm:$0xff]  ;;  %v456_v12 = vld [vmem:[%s1235_s6 + $0x4f0] sm:$0xff]  ;;  %v471_v13 = vld [vmem:[%s1235_s6 + $0x568] sm:$0xff] }
  0x56   : > { %673 = vmatpush.msrb.mxu2 %v403_v24  ;;  %692 = vmatpush.msrb.mxu3 %v420_v25  ;;  %v488_v14 = vld [vmem:[%s1235_s6 + $0x5f0] sm:$0xff]  ;;  %v438_v16 = vld [vmem:[%s1235_s6 + $0x460] sm:$0xff]  ;;  %v455_v17 = vld [vmem:[%s1235_s6 + $0x4e8] sm:$0xff]  ;;  %v522_v25 = vperm.slane %v1360_v52, 5 }
  0x57   : > { %634 = vmatpush.msrb.mxu0 %v370_v26  ;;  %653 = vmatpush.msrb.mxu1 %v387_v27  ;;  %v470_v18 = vld [vmem:[%s1235_s6 + $0x560] sm:$0xff]  ;;  %v487_v20 = vld [vmem:[%s1235_s6 + $0x5e8] sm:$0xff]  ;;  %v437_v22 = vld [vmem:[%s1235_s6 + $0x458] sm:$0xff] }
  0x58   : > { %674 = vmatpush.msrb.mxu2 %v402_v28  ;;  %693 = vmatpush.msrb.mxu3 %v419_v29  ;;  %v454_v23 = vld [vmem:[%s1235_s6 + $0x4e0] sm:$0xff]  ;;  %v469_v24 = vld [vmem:[%s1235_s6 + $0x558] sm:$0xff]  ;;  %v436_v27 = vld [vmem:[%s1235_s6 + $0x450] sm:$0xff] }
  0x59   : > { %635 = vmatpush.msrb.mxu0 %v369_v30  ;;  %654 = vmatpush.msrb.mxu1 %v386_v31  ;;  %v486_v26 = vld [vmem:[%s1235_s6 + $0x5e0] sm:$0xff]  ;;  %v453_v28 = vld [vmem:[%s1235_s6 + $0x4d8] sm:$0xff]  ;;  %v468_v29 = vld [vmem:[%s1235_s6 + $0x550] sm:$0xff] }
  0x5a   : > { %675 = vmatpush.msrb.mxu2 %v401_v32  ;;  %694 = vmatpush.msrb.mxu3 %v418_v33  ;;  %v485_v30 = vld [vmem:[%s1235_s6 + $0x5d8] sm:$0xff]  ;;  %v435_v31 = vld [vmem:[%s1235_s6 + $0x448] sm:$0xff]  ;;  %v452_v32 = vld [vmem:[%s1235_s6 + $0x4d0] sm:$0xff] }
  0x5b   : > { %636 = vmatpush.msrb.mxu0 %v368_v34  ;;  %655 = vmatpush.msrb.mxu1 %v385_v35  ;;  %v467_v33 = vld [vmem:[%s1235_s6 + $0x548] sm:$0xff]  ;;  %v484_v34 = vld [vmem:[%s1235_s6 + $0x5d0] sm:$0xff]  ;;  %v434_v35 = vld [vmem:[%s1235_s6 + $0x440] sm:$0xff] }
  0x5c   : > { %676 = vmatpush.msrb.mxu2 %v400_v36  ;;  %695 = vmatpush.msrb.mxu3 %v417_v37  ;;  %v451_v36 = vld [vmem:[%s1235_s6 + $0x4c8] sm:$0xff]  ;;  %v466_v37 = vld [vmem:[%s1235_s6 + $0x540] sm:$0xff] }
  0x5d   : > { %637 = vmatpush.msrb.mxu0 %v367_v38  ;;  %656 = vmatpush.msrb.mxu1 %v384_v39  ;;  %v483_v38 = vld [vmem:[%s1235_s6 + $0x5c8] sm:$0xff]  ;;  %v433_v39 = vld [vmem:[%s1235_s6 + $0x438] sm:$0xff] }
  0x5e   : > { %677 = vmatpush.msrb.mxu2 %v399_v40  ;;  %696 = vmatpush.msrb.mxu3 %v416_v41  ;;  %v450_v40 = vld [vmem:[%s1235_s6 + $0x4c0] sm:$0xff]  ;;  %v465_v41 = vld [vmem:[%s1235_s6 + $0x538] sm:$0xff]  ;;  %v447_v52 = vld [vmem:[%s1235_s6 + $0x4a8] sm:$0xff] }
  0x5f   : > { %638 = vmatpush.msrb.mxu0 %v366_v42  ;;  %657 = vmatpush.msrb.mxu1 %v383_v43  ;;  %v482_v42 = vld [vmem:[%s1235_s6 + $0x5c0] sm:$0xff]  ;;  %v432_v43 = vld [vmem:[%s1235_s6 + $0x430] sm:$0xff] }
  0x60   : > { %678 = vmatpush.msrb.mxu2 %v398_v44  ;;  %697 = vmatpush.msrb.mxu3 %v415_v45  ;;  %v449_v44 = vld [vmem:[%s1235_s6 + $0x4b8] sm:$0xff]  ;;  %v464_v45 = vld [vmem:[%s1235_s6 + $0x530] sm:$0xff] }
  0x61   : > { %639 = vmatpush.msrb.mxu0 %v365_v46  ;;  %658 = vmatpush.msrb.mxu1 %v382_v47  ;;  %v481_v46 = vld [vmem:[%s1235_s6 + $0x5b8] sm:$0xff]  ;;  %v431_v47 = vld [vmem:[%s1235_s6 + $0x428] sm:$0xff] }
  0x62   : > { %679 = vmatpush.msrb.mxu2 %v397_v48  ;;  %698 = vmatpush.msrb.mxu3 %v414_v49  ;;  %v448_v48 = vld [vmem:[%s1235_s6 + $0x4b0] sm:$0xff]  ;;  %v463_v49 = vld [vmem:[%s1235_s6 + $0x528] sm:$0xff] }
  0x63   : > { %640 = vmatpush.msrb.mxu0 %v364_v50  ;;  %659 = vmatpush.msrb.mxu1 %v381_v51  ;;  %v480_v50 = vld [vmem:[%s1235_s6 + $0x5b0] sm:$0xff]  ;;  %v430_v51 = vld [vmem:[%s1235_s6 + $0x420] sm:$0xff] }
  0x64   : > { %680 = vmatpush.msrb.mxu2 %v396_v53  ;;  %699 = vmatpush.msrb.mxu3 %v413_v54  ;;  %v462_v53 = vld [vmem:[%s1235_s6 + $0x520] sm:$0xff]  ;;  %v479_v54 = vld [vmem:[%s1235_s6 + $0x5a8] sm:$0xff] }
  0x65   : > { %641 = vmatpush.msrb.mxu0 %v363_v55  ;;  %660 = vmatpush.msrb.mxu1 %v380_v56  ;;  %v429_v55 = vld [vmem:[%s1235_s6 + $0x418] sm:$0xff]  ;;  %v446_v56 = vld [vmem:[%s1235_s6 + $0x4a0] sm:$0xff] }
  0x66   : > { %681 = vmatpush.msrb.mxu2 %v395_v57  ;;  %700 = vmatpush.msrb.mxu3 %v412_v58  ;;  %v461_v57 = vld [vmem:[%s1235_s6 + $0x518] sm:$0xff]  ;;  %v478_v58 = vld [vmem:[%s1235_s6 + $0x5a0] sm:$0xff] }
  0x67   : > { %603 = vmatmul.f32.vlgmr.msra.gmra.mxu2 %v519_v59  ;;  %642 = vmatpush.msrb.mxu0 %v362_v60  ;;  %v428_v59 = vld [vmem:[%s1235_s6 + $0x410] sm:$0xff]  ;;  %v445_v60 = vld [vmem:[%s1235_s6 + $0x498] sm:$0xff] }
  0x68   : > { %661 = vmatpush.msrb.mxu1 %v379_v61  ;;  %682 = vmatpush.msrb.mxu2 %v394_v62  ;;  %v460_v61 = vld [vmem:[%s1235_s6 + $0x510] sm:$0xff]  ;;  %v477_v62 = vld [vmem:[%s1235_s6 + $0x598] sm:$0xff] }
  0x69   : > { %701 = vmatpush.msrb.mxu3 %v411_v0  ;;  %563 = vmatmul.f32.vlgmr.msra.gmra.mxu0 %v517_v63  ;;  %v427_v63 = vld [vmem:[%s1235_s6 + $0x408] sm:$0xff]  ;;  %v444_v0 = vld [vmem:[%s1235_s6 + $0x490] sm:$0xff] }
  0x6a   : > { %623 = vmatmul.f32.vlgmr.msra.gmra.mxu3 %v520_v1  ;;  %707 = vmatpush.msra.mxu0 %v441_v2  ;;  %v1439_v1 = vld [vmem:[%s1351_s9 + $0x8] sm:$0x3f] }
  0x6b   : > { %747 = vmatpush.msra.mxu2 %v473_v3  ;;  %662 = vmatpush.msrb.mxu1 %v378_v4  ;;  %v459_v2 = vld [vmem:[%s1235_s6 + $0x508] sm:$0xff]  ;;  %v476_v3 = vld [vmem:[%s1235_s6 + $0x590] sm:$0xff]  ;;  %v426_v4 = vld [vmem:[%s1235_s6 + $0x400] sm:$0xff] }
  0x6c   : > { %702 = vmatpush.msrb.mxu3 %v410_v6  ;;  %583 = vmatmul.f32.vlgmr.msra.gmra.mxu1 %v518_v5  ;;  %v443_v5 = vld [vmem:[%s1235_s6 + $0x488] sm:$0xff]  ;;  %v458_v6 = vld [vmem:[%s1235_s6 + $0x500] sm:$0xff] }
  0x6d   : > { %708 = vmatpush.msra.mxu0 %v440_v7  ;;  %727 = vmatpush.msra.mxu1 %v457_v8  ;;  %v475_v7 = vld [vmem:[%s1235_s6 + $0x588] sm:$0xff]  ;;  %v525_v8 = vperm.slane %v1439_v1, 0 }
  0x6e   : > { %748 = vmatpush.msra.mxu2 %v472_v9  ;;  %767 = vmatpush.msra.mxu3 %v489_v10  ;;  %v527_v9 = vperm.slane %v1439_v1, 2  ;;  %v505_v10 = vld [vmem:[%s1235_s6 + $0x678] sm:$0xff] }
  0x6f   : > { %709 = vmatpush.msra.mxu0 %v439_v11  ;;  %728 = vmatpush.msra.mxu1 %v456_v12  ;;  %v442_v11 = vld [vmem:[%s1235_s6 + $0x480] sm:$0xff]  ;;  %v526_v12 = vperm.slane %v1439_v1, 1 }
  0x70   : > { %749 = vmatpush.msra.mxu2 %v471_v13  ;;  %768 = vmatpush.msra.mxu3 %v488_v14  ;;  %v474_v13 = vld [vmem:[%s1235_s6 + $0x580] sm:$0xff]  ;;  %v528_v14 = vperm.slane %v1439_v1, 3 }
  0x71   : > { %683 = vmatmul.f32.vlgmr.msrb.gmra.mxu2 %v523_v15  ;;  %710 = vmatpush.msra.mxu0 %v438_v16  ;;  %v504_v15 = vld [vmem:[%s1235_s6 + $0x670] sm:$0xff]  ;;  %v513_v16 = vld [vmem:[%s1235_s6 + $0x6b8] sm:$0xff] }
  0x72   : > { %729 = vmatpush.msra.mxu1 %v455_v17  ;;  %750 = vmatpush.msra.mxu2 %v470_v18  ;;  %v503_v17 = vld [vmem:[%s1235_s6 + $0x668] sm:$0xff]  ;;  %v512_v18 = vld [vmem:[%s1235_s6 + $0x6b0] sm:$0xff] }
  0x73   : > { %769 = vmatpush.msra.mxu3 %v487_v20  ;;  %643 = vmatmul.f32.vlgmr.msrb.gmra.mxu0 %v521_v19  ;;  %v502_v19 = vld [vmem:[%s1235_s6 + $0x660] sm:$0xff]  ;;  %v511_v20 = vld [vmem:[%s1235_s6 + $0x6a8] sm:$0xff] }
  0x74   : > { %703 = vmatmul.f32.vlgmr.msrb.gmra.mxu3 %v524_v21  ;;  %711 = vmatpush.msra.mxu0 %v437_v22  ;;  %v501_v21 = vld [vmem:[%s1235_s6 + $0x658] sm:$0xff]  ;;  %v510_v22 = vld [vmem:[%s1235_s6 + $0x6a0] sm:$0xff] }
  0x75   : > { %730 = vmatpush.msra.mxu1 %v454_v23  ;;  %751 = vmatpush.msra.mxu2 %v469_v24  ;;  %v500_v23 = vld [vmem:[%s1235_s6 + $0x650] sm:$0xff]  ;;  %v509_v24 = vld [vmem:[%s1235_s6 + $0x698] sm:$0xff] }
  0x76   : > { %770 = vmatpush.msra.mxu3 %v486_v26  ;;  %663 = vmatmul.f32.vlgmr.msrb.gmra.mxu1 %v522_v25  ;;  %v499_v25 = vld [vmem:[%s1235_s6 + $0x648] sm:$0xff]  ;;  %v508_v26 = vld [vmem:[%s1235_s6 + $0x690] sm:$0xff] }
  0x77   : > { %712 = vmatpush.msra.mxu0 %v436_v27  ;;  %731 = vmatpush.msra.mxu1 %v453_v28  ;;  %v498_v27 = vld [vmem:[%s1235_s6 + $0x640] sm:$0xff]  ;;  %v507_v28 = vld [vmem:[%s1235_s6 + $0x688] sm:$0xff] }
  0x78   : > { %752 = vmatpush.msra.mxu2 %v468_v29  ;;  %771 = vmatpush.msra.mxu3 %v485_v30  ;;  %v497_v29 = vld [vmem:[%s1235_s6 + $0x638] sm:$0xff]  ;;  %v506_v30 = vld [vmem:[%s1235_s6 + $0x680] sm:$0xff] }
  0x79   : > { %713 = vmatpush.msra.mxu0 %v435_v31  ;;  %732 = vmatpush.msra.mxu1 %v452_v32  ;;  %v530_v31 = vperm.slane %v1439_v1, 5  ;;  %v496_v32 = vld [vmem:[%s1235_s6 + $0x630] sm:$0xff] }
  0x7a   : > { %753 = vmatpush.msra.mxu2 %v467_v33  ;;  %772 = vmatpush.msra.mxu3 %v484_v34  ;;  %v495_v33 = vld [vmem:[%s1235_s6 + $0x628] sm:$0xff]  ;;  %v494_v34 = vld [vmem:[%s1235_s6 + $0x620] sm:$0xff] }
  0x7b   : > { %714 = vmatpush.msra.mxu0 %v434_v35  ;;  %733 = vmatpush.msra.mxu1 %v451_v36  ;;  %v493_v35 = vld [vmem:[%s1235_s6 + $0x618] sm:$0xff]  ;;  %v492_v36 = vld [vmem:[%s1235_s6 + $0x610] sm:$0xff] }
  0x7c   : > { %754 = vmatpush.msra.mxu2 %v466_v37  ;;  %773 = vmatpush.msra.mxu3 %v483_v38  ;;  %v491_v37 = vld [vmem:[%s1235_s6 + $0x608] sm:$0xff]  ;;  %v490_v38 = vld [vmem:[%s1235_s6 + $0x600] sm:$0xff] }
  0x7d   : > { %715 = vmatpush.msra.mxu0 %v433_v39  ;;  %734 = vmatpush.msra.mxu1 %v450_v40  ;;  %v529_v39 = vperm.slane %v1439_v1, 4  ;;  %v514_v40 = vld [vmem:[%s1221_s28] sm:$0x1] }
  0x7e   : > { %755 = vmatpush.msra.mxu2 %v465_v41  ;;  %774 = vmatpush.msra.mxu3 %v482_v42 }
  0x7f   : > { %716 = vmatpush.msra.mxu0 %v432_v43  ;;  %735 = vmatpush.msra.mxu1 %v449_v44 }
  0x80   : > { %756 = vmatpush.msra.mxu2 %v464_v45  ;;  %775 = vmatpush.msra.mxu3 %v481_v46 }
  0x81   : > { %717 = vmatpush.msra.mxu0 %v431_v47  ;;  %736 = vmatpush.msra.mxu1 %v448_v48 }
  0x82   : > { %757 = vmatpush.msra.mxu2 %v463_v49  ;;  %776 = vmatpush.msra.mxu3 %v480_v50 }
  0x83   : > { %718 = vmatpush.msra.mxu0 %v430_v51  ;;  %737 = vmatpush.msra.mxu1 %v447_v52 }
  0x84   : > { %758 = vmatpush.msra.mxu2 %v462_v53  ;;  %777 = vmatpush.msra.mxu3 %v479_v54 }
  0x85   : > { %719 = vmatpush.msra.mxu0 %v429_v55  ;;  %738 = vmatpush.msra.mxu1 %v446_v56 }
  0x86   : > { %759 = vmatpush.msra.mxu2 %v461_v57  ;;  %778 = vmatpush.msra.mxu3 %v478_v58 }
  0x87   : > { %720 = vmatpush.msra.mxu0 %v428_v59  ;;  %739 = vmatpush.msra.mxu1 %v445_v60 }
  0x88   : > { %760 = vmatpush.msra.mxu2 %v460_v61  ;;  %779 = vmatpush.msra.mxu3 %v477_v62 }
  0x89   : > { %721 = vmatpush.msra.mxu0 %v427_v63  ;;  %740 = vmatpush.msra.mxu1 %v444_v0 }
  0x8a   : > { %761 = vmatpush.msra.mxu2 %v459_v2  ;;  %780 = vmatpush.msra.mxu3 %v476_v3 }
  0x8b   : > { %722 = vmatpush.msra.mxu0 %v426_v4  ;;  %741 = vmatpush.msra.mxu1 %v443_v5 }
  0x8c   : > { %762 = vmatpush.msra.mxu2 %v458_v6  ;;  %781 = vmatpush.msra.mxu3 %v475_v7  ;;  %v1047_v6 = vld [vmem:[%s289_s12] ss:$0 sm:$0xff] }
  0x8d   : > { %723 = vmatmul.f32.vlgmr.msra.gmra.mxu0 %v525_v8  ;;  %763 = vmatmul.f32.vlgmr.msra.gmra.mxu2 %v527_v9 }
  0x8e   : > { %787 = vmatpush.msrb.mxu0 %v505_v10  ;;  %742 = vmatpush.msra.mxu1 %v442_v11 }
  0x8f   : > { %782 = vmatpush.msra.mxu3 %v474_v13  ;;  %743 = vmatmul.f32.vlgmr.msra.gmra.mxu1 %v526_v12 }
  0x90   : > { %783 = vmatmul.f32.vlgmr.msra.gmra.mxu3 %v528_v14  ;;  %788 = vmatpush.msrb.mxu0 %v504_v15 }
  0x91   : > { %815 = vmatpush.msrb.mxu1 %v513_v16 }
  0x92   : > { %789 = vmatpush.msrb.mxu0 %v503_v17 }
  0x93   : > { %816 = vmatpush.msrb.mxu1 %v512_v18 }
  0x94   : > { %790 = vmatpush.msrb.mxu0 %v502_v19 }
  0x95   : > { %817 = vmatpush.msrb.mxu1 %v511_v20 }
  0x96   : > { %791 = vmatpush.msrb.mxu0 %v501_v21 }
  0x97   : > { %818 = vmatpush.msrb.mxu1 %v510_v22 }
  0x98   : > { %792 = vmatpush.msrb.mxu0 %v500_v23 }
  0x99   : > { %819 = vmatpush.msrb.mxu1 %v509_v24 }
  0x9a   : > { %793 = vmatpush.msrb.mxu0 %v499_v25 }
  0x9b   : > { %820 = vmatpush.msrb.mxu1 %v508_v26 }
  0x9c   : > { %794 = vmatpush.msrb.mxu0 %v498_v27 }
  0x9d   : > { %821 = vmatpush.msrb.mxu1 %v507_v28 }
  0x9e   : > { %795 = vmatpush.msrb.mxu0 %v497_v29 }
  0x9f   : > { %822 = vmatpush.msrb.mxu1 %v506_v30 }
  0xa0   : > { %796 = vmatpush.msrb.mxu0 %v496_v32  ;;  %999 = vmatmul.msk.f32.vlgmr.msrb.gmra.mxu1 %vm544_vm0, %v530_v31 }
  0xa2   : > { %797 = vmatpush.msrb.mxu0 %v495_v33 }
  0xa4   : > { %798 = vmatpush.msrb.mxu0 %v494_v34 }
  0xa6   : > { %799 = vmatpush.msrb.mxu0 %v493_v35 }
  0xa8   : > { %800 = vmatpush.msrb.mxu0 %v492_v36 }
  0xaa   : > { %801 = vmatpush.msrb.mxu0 %v491_v37 }
  0xac   : > { %802 = vmatpush.msrb.mxu0 %v490_v38 }
  0xad   : > { %803 = vmatmul.f32.vlgmr.msrb.gmra.mxu0 %v529_v39 }
  0xe6   : > { %v564_v41 = vpop.f32.mrf.mxu0 }
  0xe7   : > { %v565_v42 = vadd.f32 %v564_v41, %v514_v40 }
  0xe9   : > { %v584_v43 = vpop.f32.mrf.mxu1 }
  0xea   : > { %v585_v44 = vadd.f32 %v584_v43, %v565_v42  ;;  %v604_v45 = vpop.f32.mrf.mxu2 }
  0xec   : > { %v605_v46 = vadd.f32 %v604_v45, %v585_v44 }
  0xed   : > { %v624_v47 = vpop.f32.mrf.mxu3 }
  0xee   : > { %v625_v48 = vadd.f32 %v624_v47, %v605_v46 }
  0xf0   : > { %v644_v49 = vpop.f32.mrf.mxu0 }
  0xf1   : > { %v645_v50 = vadd.f32 %v644_v49, %v625_v48 }
  0xf3   : > { %v664_v51 = vpop.f32.mrf.mxu1 }
  0xf4   : > { %v665_v52 = vadd.f32 %v664_v51, %v645_v50  ;;  %v684_v53 = vpop.f32.mrf.mxu2 }
  0xf6   : > { %v685_v54 = vadd.f32 %v684_v53, %v665_v52 }
  0xf7   : > { %v704_v55 = vpop.f32.mrf.mxu3 }
  0xf8   : > { %v705_v57 = vadd.f32 %v704_v55, %v685_v54 }
 0x10a   : > { %v724_v56 = vpop.f32.mrf.mxu0 }
 0x10b   : > { %v725_v58 = vadd.f32 %v724_v56, %v705_v57 }
 0x10c   : > { %v744_v59 = vpop.f32.mrf.mxu1 }
 0x10d   : > { %v745_v61 = vadd.f32 %v744_v59, %v725_v58 }
 0x110   : > { %v764_v60 = vpop.f32.mrf.mxu2 }
 0x111   : > { %v765_v62 = vadd.f32 %v764_v60, %v745_v61 }
 0x113   : > { %v784_v63 = vpop.f32.mrf.mxu3 }
 0x114   : > { %v785_v0 = vadd.f32 %v784_v63, %v765_v62 }
 0x11d   : > { %v824_v2 = vpop.f32.mrf.mxu1 }
 0x12a   : > { %v804_v1 = vpop.f32.mrf.mxu0 }
 0x12b   : > { %v805_v3 = vadd.f32 %v804_v1, %v785_v0 }
 0x12d   : > { %v825_v4 = vadd.f32 %v824_v2, %v805_v3 }
 0x12f   : > { %1048 = vtanh.f32 %v825_v4  ;;  %v1000_v7 = vmul.f32 -1.442695, %v825_v4 }
 0x131   : > { %1050 = vpow2.f32 %v1000_v7 }
 0x135   : > { %v1049_v5 = vpop.eup %1048 }
 0x136   : > { %855 = vrot.lane.b32.xlu0 %v1049_v5, %s1122_s13 }
 0x137   : > { %v1051_v8 = vpop.eup %1050 }
 0x138   : > { %v830_v9 = vadd.f32 1.0, %v1051_v8 }
 0x13a   : > { %1052 = vrcp.f32 %v830_v9  ;;  %v842_v15 = vand.u32 2147483648, %v830_v9  ;;  %vm836_vm2 = vweird.f32 %v830_v9  ;;  %v840_v16 = vand.u32 2147483647, %v830_v9 }
 0x13c   : > { %v843_v18 = vor.u32 1.1754944e-38, %v842_v15  ;;  %vm841_vm4 = vcmp.eq.f32.partialorder %v840_v16, 8.507059e+37 }
 0x13e   : > { %850 = vrot.lane.b32.xlu0 %v1047_v6, %s1122_s13 }
 0x140   : > { %v1053_v10 = vpop.eup %1052 }
 0x141   : > { %v832_v11 = vmul.f32 %v1053_v10, %v830_v9  ;;  %vm837_vm1 = vweird.f32 %v1053_v10 }
 0x142   : > { %vm838_vm3 = vmor %vm836_vm2, %vm837_vm1 }
 0x143   : > { %v833_v12 = vsub.f32 1.0, %v832_v11 }
 0x145   : > { %v834_v13 = vmul.f32 %v1053_v10, %v833_v12 }
 0x147   : > { %v835_v14 = vadd.f32 %v1053_v10, %v834_v13 }
 0x149   : > { %v839_v17 = vsel %vm838_vm3, %v1053_v10, %v835_v14 }
 0x14a   : > { %v844_v20 = vsel %vm841_vm4, %v843_v18, %v839_v17 }
 0x1a8   : > { %v856_v19 = vpop.permute.xlu0 %855 }
 0x1a9   : > { %v858_v21 = vmul.f32 %v856_v19, %v844_v20 }
 0x1ab   : > { %860 = vrot.lane.b32.xlu1 %v858_v21, %s1122_s13 }
 0x1b0   : > { %v851_v22 = vpop.permute.xlu0 %850 }
 0x1b1   : > { %v853_v23 = vmul.f32 %v851_v22, %v844_v20 }
 0x21d   : > { %v861_v24 = vpop.permute.xlu1 %860 }
 0x21e   : > { %v863_v25 = vadd.f32 %v861_v24, %v853_v23 }
 0x220   : > { %1054 = vtanh.f32 %v863_v25  ;;  %865 = vrot.lane.b32.xlu2 %v863_v25, %s1123_s16 }
 0x226   : > { %v1055_v26 = vpop.eup %1054 }
 0x227   : > { %872 = vrot.lane.b32.xlu1 %v1055_v26, %s1122_s13 }
 0x27a   : > { %v866_v27 = vpop.permute.xlu2 %865 }
 0x27b   : > { %869 = vst.msk [vmem:[%s295_s24] sm:$0x1] %vm868_vm5, %v866_v27 }
 0x299   : > { %v873_v28 = vpop.permute.xlu1 %872 }
 0x29a   : > { %v875_v29 = vmul.f32 %v873_v28, %v844_v20 }
 0x29c   : > { %877 = vrot.lane.b32.xlu2 %v875_v29, %s1124_s25 }
 0x2f6   : > { %v878_v30 = vpop.permute.xlu2 %877 }
 0x2f7   : > { %880 = vst.msk [vmem:[%s292_s29] sm:$0x1] %vm868_vm5, %v878_v30 }
 0x2f8 PF: > { %p16_p7 = scmp.ge.s32.totalorder %s1177_s23, 5   ;;  %s1522_s18 = smov %s1112_s19 }
 0x2f9   : > { %s1523_s19 = smov %s1116_s20  ;;  %s1524_s20 = smov %s1187_s26 }
 0x2fa   : > { %s1525_s21 = smov %s1177_s23  ;;  %18 = sbr.rel (!%p16_p7) target bundleno = 3 (0x3), region = 97 }
 0x2ff   :  { %910 = vsyncpa [#allocation3], 1 }
 0x300   :  { %912 = vsyncpa [#allocation3 + $0x1], 1 }

// kernel: rinterp_forward.44
= control target key start
LH: loop header
LB: loop body
LE: loop exit
PB: predicated region body
PF: predicated region fallthrough
CT: control target
= control target key end

     0   :  { %11 = vsyncpa [#allocation3], 0  ;;  %s1614_s0 = inlined_call_operand.vmem [shape: f32[3,1,1728], index: 0, kind: input, shape index: {}]   ;;  %s1615_s1 = inlined_call_operand.vmem [shape: f32[3,1728,128], index: 1, kind: input, shape index: {}]   ;;  %s1616_s2 = inlined_call_operand.hbm [shape: f32[3,1,128], index: 2, kind: input, shape index: {}]   ;;  %s1617_s3 = inlined_call_operand.vmem [shape: f32[3,1,32], index: 3, kind: input, shape index: {}]   ;;  %s1618_s4 = inlined_call_operand.vmem [shape: f32[3,1,32], index: 4, kind: output, shape index: {0}]   ;;  %s1619_s5 = inlined_call_operand.hbm [shape: f32[3,1,32], index: 5, kind: output, shape index: {1}]  }
   0x1   :  { %13 = vsyncpa [#allocation3 + $0x1], 0 }
   0x2   :  { %14 = vsyncpa [#allocation4], 0 }
   0x3   :  { %16 = vsyncpa [#allocation4 + $0x1], 0  ;;  %s1215_s18 = smov 0   ;;  %s1217_s19 = smov 0  }
   0x4   :  { %s1219_s20 = smov 0   ;;  %s1221_s21 = smov 0  }
   0x5 LB: > { %s1236_s22 = sadd.s32 4294967295, %s1180_s21   ;;  %s1015_s23 = sadd.s32 4294967294, %s1180_s21   ;;  %s1180_s21 = sphi %s1221_s21, %s1628_s21   ;;  %s1176_s20 = sphi %s1219_s20, %s1627_s20   ;;  %s1172_s19 = sphi %s1217_s19, %s1626_s19   ;;  %s1168_s18 = sphi %s1215_s18, %s1625_s18  }
   0x6   : > { %s1240_s24 = sadd.s32 1, %s1180_s21   ;;  %s81_s25 = sadd.s32 1, %s1176_s20 }
   0x7   : > { %s78_s26 = ssub.s32 %s1180_s21, %s1240_s24  ;;  %p88_p0 = scmp.ne.s32.totalorder %s1176_s20, %s1172_s19 }
   0x8   : > { %p79_p1 = scmp.eq.s32.totalorder %s78_s26, 0  ;;  %p89_p2 = scmp.eq.s32.totalorder %s1180_s21, 0 }
   0x9   : > { %p94_p3 = scmp.ne.s32.totalorder %s1172_s19, %s1168_s18  ;;  %p95_p4 = scmp.eq.s32.totalorder %s1236_s22, 0 }
   0xa   : > { %s1252_s27 = scalar_select %p79_p1, %s1176_s20, %s81_s25  }
   0xb   : > { %p1254_p5 = por %p89_p2, %p88_p0  ;;  %p1258_p6 = por %p95_p4, %p94_p3 }
   0xc   : > { %p170_p7 = scmp.eq.s32.totalorder %s1236_s22, 2  ;;  %p176_p8 = scmp.eq.s32.totalorder %s1015_s23, 2 }
   0xd   : > { %p1038_p9 = scmp.lt.s32.totalorder %s1180_s21, 3  ;;  %s211_s7 = sand.u32 1, %s1176_s20  }
   0xe   : > { %p1264_p10 = por %p170_p7, %p88_p0  ;;  %p1268_p11 = por %p176_p8, %p94_p3 }
   0xf   : > { %s217_s10 = scalar_lea.hbm %s1616_s2, %s1180_s21  ;;  %s214_s12 = scalar_lea.vmem [#allocation2], %s211_s7 }
  0x10   : > { %s219_s11 = sshll.u32 %s217_s10, 4  ;;  %s221_s13 = sshll.u32 %s214_s12, 4  ;;  %s220_s11 = int_to_ptr.hbm [resolvable:$true] %s219_s11  ;;  %s222_s13 = int_to_ptr.vmem [resolvable:$true] %s221_s13 }
  0x11   : > { %p1279_p12 = pnand %p1038_p9, %p1254_p5  ;;  %p1018_p13 = scmp.ge.s32.totalorder %s1180_s21, 1 }
  0x12   : > { %p232_p0 = scmp.lt.s32.totalorder %s1180_s21, 4  ;;  %s212_s15 = scalar_lea.sflag [#allocation3], %s211_s7 }
  0x13   : > { %s1084_s16 = sshra.s32 %s220_s11, 4  ;;  %p1088_p2 = pneg %p1279_p12  ;;  %s1085_s16 = int_to_ptr.hbm [resolvable:$true] %s1084_s16 }
  0x14   : > { %s1086_s17 = scalar_lea.hbm %s1085_s16, 1  ;;  %s1091_s26 = scalar_lea.hbm %s1616_s2, 3 }
  0x15   : > { %p1087_p1 = scmp.ne.s32.totalorder %s1085_s16, %s1086_s17  ;;  %p1092_p5 = scmp.lt.s32.totalorder %s1085_s16, %s1616_s2 }
  0x16   : > { %p1093_p7 = scmp.lt.s32.totalorder %s1091_s26, %s1086_s17 }
  0x17   : > { %p1089_p3 = pnand %p1088_p2, %p1087_p1 }
  0x18   : > { %p1094_p8 = por %p1093_p7, %p1092_p5 }
  0x19   : > { %p1090_p4 = pneg %p1089_p3 }
  0x1b   : > { %p1095_p9 = pnand %p1094_p8, %p1090_p4 }
  0x1d   : > { %1098 = shalt.err (!%p1095_p9)
}
  0x1e   : > { %1033 = dma.hbm_to_vmem [thread:$0]  (!%p1279_p12), %s220_s11, 16, %s222_s13, %s212_s15  }
  0x1f   : > { %p233_p1 = pnand %p1018_p13, %p232_p0 }
  0x20   : > { %s1300_s7 = sand.u32 (!%p233_p1), 1, %s1172_s19  }
  0x21   : > { %236 = sbr.rel (%p233_p1) target bundleno = 766 (0x2fe), region = 36  ;;  %s239_s9 = scalar_lea.sflag (!%p233_p1), [#allocation3], %s1300_s7 }
  0x22   : > { %s241_s10 = scalar_lea.vmem (!%p233_p1), [#allocation2], %s1300_s7 }
  0x26   : > { %1159 = dma.done.wait (%p1258_p6), %s239_s9, 16  }
  0x27   : > { %1161 = vsyncadd (%p1258_p6), %s239_s9, 4294967280  ;;  %p282_p12 = scmp.lt.s32.totalorder %s1236_s22, 2  ;;  %vm545_vm0 = vcmask 523264   ;;  %s1182_s8 = smov 32   ;;  %vm869_vm5 = vcmask 253952  }
  0x29   : > { %s1310_s11 = scalar_select %p282_p12, %s1236_s22, 2 }
  0x2b   : > { %s1025_s12 = smul.u32 1728, %s1310_s11  ;;  %s293_s28 = scalar_lea.vmem %s1617_s3, %s1310_s11 }
  0x2c   : > { %s1024_s29 = smul.u32 14, %s1310_s11 }
  0x2d   : > { %s1316_s15 = scalar_lea.vmem %s1615_s1, %s1025_s12  ;;  %s1183_s12 = smov 96  }
  0x2e   : > { %v314_v0 = vld [vmem:[%s1316_s15 + $0x78] sm:$0xff]  ;;  %v313_v2 = vld [vmem:[%s1316_s15 + $0x70] sm:$0xff]  ;;  %v312_v6 = vld [vmem:[%s1316_s15 + $0x68] sm:$0xff]  ;;  %s1432_s23 = scalar_lea.vmem %s1614_s0, %s1024_s29  ;;  %s281_s29 = scalar_lea.vmem [#allocation5], %s1300_s7 }
  0x2f   : > { %v346_v1 = vld [vmem:[%s1316_s15 + $0x178] sm:$0xff]  ;;  %548 = vmatpush.msra.mxu0 %v314_v0  ;;  %v345_v4 = vld [vmem:[%s1316_s15 + $0x170] sm:$0xff]  ;;  %v344_v8 = vld [vmem:[%s1316_s15 + $0x168] sm:$0xff]  ;;  %s899_s16 = sshll.u32 %s281_s29, 4  ;;  %s900_s16 = int_to_ptr.vmem [resolvable:$true] %s899_s16 }
  0x30   : > { %588 = vmatpush.msra.mxu2 %v346_v1  ;;  %v330_v3 = vld [vmem:[%s1316_s15 + $0xf8] sm:$0xff]  ;;  %v329_v7 = vld [vmem:[%s1316_s15 + $0xf0] sm:$0xff]  ;;  %v328_v10 = vld [vmem:[%s1316_s15 + $0xe8] sm:$0xff] }
  0x31   : > { %v362_v5 = vld [vmem:[%s1316_s15 + $0x1f8] sm:$0xff]  ;;  %568 = vmatpush.msra.mxu1 %v330_v3  ;;  %549 = vmatpush.msra.mxu0 %v313_v2  ;;  %v361_v9 = vld [vmem:[%s1316_s15 + $0x1f0] sm:$0xff]  ;;  %v311_v11 = vld [vmem:[%s1316_s15 + $0x60] sm:$0xff] }
  0x32   : > { %608 = vmatpush.msra.mxu3 %v362_v5  ;;  %589 = vmatpush.msra.mxu2 %v345_v4  ;;  %v343_v12 = vld [vmem:[%s1316_s15 + $0x160] sm:$0xff]  ;;  %v360_v13 = vld [vmem:[%s1316_s15 + $0x1e8] sm:$0xff]  ;;  %v310_v16 = vld [vmem:[%s1316_s15 + $0x58] sm:$0xff] }
  0x33   : > { %569 = vmatpush.msra.mxu1 %v329_v7  ;;  %550 = vmatpush.msra.mxu0 %v312_v6  ;;  %v327_v14 = vld [vmem:[%s1316_s15 + $0xe0] sm:$0xff]  ;;  %v342_v17 = vld [vmem:[%s1316_s15 + $0x158] sm:$0xff]  ;;  %v309_v20 = vld [vmem:[%s1316_s15 + $0x50] sm:$0xff] }
  0x34   : > { %609 = vmatpush.msra.mxu3 %v361_v9  ;;  %590 = vmatpush.msra.mxu2 %v344_v8  ;;  %v359_v15 = vld [vmem:[%s1316_s15 + $0x1e0] sm:$0xff]  ;;  %v326_v18 = vld [vmem:[%s1316_s15 + $0xd8] sm:$0xff]  ;;  %v341_v21 = vld [vmem:[%s1316_s15 + $0x150] sm:$0xff] }
  0x35   : > { %570 = vmatpush.msra.mxu1 %v328_v10  ;;  %551 = vmatpush.msra.mxu0 %v311_v11  ;;  %v358_v19 = vld [vmem:[%s1316_s15 + $0x1d8] sm:$0xff]  ;;  %v325_v22 = vld [vmem:[%s1316_s15 + $0xd0] sm:$0xff]  ;;  %v308_v24 = vld [vmem:[%s1316_s15 + $0x48] sm:$0xff] }
  0x36   : > { %610 = vmatpush.msra.mxu3 %v360_v13  ;;  %591 = vmatpush.msra.mxu2 %v343_v12  ;;  %v357_v23 = vld [vmem:[%s1316_s15 + $0x1d0] sm:$0xff]  ;;  %v340_v25 = vld [vmem:[%s1316_s15 + $0x148] sm:$0xff]  ;;  %v307_v28 = vld [vmem:[%s1316_s15 + $0x40] sm:$0xff] }
  0x37   : > { %571 = vmatpush.msra.mxu1 %v327_v14  ;;  %552 = vmatpush.msra.mxu0 %v310_v16  ;;  %v324_v26 = vld [vmem:[%s1316_s15 + $0xc8] sm:$0xff]  ;;  %v339_v29 = vld [vmem:[%s1316_s15 + $0x140] sm:$0xff]  ;;  %v306_v32 = vld [vmem:[%s1316_s15 + $0x38] sm:$0xff] }
  0x38   : > { %611 = vmatpush.msra.mxu3 %v359_v15  ;;  %592 = vmatpush.msra.mxu2 %v342_v17  ;;  %v356_v27 = vld [vmem:[%s1316_s15 + $0x1c8] sm:$0xff]  ;;  %v323_v30 = vld [vmem:[%s1316_s15 + $0xc0] sm:$0xff]  ;;  %v338_v33 = vld [vmem:[%s1316_s15 + $0x138] sm:$0xff] }
  0x39   : > { %572 = vmatpush.msra.mxu1 %v326_v18  ;;  %553 = vmatpush.msra.mxu0 %v309_v20  ;;  %v355_v31 = vld [vmem:[%s1316_s15 + $0x1c0] sm:$0xff]  ;;  %v322_v34 = vld [vmem:[%s1316_s15 + $0xb8] sm:$0xff]  ;;  %v305_v36 = vld [vmem:[%s1316_s15 + $0x30] sm:$0xff] }
  0x3a   : > { %612 = vmatpush.msra.mxu3 %v358_v19  ;;  %593 = vmatpush.msra.mxu2 %v341_v21  ;;  %v354_v35 = vld [vmem:[%s1316_s15 + $0x1b8] sm:$0xff]  ;;  %v337_v37 = vld [vmem:[%s1316_s15 + $0x130] sm:$0xff]  ;;  %v304_v40 = vld [vmem:[%s1316_s15 + $0x28] sm:$0xff] }
  0x3b   : > { %573 = vmatpush.msra.mxu1 %v325_v22  ;;  %554 = vmatpush.msra.mxu0 %v308_v24  ;;  %v321_v38 = vld [vmem:[%s1316_s15 + $0xb0] sm:$0xff]  ;;  %v336_v41 = vld [vmem:[%s1316_s15 + $0x128] sm:$0xff]  ;;  %v303_v44 = vld [vmem:[%s1316_s15 + $0x20] sm:$0xff] }
  0x3c   : > { %613 = vmatpush.msra.mxu3 %v357_v23  ;;  %594 = vmatpush.msra.mxu2 %v340_v25  ;;  %v353_v39 = vld [vmem:[%s1316_s15 + $0x1b0] sm:$0xff]  ;;  %v320_v42 = vld [vmem:[%s1316_s15 + $0xa8] sm:$0xff]  ;;  %v335_v45 = vld [vmem:[%s1316_s15 + $0x120] sm:$0xff] }
  0x3d   : > { %574 = vmatpush.msra.mxu1 %v324_v26  ;;  %555 = vmatpush.msra.mxu0 %v307_v28  ;;  %v352_v43 = vld [vmem:[%s1316_s15 + $0x1a8] sm:$0xff]  ;;  %v319_v46 = vld [vmem:[%s1316_s15 + $0xa0] sm:$0xff]  ;;  %v302_v48 = vld [vmem:[%s1316_s15 + $0x18] sm:$0xff] }
  0x3e   : > { %614 = vmatpush.msra.mxu3 %v356_v27  ;;  %595 = vmatpush.msra.mxu2 %v339_v29  ;;  %v351_v47 = vld [vmem:[%s1316_s15 + $0x1a0] sm:$0xff]  ;;  %v334_v49 = vld [vmem:[%s1316_s15 + $0x118] sm:$0xff]  ;;  %v301_v52 = vld [vmem:[%s1316_s15 + $0x10] sm:$0xff] }
  0x3f   : > { %575 = vmatpush.msra.mxu1 %v323_v30  ;;  %556 = vmatpush.msra.mxu0 %v306_v32  ;;  %v318_v50 = vld [vmem:[%s1316_s15 + $0x98] sm:$0xff]  ;;  %v333_v53 = vld [vmem:[%s1316_s15 + $0x110] sm:$0xff]  ;;  %v300_v56 = vld [vmem:[%s1316_s15 + $0x8] sm:$0xff] }
  0x40   : > { %615 = vmatpush.msra.mxu3 %v355_v31  ;;  %596 = vmatpush.msra.mxu2 %v338_v33  ;;  %v350_v51 = vld [vmem:[%s1316_s15 + $0x198] sm:$0xff]  ;;  %v317_v54 = vld [vmem:[%s1316_s15 + $0x90] sm:$0xff]  ;;  %v332_v57 = vld [vmem:[%s1316_s15 + $0x108] sm:$0xff] }
  0x41   : > { %576 = vmatpush.msra.mxu1 %v322_v34  ;;  %557 = vmatpush.msra.mxu0 %v305_v36  ;;  %v349_v55 = vld [vmem:[%s1316_s15 + $0x190] sm:$0xff]  ;;  %v316_v58 = vld [vmem:[%s1316_s15 + $0x88] sm:$0xff]  ;;  %v299_v60 = vld [vmem:[%s1316_s15] sm:$0xff] }
  0x42   : > { %616 = vmatpush.msra.mxu3 %v354_v35  ;;  %597 = vmatpush.msra.mxu2 %v337_v37  ;;  %v348_v59 = vld [vmem:[%s1316_s15 + $0x188] sm:$0xff]  ;;  %v331_v61 = vld [vmem:[%s1316_s15 + $0x100] sm:$0xff]  ;;  %v378_v62 = vld [vmem:[%s1316_s15 + $0x278] sm:$0xff] }
  0x43   : > { %577 = vmatpush.msra.mxu1 %v321_v38  ;;  %558 = vmatpush.msra.mxu0 %v304_v40  ;;  %v410_v63 = vld [vmem:[%s1316_s15 + $0x378] sm:$0xff]  ;;  %v315_v0 = vld [vmem:[%s1316_s15 + $0x80] sm:$0xff]  ;;  %v377_v2 = vld [vmem:[%s1316_s15 + $0x270] sm:$0xff] }
  0x44   : > { %617 = vmatpush.msra.mxu3 %v353_v39  ;;  %598 = vmatpush.msra.mxu2 %v336_v41  ;;  %v347_v1 = vld [vmem:[%s1316_s15 + $0x180] sm:$0xff]  ;;  %v394_v3 = vld [vmem:[%s1316_s15 + $0x2f8] sm:$0xff]  ;;  %v409_v4 = vld [vmem:[%s1316_s15 + $0x370] sm:$0xff] }
  0x45   : > { %578 = vmatpush.msra.mxu1 %v320_v42  ;;  %559 = vmatpush.msra.mxu0 %v303_v44  ;;  %v426_v5 = vld [vmem:[%s1316_s15 + $0x3f8] sm:$0xff]  ;;  %v376_v6 = vld [vmem:[%s1316_s15 + $0x268] sm:$0xff]  ;;  %v393_v7 = vld [vmem:[%s1316_s15 + $0x2f0] sm:$0xff] }
  0x46   : > { %618 = vmatpush.msra.mxu3 %v352_v43  ;;  %599 = vmatpush.msra.mxu2 %v335_v45  ;;  %v408_v8 = vld [vmem:[%s1316_s15 + $0x368] sm:$0xff]  ;;  %v425_v9 = vld [vmem:[%s1316_s15 + $0x3f0] sm:$0xff]  ;;  %v375_v10 = vld [vmem:[%s1316_s15 + $0x260] sm:$0xff] }
  0x47   : > { %579 = vmatpush.msra.mxu1 %v319_v46  ;;  %560 = vmatpush.msra.mxu0 %v302_v48  ;;  %v392_v11 = vld [vmem:[%s1316_s15 + $0x2e8] sm:$0xff]  ;;  %v407_v12 = vld [vmem:[%s1316_s15 + $0x360] sm:$0xff]  ;;  %v374_v14 = vld [vmem:[%s1316_s15 + $0x258] sm:$0xff] }
  0x48   : > { %619 = vmatpush.msra.mxu3 %v351_v47  ;;  %600 = vmatpush.msra.mxu2 %v334_v49  ;;  %v424_v13 = vld [vmem:[%s1316_s15 + $0x3e8] sm:$0xff]  ;;  %v391_v15 = vld [vmem:[%s1316_s15 + $0x2e0] sm:$0xff]  ;;  %v406_v16 = vld [vmem:[%s1316_s15 + $0x358] sm:$0xff] }
  0x49   : > { %580 = vmatpush.msra.mxu1 %v318_v50  ;;  %561 = vmatpush.msra.mxu0 %v301_v52  ;;  %v423_v17 = vld [vmem:[%s1316_s15 + $0x3e0] sm:$0xff]  ;;  %v373_v18 = vld [vmem:[%s1316_s15 + $0x250] sm:$0xff]  ;;  %v390_v19 = vld [vmem:[%s1316_s15 + $0x2d8] sm:$0xff] }
  0x4a   : > { %620 = vmatpush.msra.mxu3 %v350_v51  ;;  %601 = vmatpush.msra.mxu2 %v333_v53  ;;  %v405_v20 = vld [vmem:[%s1316_s15 + $0x350] sm:$0xff]  ;;  %v422_v21 = vld [vmem:[%s1316_s15 + $0x3d8] sm:$0xff]  ;;  %v372_v22 = vld [vmem:[%s1316_s15 + $0x248] sm:$0xff] }
  0x4b   : > { %581 = vmatpush.msra.mxu1 %v317_v54  ;;  %562 = vmatpush.msra.mxu0 %v300_v56  ;;  %v389_v23 = vld [vmem:[%s1316_s15 + $0x2d0] sm:$0xff]  ;;  %v404_v24 = vld [vmem:[%s1316_s15 + $0x348] sm:$0xff]  ;;  %v371_v26 = vld [vmem:[%s1316_s15 + $0x240] sm:$0xff] }
  0x4c   : > { %621 = vmatpush.msra.mxu3 %v349_v55  ;;  %602 = vmatpush.msra.mxu2 %v332_v57  ;;  %v421_v25 = vld [vmem:[%s1316_s15 + $0x3d0] sm:$0xff]  ;;  %v388_v27 = vld [vmem:[%s1316_s15 + $0x2c8] sm:$0xff]  ;;  %v403_v28 = vld [vmem:[%s1316_s15 + $0x340] sm:$0xff] }
  0x4d   : > { %582 = vmatpush.msra.mxu1 %v316_v58  ;;  %563 = vmatpush.msra.mxu0 %v299_v60  ;;  %v420_v29 = vld [vmem:[%s1316_s15 + $0x3c8] sm:$0xff]  ;;  %v370_v30 = vld [vmem:[%s1316_s15 + $0x238] sm:$0xff]  ;;  %v387_v31 = vld [vmem:[%s1316_s15 + $0x2c0] sm:$0xff] }
  0x4e   : > { %622 = vmatpush.msra.mxu3 %v348_v59  ;;  %603 = vmatpush.msra.mxu2 %v331_v61  ;;  %v402_v32 = vld [vmem:[%s1316_s15 + $0x338] sm:$0xff]  ;;  %v419_v33 = vld [vmem:[%s1316_s15 + $0x3c0] sm:$0xff]  ;;  %v369_v34 = vld [vmem:[%s1316_s15 + $0x230] sm:$0xff] }
  0x4f   : > { %628 = vmatpush.msrb.mxu0 %v378_v62  ;;  %583 = vmatpush.msra.mxu1 %v315_v0  ;;  %v386_v35 = vld [vmem:[%s1316_s15 + $0x2b8] sm:$0xff]  ;;  %v401_v36 = vld [vmem:[%s1316_s15 + $0x330] sm:$0xff]  ;;  %v368_v38 = vld [vmem:[%s1316_s15 + $0x228] sm:$0xff] }
  0x50   : > { %668 = vmatpush.msrb.mxu2 %v410_v63  ;;  %623 = vmatpush.msra.mxu3 %v347_v1  ;;  %v418_v37 = vld [vmem:[%s1316_s15 + $0x3b8] sm:$0xff]  ;;  %v385_v39 = vld [vmem:[%s1316_s15 + $0x2b0] sm:$0xff]  ;;  %v400_v40 = vld [vmem:[%s1316_s15 + $0x328] sm:$0xff] }
  0x51   : > { %629 = vmatpush.msrb.mxu0 %v377_v2  ;;  %648 = vmatpush.msrb.mxu1 %v394_v3  ;;  %v417_v41 = vld [vmem:[%s1316_s15 + $0x3b0] sm:$0xff]  ;;  %v367_v42 = vld [vmem:[%s1316_s15 + $0x220] sm:$0xff]  ;;  %v384_v43 = vld [vmem:[%s1316_s15 + $0x2a8] sm:$0xff] }
  0x52   : > { %669 = vmatpush.msrb.mxu2 %v409_v4  ;;  %688 = vmatpush.msrb.mxu3 %v426_v5  ;;  %v399_v44 = vld [vmem:[%s1316_s15 + $0x320] sm:$0xff]  ;;  %v416_v45 = vld [vmem:[%s1316_s15 + $0x3a8] sm:$0xff]  ;;  %v366_v46 = vld [vmem:[%s1316_s15 + $0x218] sm:$0xff] }
  0x53   : > { %630 = vmatpush.msrb.mxu0 %v376_v6  ;;  %649 = vmatpush.msrb.mxu1 %v393_v7  ;;  %v383_v47 = vld [vmem:[%s1316_s15 + $0x2a0] sm:$0xff]  ;;  %v398_v48 = vld [vmem:[%s1316_s15 + $0x318] sm:$0xff]  ;;  %v365_v50 = vld [vmem:[%s1316_s15 + $0x210] sm:$0xff] }
  0x54   : > { %670 = vmatpush.msrb.mxu2 %v408_v8  ;;  %689 = vmatpush.msrb.mxu3 %v425_v9  ;;  %v415_v49 = vld [vmem:[%s1316_s15 + $0x3a0] sm:$0xff]  ;;  %v382_v51 = vld [vmem:[%s1316_s15 + $0x298] sm:$0xff]  ;;  %v397_v53 = vld [vmem:[%s1316_s15 + $0x310] sm:$0xff] }
  0x55   : > { %631 = vmatpush.msrb.mxu0 %v375_v10  ;;  %650 = vmatpush.msrb.mxu1 %v392_v11  ;;  %v1441_v52 = vld [vmem:[%s1432_s23] sm:$0xff]  ;;  %v414_v54 = vld [vmem:[%s1316_s15 + $0x398] sm:$0xff]  ;;  %v364_v55 = vld [vmem:[%s1316_s15 + $0x208] sm:$0xff] }
  0x56   : > { %671 = vmatpush.msrb.mxu2 %v407_v12  ;;  %690 = vmatpush.msrb.mxu3 %v424_v13  ;;  %v381_v56 = vld [vmem:[%s1316_s15 + $0x290] sm:$0xff]  ;;  %v396_v57 = vld [vmem:[%s1316_s15 + $0x308] sm:$0xff]  ;;  %v520_v59 = vperm.slane %v1441_v52, 2  ;;  %v363_v60 = vld [vmem:[%s1316_s15 + $0x200] sm:$0xff]  ;;  %v518_v63 = vperm.slane %v1441_v52, 0  ;;  %v521_v1 = vperm.slane %v1441_v52, 3 }
  0x57   : > { %632 = vmatpush.msrb.mxu0 %v374_v14  ;;  %651 = vmatpush.msrb.mxu1 %v391_v15  ;;  %v413_v58 = vld [vmem:[%s1316_s15 + $0x390] sm:$0xff]  ;;  %v380_v61 = vld [vmem:[%s1316_s15 + $0x288] sm:$0xff]  ;;  %v395_v62 = vld [vmem:[%s1316_s15 + $0x300] sm:$0xff]  ;;  %v519_v5 = vperm.slane %v1441_v52, 1  ;;  %v524_v15 = vperm.slane %v1441_v52, 6 }
  0x58   : > { %672 = vmatpush.msrb.mxu2 %v406_v16  ;;  %691 = vmatpush.msrb.mxu3 %v423_v17  ;;  %v412_v0 = vld [vmem:[%s1316_s15 + $0x388] sm:$0xff]  ;;  %v442_v2 = vld [vmem:[%s1316_s15 + $0x478] sm:$0xff]  ;;  %v379_v4 = vld [vmem:[%s1316_s15 + $0x280] sm:$0xff] }
  0x59   : > { %633 = vmatpush.msrb.mxu0 %v373_v18  ;;  %652 = vmatpush.msrb.mxu1 %v390_v19  ;;  %v474_v3 = vld [vmem:[%s1316_s15 + $0x578] sm:$0xff]  ;;  %v411_v6 = vld [vmem:[%s1316_s15 + $0x380] sm:$0xff]  ;;  %v441_v7 = vld [vmem:[%s1316_s15 + $0x470] sm:$0xff]  ;;  %v522_v19 = vperm.slane %v1441_v52, 4 }
  0x5a   : > { %673 = vmatpush.msrb.mxu2 %v405_v20  ;;  %692 = vmatpush.msrb.mxu3 %v422_v21  ;;  %v458_v8 = vld [vmem:[%s1316_s15 + $0x4f8] sm:$0xff]  ;;  %v473_v9 = vld [vmem:[%s1316_s15 + $0x570] sm:$0xff]  ;;  %v440_v11 = vld [vmem:[%s1316_s15 + $0x468] sm:$0xff]  ;;  %v525_v21 = vperm.slane %v1441_v52, 7 }
  0x5b   : > { %634 = vmatpush.msrb.mxu0 %v372_v22  ;;  %653 = vmatpush.msrb.mxu1 %v389_v23  ;;  %v490_v10 = vld [vmem:[%s1316_s15 + $0x5f8] sm:$0xff]  ;;  %v457_v12 = vld [vmem:[%s1316_s15 + $0x4f0] sm:$0xff]  ;;  %v472_v13 = vld [vmem:[%s1316_s15 + $0x568] sm:$0xff] }
  0x5c   : > { %674 = vmatpush.msrb.mxu2 %v404_v24  ;;  %693 = vmatpush.msrb.mxu3 %v421_v25  ;;  %v489_v14 = vld [vmem:[%s1316_s15 + $0x5f0] sm:$0xff]  ;;  %v439_v16 = vld [vmem:[%s1316_s15 + $0x460] sm:$0xff]  ;;  %v456_v17 = vld [vmem:[%s1316_s15 + $0x4e8] sm:$0xff]  ;;  %v523_v25 = vperm.slane %v1441_v52, 5 }
  0x5d   : > { %635 = vmatpush.msrb.mxu0 %v371_v26  ;;  %654 = vmatpush.msrb.mxu1 %v388_v27  ;;  %v471_v18 = vld [vmem:[%s1316_s15 + $0x560] sm:$0xff]  ;;  %v488_v20 = vld [vmem:[%s1316_s15 + $0x5e8] sm:$0xff]  ;;  %v438_v22 = vld [vmem:[%s1316_s15 + $0x458] sm:$0xff] }
  0x5e   : > { %675 = vmatpush.msrb.mxu2 %v403_v28  ;;  %694 = vmatpush.msrb.mxu3 %v420_v29  ;;  %v455_v23 = vld [vmem:[%s1316_s15 + $0x4e0] sm:$0xff]  ;;  %v470_v24 = vld [vmem:[%s1316_s15 + $0x558] sm:$0xff]  ;;  %v437_v27 = vld [vmem:[%s1316_s15 + $0x450] sm:$0xff] }
  0x5f   : > { %636 = vmatpush.msrb.mxu0 %v370_v30  ;;  %655 = vmatpush.msrb.mxu1 %v387_v31  ;;  %v487_v26 = vld [vmem:[%s1316_s15 + $0x5e0] sm:$0xff]  ;;  %v454_v28 = vld [vmem:[%s1316_s15 + $0x4d8] sm:$0xff]  ;;  %v469_v29 = vld [vmem:[%s1316_s15 + $0x550] sm:$0xff] }
  0x60   : > { %676 = vmatpush.msrb.mxu2 %v402_v32  ;;  %695 = vmatpush.msrb.mxu3 %v419_v33  ;;  %v486_v30 = vld [vmem:[%s1316_s15 + $0x5d8] sm:$0xff]  ;;  %v436_v31 = vld [vmem:[%s1316_s15 + $0x448] sm:$0xff]  ;;  %v453_v32 = vld [vmem:[%s1316_s15 + $0x4d0] sm:$0xff] }
  0x61   : > { %637 = vmatpush.msrb.mxu0 %v369_v34  ;;  %656 = vmatpush.msrb.mxu1 %v386_v35  ;;  %v468_v33 = vld [vmem:[%s1316_s15 + $0x548] sm:$0xff]  ;;  %v485_v34 = vld [vmem:[%s1316_s15 + $0x5d0] sm:$0xff]  ;;  %v435_v35 = vld [vmem:[%s1316_s15 + $0x440] sm:$0xff] }
  0x62   : > { %677 = vmatpush.msrb.mxu2 %v401_v36  ;;  %696 = vmatpush.msrb.mxu3 %v418_v37  ;;  %v452_v36 = vld [vmem:[%s1316_s15 + $0x4c8] sm:$0xff]  ;;  %v467_v37 = vld [vmem:[%s1316_s15 + $0x540] sm:$0xff] }
  0x63   : > { %638 = vmatpush.msrb.mxu0 %v368_v38  ;;  %657 = vmatpush.msrb.mxu1 %v385_v39  ;;  %v484_v38 = vld [vmem:[%s1316_s15 + $0x5c8] sm:$0xff]  ;;  %v434_v39 = vld [vmem:[%s1316_s15 + $0x438] sm:$0xff] }
  0x64   : > { %678 = vmatpush.msrb.mxu2 %v400_v40  ;;  %697 = vmatpush.msrb.mxu3 %v417_v41  ;;  %v451_v40 = vld [vmem:[%s1316_s15 + $0x4c0] sm:$0xff]  ;;  %v466_v41 = vld [vmem:[%s1316_s15 + $0x538] sm:$0xff]  ;;  %v448_v52 = vld [vmem:[%s1316_s15 + $0x4a8] sm:$0xff] }
  0x65   : > { %639 = vmatpush.msrb.mxu0 %v367_v42  ;;  %658 = vmatpush.msrb.mxu1 %v384_v43  ;;  %v483_v42 = vld [vmem:[%s1316_s15 + $0x5c0] sm:$0xff]  ;;  %v433_v43 = vld [vmem:[%s1316_s15 + $0x430] sm:$0xff] }
  0x66   : > { %679 = vmatpush.msrb.mxu2 %v399_v44  ;;  %698 = vmatpush.msrb.mxu3 %v416_v45  ;;  %v450_v44 = vld [vmem:[%s1316_s15 + $0x4b8] sm:$0xff]  ;;  %v465_v45 = vld [vmem:[%s1316_s15 + $0x530] sm:$0xff] }
  0x67   : > { %640 = vmatpush.msrb.mxu0 %v366_v46  ;;  %659 = vmatpush.msrb.mxu1 %v383_v47  ;;  %v482_v46 = vld [vmem:[%s1316_s15 + $0x5b8] sm:$0xff]  ;;  %v432_v47 = vld [vmem:[%s1316_s15 + $0x428] sm:$0xff] }
  0x68   : > { %680 = vmatpush.msrb.mxu2 %v398_v48  ;;  %699 = vmatpush.msrb.mxu3 %v415_v49  ;;  %v449_v48 = vld [vmem:[%s1316_s15 + $0x4b0] sm:$0xff]  ;;  %v464_v49 = vld [vmem:[%s1316_s15 + $0x528] sm:$0xff] }
  0x69   : > { %641 = vmatpush.msrb.mxu0 %v365_v50  ;;  %660 = vmatpush.msrb.mxu1 %v382_v51  ;;  %v481_v50 = vld [vmem:[%s1316_s15 + $0x5b0] sm:$0xff]  ;;  %v431_v51 = vld [vmem:[%s1316_s15 + $0x420] sm:$0xff] }
  0x6a   : > { %681 = vmatpush.msrb.mxu2 %v397_v53  ;;  %700 = vmatpush.msrb.mxu3 %v414_v54  ;;  %v463_v53 = vld [vmem:[%s1316_s15 + $0x520] sm:$0xff]  ;;  %v480_v54 = vld [vmem:[%s1316_s15 + $0x5a8] sm:$0xff] }
  0x6b   : > { %642 = vmatpush.msrb.mxu0 %v364_v55  ;;  %661 = vmatpush.msrb.mxu1 %v381_v56  ;;  %v430_v55 = vld [vmem:[%s1316_s15 + $0x418] sm:$0xff]  ;;  %v447_v56 = vld [vmem:[%s1316_s15 + $0x4a0] sm:$0xff] }
  0x6c   : > { %682 = vmatpush.msrb.mxu2 %v396_v57  ;;  %701 = vmatpush.msrb.mxu3 %v413_v58  ;;  %v462_v57 = vld [vmem:[%s1316_s15 + $0x518] sm:$0xff]  ;;  %v479_v58 = vld [vmem:[%s1316_s15 + $0x5a0] sm:$0xff] }
  0x6d   : > { %604 = vmatmul.f32.vlgmr.msra.gmra.mxu2 %v520_v59  ;;  %643 = vmatpush.msrb.mxu0 %v363_v60  ;;  %v429_v59 = vld [vmem:[%s1316_s15 + $0x410] sm:$0xff]  ;;  %v446_v60 = vld [vmem:[%s1316_s15 + $0x498] sm:$0xff] }
  0x6e   : > { %662 = vmatpush.msrb.mxu1 %v380_v61  ;;  %683 = vmatpush.msrb.mxu2 %v395_v62  ;;  %v461_v61 = vld [vmem:[%s1316_s15 + $0x510] sm:$0xff]  ;;  %v478_v62 = vld [vmem:[%s1316_s15 + $0x598] sm:$0xff] }
  0x6f   : > { %702 = vmatpush.msrb.mxu3 %v412_v0  ;;  %564 = vmatmul.f32.vlgmr.msra.gmra.mxu0 %v518_v63  ;;  %v428_v63 = vld [vmem:[%s1316_s15 + $0x408] sm:$0xff]  ;;  %v445_v0 = vld [vmem:[%s1316_s15 + $0x490] sm:$0xff] }
  0x70   : > { %624 = vmatmul.f32.vlgmr.msra.gmra.mxu3 %v521_v1  ;;  %708 = vmatpush.msra.mxu0 %v442_v2  ;;  %v1520_v1 = vld [vmem:[%s1432_s23 + $0x8] sm:$0x3f]  ;;  %s886_s23 = scalar_lea.sflag [#allocation4], %s1300_s7 }
  0x71   : > { %748 = vmatpush.msra.mxu2 %v474_v3  ;;  %663 = vmatpush.msrb.mxu1 %v379_v4  ;;  %v460_v2 = vld [vmem:[%s1316_s15 + $0x508] sm:$0xff]  ;;  %v477_v3 = vld [vmem:[%s1316_s15 + $0x590] sm:$0xff]  ;;  %v427_v4 = vld [vmem:[%s1316_s15 + $0x400] sm:$0xff] }
  0x72   : > { %703 = vmatpush.msrb.mxu3 %v411_v6  ;;  %584 = vmatmul.f32.vlgmr.msra.gmra.mxu1 %v519_v5  ;;  %v444_v5 = vld [vmem:[%s1316_s15 + $0x488] sm:$0xff]  ;;  %v459_v6 = vld [vmem:[%s1316_s15 + $0x500] sm:$0xff] }
  0x73   : > { %709 = vmatpush.msra.mxu0 %v441_v7  ;;  %728 = vmatpush.msra.mxu1 %v458_v8  ;;  %v476_v7 = vld [vmem:[%s1316_s15 + $0x588] sm:$0xff]  ;;  %v526_v8 = vperm.slane %v1520_v1, 0 }
  0x74   : > { %749 = vmatpush.msra.mxu2 %v473_v9  ;;  %768 = vmatpush.msra.mxu3 %v490_v10  ;;  %v528_v9 = vperm.slane %v1520_v1, 2  ;;  %v506_v10 = vld [vmem:[%s1316_s15 + $0x678] sm:$0xff] }
  0x75   : > { %710 = vmatpush.msra.mxu0 %v440_v11  ;;  %729 = vmatpush.msra.mxu1 %v457_v12  ;;  %v443_v11 = vld [vmem:[%s1316_s15 + $0x480] sm:$0xff]  ;;  %v527_v12 = vperm.slane %v1520_v1, 1 }
  0x76   : > { %750 = vmatpush.msra.mxu2 %v472_v13  ;;  %769 = vmatpush.msra.mxu3 %v489_v14  ;;  %v475_v13 = vld [vmem:[%s1316_s15 + $0x580] sm:$0xff]  ;;  %v529_v14 = vperm.slane %v1520_v1, 3 }
  0x77   : > { %684 = vmatmul.f32.vlgmr.msrb.gmra.mxu2 %v524_v15  ;;  %711 = vmatpush.msra.mxu0 %v439_v16  ;;  %v505_v15 = vld [vmem:[%s1316_s15 + $0x670] sm:$0xff]  ;;  %v514_v16 = vld [vmem:[%s1316_s15 + $0x6b8] sm:$0xff] }
  0x78   : > { %730 = vmatpush.msra.mxu1 %v456_v17  ;;  %751 = vmatpush.msra.mxu2 %v471_v18  ;;  %v504_v17 = vld [vmem:[%s1316_s15 + $0x668] sm:$0xff]  ;;  %v513_v18 = vld [vmem:[%s1316_s15 + $0x6b0] sm:$0xff] }
  0x79   : > { %770 = vmatpush.msra.mxu3 %v488_v20  ;;  %644 = vmatmul.f32.vlgmr.msrb.gmra.mxu0 %v522_v19  ;;  %v503_v19 = vld [vmem:[%s1316_s15 + $0x660] sm:$0xff]  ;;  %v512_v20 = vld [vmem:[%s1316_s15 + $0x6a8] sm:$0xff] }
  0x7a   : > { %704 = vmatmul.f32.vlgmr.msrb.gmra.mxu3 %v525_v21  ;;  %712 = vmatpush.msra.mxu0 %v438_v22  ;;  %v502_v21 = vld [vmem:[%s1316_s15 + $0x658] sm:$0xff]  ;;  %v511_v22 = vld [vmem:[%s1316_s15 + $0x6a0] sm:$0xff] }
  0x7b   : > { %731 = vmatpush.msra.mxu1 %v455_v23  ;;  %752 = vmatpush.msra.mxu2 %v470_v24  ;;  %v501_v23 = vld [vmem:[%s1316_s15 + $0x650] sm:$0xff]  ;;  %v510_v24 = vld [vmem:[%s1316_s15 + $0x698] sm:$0xff] }
  0x7c   : > { %771 = vmatpush.msra.mxu3 %v487_v26  ;;  %664 = vmatmul.f32.vlgmr.msrb.gmra.mxu1 %v523_v25  ;;  %v500_v25 = vld [vmem:[%s1316_s15 + $0x648] sm:$0xff]  ;;  %v509_v26 = vld [vmem:[%s1316_s15 + $0x690] sm:$0xff] }
  0x7d   : > { %713 = vmatpush.msra.mxu0 %v437_v27  ;;  %732 = vmatpush.msra.mxu1 %v454_v28  ;;  %v499_v27 = vld [vmem:[%s1316_s15 + $0x640] sm:$0xff]  ;;  %v508_v28 = vld [vmem:[%s1316_s15 + $0x688] sm:$0xff] }
  0x7e   : > { %753 = vmatpush.msra.mxu2 %v469_v29  ;;  %772 = vmatpush.msra.mxu3 %v486_v30  ;;  %v498_v29 = vld [vmem:[%s1316_s15 + $0x638] sm:$0xff]  ;;  %v507_v30 = vld [vmem:[%s1316_s15 + $0x680] sm:$0xff] }
  0x7f   : > { %714 = vmatpush.msra.mxu0 %v436_v31  ;;  %733 = vmatpush.msra.mxu1 %v453_v32  ;;  %v531_v31 = vperm.slane %v1520_v1, 5  ;;  %v497_v32 = vld [vmem:[%s1316_s15 + $0x630] sm:$0xff] }
  0x80   : > { %754 = vmatpush.msra.mxu2 %v468_v33  ;;  %773 = vmatpush.msra.mxu3 %v485_v34  ;;  %v496_v33 = vld [vmem:[%s1316_s15 + $0x628] sm:$0xff]  ;;  %v495_v34 = vld [vmem:[%s1316_s15 + $0x620] sm:$0xff] }
  0x81   : > { %715 = vmatpush.msra.mxu0 %v435_v35  ;;  %734 = vmatpush.msra.mxu1 %v452_v36  ;;  %v494_v35 = vld [vmem:[%s1316_s15 + $0x618] sm:$0xff]  ;;  %v493_v36 = vld [vmem:[%s1316_s15 + $0x610] sm:$0xff] }
  0x82   : > { %755 = vmatpush.msra.mxu2 %v467_v37  ;;  %774 = vmatpush.msra.mxu3 %v484_v38  ;;  %v492_v37 = vld [vmem:[%s1316_s15 + $0x608] sm:$0xff]  ;;  %v491_v38 = vld [vmem:[%s1316_s15 + $0x600] sm:$0xff]  ;;  %s897_s15 = scalar_lea.hbm %s1619_s5, %s1236_s22  ;;  %s1134_s22 = scalar_lea.hbm %s1619_s5, 3 }
  0x83   : > { %716 = vmatpush.msra.mxu0 %v434_v39  ;;  %735 = vmatpush.msra.mxu1 %v451_v40  ;;  %v530_v39 = vperm.slane %v1520_v1, 4  ;;  %v515_v40 = vld [vmem:[%s241_s10] sm:$0x1]  ;;  %s901_s17 = sshll.u32 %s897_s15, 4  ;;  %s902_s17 = int_to_ptr.hbm [resolvable:$true] %s901_s17 }
  0x84   : > { %756 = vmatpush.msra.mxu2 %v466_v41  ;;  %775 = vmatpush.msra.mxu3 %v483_v42  ;;  %s1128_s25 = sshra.s32 %s902_s17, 4  ;;  %s1129_s25 = int_to_ptr.hbm [resolvable:$true] %s1128_s25 }
  0x85   : > { %717 = vmatpush.msra.mxu0 %v433_v43  ;;  %736 = vmatpush.msra.mxu1 %v450_v44  ;;  %s1130_s26 = scalar_lea.hbm %s1129_s25, 1  ;;  %p1135_p2 = scmp.lt.s32.totalorder %s1129_s25, %s1619_s5 }
  0x86   : > { %757 = vmatpush.msra.mxu2 %v465_v45  ;;  %776 = vmatpush.msra.mxu3 %v482_v46  ;;  %p1131_p6 = scmp.ne.s32.totalorder %s1129_s25, %s1130_s26  ;;  %p1136_p3 = scmp.lt.s32.totalorder %s1134_s22, %s1130_s26 }
  0x87   : > { %718 = vmatpush.msra.mxu0 %v432_v47  ;;  %737 = vmatpush.msra.mxu1 %v449_v48 }
  0x88   : > { %758 = vmatpush.msra.mxu2 %v464_v49  ;;  %777 = vmatpush.msra.mxu3 %v481_v50  ;;  %p1132_p13 = pnand %p1131_p6, %p1264_p10  ;;  %p1137_p4 = por %p1136_p3, %p1135_p2 }
  0x89   : > { %719 = vmatpush.msra.mxu0 %v431_v51  ;;  %738 = vmatpush.msra.mxu1 %v448_v52 }
  0x8a   : > { %759 = vmatpush.msra.mxu2 %v463_v53  ;;  %778 = vmatpush.msra.mxu3 %v480_v54  ;;  %p1133_p0 = pneg %p1132_p13 }
  0x8b   : > { %720 = vmatpush.msra.mxu0 %v430_v55  ;;  %739 = vmatpush.msra.mxu1 %v447_v56 }
  0x8c   : > { %760 = vmatpush.msra.mxu2 %v462_v57  ;;  %779 = vmatpush.msra.mxu3 %v479_v58  ;;  %p1138_p5 = pnand %p1137_p4, %p1133_p0 }
  0x8d   : > { %721 = vmatpush.msra.mxu0 %v429_v59  ;;  %740 = vmatpush.msra.mxu1 %v446_v60 }
  0x8e   : > { %761 = vmatpush.msra.mxu2 %v461_v61  ;;  %780 = vmatpush.msra.mxu3 %v478_v62 }
  0x8f   : > { %722 = vmatpush.msra.mxu0 %v428_v63  ;;  %741 = vmatpush.msra.mxu1 %v445_v0 }
  0x90   : > { %762 = vmatpush.msra.mxu2 %v460_v2  ;;  %781 = vmatpush.msra.mxu3 %v477_v3 }
  0x91   : > { %723 = vmatpush.msra.mxu0 %v427_v4  ;;  %742 = vmatpush.msra.mxu1 %v444_v5 }
  0x92   : > { %763 = vmatpush.msra.mxu2 %v459_v6  ;;  %782 = vmatpush.msra.mxu3 %v476_v7  ;;  %v1075_v6 = vld [vmem:[%s293_s28] ss:$0 sm:$0xff] }
  0x93   : > { %724 = vmatmul.f32.vlgmr.msra.gmra.mxu0 %v526_v8  ;;  %764 = vmatmul.f32.vlgmr.msra.gmra.mxu2 %v528_v9 }
  0x94   : > { %788 = vmatpush.msrb.mxu0 %v506_v10  ;;  %743 = vmatpush.msra.mxu1 %v443_v11 }
  0x95   : > { %783 = vmatpush.msra.mxu3 %v475_v13  ;;  %744 = vmatmul.f32.vlgmr.msra.gmra.mxu1 %v527_v12 }
  0x96   : > { %784 = vmatmul.f32.vlgmr.msra.gmra.mxu3 %v529_v14  ;;  %789 = vmatpush.msrb.mxu0 %v505_v15 }
  0x97   : > { %816 = vmatpush.msrb.mxu1 %v514_v16 }
  0x98   : > { %790 = vmatpush.msrb.mxu0 %v504_v17 }
  0x99   : > { %817 = vmatpush.msrb.mxu1 %v513_v18 }
  0x9a   : > { %791 = vmatpush.msrb.mxu0 %v503_v19 }
  0x9b   : > { %818 = vmatpush.msrb.mxu1 %v512_v20 }
  0x9c   : > { %792 = vmatpush.msrb.mxu0 %v502_v21 }
  0x9d   : > { %819 = vmatpush.msrb.mxu1 %v511_v22 }
  0x9e   : > { %793 = vmatpush.msrb.mxu0 %v501_v23 }
  0x9f   : > { %820 = vmatpush.msrb.mxu1 %v510_v24 }
  0xa0   : > { %794 = vmatpush.msrb.mxu0 %v500_v25 }
  0xa1   : > { %821 = vmatpush.msrb.mxu1 %v509_v26 }
  0xa2   : > { %795 = vmatpush.msrb.mxu0 %v499_v27 }
  0xa3   : > { %822 = vmatpush.msrb.mxu1 %v508_v28 }
  0xa4   : > { %796 = vmatpush.msrb.mxu0 %v498_v29 }
  0xa5   : > { %823 = vmatpush.msrb.mxu1 %v507_v30 }
  0xa6   : > { %797 = vmatpush.msrb.mxu0 %v497_v32  ;;  %1020 = vmatmul.msk.f32.vlgmr.msrb.gmra.mxu1 %vm545_vm0, %v531_v31 }
  0xa8   : > { %798 = vmatpush.msrb.mxu0 %v496_v33 }
  0xaa   : > { %799 = vmatpush.msrb.mxu0 %v495_v34 }
  0xac   : > { %800 = vmatpush.msrb.mxu0 %v494_v35 }
  0xae   : > { %801 = vmatpush.msrb.mxu0 %v493_v36 }
  0xb0   : > { %802 = vmatpush.msrb.mxu0 %v492_v37 }
  0xb2   : > { %803 = vmatpush.msrb.mxu0 %v491_v38 }
  0xb3   : > { %804 = vmatmul.f32.vlgmr.msrb.gmra.mxu0 %v530_v39 }
  0xec   : > { %v565_v41 = vpop.f32.mrf.mxu0 }
  0xed   : > { %v566_v42 = vadd.f32 %v565_v41, %v515_v40 }
  0xef   : > { %v585_v43 = vpop.f32.mrf.mxu1 }
  0xf0   : > { %v586_v44 = vadd.f32 %v585_v43, %v566_v42  ;;  %v605_v45 = vpop.f32.mrf.mxu2 }
  0xf2   : > { %v606_v46 = vadd.f32 %v605_v45, %v586_v44 }
  0xf3   : > { %v625_v47 = vpop.f32.mrf.mxu3 }
  0xf4   : > { %v626_v48 = vadd.f32 %v625_v47, %v606_v46 }
  0xf6   : > { %v645_v49 = vpop.f32.mrf.mxu0 }
  0xf7   : > { %v646_v50 = vadd.f32 %v645_v49, %v626_v48 }
  0xf9   : > { %v665_v51 = vpop.f32.mrf.mxu1 }
  0xfa   : > { %v666_v52 = vadd.f32 %v665_v51, %v646_v50  ;;  %v685_v53 = vpop.f32.mrf.mxu2 }
  0xfc   : > { %v686_v54 = vadd.f32 %v685_v53, %v666_v52 }
  0xfd   : > { %v705_v55 = vpop.f32.mrf.mxu3 }
  0xfe   : > { %v706_v57 = vadd.f32 %v705_v55, %v686_v54 }
 0x110   : > { %v725_v56 = vpop.f32.mrf.mxu0 }
 0x111   : > { %v726_v58 = vadd.f32 %v725_v56, %v706_v57 }
 0x112   : > { %v745_v59 = vpop.f32.mrf.mxu1 }
 0x113   : > { %v746_v61 = vadd.f32 %v745_v59, %v726_v58 }
 0x116   : > { %v765_v60 = vpop.f32.mrf.mxu2 }
 0x117   : > { %v766_v62 = vadd.f32 %v765_v60, %v746_v61 }
 0x119   : > { %v785_v63 = vpop.f32.mrf.mxu3 }
 0x11a   : > { %v786_v0 = vadd.f32 %v785_v63, %v766_v62 }
 0x123   : > { %v825_v2 = vpop.f32.mrf.mxu1 }
 0x130   : > { %v805_v1 = vpop.f32.mrf.mxu0 }
 0x131   : > { %v806_v3 = vadd.f32 %v805_v1, %v786_v0 }
 0x133   : > { %v826_v4 = vadd.f32 %v825_v2, %v806_v3 }
 0x135   : > { %1076 = vtanh.f32 %v826_v4  ;;  %v1021_v7 = vmul.f32 -1.442695, %v826_v4 }
 0x137   : > { %1078 = vpow2.f32 %v1021_v7 }
 0x13b   : > { %v1077_v5 = vpop.eup %1076 }
 0x13c   : > { %856 = vrot.lane.b32.xlu0 %v1077_v5, %s1182_s8 }
 0x13d   : > { %v1079_v8 = vpop.eup %1078 }
 0x13e   : > { %v831_v9 = vadd.f32 1.0, %v1079_v8 }
 0x140   : > { %1080 = vrcp.f32 %v831_v9  ;;  %v843_v15 = vand.u32 2147483648, %v831_v9  ;;  %vm837_vm2 = vweird.f32 %v831_v9  ;;  %v841_v16 = vand.u32 2147483647, %v831_v9 }
 0x142   : > { %v844_v18 = vor.u32 1.1754944e-38, %v843_v15  ;;  %vm842_vm4 = vcmp.eq.f32.partialorder %v841_v16, 8.507059e+37 }
 0x144   : > { %851 = vrot.lane.b32.xlu0 %v1075_v6, %s1182_s8 }
 0x146   : > { %v1081_v10 = vpop.eup %1080 }
 0x147   : > { %v833_v11 = vmul.f32 %v1081_v10, %v831_v9  ;;  %vm838_vm1 = vweird.f32 %v1081_v10 }
 0x148   : > { %vm839_vm3 = vmor %vm837_vm2, %vm838_vm1 }
 0x149   : > { %v834_v12 = vsub.f32 1.0, %v833_v11 }
 0x14b   : > { %v835_v13 = vmul.f32 %v1081_v10, %v834_v12 }
 0x14d   : > { %v836_v14 = vadd.f32 %v1081_v10, %v835_v13 }
 0x14f   : > { %v840_v17 = vsel %vm839_vm3, %v1081_v10, %v836_v14 }
 0x150   : > { %v845_v20 = vsel %vm842_vm4, %v844_v18, %v840_v17 }
 0x1ae   : > { %v857_v19 = vpop.permute.xlu0 %856 }
 0x1af   : > { %v859_v21 = vmul.f32 %v857_v19, %v845_v20 }
 0x1b1   : > { %861 = vrot.lane.b32.xlu1 %v859_v21, %s1182_s8 }
 0x1b6   : > { %v852_v22 = vpop.permute.xlu0 %851 }
 0x1b7   : > { %v854_v23 = vmul.f32 %v852_v22, %v845_v20 }
 0x223   : > { %v862_v24 = vpop.permute.xlu1 %861 }
 0x224   : > { %v864_v25 = vadd.f32 %v862_v24, %v854_v23 }
 0x226   : > { %1082 = vtanh.f32 %v864_v25  ;;  %866 = vrot.lane.b32.xlu2 %v864_v25, %s1183_s12 }
 0x22c   : > { %v1083_v26 = vpop.eup %1082 }
 0x22d   : > { %873 = vrot.lane.b32.xlu1 %v1083_v26, %s1182_s8 }
 0x280   : > { %v867_v27 = vpop.permute.xlu2 %866 }
 0x281   : > { %870 = vst.msk [vmem:[%s281_s29] sm:$0x1] %vm869_vm5, %v867_v27 }
 0x282   : > { %1141 = shalt.err (!%p1138_p5)
}
 0x283   : > { %1028 = dma.vmem_to_hbm [thread:$0]  (%p1264_p10), %s900_s16, 16, %s902_s17, %s886_s23  }
 0x284   : > { %s1184_s7 = smov 64   ;;  %s296_s14 = scalar_lea.vmem %s1618_s4, %s1310_s11 }
 0x29f   : > { %v874_v28 = vpop.permute.xlu1 %873 }
 0x2a0   : > { %v876_v29 = vmul.f32 %v874_v28, %v845_v20 }
 0x2a2   : > { %878 = vrot.lane.b32.xlu2 %v876_v29, %s1184_s7 }
 0x2fc   : > { %v879_v30 = vpop.permute.xlu2 %878 }
 0x2fd   : > { %881 = vst.msk [vmem:[%s296_s14] sm:$0x1] %vm869_vm5, %v879_v30 }
 0x2fe PF: > { %p1039_p7 = scmp.ge.s32.totalorder %s1180_s21, 2  ;;  %s919_s15 = sand.u32 1, %s1168_s18  }
 0x2ff   : > { %s920_s30 = scalar_lea.sflag [#allocation4], %s919_s15 }
 0x300   : > { %p1035_p8 = pnand %p1039_p7, %p1268_p11 }
 0x302   : > { %p1036_p10 = pneg %p1035_p8 }
 0x304   : > { %1163 = dma.done.wait (%p1036_p10), %s920_s30, 16  }
 0x305   : > { %1165 = vsyncadd (%p1036_p10), %s920_s30, 4294967280  ;;  %p19_p9 = scmp.ge.s32.totalorder %s1240_s24, 5   ;;  %s1625_s18 = smov %s1172_s19 }
 0x306   : > { %s1626_s19 = smov %s1176_s20  ;;  %s1627_s20 = smov %s1252_s27 }
 0x307   : > { %s1628_s21 = smov %s1240_s24  ;;  %21 = sbr.rel (!%p19_p9) target bundleno = 5 (0x5), region = 102 }
 0x30c   :  { %925 = vsyncpa [#allocation3], 1 }
 0x30d   :  { %927 = vsyncpa [#allocation3 + $0x1], 1 }
 0x30e   :  { %928 = vsyncpa [#allocation4], 1 }
 0x30f   :  { %930 = vsyncpa [#allocation4 + $0x1], 1 }

// kernel: rinterp_forward.39
= control target key start
LH: loop header
LB: loop body
LE: loop exit
PB: predicated region body
PF: predicated region fallthrough
CT: control target
= control target key end

     0   :  { %8 = vsyncpa [#allocation3], 0  ;;  %s853_s0 = inlined_call_operand.vmem [shape: f32[3,8,256], index: 0, kind: input, shape index: {}]   ;;  %s854_s1 = inlined_call_operand.hbm [shape: f32[3,256,128], index: 1, kind: input, shape index: {}]   ;;  %s855_s2 = inlined_call_operand.hbm [shape: f32[3,1,128], index: 2, kind: input, shape index: {}]   ;;  %s856_s3 = inlined_call_operand.vmem [shape: f32[3,8,128], index: 3, kind: output, shape index: {}]  }
   0x1   :  { %10 = vsyncpa [#allocation3 + $0x1], 0 }
   0x2   :  { %11 = vsyncpa [#allocation5], 0 }
   0x3   :  { %13 = vsyncpa [#allocation5 + $0x1], 0  ;;  %s700_s12 = smov 0   ;;  %s702_s13 = smov 0  }
   0x4   :  { %s704_s14 = smov 0   ;;  %s706_s15 = smov 0  }
   0x5   :  { %s708_s16 = smov 0   ;;  %s710_s17 = smov 0  }
   0x6 LB: > { %s483_s18 = sadd.s32 4294967295, %s676_s17   ;;  %s31_s19 = sadd.s32 1, %s672_s16  ;;  %s676_s17 = sphi %s710_s17, %s19_s17   ;;  %s672_s16 = sphi %s708_s16, %s864_s16   ;;  %s668_s15 = sphi %s706_s15, %s863_s15   ;;  %s664_s14 = sphi %s704_s14, %s862_s14   ;;  %s660_s13 = sphi %s702_s13, %s861_s13   ;;  %s656_s12 = sphi %s700_s12, %s860_s12  }
   0x7   : > { %p33_p0 = scmp.ge.s32.totalorder %s31_s19, 3  ;;  %s66_s20 = sadd.s32 1, %s664_s14 }
   0x8   : > { %p73_p1 = scmp.ne.s32.totalorder %s664_s14, %s660_s13  ;;  %p74_p2 = scmp.eq.s32.totalorder %s676_s17, 0 }
   0x9   : > { %s866_s19 = smov (%p33_p0, %s31_s19), 0  ;;  %p79_p4 = scmp.ne.s32.totalorder %s660_s13, %s656_s12 }
   0xa   : > { %p736_p3 = por %p74_p2, %p73_p1  ;;  %s63_s22 = ssub.s32 %s672_s16, %s866_s19 }
   0xb   : > { %p80_p5 = scmp.eq.s32.totalorder %s483_s18, 0  ;;  %p64_p6 = scmp.eq.s32.totalorder %s63_s22, 0 }
   0xc   : > { %p510_p8 = scmp.lt.s32.totalorder %s676_s17, 3  ;;  %s169_s25 = sand.u32 1, %s664_s14  }
   0xd   : > { %p743_p7 = por %p80_p5, %p79_p4  ;;  %s497_s26 = sshll.u32 %s672_s16, 8 }
   0xe   : > { %s749_s24 = scalar_select %p64_p6, %s664_s14, %s66_s20  }
   0xf   : > { %s487_s27 = sshll.u32 %s169_s25, 8  ;;  %s178_s30 = scalar_lea.hbm %s854_s1, %s497_s26 }
  0x10   : > { %s179_s4 = sshll.u32 %s178_s30, 4  ;;  %s173_s5 = scalar_lea.vmem [#allocation2], %s487_s27  ;;  %s180_s4 = int_to_ptr.hbm [resolvable:$true] %s179_s4 }
  0x11   : > { %s181_s6 = sshll.u32 %s173_s5, 4  ;;  %p758_p9 = pnand %p510_p8, %p736_p3  ;;  %s182_s6 = int_to_ptr.vmem [resolvable:$true] %s181_s6 }
  0x12   : > { %p490_p10 = scmp.ge.s32.totalorder %s676_s17, 1  ;;  %p206_p11 = scmp.lt.s32.totalorder %s676_s17, 4 }
  0x13   : > { %s170_s8 = scalar_lea.sflag [#allocation3], %s169_s25  ;;  %s678_s9 = smov 128  }
  0x14   : > { %s679_s10 = smov 8   ;;  %p207_p12 = pnand %p490_p10, %p206_p11 }
  0x15   : > { %506 = dma.hbm_to_vmem [thread:$0]  (!%p758_p9), %s180_s4, 4096, %s182_s6, %s170_s8, %s678_s9, %s678_s9, %s679_s10  }
  0x16   : > { %s197_s18 = scalar_lea.hbm %s855_s2, %s672_s16  ;;  %s194_s21 = scalar_lea.vmem [#allocation4], %s169_s25 }
  0x17   : > { %s199_s20 = sshll.u32 %s197_s18, 4  ;;  %s201_s22 = sshll.u32 %s194_s21, 4  ;;  %s200_s20 = int_to_ptr.hbm [resolvable:$true] %s199_s20  ;;  %s202_s22 = int_to_ptr.vmem [resolvable:$true] %s201_s22 }
  0x18   : > { %s192_s26 = scalar_lea.sflag [#allocation5], %s169_s25  ;;  %210 = sbr.rel (%p207_p12) target bundleno = 197 (0xc5), region = 32 }
  0x19   : > { %509 = dma.hbm_to_vmem [thread:$0]  (!%p758_p9), %s200_s20, 16, %s202_s22, %s192_s26  }
  0x1a   : > { %s773_s27 = sand.u32 (!%p207_p12), 1, %s660_s13  }
  0x1b   : > { %s491_s28 = sshll.u32 (!%p207_p12), %s773_s27, 8  ;;  %s213_s29 = scalar_lea.sflag (!%p207_p12), [#allocation3], %s773_s27 }
  0x1c   : > { %s777_s30 = scalar_lea.vmem (!%p207_p12), [#allocation2], %s491_s28 }
  0x1d   : > { %647 = dma.done.wait (%p743_p7), %s213_s29, 4096  }
  0x1e   : > { %649 = vsyncadd (%p743_p7), %s213_s29, 4294963200  ;;  %s223_s25 = scalar_lea.sflag [#allocation5], %s773_s27  ;;  %s225_s4 = scalar_lea.vmem [#allocation4], %s773_s27 }
  0x1f   : > { %651 = dma.done.wait (%p743_p7), %s223_s25, 16  }
  0x20   : > { %653 = vsyncadd (%p743_p7), %s223_s25, 4294967280  ;;  %v297_v0 = vld [vmem:[%s777_s30 + $0x78] sm:$0xff]  ;;  %v296_v1 = vld [vmem:[%s777_s30 + $0x70] sm:$0xff]  ;;  %p264_p13 = scmp.lt.s32.totalorder %s668_s15, 2 }
  0x21   : > { %v313_v2 = vld [vmem:[%s777_s30 + $0xf8] sm:$0xff]  ;;  %318 = vmatpush.msra.mxu0 %v297_v0  ;;  %v312_v3 = vld [vmem:[%s777_s30 + $0xf0] sm:$0xff]  ;;  %v295_v4 = vld [vmem:[%s777_s30 + $0x68] sm:$0xff] }
  0x22   : > { %338 = vmatpush.msra.mxu1 %v313_v2  ;;  %v311_v5 = vld [vmem:[%s777_s30 + $0xe8] sm:$0xff]  ;;  %v294_v6 = vld [vmem:[%s777_s30 + $0x60] sm:$0xff]  ;;  %v293_v8 = vld [vmem:[%s777_s30 + $0x58] sm:$0xff]  ;;  %s868_s15 = smov (!%p264_p13, %s668_s15), 2 }
  0x23   : > { %319 = vmatpush.msra.mxu0 %v296_v1  ;;  %v310_v7 = vld [vmem:[%s777_s30 + $0xe0] sm:$0xff]  ;;  %v309_v9 = vld [vmem:[%s777_s30 + $0xd8] sm:$0xff]  ;;  %v292_v10 = vld [vmem:[%s777_s30 + $0x50] sm:$0xff]  ;;  %s498_s23 = sshll.u32 %s868_s15, 4  ;;  %s494_s8 = sshll.u32 %s868_s15, 3 }
  0x24   : > { %339 = vmatpush.msra.mxu1 %v312_v3  ;;  %v308_v11 = vld [vmem:[%s777_s30 + $0xd0] sm:$0xff]  ;;  %v291_v12 = vld [vmem:[%s777_s30 + $0x48] sm:$0xff]  ;;  %v290_v14 = vld [vmem:[%s777_s30 + $0x40] sm:$0xff]  ;;  %s272_s7 = scalar_lea.vmem %s853_s0, %s498_s23  ;;  %s279_s11 = scalar_lea.vmem %s856_s3, %s494_s8 }
  0x25   : > { %320 = vmatpush.msra.mxu0 %v295_v4  ;;  %v307_v13 = vld [vmem:[%s777_s30 + $0xc8] sm:$0xff]  ;;  %v306_v15 = vld [vmem:[%s777_s30 + $0xc0] sm:$0xff]  ;;  %v289_v16 = vld [vmem:[%s777_s30 + $0x38] sm:$0xff] }
  0x26   : > { %340 = vmatpush.msra.mxu1 %v311_v5  ;;  %v305_v17 = vld [vmem:[%s777_s30 + $0xb8] sm:$0xff]  ;;  %v288_v18 = vld [vmem:[%s777_s30 + $0x30] sm:$0xff]  ;;  %v287_v20 = vld [vmem:[%s777_s30 + $0x28] sm:$0xff] }
  0x27   : > { %321 = vmatpush.msra.mxu0 %v294_v6  ;;  %v304_v19 = vld [vmem:[%s777_s30 + $0xb0] sm:$0xff]  ;;  %v303_v21 = vld [vmem:[%s777_s30 + $0xa8] sm:$0xff]  ;;  %v286_v22 = vld [vmem:[%s777_s30 + $0x20] sm:$0xff] }
  0x28   : > { %341 = vmatpush.msra.mxu1 %v310_v7  ;;  %v302_v23 = vld [vmem:[%s777_s30 + $0xa0] sm:$0xff]  ;;  %v285_v24 = vld [vmem:[%s777_s30 + $0x18] sm:$0xff]  ;;  %v284_v26 = vld [vmem:[%s777_s30 + $0x10] sm:$0xff] }
  0x29   : > { %322 = vmatpush.msra.mxu0 %v293_v8  ;;  %v301_v25 = vld [vmem:[%s777_s30 + $0x98] sm:$0xff]  ;;  %v300_v27 = vld [vmem:[%s777_s30 + $0x90] sm:$0xff]  ;;  %v283_v28 = vld [vmem:[%s777_s30 + $0x8] sm:$0xff] }
  0x2a   : > { %342 = vmatpush.msra.mxu1 %v309_v9  ;;  %v299_v29 = vld [vmem:[%s777_s30 + $0x88] sm:$0xff]  ;;  %v282_v30 = vld [vmem:[%s777_s30] sm:$0xff] }
  0x2b   : > { %323 = vmatpush.msra.mxu0 %v292_v10  ;;  %v298_v31 = vld [vmem:[%s777_s30 + $0x80] sm:$0xff]  ;;  %v281_v33 = vld [vmem:[%s272_s7 + $0x8] sm:$0xff] }
  0x2c   : > { %343 = vmatpush.msra.mxu1 %v308_v11  ;;  %v280_v32 = vld [vmem:[%s272_s7] sm:$0xff] }
  0x2d   : > { %324 = vmatpush.msra.mxu0 %v291_v12  ;;  %v561_v34 = vld [vmem:[%s225_s4] ss:$0 sm:$0xff] }
  0x2e   : > { %344 = vmatpush.msra.mxu1 %v307_v13 }
  0x2f   : > { %325 = vmatpush.msra.mxu0 %v290_v14 }
  0x30   : > { %345 = vmatpush.msra.mxu1 %v306_v15 }
  0x31   : > { %326 = vmatpush.msra.mxu0 %v289_v16 }
  0x32   : > { %346 = vmatpush.msra.mxu1 %v305_v17 }
  0x33   : > { %327 = vmatpush.msra.mxu0 %v288_v18 }
  0x34   : > { %347 = vmatpush.msra.mxu1 %v304_v19 }
  0x35   : > { %328 = vmatpush.msra.mxu0 %v287_v20 }
  0x36   : > { %348 = vmatpush.msra.mxu1 %v303_v21 }
  0x37   : > { %329 = vmatpush.msra.mxu0 %v286_v22 }
  0x38   : > { %349 = vmatpush.msra.mxu1 %v302_v23 }
  0x39   : > { %330 = vmatpush.msra.mxu0 %v285_v24 }
  0x3a   : > { %350 = vmatpush.msra.mxu1 %v301_v25 }
  0x3b   : > { %331 = vmatpush.msra.mxu0 %v284_v26 }
  0x3c   : > { %351 = vmatpush.msra.mxu1 %v300_v27 }
  0x3d   : > { %332 = vmatpush.msra.mxu0 %v283_v28 }
  0x3e   : > { %352 = vmatpush.msra.mxu1 %v299_v29 }
  0x3f   : > { %333 = vmatpush.msra.mxu0 %v282_v30 }
  0x40   : > { %353 = vmatpush.msra.mxu1 %v298_v31  ;;  %334 = vmatmul.f32.vlgmr.msra.gmra.mxu0 %v280_v32 }
  0x41   : > { %354 = vmatmul.f32.vlgmr.msra.gmra.mxu1 %v281_v33 }
  0xbd   : > { %v335_v35 = vpop.f32.mrf.mxu0 }
  0xbe   : > { %v355_v36 = vpop.f32.mrf.mxu1  ;;  %v336_v37 = vadd.f32 %v561_v34, %v335_v35 }
  0xc0   : > { %v356_v38 = vadd.f32 %v355_v36, %v336_v37 }
  0xc2   : > { %v358_v39 = vmax.f32 %v356_v38, 0.0 }
  0xc4   : > { %359 = vst [vmem:[%s279_s11] sm:$0xff] %v358_v39 }
  0xc5 PF: > { %s19_s17 = sadd.s32 1, %s676_s17   ;;  %s860_s12 = smov %s660_s13 }
  0xc6   : > { %p16_p0 = scmp.ge.s32.totalorder %s19_s17, 5   ;;  %s861_s13 = smov %s664_s14 }
  0xc7   : > { %s862_s14 = smov %s749_s24  ;;  %s863_s15 = smov %s672_s16 }
  0xc8   : > { %s864_s16 = smov %s866_s19  ;;  %18 = sbr.rel (!%p16_p0) target bundleno = 6 (0x6), region = 88 }
  0xcd   :  { %385 = vsyncpa [#allocation3], 1 }
  0xce   :  { %387 = vsyncpa [#allocation3 + $0x1], 1 }
  0xcf   :  { %388 = vsyncpa [#allocation5], 1 }
  0xd0   :  { %390 = vsyncpa [#allocation5 + $0x1], 1 }

// kernel: rinterp_forward.46
= control target key start
LH: loop header
LB: loop body
LE: loop exit
PB: predicated region body
PF: predicated region fallthrough
CT: control target
= control target key end

     0   :  { %8 = vsyncpa [#allocation3], 0  ;;  %s884_s0 = inlined_call_operand.vmem [shape: f32[3,27,128], index: 0, kind: input, shape index: {}]   ;;  %s885_s1 = inlined_call_operand.hbm [shape: f32[3,128,128], index: 1, kind: input, shape index: {}]   ;;  %s886_s2 = inlined_call_operand.hbm [shape: f32[3,1,128], index: 2, kind: input, shape index: {}]   ;;  %s887_s3 = inlined_call_operand.vmem [shape: f32[3,27,128], index: 3, kind: output, shape index: {}]  }
   0x1   :  { %10 = vsyncpa [#allocation3 + $0x1], 0 }
   0x2   :  { %11 = vsyncpa [#allocation5], 0 }
   0x3   :  { %13 = vsyncpa [#allocation5 + $0x1], 0  ;;  %s744_s12 = smov 0   ;;  %s746_s13 = smov 0  }
   0x4   :  { %s748_s14 = smov 0   ;;  %s750_s15 = smov 0  }
   0x5   :  { %s752_s16 = smov 0   ;;  %s754_s17 = smov 0  }
   0x6 LB: > { %s477_s18 = sadd.s32 4294967295, %s720_s17   ;;  %s31_s19 = sadd.s32 1, %s716_s16  ;;  %s720_s17 = sphi %s754_s17, %s19_s17   ;;  %s716_s16 = sphi %s752_s16, %s895_s16   ;;  %s712_s15 = sphi %s750_s15, %s894_s15   ;;  %s708_s14 = sphi %s748_s14, %s893_s14   ;;  %s704_s13 = sphi %s746_s13, %s892_s13   ;;  %s700_s12 = sphi %s744_s12, %s891_s12  }
   0x7   : > { %p33_p0 = scmp.ge.s32.totalorder %s31_s19, 3  ;;  %s66_s20 = sadd.s32 1, %s708_s14 }
   0x8   : > { %p73_p1 = scmp.ne.s32.totalorder %s708_s14, %s704_s13  ;;  %p74_p2 = scmp.eq.s32.totalorder %s720_s17, 0 }
   0x9   : > { %s897_s19 = smov (%p33_p0, %s31_s19), 0  ;;  %p79_p4 = scmp.ne.s32.totalorder %s704_s13, %s700_s12 }
   0xa   : > { %p780_p3 = por %p74_p2, %p73_p1  ;;  %s63_s22 = ssub.s32 %s716_s16, %s897_s19 }
   0xb   : > { %p80_p5 = scmp.eq.s32.totalorder %s477_s18, 0  ;;  %p64_p6 = scmp.eq.s32.totalorder %s63_s22, 0 }
   0xc   : > { %p554_p8 = scmp.lt.s32.totalorder %s720_s17, 3  ;;  %s170_s25 = sand.u32 1, %s708_s14  }
   0xd   : > { %p787_p7 = por %p80_p5, %p79_p4  ;;  %s492_s26 = sshll.u32 %s716_s16, 7 }
   0xe   : > { %s793_s24 = scalar_select %p64_p6, %s708_s14, %s66_s20  }
   0xf   : > { %s481_s27 = sshll.u32 %s170_s25, 7  ;;  %s179_s30 = scalar_lea.hbm %s885_s1, %s492_s26 }
  0x10   : > { %s180_s4 = sshll.u32 %s179_s30, 4  ;;  %s174_s5 = scalar_lea.vmem [#allocation2], %s481_s27  ;;  %s181_s4 = int_to_ptr.hbm [resolvable:$true] %s180_s4 }
  0x11   : > { %s182_s6 = sshll.u32 %s174_s5, 4  ;;  %p802_p9 = pnand %p554_p8, %p780_p3  ;;  %s183_s6 = int_to_ptr.vmem [resolvable:$true] %s182_s6 }
  0x12   : > { %p484_p10 = scmp.ge.s32.totalorder %s720_s17, 1  ;;  %p207_p11 = scmp.lt.s32.totalorder %s720_s17, 4 }
  0x13   : > { %s171_s8 = scalar_lea.sflag [#allocation3], %s170_s25  ;;  %s722_s9 = smov 128  }
  0x14   : > { %s723_s10 = smov 8   ;;  %p208_p12 = pnand %p484_p10, %p207_p11 }
  0x15   : > { %550 = dma.hbm_to_vmem [thread:$0]  (!%p802_p9), %s181_s4, 2048, %s183_s6, %s171_s8, %s722_s9, %s722_s9, %s723_s10  }
  0x16   : > { %s198_s18 = scalar_lea.hbm %s886_s2, %s716_s16  ;;  %s195_s21 = scalar_lea.vmem [#allocation4], %s170_s25 }
  0x17   : > { %s200_s20 = sshll.u32 %s198_s18, 4  ;;  %s202_s22 = sshll.u32 %s195_s21, 4  ;;  %s201_s20 = int_to_ptr.hbm [resolvable:$true] %s200_s20  ;;  %s203_s22 = int_to_ptr.vmem [resolvable:$true] %s202_s22 }
  0x18   : > { %s193_s26 = scalar_lea.sflag [#allocation5], %s170_s25  ;;  %211 = sbr.rel (%p208_p12) target bundleno = 202 (0xca), region = 32 }
  0x19   : > { %553 = dma.hbm_to_vmem [thread:$0]  (!%p802_p9), %s201_s20, 16, %s203_s22, %s193_s26  }
  0x1a   : > { %s817_s27 = sand.u32 (!%p208_p12), 1, %s704_s13  }
  0x1b   : > { %s485_s28 = sshll.u32 (!%p208_p12), %s817_s27, 7  ;;  %s214_s29 = scalar_lea.sflag (!%p208_p12), [#allocation3], %s817_s27 }
  0x1c   : > { %s821_s30 = scalar_lea.vmem (!%p208_p12), [#allocation2], %s485_s28 }
  0x1d   : > { %691 = dma.done.wait (%p787_p7), %s214_s29, 2048  }
  0x1e   : > { %693 = vsyncadd (%p787_p7), %s214_s29, 4294965248  ;;  %s224_s25 = scalar_lea.sflag [#allocation5], %s817_s27  ;;  %s226_s4 = scalar_lea.vmem [#allocation4], %s817_s27 }
  0x1f   : > { %695 = dma.done.wait (%p787_p7), %s224_s25, 16  }
  0x20   : > { %697 = vsyncadd (%p787_p7), %s224_s25, 4294967280  ;;  %v306_v0 = vld [vmem:[%s821_s30 + $0x78] sm:$0xff]  ;;  %v305_v1 = vld [vmem:[%s821_s30 + $0x70] sm:$0xff]  ;;  %p268_p13 = scmp.lt.s32.totalorder %s712_s15, 2 }
  0x21   : > { %496 = vmatpush.msra.mxu2 %v306_v0  ;;  %497 = vmatpush.msra.mxu3 %v306_v0  ;;  %v304_v2 = vld [vmem:[%s821_s30 + $0x68] sm:$0xff]  ;;  %v303_v3 = vld [vmem:[%s821_s30 + $0x60] sm:$0xff]  ;;  %v302_v4 = vld [vmem:[%s821_s30 + $0x58] sm:$0xff] }
  0x22   : > { %311 = vmatpush.msra.mxu0 %v306_v0  ;;  %495 = vmatpush.msra.mxu1 %v306_v0  ;;  %v301_v5 = vld [vmem:[%s821_s30 + $0x50] sm:$0xff]  ;;  %v300_v6 = vld [vmem:[%s821_s30 + $0x48] sm:$0xff]  ;;  %v299_v7 = vld [vmem:[%s821_s30 + $0x40] sm:$0xff]  ;;  %s899_s15 = smov (!%p268_p13, %s712_s15), 2 }
  0x23   : > { %499 = vmatpush.msra.mxu2 %v305_v1  ;;  %500 = vmatpush.msra.mxu3 %v305_v1  ;;  %v298_v8 = vld [vmem:[%s821_s30 + $0x38] sm:$0xff]  ;;  %v297_v9 = vld [vmem:[%s821_s30 + $0x30] sm:$0xff]  ;;  %v296_v10 = vld [vmem:[%s821_s30 + $0x28] sm:$0xff]  ;;  %s493_s23 = sshll.u32 %s899_s15, 5 }
  0x24   : > { %312 = vmatpush.msra.mxu0 %v305_v1  ;;  %498 = vmatpush.msra.mxu1 %v305_v1  ;;  %v295_v11 = vld [vmem:[%s821_s30 + $0x20] sm:$0xff]  ;;  %v294_v12 = vld [vmem:[%s821_s30 + $0x18] sm:$0xff]  ;;  %v293_v13 = vld [vmem:[%s821_s30 + $0x10] sm:$0xff]  ;;  %s275_s7 = scalar_lea.vmem %s884_s0, %s493_s23  ;;  %s285_s10 = scalar_lea.vmem %s887_s3, %s493_s23 }
  0x25   : > { %502 = vmatpush.msra.mxu2 %v304_v2  ;;  %503 = vmatpush.msra.mxu3 %v304_v2  ;;  %v292_v14 = vld [vmem:[%s821_s30 + $0x8] sm:$0xff]  ;;  %v291_v15 = vld [vmem:[%s821_s30] sm:$0xff]  ;;  %v289_v16 = vld [vmem:[%s275_s7 + $0x10] sm:$0xff] }
  0x26   : > { %313 = vmatpush.msra.mxu0 %v304_v2  ;;  %501 = vmatpush.msra.mxu1 %v304_v2  ;;  %v290_v17 = vld [vmem:[%s275_s7 + $0x18] sm:$0x7]  ;;  %v287_v18 = vld [vmem:[%s275_s7] sm:$0xff]  ;;  %v288_v19 = vld [vmem:[%s275_s7 + $0x8] sm:$0xff] }
  0x27   : > { %505 = vmatpush.msra.mxu2 %v303_v3  ;;  %506 = vmatpush.msra.mxu3 %v303_v3  ;;  %v605_v20 = vld [vmem:[%s226_s4] ss:$0 sm:$0xff] }
  0x28   : > { %314 = vmatpush.msra.mxu0 %v303_v3  ;;  %504 = vmatpush.msra.mxu1 %v303_v3 }
  0x29   : > { %508 = vmatpush.msra.mxu2 %v302_v4  ;;  %509 = vmatpush.msra.mxu3 %v302_v4 }
  0x2a   : > { %315 = vmatpush.msra.mxu0 %v302_v4  ;;  %507 = vmatpush.msra.mxu1 %v302_v4 }
  0x2b   : > { %511 = vmatpush.msra.mxu2 %v301_v5  ;;  %512 = vmatpush.msra.mxu3 %v301_v5 }
  0x2c   : > { %316 = vmatpush.msra.mxu0 %v301_v5  ;;  %510 = vmatpush.msra.mxu1 %v301_v5 }
  0x2d   : > { %514 = vmatpush.msra.mxu2 %v300_v6  ;;  %515 = vmatpush.msra.mxu3 %v300_v6 }
  0x2e   : > { %317 = vmatpush.msra.mxu0 %v300_v6  ;;  %513 = vmatpush.msra.mxu1 %v300_v6 }
  0x2f   : > { %517 = vmatpush.msra.mxu2 %v299_v7  ;;  %518 = vmatpush.msra.mxu3 %v299_v7 }
  0x30   : > { %318 = vmatpush.msra.mxu0 %v299_v7  ;;  %516 = vmatpush.msra.mxu1 %v299_v7 }
  0x31   : > { %520 = vmatpush.msra.mxu2 %v298_v8  ;;  %521 = vmatpush.msra.mxu3 %v298_v8 }
  0x32   : > { %319 = vmatpush.msra.mxu0 %v298_v8  ;;  %519 = vmatpush.msra.mxu1 %v298_v8 }
  0x33   : > { %523 = vmatpush.msra.mxu2 %v297_v9  ;;  %524 = vmatpush.msra.mxu3 %v297_v9 }
  0x34   : > { %320 = vmatpush.msra.mxu0 %v297_v9  ;;  %522 = vmatpush.msra.mxu1 %v297_v9 }
  0x35   : > { %526 = vmatpush.msra.mxu2 %v296_v10  ;;  %527 = vmatpush.msra.mxu3 %v296_v10 }
  0x36   : > { %321 = vmatpush.msra.mxu0 %v296_v10  ;;  %525 = vmatpush.msra.mxu1 %v296_v10 }
  0x37   : > { %529 = vmatpush.msra.mxu2 %v295_v11  ;;  %530 = vmatpush.msra.mxu3 %v295_v11 }
  0x38   : > { %322 = vmatpush.msra.mxu0 %v295_v11  ;;  %528 = vmatpush.msra.mxu1 %v295_v11 }
  0x39   : > { %532 = vmatpush.msra.mxu2 %v294_v12  ;;  %533 = vmatpush.msra.mxu3 %v294_v12 }
  0x3a   : > { %323 = vmatpush.msra.mxu0 %v294_v12  ;;  %531 = vmatpush.msra.mxu1 %v294_v12 }
  0x3b   : > { %535 = vmatpush.msra.mxu2 %v293_v13  ;;  %536 = vmatpush.msra.mxu3 %v293_v13 }
  0x3c   : > { %324 = vmatpush.msra.mxu0 %v293_v13  ;;  %534 = vmatpush.msra.mxu1 %v293_v13 }
  0x3d   : > { %538 = vmatpush.msra.mxu2 %v292_v14  ;;  %539 = vmatpush.msra.mxu3 %v292_v14 }
  0x3e   : > { %325 = vmatpush.msra.mxu0 %v292_v14  ;;  %537 = vmatpush.msra.mxu1 %v292_v14 }
  0x3f   : > { %541 = vmatpush.msra.mxu2 %v291_v15  ;;  %542 = vmatpush.msra.mxu3 %v291_v15 }
  0x40   : > { %333 = vmatmul.f32.vlgmr.msra.gmra.mxu2 %v289_v16  ;;  %336 = vmatmul.f32.vlgmr.msra.gmra.mxu3 %v290_v17 }
  0x41   : > { %326 = vmatpush.msra.mxu0 %v291_v15  ;;  %540 = vmatpush.msra.mxu1 %v291_v15 }
  0x42   : > { %327 = vmatmul.f32.vlgmr.msra.gmra.mxu0 %v287_v18  ;;  %330 = vmatmul.f32.vlgmr.msra.gmra.mxu1 %v288_v19 }
  0xbf   : > { %v328_v21 = vpop.f32.mrf.mxu0  ;;  %v331_v22 = vpop.f32.mrf.mxu1 }
  0xc0   : > { %v329_v23 = vadd.f32 %v605_v20, %v328_v21  ;;  %v332_v24 = vadd.f32 %v605_v20, %v331_v22 }
  0xc2   : > { %v340_v25 = vmax.f32 %v329_v23, 0.0  ;;  %v341_v26 = vmax.f32 %v332_v24, 0.0 }
  0xc3   : > { %v334_v27 = vpop.f32.mrf.mxu2  ;;  %v337_v28 = vpop.f32.mrf.mxu3 }
  0xc4   : > { %344 = vst [vmem:[%s285_s10] sm:$0xff] %v340_v25  ;;  %v335_v29 = vadd.f32 %v605_v20, %v334_v27  ;;  %v338_v30 = vadd.f32 %v605_v20, %v337_v28 }
  0xc5   : > { %345 = vst [vmem:[%s285_s10 + $0x8] sm:$0xff] %v341_v26 }
  0xc6   : > { %v342_v31 = vmax.f32 %v335_v29, 0.0  ;;  %v343_v32 = vmax.f32 %v338_v30, 0.0 }
  0xc8   : > { %346 = vst [vmem:[%s285_s10 + $0x10] sm:$0xff] %v342_v31 }
  0xc9   : > { %347 = vst [vmem:[%s285_s10 + $0x18] sm:$0x7] %v343_v32 }
  0xca PF: > { %s19_s17 = sadd.s32 1, %s720_s17   ;;  %s891_s12 = smov %s704_s13 }
  0xcb   : > { %p16_p0 = scmp.ge.s32.totalorder %s19_s17, 5   ;;  %s892_s13 = smov %s708_s14 }
  0xcc   : > { %s893_s14 = smov %s793_s24  ;;  %s894_s15 = smov %s716_s16 }
  0xcd   : > { %s895_s16 = smov %s897_s19  ;;  %18 = sbr.rel (!%p16_p0) target bundleno = 6 (0x6), region = 88 }
  0xd2   :  { %378 = vsyncpa [#allocation3], 1 }
  0xd3   :  { %380 = vsyncpa [#allocation3 + $0x1], 1 }
  0xd4   :  { %381 = vsyncpa [#allocation5], 1 }
  0xd5   :  { %383 = vsyncpa [#allocation5 + $0x1], 1 }

// kernel: rinterp_forward.40
= control target key start
LH: loop header
LB: loop body
LE: loop exit
PB: predicated region body
PF: predicated region fallthrough
CT: control target
= control target key end

     0   :  { %s546_s12 = smov 0   ;;  %s548_s13 = smov 0   ;;  %s617_s0 = inlined_call_operand.vmem [shape: f32[3,27,128], index: 0, kind: input, shape index: {}]   ;;  %s618_s1 = inlined_call_operand.vmem [shape: f32[3,128,128], index: 1, kind: input, shape index: {}]   ;;  %s619_s2 = inlined_call_operand.vmem [shape: f32[3,1,128], index: 2, kind: input, shape index: {}]   ;;  %s620_s3 = inlined_call_operand.vmem [shape: f32[3,27,128], index: 3, kind: output, shape index: {}]  }
   0x1   :  { %s550_s14 = smov 0  }
   0x2 LB: > { %s25_s15 = sadd.s32 1, %s520_s13  ;;  %p417_p0 = scmp.ge.s32.totalorder %s524_s14, 1  ;;  %s524_s14 = sphi %s550_s14, %s13_s14   ;;  %s520_s13 = sphi %s548_s13, %s622_s13   ;;  %s516_s12 = sphi %s546_s12, %s621_s12  }
   0x3   : > { %p27_p1 = scmp.ge.s32.totalorder %s25_s15, 3  ;;  %p176_p2 = scmp.lt.s32.totalorder %s524_s14, 4 }
   0x5   : > { %s624_s15 = smov (%p27_p1, %s25_s15), 0  ;;  %p177_p3 = pnand %p417_p0, %p176_p2 }
   0x6   : > { %p217_p4 = scmp.lt.s32.totalorder (!%p177_p3), %s516_s12, 2 }
   0x7   : > { %180 = sbr.rel (%p177_p3) target bundleno = 185 (0xb9), region = 32 }
   0xc   : > { %s626_s12 = smov (!%p217_p4, %s516_s12), 2 }
   0xd   : > { %s427_s16 = sshll.u32 %s626_s12, 7  ;;  %s233_s22 = scalar_lea.vmem %s619_s2, %s626_s12 }
   0xe   : > { %s570_s19 = scalar_lea.vmem %s618_s1, %s427_s16  ;;  %s426_s23 = sshll.u32 %s626_s12, 5  ;;  %v501_v20 = vld [vmem:[%s233_s22] ss:$0 sm:$0xff] }
   0xf   : > { %v263_v0 = vld [vmem:[%s570_s19 + $0x78] sm:$0xff]  ;;  %v262_v1 = vld [vmem:[%s570_s19 + $0x70] sm:$0xff]  ;;  %v261_v2 = vld [vmem:[%s570_s19 + $0x68] sm:$0xff]  ;;  %s224_s26 = scalar_lea.vmem %s617_s0, %s426_s23  ;;  %s242_s4 = scalar_lea.vmem %s620_s3, %s426_s23 }
  0x10   : > { %430 = vmatpush.msra.mxu2 %v263_v0  ;;  %431 = vmatpush.msra.mxu3 %v263_v0  ;;  %v260_v3 = vld [vmem:[%s570_s19 + $0x60] sm:$0xff]  ;;  %v259_v4 = vld [vmem:[%s570_s19 + $0x58] sm:$0xff]  ;;  %v258_v5 = vld [vmem:[%s570_s19 + $0x50] sm:$0xff] }
  0x11   : > { %268 = vmatpush.msra.mxu0 %v263_v0  ;;  %429 = vmatpush.msra.mxu1 %v263_v0  ;;  %v257_v6 = vld [vmem:[%s570_s19 + $0x48] sm:$0xff]  ;;  %v256_v7 = vld [vmem:[%s570_s19 + $0x40] sm:$0xff]  ;;  %v255_v8 = vld [vmem:[%s570_s19 + $0x38] sm:$0xff] }
  0x12   : > { %433 = vmatpush.msra.mxu2 %v262_v1  ;;  %434 = vmatpush.msra.mxu3 %v262_v1  ;;  %v254_v9 = vld [vmem:[%s570_s19 + $0x30] sm:$0xff]  ;;  %v253_v10 = vld [vmem:[%s570_s19 + $0x28] sm:$0xff]  ;;  %v252_v11 = vld [vmem:[%s570_s19 + $0x20] sm:$0xff] }
  0x13   : > { %269 = vmatpush.msra.mxu0 %v262_v1  ;;  %432 = vmatpush.msra.mxu1 %v262_v1  ;;  %v251_v12 = vld [vmem:[%s570_s19 + $0x18] sm:$0xff]  ;;  %v250_v13 = vld [vmem:[%s570_s19 + $0x10] sm:$0xff]  ;;  %v249_v14 = vld [vmem:[%s570_s19 + $0x8] sm:$0xff] }
  0x14   : > { %436 = vmatpush.msra.mxu2 %v261_v2  ;;  %437 = vmatpush.msra.mxu3 %v261_v2  ;;  %v248_v15 = vld [vmem:[%s570_s19] sm:$0xff]  ;;  %v246_v16 = vld [vmem:[%s224_s26 + $0x10] sm:$0xff]  ;;  %v247_v17 = vld [vmem:[%s224_s26 + $0x18] sm:$0x7] }
  0x15   : > { %270 = vmatpush.msra.mxu0 %v261_v2  ;;  %435 = vmatpush.msra.mxu1 %v261_v2  ;;  %v244_v18 = vld [vmem:[%s224_s26] sm:$0xff]  ;;  %v245_v19 = vld [vmem:[%s224_s26 + $0x8] sm:$0xff] }
  0x16   : > { %439 = vmatpush.msra.mxu2 %v260_v3  ;;  %440 = vmatpush.msra.mxu3 %v260_v3 }
  0x17   : > { %271 = vmatpush.msra.mxu0 %v260_v3  ;;  %438 = vmatpush.msra.mxu1 %v260_v3 }
  0x18   : > { %442 = vmatpush.msra.mxu2 %v259_v4  ;;  %443 = vmatpush.msra.mxu3 %v259_v4 }
  0x19   : > { %272 = vmatpush.msra.mxu0 %v259_v4  ;;  %441 = vmatpush.msra.mxu1 %v259_v4 }
  0x1a   : > { %445 = vmatpush.msra.mxu2 %v258_v5  ;;  %446 = vmatpush.msra.mxu3 %v258_v5 }
  0x1b   : > { %273 = vmatpush.msra.mxu0 %v258_v5  ;;  %444 = vmatpush.msra.mxu1 %v258_v5 }
  0x1c   : > { %448 = vmatpush.msra.mxu2 %v257_v6  ;;  %449 = vmatpush.msra.mxu3 %v257_v6 }
  0x1d   : > { %274 = vmatpush.msra.mxu0 %v257_v6  ;;  %447 = vmatpush.msra.mxu1 %v257_v6 }
  0x1e   : > { %451 = vmatpush.msra.mxu2 %v256_v7  ;;  %452 = vmatpush.msra.mxu3 %v256_v7 }
  0x1f   : > { %275 = vmatpush.msra.mxu0 %v256_v7  ;;  %450 = vmatpush.msra.mxu1 %v256_v7 }
  0x20   : > { %454 = vmatpush.msra.mxu2 %v255_v8  ;;  %455 = vmatpush.msra.mxu3 %v255_v8 }
  0x21   : > { %276 = vmatpush.msra.mxu0 %v255_v8  ;;  %453 = vmatpush.msra.mxu1 %v255_v8 }
  0x22   : > { %457 = vmatpush.msra.mxu2 %v254_v9  ;;  %458 = vmatpush.msra.mxu3 %v254_v9 }
  0x23   : > { %277 = vmatpush.msra.mxu0 %v254_v9  ;;  %456 = vmatpush.msra.mxu1 %v254_v9 }
  0x24   : > { %460 = vmatpush.msra.mxu2 %v253_v10  ;;  %461 = vmatpush.msra.mxu3 %v253_v10 }
  0x25   : > { %278 = vmatpush.msra.mxu0 %v253_v10  ;;  %459 = vmatpush.msra.mxu1 %v253_v10 }
  0x26   : > { %463 = vmatpush.msra.mxu2 %v252_v11  ;;  %464 = vmatpush.msra.mxu3 %v252_v11 }
  0x27   : > { %279 = vmatpush.msra.mxu0 %v252_v11  ;;  %462 = vmatpush.msra.mxu1 %v252_v11 }
  0x28   : > { %466 = vmatpush.msra.mxu2 %v251_v12  ;;  %467 = vmatpush.msra.mxu3 %v251_v12 }
  0x29   : > { %280 = vmatpush.msra.mxu0 %v251_v12  ;;  %465 = vmatpush.msra.mxu1 %v251_v12 }
  0x2a   : > { %469 = vmatpush.msra.mxu2 %v250_v13  ;;  %470 = vmatpush.msra.mxu3 %v250_v13 }
  0x2b   : > { %281 = vmatpush.msra.mxu0 %v250_v13  ;;  %468 = vmatpush.msra.mxu1 %v250_v13 }
  0x2c   : > { %472 = vmatpush.msra.mxu2 %v249_v14  ;;  %473 = vmatpush.msra.mxu3 %v249_v14 }
  0x2d   : > { %282 = vmatpush.msra.mxu0 %v249_v14  ;;  %471 = vmatpush.msra.mxu1 %v249_v14 }
  0x2e   : > { %475 = vmatpush.msra.mxu2 %v248_v15  ;;  %476 = vmatpush.msra.mxu3 %v248_v15 }
  0x2f   : > { %290 = vmatmul.f32.vlgmr.msra.gmra.mxu2 %v246_v16  ;;  %293 = vmatmul.f32.vlgmr.msra.gmra.mxu3 %v247_v17 }
  0x30   : > { %283 = vmatpush.msra.mxu0 %v248_v15  ;;  %474 = vmatpush.msra.mxu1 %v248_v15 }
  0x31   : > { %284 = vmatmul.f32.vlgmr.msra.gmra.mxu0 %v244_v18  ;;  %287 = vmatmul.f32.vlgmr.msra.gmra.mxu1 %v245_v19 }
  0xae   : > { %v285_v21 = vpop.f32.mrf.mxu0  ;;  %v288_v22 = vpop.f32.mrf.mxu1 }
  0xaf   : > { %v286_v23 = vadd.f32 %v501_v20, %v285_v21  ;;  %v289_v24 = vadd.f32 %v501_v20, %v288_v22 }
  0xb1   : > { %v297_v25 = vmax.f32 %v286_v23, 0.0  ;;  %v298_v26 = vmax.f32 %v289_v24, 0.0 }
  0xb2   : > { %v291_v27 = vpop.f32.mrf.mxu2  ;;  %v294_v28 = vpop.f32.mrf.mxu3 }
  0xb3   : > { %301 = vst [vmem:[%s242_s4] sm:$0xff] %v297_v25  ;;  %v292_v29 = vadd.f32 %v501_v20, %v291_v27  ;;  %v295_v30 = vadd.f32 %v501_v20, %v294_v28 }
  0xb4   : > { %302 = vst [vmem:[%s242_s4 + $0x8] sm:$0xff] %v298_v26 }
  0xb5   : > { %v299_v31 = vmax.f32 %v292_v29, 0.0  ;;  %v300_v32 = vmax.f32 %v295_v30, 0.0 }
  0xb7   : > { %303 = vst [vmem:[%s242_s4 + $0x10] sm:$0xff] %v299_v31 }
  0xb8   : > { %304 = vst [vmem:[%s242_s4 + $0x18] sm:$0x7] %v300_v32 }
  0xb9 PF: > { %s13_s14 = sadd.s32 1, %s524_s14   ;;  %s621_s12 = smov %s520_s13 }
  0xba   : > { %p10_p5 = scmp.ge.s32.totalorder %s13_s14, 5   ;;  %s622_s13 = smov %s624_s15 }
  0xbc   :  { %12 = sbr.rel (!%p10_p5) target bundleno = 2 (0x2), region = 68 }

// kernel: rinterp_forward.41
= control target key start
LH: loop header
LB: loop body
LE: loop exit
PB: predicated region body
PF: predicated region fallthrough
CT: control target
= control target key end

     0   :  { %s651_s12 = smov 0   ;;  %s653_s13 = smov 0   ;;  %s766_s0 = inlined_call_operand.vmem [shape: f32[3,125,64], index: 0, kind: input, shape index: {}]   ;;  %s767_s1 = inlined_call_operand.vmem [shape: f32[3,64,128], index: 1, kind: input, shape index: {}]   ;;  %s768_s2 = inlined_call_operand.vmem [shape: f32[3,1,128], index: 2, kind: input, shape index: {}]   ;;  %s769_s3 = inlined_call_operand.vmem [shape: f32[3,125,128], index: 3, kind: output, shape index: {}]  }
   0x1   :  { %s655_s14 = smov 0  }
   0x2 LB: > { %s25_s15 = sadd.s32 1, %s625_s13  ;;  %p530_p0 = scmp.ge.s32.totalorder %s629_s14, 1  ;;  %s629_s14 = sphi %s655_s14, %s13_s14   ;;  %s625_s13 = sphi %s653_s13, %s771_s13   ;;  %s621_s12 = sphi %s651_s12, %s770_s12  }
   0x3   : > { %p27_p1 = scmp.ge.s32.totalorder %s25_s15, 3  ;;  %p176_p2 = scmp.lt.s32.totalorder %s629_s14, 4 }
   0x5   : > { %s773_s15 = smov (%p27_p1, %s25_s15), 0  ;;  %p177_p3 = pnand %p530_p0, %p176_p2 }
   0x6   : > { %p217_p4 = scmp.lt.s32.totalorder (!%p177_p3), %s621_s12, 2 }
   0x7   : > { %180 = sbr.rel (%p177_p3) target bundleno = 193 (0xc1), region = 32 }
   0xc   : > { %s775_s12 = smov (!%p217_p4, %s621_s12), 2  ;;  %vm272_vm0 = vcmask 523264  }
   0xd   : > { %s556_s16 = sshll.u32 %s775_s12, 6  ;;  %s233_s22 = scalar_lea.vmem %s768_s2, %s775_s12 }
   0xe   : > { %s675_s19 = scalar_lea.vmem %s767_s1, %s556_s16  ;;  %s555_s23 = sshll.u32 %s775_s12, 7  ;;  %v606_v24 = vld [vmem:[%s233_s22] ss:$0 sm:$0xff] }
   0xf   : > { %v267_v0 = vld [vmem:[%s675_s19 + $0x38] sm:$0xff]  ;;  %v266_v1 = vld [vmem:[%s675_s19 + $0x30] sm:$0xff]  ;;  %v265_v2 = vld [vmem:[%s675_s19 + $0x28] sm:$0xff]  ;;  %s693_s26 = scalar_lea.vmem %s766_s0, %s555_s23  ;;  %s739_s4 = scalar_lea.vmem %s769_s3, %s555_s23 }
  0x10   : > { %559 = vmatpush.msra.mxu2 %v267_v0  ;;  %560 = vmatpush.msra.mxu3 %v267_v0  ;;  %v264_v3 = vld [vmem:[%s675_s19 + $0x20] sm:$0xff]  ;;  %v263_v4 = vld [vmem:[%s675_s19 + $0x18] sm:$0xff]  ;;  %v262_v5 = vld [vmem:[%s675_s19 + $0x10] sm:$0xff] }
  0x11   : > { %329 = vmatpush.msra.mxu0 %v267_v0  ;;  %558 = vmatpush.msra.mxu1 %v267_v0  ;;  %v261_v6 = vld [vmem:[%s675_s19 + $0x8] sm:$0xff]  ;;  %v260_v7 = vld [vmem:[%s675_s19] sm:$0xff]  ;;  %v254_v16 = vld [vmem:[%s693_s26 + $0x50] sm:$0xff] }
  0x12   : > { %562 = vmatpush.msra.mxu2 %v266_v1  ;;  %563 = vmatpush.msra.mxu3 %v266_v1  ;;  %v252_v8 = vld [vmem:[%s693_s26 + $0x40] sm:$0xff]  ;;  %v253_v12 = vld [vmem:[%s693_s26 + $0x48] sm:$0xff]  ;;  %v258_v17 = vld [vmem:[%s693_s26 + $0x70] sm:$0xff] }
  0x13   : > { %330 = vmatpush.msra.mxu0 %v266_v1  ;;  %561 = vmatpush.msra.mxu1 %v266_v1  ;;  %v256_v9 = vld [vmem:[%s693_s26 + $0x60] sm:$0xff]  ;;  %v257_v13 = vld [vmem:[%s693_s26 + $0x68] sm:$0xff]  ;;  %v246_v18 = vld [vmem:[%s693_s26 + $0x10] sm:$0xff] }
  0x14   : > { %565 = vmatpush.msra.mxu2 %v265_v2  ;;  %566 = vmatpush.msra.mxu3 %v265_v2  ;;  %v244_v10 = vld [vmem:[%s693_s26] sm:$0xff]  ;;  %v245_v14 = vld [vmem:[%s693_s26 + $0x8] sm:$0xff]  ;;  %v250_v19 = vld [vmem:[%s693_s26 + $0x30] sm:$0xff] }
  0x15   : > { %331 = vmatpush.msra.mxu0 %v265_v2  ;;  %564 = vmatpush.msra.mxu1 %v265_v2  ;;  %v248_v11 = vld [vmem:[%s693_s26 + $0x20] sm:$0xff]  ;;  %v249_v15 = vld [vmem:[%s693_s26 + $0x28] sm:$0xff]  ;;  %v255_v20 = vld [vmem:[%s693_s26 + $0x58] sm:$0xff] }
  0x16   : > { %568 = vmatpush.msra.mxu2 %v264_v3  ;;  %569 = vmatpush.msra.mxu3 %v264_v3  ;;  %v259_v21 = vld [vmem:[%s693_s26 + $0x78] sm:$0x1f] }
  0x17   : > { %332 = vmatpush.msra.mxu0 %v264_v3  ;;  %567 = vmatpush.msra.mxu1 %v264_v3  ;;  %v247_v22 = vld [vmem:[%s693_s26 + $0x18] sm:$0xff] }
  0x18   : > { %571 = vmatpush.msra.mxu2 %v263_v4  ;;  %572 = vmatpush.msra.mxu3 %v263_v4  ;;  %v251_v23 = vld [vmem:[%s693_s26 + $0x38] sm:$0xff] }
  0x19   : > { %333 = vmatpush.msra.mxu0 %v263_v4  ;;  %570 = vmatpush.msra.mxu1 %v263_v4 }
  0x1a   : > { %574 = vmatpush.msra.mxu2 %v262_v5  ;;  %575 = vmatpush.msra.mxu3 %v262_v5 }
  0x1b   : > { %334 = vmatpush.msra.mxu0 %v262_v5  ;;  %573 = vmatpush.msra.mxu1 %v262_v5 }
  0x1c   : > { %577 = vmatpush.msra.mxu2 %v261_v6  ;;  %578 = vmatpush.msra.mxu3 %v261_v6 }
  0x1d   : > { %335 = vmatpush.msra.mxu0 %v261_v6  ;;  %576 = vmatpush.msra.mxu1 %v261_v6 }
  0x1e   : > { %580 = vmatpush.msra.mxu2 %v260_v7  ;;  %581 = vmatpush.msra.mxu3 %v260_v7 }
  0x1f   : > { %545 = vmatmul.msk.f32.vlgmr.msra.gmra.mxu2 %vm272_vm0, %v252_v8  ;;  %549 = vmatmul.msk.f32.vlgmr.msra.gmra.mxu3 %vm272_vm0, %v256_v9 }
  0x20   : > { %336 = vmatpush.msra.mxu0 %v260_v7  ;;  %579 = vmatpush.msra.mxu1 %v260_v7 }
  0x21   : > { %537 = vmatmul.msk.f32.vlgmr.msra.gmra.mxu0 %vm272_vm0, %v244_v10  ;;  %541 = vmatmul.msk.f32.vlgmr.msra.gmra.mxu1 %vm272_vm0, %v248_v11 }
  0x27   : > { %546 = vmatmul.msk.f32.gmra.mxu2 %vm272_vm0, %v253_v12  ;;  %550 = vmatmul.msk.f32.gmra.mxu3 %vm272_vm0, %v257_v13 }
  0x29   : > { %538 = vmatmul.msk.f32.gmra.mxu0 %vm272_vm0, %v245_v14  ;;  %542 = vmatmul.msk.f32.gmra.mxu1 %vm272_vm0, %v249_v15 }
  0x2f   : > { %547 = vmatmul.msk.f32.gmra.mxu2 %vm272_vm0, %v254_v16  ;;  %551 = vmatmul.msk.f32.gmra.mxu3 %vm272_vm0, %v258_v17 }
  0x31   : > { %539 = vmatmul.msk.f32.gmra.mxu0 %vm272_vm0, %v246_v18  ;;  %543 = vmatmul.msk.f32.gmra.mxu1 %vm272_vm0, %v250_v19 }
  0x37   : > { %548 = vmatmul.msk.f32.gmra.mxu2 %vm272_vm0, %v255_v20  ;;  %552 = vmatmul.msk.f32.gmra.mxu3 %vm272_vm0, %v259_v21 }
  0x39   : > { %540 = vmatmul.msk.f32.gmra.mxu0 %vm272_vm0, %v247_v22  ;;  %544 = vmatmul.msk.f32.gmra.mxu1 %vm272_vm0, %v251_v23 }
  0x9e   : > { %v338_v25 = vpop.f32.mrf.mxu0  ;;  %v350_v26 = vpop.f32.mrf.mxu1 }
  0x9f   : > { %v339_v27 = vadd.f32 %v606_v24, %v338_v25  ;;  %v351_v28 = vadd.f32 %v606_v24, %v350_v26 }
  0xa1   : > { %v386_v29 = vmax.f32 %v339_v27, 0.0  ;;  %v390_v30 = vmax.f32 %v351_v28, 0.0 }
  0xa2   : > { %v362_v31 = vpop.f32.mrf.mxu2  ;;  %v374_v32 = vpop.f32.mrf.mxu3 }
  0xa3   : > { %402 = vst [vmem:[%s739_s4] sm:$0xff] %v386_v29  ;;  %v363_v33 = vadd.f32 %v606_v24, %v362_v31  ;;  %v375_v34 = vadd.f32 %v606_v24, %v374_v32 }
  0xa4   : > { %406 = vst [vmem:[%s739_s4 + $0x20] sm:$0xff] %v390_v30 }
  0xa5   : > { %v394_v35 = vmax.f32 %v363_v33, 0.0  ;;  %v398_v36 = vmax.f32 %v375_v34, 0.0 }
  0xa6   : > { %v341_v37 = vpop.f32.mrf.mxu0  ;;  %v353_v38 = vpop.f32.mrf.mxu1 }
  0xa7   : > { %410 = vst [vmem:[%s739_s4 + $0x40] sm:$0xff] %v394_v35  ;;  %v342_v39 = vadd.f32 %v606_v24, %v341_v37  ;;  %v354_v40 = vadd.f32 %v606_v24, %v353_v38 }
  0xa8   : > { %414 = vst [vmem:[%s739_s4 + $0x60] sm:$0xff] %v398_v36 }
  0xa9   : > { %v387_v41 = vmax.f32 %v342_v39, 0.0  ;;  %v391_v42 = vmax.f32 %v354_v40, 0.0 }
  0xaa   : > { %v365_v43 = vpop.f32.mrf.mxu2  ;;  %v377_v44 = vpop.f32.mrf.mxu3 }
  0xab   : > { %403 = vst [vmem:[%s739_s4 + $0x8] sm:$0xff] %v387_v41  ;;  %v366_v45 = vadd.f32 %v606_v24, %v365_v43  ;;  %v378_v46 = vadd.f32 %v606_v24, %v377_v44 }
  0xac   : > { %407 = vst [vmem:[%s739_s4 + $0x28] sm:$0xff] %v391_v42 }
  0xad   : > { %v395_v47 = vmax.f32 %v366_v45, 0.0  ;;  %v399_v48 = vmax.f32 %v378_v46, 0.0 }
  0xae   : > { %v344_v49 = vpop.f32.mrf.mxu0  ;;  %v356_v50 = vpop.f32.mrf.mxu1 }
  0xaf   : > { %411 = vst [vmem:[%s739_s4 + $0x48] sm:$0xff] %v395_v47  ;;  %v345_v51 = vadd.f32 %v606_v24, %v344_v49  ;;  %v357_v52 = vadd.f32 %v606_v24, %v356_v50 }
  0xb0   : > { %415 = vst [vmem:[%s739_s4 + $0x68] sm:$0xff] %v399_v48 }
  0xb1   : > { %v388_v53 = vmax.f32 %v345_v51, 0.0  ;;  %v392_v54 = vmax.f32 %v357_v52, 0.0 }
  0xb2   : > { %v368_v55 = vpop.f32.mrf.mxu2  ;;  %v380_v56 = vpop.f32.mrf.mxu3 }
  0xb3   : > { %404 = vst [vmem:[%s739_s4 + $0x10] sm:$0xff] %v388_v53  ;;  %v369_v57 = vadd.f32 %v606_v24, %v368_v55  ;;  %v381_v58 = vadd.f32 %v606_v24, %v380_v56 }
  0xb4   : > { %408 = vst [vmem:[%s739_s4 + $0x30] sm:$0xff] %v392_v54 }
  0xb5   : > { %v396_v59 = vmax.f32 %v369_v57, 0.0  ;;  %v400_v60 = vmax.f32 %v381_v58, 0.0 }
  0xb6   : > { %v347_v61 = vpop.f32.mrf.mxu0  ;;  %v359_v62 = vpop.f32.mrf.mxu1 }
  0xb7   : > { %412 = vst [vmem:[%s739_s4 + $0x50] sm:$0xff] %v396_v59  ;;  %v348_v63 = vadd.f32 %v606_v24, %v347_v61  ;;  %v360_v0 = vadd.f32 %v606_v24, %v359_v62 }
  0xb8   : > { %416 = vst [vmem:[%s739_s4 + $0x70] sm:$0xff] %v400_v60 }
  0xb9   : > { %v389_v1 = vmax.f32 %v348_v63, 0.0  ;;  %v393_v2 = vmax.f32 %v360_v0, 0.0 }
  0xba   : > { %v371_v3 = vpop.f32.mrf.mxu2  ;;  %v383_v4 = vpop.f32.mrf.mxu3 }
  0xbb   : > { %405 = vst [vmem:[%s739_s4 + $0x18] sm:$0xff] %v389_v1  ;;  %v372_v5 = vadd.f32 %v606_v24, %v371_v3  ;;  %v384_v6 = vadd.f32 %v606_v24, %v383_v4 }
  0xbc   : > { %409 = vst [vmem:[%s739_s4 + $0x38] sm:$0xff] %v393_v2 }
  0xbd   : > { %v397_v7 = vmax.f32 %v372_v5, 0.0  ;;  %v401_v8 = vmax.f32 %v384_v6, 0.0 }
  0xbf   : > { %413 = vst [vmem:[%s739_s4 + $0x58] sm:$0xff] %v397_v7 }
  0xc0   : > { %417 = vst [vmem:[%s739_s4 + $0x78] sm:$0x1f] %v401_v8 }
  0xc1 PF: > { %s13_s14 = sadd.s32 1, %s629_s14   ;;  %s770_s12 = smov %s625_s13 }
  0xc2   : > { %p10_p5 = scmp.ge.s32.totalorder %s13_s14, 5   ;;  %s771_s13 = smov %s773_s15 }
  0xc4   :  { %12 = sbr.rel (!%p10_p5) target bundleno = 2 (0x2), region = 68 }

// kernel: rinterp_forward.48
= control target key start
LH: loop header
LB: loop body
LE: loop exit
PB: predicated region body
PF: predicated region fallthrough
CT: control target
= control target key end

     0   :  { %s1150_s12 = smov 0   ;;  %s1152_s13 = smov 0   ;;  %s1486_s0 = inlined_call_operand.vmem [shape: f32[3,1024,32], index: 0, kind: input, shape index: {}]   ;;  %s1487_s1 = inlined_call_operand.vmem [shape: f32[3,32,128], index: 1, kind: input, shape index: {}]   ;;  %s1488_s2 = inlined_call_operand.vmem [shape: f32[3,1,128], index: 2, kind: input, shape index: {}]   ;;  %s1489_s3 = inlined_call_operand.vmem [shape: f32[3,1024,128], index: 3, kind: output, shape index: {}]  }
   0x1   :  { %s1154_s14 = smov 0   ;;  %s1156_s15 = smov 0  }
   0x2   :  { %s1158_s16 = smov 0  }
   0x3 LB: > { %s22_s17 = sadd.s32 1, %s1120_s14  ;;  %s25_s18 = sadd.s32 1, %s1124_s15  ;;  %s1128_s16 = sphi %s1158_s16, %s13_s16   ;;  %s1124_s15 = sphi %s1156_s15, %s1493_s15   ;;  %s1120_s14 = sphi %s1154_s14, %s1492_s14   ;;  %s1116_s13 = sphi %s1152_s13, %s1491_s13   ;;  %s1112_s12 = sphi %s1150_s12, %s1490_s12  }
   0x4   : > { %p23_p0 = scmp.ge.s32.totalorder %s22_s17, 2  ;;  %p961_p1 = scmp.ge.s32.totalorder %s1128_s16, 1 }
   0x5   : > { %p176_p2 = scmp.lt.s32.totalorder %s1128_s16, 7 }
   0x6   : > { %s1495_s17 = smov (%p23_p0, %s22_s17), 0  ;;  %s1497_s18 = smov (!%p23_p0, %s25_s18), %s1124_s15 }
   0x7   : > { %p177_p3 = pnand %p961_p1, %p176_p2  ;;  %p27_p4 = scmp.ge.s32.totalorder %s1497_s18, 3 }
   0x8   : > { %s962_s19 = sshll.u32 (!%p177_p3), %s1112_s12, 6  ;;  %p217_p5 = scmp.lt.s32.totalorder (!%p177_p3), %s1116_s13, 2 }
   0x9   : > { %s1499_s18 = smov (%p27_p4, %s1497_s18), 0  ;;  %180 = sbr.rel (%p177_p3) target bundleno = 283 (0x11b), region = 32 }
   0xa   : > { %p219_p6 = scmp.lt.s32.totalorder (!%p177_p3), %s962_s19, 127 }
   0xe   : > { %s1501_s13 = smov (!%p217_p5, %s1116_s13), 2  ;;  %s1503_s19 = smov (!%p219_p6, %s962_s19), 127  ;;  %vm316_vm0 = vcmask 261120  }
   0xf   : > { %s963_s20 = sshll.u32 %s1501_s13, 7  ;;  %s1036_s21 = sshll.u32 %s1501_s13, 5 }
  0x10   : > { %s1184_s22 = sadd.s32 %s963_s20, %s1503_s19  ;;  %s230_s25 = scalar_lea.vmem %s1487_s1, %s1036_s21 }
  0x11   : > { %s964_s26 = sshll.u32 %s1184_s22, 3  ;;  %s233_s29 = scalar_lea.vmem %s1488_s2, %s1501_s13  ;;  %v311_v0 = vld [vmem:[%s230_s25 + $0x18] sm:$0xff]  ;;  %v310_v1 = vld [vmem:[%s230_s25 + $0x10] sm:$0xff]  ;;  %v309_v2 = vld [vmem:[%s230_s25 + $0x8] sm:$0xff] }
  0x12   : > { %1038 = vmatpush.msra.mxu2 %v311_v0  ;;  %1039 = vmatpush.msra.mxu3 %v311_v0  ;;  %s1199_s5 = scalar_lea.vmem %s1486_s0, %s964_s26  ;;  %v308_v3 = vld [vmem:[%s230_s25] sm:$0xff]  ;;  %s1343_s10 = scalar_lea.vmem %s1489_s3, %s964_s26 }
  0x13   : > { %521 = vmatpush.msra.mxu0 %v311_v0  ;;  %1037 = vmatpush.msra.mxu1 %v311_v0  ;;  %v276_v4 = vld [vmem:[%s1199_s5 + $0x100] sm:$0xff]  ;;  %v277_v8 = vld [vmem:[%s1199_s5 + $0x108] sm:$0xff]  ;;  %v278_v12 = vld [vmem:[%s1199_s5 + $0x110] sm:$0xff] }
  0x14   : > { %1041 = vmatpush.msra.mxu2 %v310_v1  ;;  %1042 = vmatpush.msra.mxu3 %v310_v1  ;;  %v292_v5 = vld [vmem:[%s1199_s5 + $0x180] sm:$0xff]  ;;  %v293_v9 = vld [vmem:[%s1199_s5 + $0x188] sm:$0xff]  ;;  %v294_v13 = vld [vmem:[%s1199_s5 + $0x190] sm:$0xff] }
  0x15   : > { %522 = vmatpush.msra.mxu0 %v310_v1  ;;  %1040 = vmatpush.msra.mxu1 %v310_v1  ;;  %v244_v6 = vld [vmem:[%s1199_s5] sm:$0xff]  ;;  %v245_v10 = vld [vmem:[%s1199_s5 + $0x8] sm:$0xff]  ;;  %v246_v14 = vld [vmem:[%s1199_s5 + $0x10] sm:$0xff] }
  0x16   : > { %1044 = vmatpush.msra.mxu2 %v309_v2  ;;  %1045 = vmatpush.msra.mxu3 %v309_v2  ;;  %v260_v7 = vld [vmem:[%s1199_s5 + $0x80] sm:$0xff]  ;;  %v261_v11 = vld [vmem:[%s1199_s5 + $0x88] sm:$0xff]  ;;  %v262_v15 = vld [vmem:[%s1199_s5 + $0x90] sm:$0xff] }
  0x17   : > { %523 = vmatpush.msra.mxu0 %v309_v2  ;;  %1043 = vmatpush.msra.mxu1 %v309_v2  ;;  %v279_v16 = vld [vmem:[%s1199_s5 + $0x118] sm:$0xff]  ;;  %v280_v20 = vld [vmem:[%s1199_s5 + $0x120] sm:$0xff]  ;;  %v281_v24 = vld [vmem:[%s1199_s5 + $0x128] sm:$0xff] }
  0x18   : > { %1047 = vmatpush.msra.mxu2 %v308_v3  ;;  %1048 = vmatpush.msra.mxu3 %v308_v3  ;;  %v295_v17 = vld [vmem:[%s1199_s5 + $0x198] sm:$0xff]  ;;  %v296_v21 = vld [vmem:[%s1199_s5 + $0x1a0] sm:$0xff]  ;;  %v297_v25 = vld [vmem:[%s1199_s5 + $0x1a8] sm:$0xff] }
  0x19   : > { %1002 = vmatmul.msk.f32.vlgmr.msra.gmra.mxu2 %vm316_vm0, %v276_v4  ;;  %1018 = vmatmul.msk.f32.vlgmr.msra.gmra.mxu3 %vm316_vm0, %v292_v5  ;;  %v247_v18 = vld [vmem:[%s1199_s5 + $0x18] sm:$0xff]  ;;  %v248_v22 = vld [vmem:[%s1199_s5 + $0x20] sm:$0xff]  ;;  %v249_v26 = vld [vmem:[%s1199_s5 + $0x28] sm:$0xff] }
  0x1a   : > { %524 = vmatpush.msra.mxu0 %v308_v3  ;;  %1046 = vmatpush.msra.mxu1 %v308_v3  ;;  %v263_v19 = vld [vmem:[%s1199_s5 + $0x98] sm:$0xff]  ;;  %v264_v23 = vld [vmem:[%s1199_s5 + $0xa0] sm:$0xff]  ;;  %v265_v27 = vld [vmem:[%s1199_s5 + $0xa8] sm:$0xff] }
  0x1b   : > { %970 = vmatmul.msk.f32.vlgmr.msra.gmra.mxu0 %vm316_vm0, %v244_v6  ;;  %986 = vmatmul.msk.f32.vlgmr.msra.gmra.mxu1 %vm316_vm0, %v260_v7  ;;  %v282_v28 = vld [vmem:[%s1199_s5 + $0x130] sm:$0xff]  ;;  %v283_v32 = vld [vmem:[%s1199_s5 + $0x138] sm:$0xff]  ;;  %v284_v36 = vld [vmem:[%s1199_s5 + $0x140] sm:$0xff] }
  0x1c   : > { %v298_v29 = vld [vmem:[%s1199_s5 + $0x1b0] sm:$0xff]  ;;  %v299_v33 = vld [vmem:[%s1199_s5 + $0x1b8] sm:$0xff]  ;;  %v300_v37 = vld [vmem:[%s1199_s5 + $0x1c0] sm:$0xff] }
  0x1d   : > { %v250_v30 = vld [vmem:[%s1199_s5 + $0x30] sm:$0xff]  ;;  %v251_v34 = vld [vmem:[%s1199_s5 + $0x38] sm:$0xff]  ;;  %v252_v38 = vld [vmem:[%s1199_s5 + $0x40] sm:$0xff] }
  0x1e   : > { %v266_v31 = vld [vmem:[%s1199_s5 + $0xb0] sm:$0xff]  ;;  %v267_v35 = vld [vmem:[%s1199_s5 + $0xb8] sm:$0xff]  ;;  %v268_v39 = vld [vmem:[%s1199_s5 + $0xc0] sm:$0xff] }
  0x1f   : > { %v285_v40 = vld [vmem:[%s1199_s5 + $0x148] sm:$0xff]  ;;  %v286_v44 = vld [vmem:[%s1199_s5 + $0x150] sm:$0xff]  ;;  %v287_v48 = vld [vmem:[%s1199_s5 + $0x158] sm:$0xff] }
  0x20   : > { %v301_v41 = vld [vmem:[%s1199_s5 + $0x1c8] sm:$0xff]  ;;  %v302_v45 = vld [vmem:[%s1199_s5 + $0x1d0] sm:$0xff]  ;;  %v303_v49 = vld [vmem:[%s1199_s5 + $0x1d8] sm:$0xff] }
  0x21   : > { %1003 = vmatmul.msk.f32.gmra.mxu2 %vm316_vm0, %v277_v8  ;;  %1019 = vmatmul.msk.f32.gmra.mxu3 %vm316_vm0, %v293_v9  ;;  %v253_v42 = vld [vmem:[%s1199_s5 + $0x48] sm:$0xff]  ;;  %v254_v46 = vld [vmem:[%s1199_s5 + $0x50] sm:$0xff]  ;;  %v255_v50 = vld [vmem:[%s1199_s5 + $0x58] sm:$0xff] }
  0x22   : > { %v269_v43 = vld [vmem:[%s1199_s5 + $0xc8] sm:$0xff]  ;;  %v270_v47 = vld [vmem:[%s1199_s5 + $0xd0] sm:$0xff]  ;;  %v271_v51 = vld [vmem:[%s1199_s5 + $0xd8] sm:$0xff] }
  0x23   : > { %971 = vmatmul.msk.f32.gmra.mxu0 %vm316_vm0, %v245_v10  ;;  %987 = vmatmul.msk.f32.gmra.mxu1 %vm316_vm0, %v261_v11  ;;  %v288_v52 = vld [vmem:[%s1199_s5 + $0x160] sm:$0xff]  ;;  %v289_v56 = vld [vmem:[%s1199_s5 + $0x168] sm:$0xff]  ;;  %v290_v60 = vld [vmem:[%s1199_s5 + $0x170] sm:$0xff] }
  0x24   : > { %v304_v53 = vld [vmem:[%s1199_s5 + $0x1e0] sm:$0xff]  ;;  %v305_v57 = vld [vmem:[%s1199_s5 + $0x1e8] sm:$0xff]  ;;  %v306_v61 = vld [vmem:[%s1199_s5 + $0x1f0] sm:$0xff] }
  0x25   : > { %v256_v54 = vld [vmem:[%s1199_s5 + $0x60] sm:$0xff]  ;;  %v257_v58 = vld [vmem:[%s1199_s5 + $0x68] sm:$0xff]  ;;  %v258_v62 = vld [vmem:[%s1199_s5 + $0x70] sm:$0xff] }
  0x26   : > { %v272_v55 = vld [vmem:[%s1199_s5 + $0xe0] sm:$0xff]  ;;  %v273_v59 = vld [vmem:[%s1199_s5 + $0xe8] sm:$0xff]  ;;  %v274_v63 = vld [vmem:[%s1199_s5 + $0xf0] sm:$0xff] }
  0x27   : > { %v291_v0 = vld [vmem:[%s1199_s5 + $0x178] sm:$0xff]  ;;  %v1334_v4 = vld [vmem:[%s233_s29] ss:$0 sm:$0xff] }
  0x28   : > { %v307_v1 = vld [vmem:[%s1199_s5 + $0x1f8] sm:$0xff] }
  0x29   : > { %1004 = vmatmul.msk.f32.gmra.mxu2 %vm316_vm0, %v278_v12  ;;  %1020 = vmatmul.msk.f32.gmra.mxu3 %vm316_vm0, %v294_v13  ;;  %v259_v2 = vld [vmem:[%s1199_s5 + $0x78] sm:$0xff] }
  0x2a   : > { %v275_v3 = vld [vmem:[%s1199_s5 + $0xf8] sm:$0xff] }
  0x2b   : > { %972 = vmatmul.msk.f32.gmra.mxu0 %vm316_vm0, %v246_v14  ;;  %988 = vmatmul.msk.f32.gmra.mxu1 %vm316_vm0, %v262_v15 }
  0x31   : > { %1005 = vmatmul.msk.f32.gmra.mxu2 %vm316_vm0, %v279_v16  ;;  %1021 = vmatmul.msk.f32.gmra.mxu3 %vm316_vm0, %v295_v17 }
  0x33   : > { %973 = vmatmul.msk.f32.gmra.mxu0 %vm316_vm0, %v247_v18  ;;  %989 = vmatmul.msk.f32.gmra.mxu1 %vm316_vm0, %v263_v19 }
  0x39   : > { %1006 = vmatmul.msk.f32.gmra.mxu2 %vm316_vm0, %v280_v20  ;;  %1022 = vmatmul.msk.f32.gmra.mxu3 %vm316_vm0, %v296_v21 }
  0x3b   : > { %974 = vmatmul.msk.f32.gmra.mxu0 %vm316_vm0, %v248_v22  ;;  %990 = vmatmul.msk.f32.gmra.mxu1 %vm316_vm0, %v264_v23 }
  0x41   : > { %1007 = vmatmul.msk.f32.gmra.mxu2 %vm316_vm0, %v281_v24  ;;  %1023 = vmatmul.msk.f32.gmra.mxu3 %vm316_vm0, %v297_v25 }
  0x43   : > { %975 = vmatmul.msk.f32.gmra.mxu0 %vm316_vm0, %v249_v26  ;;  %991 = vmatmul.msk.f32.gmra.mxu1 %vm316_vm0, %v265_v27 }
  0x49   : > { %1008 = vmatmul.msk.f32.gmra.mxu2 %vm316_vm0, %v282_v28  ;;  %1024 = vmatmul.msk.f32.gmra.mxu3 %vm316_vm0, %v298_v29 }
  0x4b   : > { %976 = vmatmul.msk.f32.gmra.mxu0 %vm316_vm0, %v250_v30  ;;  %992 = vmatmul.msk.f32.gmra.mxu1 %vm316_vm0, %v266_v31 }
  0x51   : > { %1009 = vmatmul.msk.f32.gmra.mxu2 %vm316_vm0, %v283_v32  ;;  %1025 = vmatmul.msk.f32.gmra.mxu3 %vm316_vm0, %v299_v33 }
  0x53   : > { %977 = vmatmul.msk.f32.gmra.mxu0 %vm316_vm0, %v251_v34  ;;  %993 = vmatmul.msk.f32.gmra.mxu1 %vm316_vm0, %v267_v35 }
  0x59   : > { %1010 = vmatmul.msk.f32.gmra.mxu2 %vm316_vm0, %v284_v36  ;;  %1026 = vmatmul.msk.f32.gmra.mxu3 %vm316_vm0, %v300_v37 }
  0x5b   : > { %978 = vmatmul.msk.f32.gmra.mxu0 %vm316_vm0, %v252_v38  ;;  %994 = vmatmul.msk.f32.gmra.mxu1 %vm316_vm0, %v268_v39 }
  0x61   : > { %1011 = vmatmul.msk.f32.gmra.mxu2 %vm316_vm0, %v285_v40  ;;  %1027 = vmatmul.msk.f32.gmra.mxu3 %vm316_vm0, %v301_v41 }
  0x63   : > { %979 = vmatmul.msk.f32.gmra.mxu0 %vm316_vm0, %v253_v42  ;;  %995 = vmatmul.msk.f32.gmra.mxu1 %vm316_vm0, %v269_v43 }
  0x69   : > { %1012 = vmatmul.msk.f32.gmra.mxu2 %vm316_vm0, %v286_v44  ;;  %1028 = vmatmul.msk.f32.gmra.mxu3 %vm316_vm0, %v302_v45 }
  0x6b   : > { %980 = vmatmul.msk.f32.gmra.mxu0 %vm316_vm0, %v254_v46  ;;  %996 = vmatmul.msk.f32.gmra.mxu1 %vm316_vm0, %v270_v47 }
  0x71   : > { %1013 = vmatmul.msk.f32.gmra.mxu2 %vm316_vm0, %v287_v48  ;;  %1029 = vmatmul.msk.f32.gmra.mxu3 %vm316_vm0, %v303_v49 }
  0x73   : > { %981 = vmatmul.msk.f32.gmra.mxu0 %vm316_vm0, %v255_v50  ;;  %997 = vmatmul.msk.f32.gmra.mxu1 %vm316_vm0, %v271_v51 }
  0x79   : > { %1014 = vmatmul.msk.f32.gmra.mxu2 %vm316_vm0, %v288_v52  ;;  %1030 = vmatmul.msk.f32.gmra.mxu3 %vm316_vm0, %v304_v53 }
  0x7b   : > { %982 = vmatmul.msk.f32.gmra.mxu0 %vm316_vm0, %v256_v54  ;;  %998 = vmatmul.msk.f32.gmra.mxu1 %vm316_vm0, %v272_v55 }
  0x81   : > { %1015 = vmatmul.msk.f32.gmra.mxu2 %vm316_vm0, %v289_v56  ;;  %1031 = vmatmul.msk.f32.gmra.mxu3 %vm316_vm0, %v305_v57 }
  0x83   : > { %983 = vmatmul.msk.f32.gmra.mxu0 %vm316_vm0, %v257_v58  ;;  %999 = vmatmul.msk.f32.gmra.mxu1 %vm316_vm0, %v273_v59 }
  0x89   : > { %1016 = vmatmul.msk.f32.gmra.mxu2 %vm316_vm0, %v290_v60  ;;  %1032 = vmatmul.msk.f32.gmra.mxu3 %vm316_vm0, %v306_v61 }
  0x8b   : > { %984 = vmatmul.msk.f32.gmra.mxu0 %vm316_vm0, %v258_v62  ;;  %1000 = vmatmul.msk.f32.gmra.mxu1 %vm316_vm0, %v274_v63 }
  0x91   : > { %1017 = vmatmul.msk.f32.gmra.mxu2 %vm316_vm0, %v291_v0  ;;  %1033 = vmatmul.msk.f32.gmra.mxu3 %vm316_vm0, %v307_v1 }
  0x93   : > { %985 = vmatmul.msk.f32.gmra.mxu0 %vm316_vm0, %v259_v2  ;;  %1001 = vmatmul.msk.f32.gmra.mxu1 %vm316_vm0, %v275_v3 }
  0x98   : > { %v526_v5 = vpop.f32.mrf.mxu0  ;;  %v574_v6 = vpop.f32.mrf.mxu1 }
  0x99   : > { %v527_v7 = vadd.f32 %v1334_v4, %v526_v5  ;;  %v575_v8 = vadd.f32 %v1334_v4, %v574_v6 }
  0x9b   : > { %v718_v9 = vmax.f32 %v527_v7, 0.0  ;;  %v734_v10 = vmax.f32 %v575_v8, 0.0 }
  0x9c   : > { %v622_v11 = vpop.f32.mrf.mxu2  ;;  %v670_v12 = vpop.f32.mrf.mxu3 }
  0x9d   : > { %782 = vst [vmem:[%s1343_s10] sm:$0xff] %v718_v9  ;;  %v623_v13 = vadd.f32 %v1334_v4, %v622_v11  ;;  %v671_v14 = vadd.f32 %v1334_v4, %v670_v12 }
  0x9e   : > { %798 = vst [vmem:[%s1343_s10 + $0x80] sm:$0xff] %v734_v10 }
  0x9f   : > { %v750_v15 = vmax.f32 %v623_v13, 0.0  ;;  %v766_v16 = vmax.f32 %v671_v14, 0.0 }
  0xa0   : > { %v529_v17 = vpop.f32.mrf.mxu0  ;;  %v577_v18 = vpop.f32.mrf.mxu1 }
  0xa1   : > { %814 = vst [vmem:[%s1343_s10 + $0x100] sm:$0xff] %v750_v15  ;;  %v530_v19 = vadd.f32 %v1334_v4, %v529_v17  ;;  %v578_v20 = vadd.f32 %v1334_v4, %v577_v18 }
  0xa2   : > { %830 = vst [vmem:[%s1343_s10 + $0x180] sm:$0xff] %v766_v16 }
  0xa3   : > { %v719_v21 = vmax.f32 %v530_v19, 0.0  ;;  %v735_v22 = vmax.f32 %v578_v20, 0.0 }
  0xa4   : > { %v625_v23 = vpop.f32.mrf.mxu2  ;;  %v673_v24 = vpop.f32.mrf.mxu3 }
  0xa5   : > { %783 = vst [vmem:[%s1343_s10 + $0x8] sm:$0xff] %v719_v21  ;;  %v626_v25 = vadd.f32 %v1334_v4, %v625_v23  ;;  %v674_v26 = vadd.f32 %v1334_v4, %v673_v24 }
  0xa6   : > { %799 = vst [vmem:[%s1343_s10 + $0x88] sm:$0xff] %v735_v22 }
  0xa7   : > { %v751_v27 = vmax.f32 %v626_v25, 0.0  ;;  %v767_v28 = vmax.f32 %v674_v26, 0.0 }
  0xa8   : > { %v532_v29 = vpop.f32.mrf.mxu0  ;;  %v580_v30 = vpop.f32.mrf.mxu1 }
  0xa9   : > { %815 = vst [vmem:[%s1343_s10 + $0x108] sm:$0xff] %v751_v27  ;;  %v533_v31 = vadd.f32 %v1334_v4, %v532_v29  ;;  %v581_v32 = vadd.f32 %v1334_v4, %v580_v30 }
  0xaa   : > { %831 = vst [vmem:[%s1343_s10 + $0x188] sm:$0xff] %v767_v28 }
  0xab   : > { %v720_v33 = vmax.f32 %v533_v31, 0.0  ;;  %v736_v34 = vmax.f32 %v581_v32, 0.0 }
  0xac   : > { %v628_v35 = vpop.f32.mrf.mxu2  ;;  %v676_v36 = vpop.f32.mrf.mxu3 }
  0xad   : > { %784 = vst [vmem:[%s1343_s10 + $0x10] sm:$0xff] %v720_v33  ;;  %v629_v37 = vadd.f32 %v1334_v4, %v628_v35  ;;  %v677_v38 = vadd.f32 %v1334_v4, %v676_v36 }
  0xae   : > { %800 = vst [vmem:[%s1343_s10 + $0x90] sm:$0xff] %v736_v34 }
  0xaf   : > { %v752_v39 = vmax.f32 %v629_v37, 0.0  ;;  %v768_v40 = vmax.f32 %v677_v38, 0.0 }
  0xb0   : > { %v535_v41 = vpop.f32.mrf.mxu0  ;;  %v583_v42 = vpop.f32.mrf.mxu1 }
  0xb1   : > { %816 = vst [vmem:[%s1343_s10 + $0x110] sm:$0xff] %v752_v39  ;;  %v536_v43 = vadd.f32 %v1334_v4, %v535_v41  ;;  %v584_v44 = vadd.f32 %v1334_v4, %v583_v42 }
  0xb2   : > { %832 = vst [vmem:[%s1343_s10 + $0x190] sm:$0xff] %v768_v40 }
  0xb3   : > { %v721_v45 = vmax.f32 %v536_v43, 0.0  ;;  %v737_v46 = vmax.f32 %v584_v44, 0.0 }
  0xb4   : > { %v631_v47 = vpop.f32.mrf.mxu2  ;;  %v679_v48 = vpop.f32.mrf.mxu3 }
  0xb5   : > { %785 = vst [vmem:[%s1343_s10 + $0x18] sm:$0xff] %v721_v45  ;;  %v632_v49 = vadd.f32 %v1334_v4, %v631_v47  ;;  %v680_v50 = vadd.f32 %v1334_v4, %v679_v48 }
  0xb6   : > { %801 = vst [vmem:[%s1343_s10 + $0x98] sm:$0xff] %v737_v46 }
  0xb7   : > { %v753_v51 = vmax.f32 %v632_v49, 0.0  ;;  %v769_v52 = vmax.f32 %v680_v50, 0.0 }
  0xb8   : > { %v538_v53 = vpop.f32.mrf.mxu0  ;;  %v586_v54 = vpop.f32.mrf.mxu1 }
  0xb9   : > { %817 = vst [vmem:[%s1343_s10 + $0x118] sm:$0xff] %v753_v51  ;;  %v539_v55 = vadd.f32 %v1334_v4, %v538_v53  ;;  %v587_v56 = vadd.f32 %v1334_v4, %v586_v54 }
  0xba   : > { %833 = vst [vmem:[%s1343_s10 + $0x198] sm:$0xff] %v769_v52 }
  0xbb   : > { %v722_v57 = vmax.f32 %v539_v55, 0.0  ;;  %v738_v58 = vmax.f32 %v587_v56, 0.0 }
  0xbc   : > { %v634_v59 = vpop.f32.mrf.mxu2  ;;  %v682_v60 = vpop.f32.mrf.mxu3 }
  0xbd   : > { %786 = vst [vmem:[%s1343_s10 + $0x20] sm:$0xff] %v722_v57  ;;  %v635_v61 = vadd.f32 %v1334_v4, %v634_v59  ;;  %v683_v62 = vadd.f32 %v1334_v4, %v682_v60 }
  0xbe   : > { %802 = vst [vmem:[%s1343_s10 + $0xa0] sm:$0xff] %v738_v58 }
  0xbf   : > { %v754_v63 = vmax.f32 %v635_v61, 0.0  ;;  %v770_v0 = vmax.f32 %v683_v62, 0.0 }
  0xc0   : > { %v541_v1 = vpop.f32.mrf.mxu0  ;;  %v589_v2 = vpop.f32.mrf.mxu1 }
  0xc1   : > { %818 = vst [vmem:[%s1343_s10 + $0x120] sm:$0xff] %v754_v63  ;;  %v542_v3 = vadd.f32 %v1334_v4, %v541_v1  ;;  %v590_v5 = vadd.f32 %v1334_v4, %v589_v2 }
  0xc2   : > { %834 = vst [vmem:[%s1343_s10 + $0x1a0] sm:$0xff] %v770_v0 }
  0xc3   : > { %v723_v6 = vmax.f32 %v542_v3, 0.0  ;;  %v739_v7 = vmax.f32 %v590_v5, 0.0 }
  0xc4   : > { %v637_v8 = vpop.f32.mrf.mxu2  ;;  %v685_v9 = vpop.f32.mrf.mxu3 }
  0xc5   : > { %787 = vst [vmem:[%s1343_s10 + $0x28] sm:$0xff] %v723_v6  ;;  %v638_v10 = vadd.f32 %v1334_v4, %v637_v8  ;;  %v686_v11 = vadd.f32 %v1334_v4, %v685_v9 }
  0xc6   : > { %803 = vst [vmem:[%s1343_s10 + $0xa8] sm:$0xff] %v739_v7 }
  0xc7   : > { %v755_v12 = vmax.f32 %v638_v10, 0.0  ;;  %v771_v13 = vmax.f32 %v686_v11, 0.0 }
  0xc8   : > { %v544_v14 = vpop.f32.mrf.mxu0  ;;  %v592_v15 = vpop.f32.mrf.mxu1 }
  0xc9   : > { %819 = vst [vmem:[%s1343_s10 + $0x128] sm:$0xff] %v755_v12  ;;  %v545_v16 = vadd.f32 %v1334_v4, %v544_v14  ;;  %v593_v17 = vadd.f32 %v1334_v4, %v592_v15 }
  0xca   : > { %835 = vst [vmem:[%s1343_s10 + $0x1a8] sm:$0xff] %v771_v13 }
  0xcb   : > { %v724_v18 = vmax.f32 %v545_v16, 0.0  ;;  %v740_v19 = vmax.f32 %v593_v17, 0.0 }
  0xcc   : > { %v640_v20 = vpop.f32.mrf.mxu2  ;;  %v688_v21 = vpop.f32.mrf.mxu3 }
  0xcd   : > { %788 = vst [vmem:[%s1343_s10 + $0x30] sm:$0xff] %v724_v18  ;;  %v641_v22 = vadd.f32 %v1334_v4, %v640_v20  ;;  %v689_v23 = vadd.f32 %v1334_v4, %v688_v21 }
  0xce   : > { %804 = vst [vmem:[%s1343_s10 + $0xb0] sm:$0xff] %v740_v19 }
  0xcf   : > { %v756_v24 = vmax.f32 %v641_v22, 0.0  ;;  %v772_v25 = vmax.f32 %v689_v23, 0.0 }
  0xd0   : > { %v547_v26 = vpop.f32.mrf.mxu0  ;;  %v595_v27 = vpop.f32.mrf.mxu1 }
  0xd1   : > { %820 = vst [vmem:[%s1343_s10 + $0x130] sm:$0xff] %v756_v24  ;;  %v548_v28 = vadd.f32 %v1334_v4, %v547_v26  ;;  %v596_v29 = vadd.f32 %v1334_v4, %v595_v27 }
  0xd2   : > { %836 = vst [vmem:[%s1343_s10 + $0x1b0] sm:$0xff] %v772_v25 }
  0xd3   : > { %v725_v30 = vmax.f32 %v548_v28, 0.0  ;;  %v741_v31 = vmax.f32 %v596_v29, 0.0 }
  0xd4   : > { %v643_v32 = vpop.f32.mrf.mxu2  ;;  %v691_v33 = vpop.f32.mrf.mxu3 }
  0xd5   : > { %789 = vst [vmem:[%s1343_s10 + $0x38] sm:$0xff] %v725_v30  ;;  %v644_v34 = vadd.f32 %v1334_v4, %v643_v32  ;;  %v692_v35 = vadd.f32 %v1334_v4, %v691_v33 }
  0xd6   : > { %805 = vst [vmem:[%s1343_s10 + $0xb8] sm:$0xff] %v741_v31 }
  0xd7   : > { %v757_v36 = vmax.f32 %v644_v34, 0.0  ;;  %v773_v37 = vmax.f32 %v692_v35, 0.0 }
  0xd8   : > { %v550_v38 = vpop.f32.mrf.mxu0  ;;  %v598_v39 = vpop.f32.mrf.mxu1 }
  0xd9   : > { %821 = vst [vmem:[%s1343_s10 + $0x138] sm:$0xff] %v757_v36  ;;  %v551_v40 = vadd.f32 %v1334_v4, %v550_v38  ;;  %v599_v41 = vadd.f32 %v1334_v4, %v598_v39 }
  0xda   : > { %837 = vst [vmem:[%s1343_s10 + $0x1b8] sm:$0xff] %v773_v37 }
  0xdb   : > { %v726_v42 = vmax.f32 %v551_v40, 0.0  ;;  %v742_v43 = vmax.f32 %v599_v41, 0.0 }
  0xdc   : > { %v646_v44 = vpop.f32.mrf.mxu2  ;;  %v694_v45 = vpop.f32.mrf.mxu3 }
  0xdd   : > { %790 = vst [vmem:[%s1343_s10 + $0x40] sm:$0xff] %v726_v42  ;;  %v647_v46 = vadd.f32 %v1334_v4, %v646_v44  ;;  %v695_v47 = vadd.f32 %v1334_v4, %v694_v45 }
  0xde   : > { %806 = vst [vmem:[%s1343_s10 + $0xc0] sm:$0xff] %v742_v43 }
  0xdf   : > { %v758_v48 = vmax.f32 %v647_v46, 0.0  ;;  %v774_v49 = vmax.f32 %v695_v47, 0.0 }
  0xe0   : > { %v553_v50 = vpop.f32.mrf.mxu0  ;;  %v601_v51 = vpop.f32.mrf.mxu1 }
  0xe1   : > { %822 = vst [vmem:[%s1343_s10 + $0x140] sm:$0xff] %v758_v48  ;;  %v554_v52 = vadd.f32 %v1334_v4, %v553_v50  ;;  %v602_v53 = vadd.f32 %v1334_v4, %v601_v51 }
  0xe2   : > { %838 = vst [vmem:[%s1343_s10 + $0x1c0] sm:$0xff] %v774_v49 }
  0xe3   : > { %v727_v54 = vmax.f32 %v554_v52, 0.0  ;;  %v743_v55 = vmax.f32 %v602_v53, 0.0 }
  0xe4   : > { %v649_v56 = vpop.f32.mrf.mxu2  ;;  %v697_v57 = vpop.f32.mrf.mxu3 }
  0xe5   : > { %791 = vst [vmem:[%s1343_s10 + $0x48] sm:$0xff] %v727_v54  ;;  %v650_v58 = vadd.f32 %v1334_v4, %v649_v56  ;;  %v698_v59 = vadd.f32 %v1334_v4, %v697_v57 }
  0xe6   : > { %807 = vst [vmem:[%s1343_s10 + $0xc8] sm:$0xff] %v743_v55 }
  0xe7   : > { %v759_v60 = vmax.f32 %v650_v58, 0.0  ;;  %v775_v61 = vmax.f32 %v698_v59, 0.0 }
  0xe8   : > { %v556_v62 = vpop.f32.mrf.mxu0  ;;  %v604_v63 = vpop.f32.mrf.mxu1 }
  0xe9   : > { %823 = vst [vmem:[%s1343_s10 + $0x148] sm:$0xff] %v759_v60  ;;  %v557_v0 = vadd.f32 %v1334_v4, %v556_v62  ;;  %v605_v1 = vadd.f32 %v1334_v4, %v604_v63 }
  0xea   : > { %839 = vst [vmem:[%s1343_s10 + $0x1c8] sm:$0xff] %v775_v61 }
  0xeb   : > { %v728_v2 = vmax.f32 %v557_v0, 0.0  ;;  %v744_v3 = vmax.f32 %v605_v1, 0.0 }
  0xec   : > { %v652_v5 = vpop.f32.mrf.mxu2  ;;  %v700_v6 = vpop.f32.mrf.mxu3 }
  0xed   : > { %792 = vst [vmem:[%s1343_s10 + $0x50] sm:$0xff] %v728_v2  ;;  %v653_v7 = vadd.f32 %v1334_v4, %v652_v5  ;;  %v701_v8 = vadd.f32 %v1334_v4, %v700_v6 }
  0xee   : > { %808 = vst [vmem:[%s1343_s10 + $0xd0] sm:$0xff] %v744_v3 }
  0xef   : > { %v760_v9 = vmax.f32 %v653_v7, 0.0  ;;  %v776_v10 = vmax.f32 %v701_v8, 0.0 }
  0xf0   : > { %v559_v11 = vpop.f32.mrf.mxu0  ;;  %v607_v12 = vpop.f32.mrf.mxu1 }
  0xf1   : > { %824 = vst [vmem:[%s1343_s10 + $0x150] sm:$0xff] %v760_v9  ;;  %v560_v13 = vadd.f32 %v1334_v4, %v559_v11  ;;  %v608_v14 = vadd.f32 %v1334_v4, %v607_v12 }
  0xf2   : > { %840 = vst [vmem:[%s1343_s10 + $0x1d0] sm:$0xff] %v776_v10 }
  0xf3   : > { %v729_v15 = vmax.f32 %v560_v13, 0.0  ;;  %v745_v16 = vmax.f32 %v608_v14, 0.0 }
  0xf4   : > { %v655_v17 = vpop.f32.mrf.mxu2  ;;  %v703_v18 = vpop.f32.mrf.mxu3 }
  0xf5   : > { %793 = vst [vmem:[%s1343_s10 + $0x58] sm:$0xff] %v729_v15  ;;  %v656_v19 = vadd.f32 %v1334_v4, %v655_v17  ;;  %v704_v20 = vadd.f32 %v1334_v4, %v703_v18 }
  0xf6   : > { %809 = vst [vmem:[%s1343_s10 + $0xd8] sm:$0xff] %v745_v16 }
  0xf7   : > { %v761_v21 = vmax.f32 %v656_v19, 0.0  ;;  %v777_v22 = vmax.f32 %v704_v20, 0.0 }
  0xf8   : > { %v562_v23 = vpop.f32.mrf.mxu0  ;;  %v610_v24 = vpop.f32.mrf.mxu1 }
  0xf9   : > { %825 = vst [vmem:[%s1343_s10 + $0x158] sm:$0xff] %v761_v21  ;;  %v563_v25 = vadd.f32 %v1334_v4, %v562_v23  ;;  %v611_v26 = vadd.f32 %v1334_v4, %v610_v24 }
  0xfa   : > { %841 = vst [vmem:[%s1343_s10 + $0x1d8] sm:$0xff] %v777_v22 }
  0xfb   : > { %v730_v27 = vmax.f32 %v563_v25, 0.0  ;;  %v746_v28 = vmax.f32 %v611_v26, 0.0 }
  0xfc   : > { %v658_v29 = vpop.f32.mrf.mxu2  ;;  %v706_v30 = vpop.f32.mrf.mxu3 }
  0xfd   : > { %794 = vst [vmem:[%s1343_s10 + $0x60] sm:$0xff] %v730_v27  ;;  %v659_v31 = vadd.f32 %v1334_v4, %v658_v29  ;;  %v707_v32 = vadd.f32 %v1334_v4, %v706_v30 }
  0xfe   : > { %810 = vst [vmem:[%s1343_s10 + $0xe0] sm:$0xff] %v746_v28 }
  0xff   : > { %v762_v33 = vmax.f32 %v659_v31, 0.0  ;;  %v778_v34 = vmax.f32 %v707_v32, 0.0 }
 0x100   : > { %v565_v35 = vpop.f32.mrf.mxu0  ;;  %v613_v36 = vpop.f32.mrf.mxu1 }
 0x101   : > { %826 = vst [vmem:[%s1343_s10 + $0x160] sm:$0xff] %v762_v33  ;;  %v566_v37 = vadd.f32 %v1334_v4, %v565_v35  ;;  %v614_v38 = vadd.f32 %v1334_v4, %v613_v36 }
 0x102   : > { %842 = vst [vmem:[%s1343_s10 + $0x1e0] sm:$0xff] %v778_v34 }
 0x103   : > { %v731_v39 = vmax.f32 %v566_v37, 0.0  ;;  %v747_v40 = vmax.f32 %v614_v38, 0.0 }
 0x104   : > { %v661_v41 = vpop.f32.mrf.mxu2  ;;  %v709_v42 = vpop.f32.mrf.mxu3 }
 0x105   : > { %795 = vst [vmem:[%s1343_s10 + $0x68] sm:$0xff] %v731_v39  ;;  %v662_v43 = vadd.f32 %v1334_v4, %v661_v41  ;;  %v710_v44 = vadd.f32 %v1334_v4, %v709_v42 }
 0x106   : > { %811 = vst [vmem:[%s1343_s10 + $0xe8] sm:$0xff] %v747_v40 }
 0x107   : > { %v763_v45 = vmax.f32 %v662_v43, 0.0  ;;  %v779_v46 = vmax.f32 %v710_v44, 0.0 }
 0x108   : > { %v568_v47 = vpop.f32.mrf.mxu0  ;;  %v616_v48 = vpop.f32.mrf.mxu1 }
 0x109   : > { %827 = vst [vmem:[%s1343_s10 + $0x168] sm:$0xff] %v763_v45  ;;  %v569_v49 = vadd.f32 %v1334_v4, %v568_v47  ;;  %v617_v50 = vadd.f32 %v1334_v4, %v616_v48 }
 0x10a   : > { %843 = vst [vmem:[%s1343_s10 + $0x1e8] sm:$0xff] %v779_v46 }
 0x10b   : > { %v732_v51 = vmax.f32 %v569_v49, 0.0  ;;  %v748_v52 = vmax.f32 %v617_v50, 0.0 }
 0x10c   : > { %v664_v53 = vpop.f32.mrf.mxu2  ;;  %v712_v54 = vpop.f32.mrf.mxu3 }
 0x10d   : > { %796 = vst [vmem:[%s1343_s10 + $0x70] sm:$0xff] %v732_v51  ;;  %v665_v55 = vadd.f32 %v1334_v4, %v664_v53  ;;  %v713_v56 = vadd.f32 %v1334_v4, %v712_v54 }
 0x10e   : > { %812 = vst [vmem:[%s1343_s10 + $0xf0] sm:$0xff] %v748_v52 }
 0x10f   : > { %v764_v57 = vmax.f32 %v665_v55, 0.0  ;;  %v780_v58 = vmax.f32 %v713_v56, 0.0 }
 0x110   : > { %v571_v59 = vpop.f32.mrf.mxu0  ;;  %v619_v60 = vpop.f32.mrf.mxu1 }
 0x111   : > { %828 = vst [vmem:[%s1343_s10 + $0x170] sm:$0xff] %v764_v57  ;;  %v572_v61 = vadd.f32 %v1334_v4, %v571_v59  ;;  %v620_v62 = vadd.f32 %v1334_v4, %v619_v60 }
 0x112   : > { %844 = vst [vmem:[%s1343_s10 + $0x1f0] sm:$0xff] %v780_v58 }
 0x113   : > { %v733_v63 = vmax.f32 %v572_v61, 0.0  ;;  %v749_v0 = vmax.f32 %v620_v62, 0.0 }
 0x114   : > { %v667_v1 = vpop.f32.mrf.mxu2  ;;  %v715_v2 = vpop.f32.mrf.mxu3 }
 0x115   : > { %797 = vst [vmem:[%s1343_s10 + $0x78] sm:$0xff] %v733_v63  ;;  %v668_v3 = vadd.f32 %v1334_v4, %v667_v1  ;;  %v716_v5 = vadd.f32 %v1334_v4, %v715_v2 }
 0x116   : > { %813 = vst [vmem:[%s1343_s10 + $0xf8] sm:$0xff] %v749_v0 }
 0x117   : > { %v765_v6 = vmax.f32 %v668_v3, 0.0  ;;  %v781_v7 = vmax.f32 %v716_v5, 0.0 }
 0x119   : > { %829 = vst [vmem:[%s1343_s10 + $0x178] sm:$0xff] %v765_v6 }
 0x11a   : > { %845 = vst [vmem:[%s1343_s10 + $0x1f8] sm:$0xff] %v781_v7 }
 0x11b PF: > { %s13_s16 = sadd.s32 1, %s1128_s16   ;;  %s1490_s12 = smov %s1120_s14 }
 0x11c   : > { %p10_p7 = scmp.ge.s32.totalorder %s13_s16, 8   ;;  %s1491_s13 = smov %s1124_s15 }
 0x11d   : > { %s1492_s14 = smov %s1495_s17  ;;  %s1493_s15 = smov %s1499_s18 }
 0x11e   :  { %12 = sbr.rel (!%p10_p7) target bundleno = 3 (0x3), region = 68 }

// kernel: rinterp_forward.43
= control target key start
LH: loop header
LB: loop body
LE: loop exit
PB: predicated region body
PF: predicated region fallthrough
CT: control target
= control target key end

     0   :  { %s1102_s12 = smov 0   ;;  %s1104_s13 = smov 0   ;;  %s1438_s0 = inlined_call_operand.vmem [shape: f32[3,4096,54], index: 0, kind: input, shape index: {}]   ;;  %s1439_s1 = inlined_call_operand.vmem [shape: f32[3,54,128], index: 1, kind: input, shape index: {}]   ;;  %s1440_s2 = inlined_call_operand.vmem [shape: f32[3,1,128], index: 2, kind: input, shape index: {}]   ;;  %s1441_s3 = inlined_call_operand.vmem [shape: f32[3,4096,128], index: 3, kind: output, shape index: {}]  }
   0x1   :  { %s1106_s14 = smov 0   ;;  %s1108_s15 = smov 0  }
   0x2   :  { %s1110_s16 = smov 0  }
   0x3 LB: > { %s22_s17 = sadd.s32 1, %s1072_s14  ;;  %s25_s18 = sadd.s32 1, %s1076_s15  ;;  %s1080_s16 = sphi %s1110_s16, %s13_s16   ;;  %s1076_s15 = sphi %s1108_s15, %s1445_s15   ;;  %s1072_s14 = sphi %s1106_s14, %s1444_s14   ;;  %s1068_s13 = sphi %s1104_s13, %s1443_s13   ;;  %s1064_s12 = sphi %s1102_s12, %s1442_s12  }
   0x4   : > { %p23_p0 = scmp.ge.s32.totalorder %s22_s17, 8  ;;  %p904_p1 = scmp.ge.s32.totalorder %s1080_s16, 1 }
   0x5   : > { %p176_p2 = scmp.lt.s32.totalorder %s1080_s16, 25 }
   0x6   : > { %s1447_s17 = smov (%p23_p0, %s22_s17), 0  ;;  %s1449_s18 = smov (!%p23_p0, %s25_s18), %s1076_s15 }
   0x7   : > { %p177_p3 = pnand %p904_p1, %p176_p2  ;;  %p27_p4 = scmp.ge.s32.totalorder %s1449_s18, 3 }
   0x8   : > { %s905_s19 = sshll.u32 (!%p177_p3), %s1064_s12, 6  ;;  %p217_p5 = scmp.lt.s32.totalorder (!%p177_p3), %s1068_s13, 2 }
   0x9   : > { %s1451_s18 = smov (%p27_p4, %s1449_s18), 0  ;;  %180 = sbr.rel (%p177_p3) target bundleno = 288 (0x120), region = 32 }
   0xa   : > { %p219_p6 = scmp.lt.s32.totalorder (!%p177_p3), %s905_s19, 511 }
   0xe   : > { %s1453_s13 = smov (!%p217_p5, %s1068_s13), 2  ;;  %s1455_s19 = smov (!%p219_p6, %s905_s19), 511  ;;  %vm512_vm0 = vcmask 1045504   ;;  %vm319_vm1 = vcmask 441344  }
   0xf   : > { %s1000_s20 = smul.u32 56, %s1453_s13  ;;  %s233_s23 = scalar_lea.vmem %s1440_s2, %s1453_s13 }
  0x10   : > { %s906_s24 = sshll.u32 %s1453_s13, 9 }
  0x11   : > { %s230_s27 = scalar_lea.vmem %s1439_s1, %s1000_s20  ;;  %s1143_s28 = sadd.s32 %s906_s24, %s1455_s19 }
  0x12   : > { %v314_v0 = vld [vmem:[%s230_s27 + $0x30] sm:$0x3f]  ;;  %v313_v1 = vld [vmem:[%s230_s27 + $0x28] sm:$0xff]  ;;  %v312_v2 = vld [vmem:[%s230_s27 + $0x20] sm:$0xff]  ;;  %s907_s29 = sshll.u32 %s1143_s28, 3 }
  0x13   : > { %980 = vmatpush.msk.msra.mxu2 %vm512_vm0, %v314_v0  ;;  %981 = vmatpush.msk.msra.mxu3 %vm512_vm0, %v314_v0  ;;  %v311_v3 = vld [vmem:[%s230_s27 + $0x18] sm:$0xff]  ;;  %v310_v4 = vld [vmem:[%s230_s27 + $0x10] sm:$0xff]  ;;  %s1151_s5 = scalar_lea.vmem %s1438_s0, %s907_s29  ;;  %v309_v5 = vld [vmem:[%s230_s27 + $0x8] sm:$0xff]  ;;  %s1293_s10 = scalar_lea.vmem %s1441_s3, %s907_s29 }
  0x14   : > { %912 = vmatpush.msk.msra.mxu0 %vm512_vm0, %v314_v0  ;;  %979 = vmatpush.msk.msra.mxu1 %vm512_vm0, %v314_v0  ;;  %v308_v6 = vld [vmem:[%s230_s27] sm:$0xff]  ;;  %v277_v11 = vld [vmem:[%s1151_s5 + $0x108] sm:$0xff]  ;;  %v278_v15 = vld [vmem:[%s1151_s5 + $0x110] sm:$0xff] }
  0x15   : > { %983 = vmatpush.msra.mxu2 %v313_v1  ;;  %984 = vmatpush.msra.mxu3 %v313_v1  ;;  %v276_v7 = vld [vmem:[%s1151_s5 + $0x100] sm:$0xff]  ;;  %v293_v12 = vld [vmem:[%s1151_s5 + $0x188] sm:$0xff]  ;;  %v294_v16 = vld [vmem:[%s1151_s5 + $0x190] sm:$0xff] }
  0x16   : > { %526 = vmatpush.msra.mxu0 %v313_v1  ;;  %982 = vmatpush.msra.mxu1 %v313_v1  ;;  %v292_v8 = vld [vmem:[%s1151_s5 + $0x180] sm:$0xff]  ;;  %v245_v13 = vld [vmem:[%s1151_s5 + $0x8] sm:$0xff]  ;;  %v246_v17 = vld [vmem:[%s1151_s5 + $0x10] sm:$0xff] }
  0x17   : > { %986 = vmatpush.msra.mxu2 %v312_v2  ;;  %987 = vmatpush.msra.mxu3 %v312_v2  ;;  %v244_v9 = vld [vmem:[%s1151_s5] sm:$0xff]  ;;  %v261_v14 = vld [vmem:[%s1151_s5 + $0x88] sm:$0xff]  ;;  %v262_v18 = vld [vmem:[%s1151_s5 + $0x90] sm:$0xff] }
  0x18   : > { %527 = vmatpush.msra.mxu0 %v312_v2  ;;  %985 = vmatpush.msra.mxu1 %v312_v2  ;;  %v260_v10 = vld [vmem:[%s1151_s5 + $0x80] sm:$0xff]  ;;  %v279_v19 = vld [vmem:[%s1151_s5 + $0x118] sm:$0xff]  ;;  %v281_v27 = vld [vmem:[%s1151_s5 + $0x128] sm:$0xff] }
  0x19   : > { %989 = vmatpush.msra.mxu2 %v311_v3  ;;  %990 = vmatpush.msra.mxu3 %v311_v3  ;;  %v295_v20 = vld [vmem:[%s1151_s5 + $0x198] sm:$0xff]  ;;  %v280_v23 = vld [vmem:[%s1151_s5 + $0x120] sm:$0xff]  ;;  %v297_v28 = vld [vmem:[%s1151_s5 + $0x1a8] sm:$0xff] }
  0x1a   : > { %528 = vmatpush.msra.mxu0 %v311_v3  ;;  %988 = vmatpush.msra.mxu1 %v311_v3  ;;  %v247_v21 = vld [vmem:[%s1151_s5 + $0x18] sm:$0xff]  ;;  %v296_v24 = vld [vmem:[%s1151_s5 + $0x1a0] sm:$0xff]  ;;  %v249_v29 = vld [vmem:[%s1151_s5 + $0x28] sm:$0xff] }
  0x1b   : > { %992 = vmatpush.msra.mxu2 %v310_v4  ;;  %993 = vmatpush.msra.mxu3 %v310_v4  ;;  %v263_v22 = vld [vmem:[%s1151_s5 + $0x98] sm:$0xff]  ;;  %v248_v25 = vld [vmem:[%s1151_s5 + $0x20] sm:$0xff]  ;;  %v265_v30 = vld [vmem:[%s1151_s5 + $0xa8] sm:$0xff] }
  0x1c   : > { %529 = vmatpush.msra.mxu0 %v310_v4  ;;  %991 = vmatpush.msra.mxu1 %v310_v4  ;;  %v264_v26 = vld [vmem:[%s1151_s5 + $0xa0] sm:$0xff]  ;;  %v282_v31 = vld [vmem:[%s1151_s5 + $0x130] sm:$0xff]  ;;  %v283_v35 = vld [vmem:[%s1151_s5 + $0x138] sm:$0xff] }
  0x1d   : > { %995 = vmatpush.msra.mxu2 %v309_v5  ;;  %996 = vmatpush.msra.mxu3 %v309_v5  ;;  %v298_v32 = vld [vmem:[%s1151_s5 + $0x1b0] sm:$0xff]  ;;  %v299_v36 = vld [vmem:[%s1151_s5 + $0x1b8] sm:$0xff]  ;;  %v284_v39 = vld [vmem:[%s1151_s5 + $0x140] sm:$0xff] }
  0x1e   : > { %530 = vmatpush.msra.mxu0 %v309_v5  ;;  %994 = vmatpush.msra.mxu1 %v309_v5  ;;  %v250_v33 = vld [vmem:[%s1151_s5 + $0x30] sm:$0xff]  ;;  %v251_v37 = vld [vmem:[%s1151_s5 + $0x38] sm:$0xff]  ;;  %v300_v40 = vld [vmem:[%s1151_s5 + $0x1c0] sm:$0xff] }
  0x1f   : > { %998 = vmatpush.msra.mxu2 %v308_v6  ;;  %999 = vmatpush.msra.mxu3 %v308_v6  ;;  %v266_v34 = vld [vmem:[%s1151_s5 + $0xb0] sm:$0xff]  ;;  %v267_v38 = vld [vmem:[%s1151_s5 + $0xb8] sm:$0xff]  ;;  %v252_v41 = vld [vmem:[%s1151_s5 + $0x40] sm:$0xff] }
  0x20   : > { %945 = vmatmul.msk.f32.vlgmr.msra.gmra.mxu2 %vm319_vm1, %v276_v7  ;;  %961 = vmatmul.msk.f32.vlgmr.msra.gmra.mxu3 %vm319_vm1, %v292_v8  ;;  %v268_v42 = vld [vmem:[%s1151_s5 + $0xc0] sm:$0xff]  ;;  %v285_v43 = vld [vmem:[%s1151_s5 + $0x148] sm:$0xff]  ;;  %v286_v47 = vld [vmem:[%s1151_s5 + $0x150] sm:$0xff] }
  0x21   : > { %531 = vmatpush.msra.mxu0 %v308_v6  ;;  %997 = vmatpush.msra.mxu1 %v308_v6  ;;  %v301_v44 = vld [vmem:[%s1151_s5 + $0x1c8] sm:$0xff]  ;;  %v302_v48 = vld [vmem:[%s1151_s5 + $0x1d0] sm:$0xff]  ;;  %v287_v51 = vld [vmem:[%s1151_s5 + $0x158] sm:$0xff] }
  0x22   : > { %913 = vmatmul.msk.f32.vlgmr.msra.gmra.mxu0 %vm319_vm1, %v244_v9  ;;  %929 = vmatmul.msk.f32.vlgmr.msra.gmra.mxu1 %vm319_vm1, %v260_v10  ;;  %v253_v45 = vld [vmem:[%s1151_s5 + $0x48] sm:$0xff]  ;;  %v254_v49 = vld [vmem:[%s1151_s5 + $0x50] sm:$0xff]  ;;  %v303_v52 = vld [vmem:[%s1151_s5 + $0x1d8] sm:$0xff] }
  0x23   : > { %v269_v46 = vld [vmem:[%s1151_s5 + $0xc8] sm:$0xff]  ;;  %v270_v50 = vld [vmem:[%s1151_s5 + $0xd0] sm:$0xff]  ;;  %v255_v53 = vld [vmem:[%s1151_s5 + $0x58] sm:$0xff] }
  0x24   : > { %v271_v54 = vld [vmem:[%s1151_s5 + $0xd8] sm:$0xff]  ;;  %v288_v55 = vld [vmem:[%s1151_s5 + $0x160] sm:$0xff]  ;;  %v289_v59 = vld [vmem:[%s1151_s5 + $0x168] sm:$0xff] }
  0x25   : > { %v304_v56 = vld [vmem:[%s1151_s5 + $0x1e0] sm:$0xff]  ;;  %v305_v60 = vld [vmem:[%s1151_s5 + $0x1e8] sm:$0xff]  ;;  %v290_v63 = vld [vmem:[%s1151_s5 + $0x170] sm:$0xff] }
  0x26   : > { %v256_v57 = vld [vmem:[%s1151_s5 + $0x60] sm:$0xff]  ;;  %v257_v61 = vld [vmem:[%s1151_s5 + $0x68] sm:$0xff]  ;;  %v306_v0 = vld [vmem:[%s1151_s5 + $0x1f0] sm:$0xff] }
  0x27   : > { %v272_v58 = vld [vmem:[%s1151_s5 + $0xe0] sm:$0xff]  ;;  %v273_v62 = vld [vmem:[%s1151_s5 + $0xe8] sm:$0xff]  ;;  %v258_v1 = vld [vmem:[%s1151_s5 + $0x70] sm:$0xff] }
  0x28   : > { %946 = vmatmul.msk.f32.gmra.mxu2 %vm319_vm1, %v277_v11  ;;  %962 = vmatmul.msk.f32.gmra.mxu3 %vm319_vm1, %v293_v12  ;;  %v274_v2 = vld [vmem:[%s1151_s5 + $0xf0] sm:$0xff]  ;;  %v291_v3 = vld [vmem:[%s1151_s5 + $0x178] sm:$0xff]  ;;  %v1286_v7 = vld [vmem:[%s233_s23] ss:$0 sm:$0xff] }
  0x29   : > { %v307_v4 = vld [vmem:[%s1151_s5 + $0x1f8] sm:$0xff] }
  0x2a   : > { %914 = vmatmul.msk.f32.gmra.mxu0 %vm319_vm1, %v245_v13  ;;  %930 = vmatmul.msk.f32.gmra.mxu1 %vm319_vm1, %v261_v14  ;;  %v259_v5 = vld [vmem:[%s1151_s5 + $0x78] sm:$0xff] }
  0x2b   : > { %v275_v6 = vld [vmem:[%s1151_s5 + $0xf8] sm:$0xff] }
  0x30   : > { %947 = vmatmul.msk.f32.gmra.mxu2 %vm319_vm1, %v278_v15  ;;  %963 = vmatmul.msk.f32.gmra.mxu3 %vm319_vm1, %v294_v16 }
  0x32   : > { %915 = vmatmul.msk.f32.gmra.mxu0 %vm319_vm1, %v246_v17  ;;  %931 = vmatmul.msk.f32.gmra.mxu1 %vm319_vm1, %v262_v18 }
  0x38   : > { %948 = vmatmul.msk.f32.gmra.mxu2 %vm319_vm1, %v279_v19  ;;  %964 = vmatmul.msk.f32.gmra.mxu3 %vm319_vm1, %v295_v20 }
  0x3a   : > { %916 = vmatmul.msk.f32.gmra.mxu0 %vm319_vm1, %v247_v21  ;;  %932 = vmatmul.msk.f32.gmra.mxu1 %vm319_vm1, %v263_v22 }
  0x40   : > { %949 = vmatmul.msk.f32.gmra.mxu2 %vm319_vm1, %v280_v23  ;;  %965 = vmatmul.msk.f32.gmra.mxu3 %vm319_vm1, %v296_v24 }
  0x42   : > { %917 = vmatmul.msk.f32.gmra.mxu0 %vm319_vm1, %v248_v25  ;;  %933 = vmatmul.msk.f32.gmra.mxu1 %vm319_vm1, %v264_v26 }
  0x48   : > { %950 = vmatmul.msk.f32.gmra.mxu2 %vm319_vm1, %v281_v27  ;;  %966 = vmatmul.msk.f32.gmra.mxu3 %vm319_vm1, %v297_v28 }
  0x4a   : > { %918 = vmatmul.msk.f32.gmra.mxu0 %vm319_vm1, %v249_v29  ;;  %934 = vmatmul.msk.f32.gmra.mxu1 %vm319_vm1, %v265_v30 }
  0x50   : > { %951 = vmatmul.msk.f32.gmra.mxu2 %vm319_vm1, %v282_v31  ;;  %967 = vmatmul.msk.f32.gmra.mxu3 %vm319_vm1, %v298_v32 }
  0x52   : > { %919 = vmatmul.msk.f32.gmra.mxu0 %vm319_vm1, %v250_v33  ;;  %935 = vmatmul.msk.f32.gmra.mxu1 %vm319_vm1, %v266_v34 }
  0x58   : > { %952 = vmatmul.msk.f32.gmra.mxu2 %vm319_vm1, %v283_v35  ;;  %968 = vmatmul.msk.f32.gmra.mxu3 %vm319_vm1, %v299_v36 }
  0x5a   : > { %920 = vmatmul.msk.f32.gmra.mxu0 %vm319_vm1, %v251_v37  ;;  %936 = vmatmul.msk.f32.gmra.mxu1 %vm319_vm1, %v267_v38 }
  0x60   : > { %953 = vmatmul.msk.f32.gmra.mxu2 %vm319_vm1, %v284_v39  ;;  %969 = vmatmul.msk.f32.gmra.mxu3 %vm319_vm1, %v300_v40 }
  0x62   : > { %921 = vmatmul.msk.f32.gmra.mxu0 %vm319_vm1, %v252_v41  ;;  %937 = vmatmul.msk.f32.gmra.mxu1 %vm319_vm1, %v268_v42 }
  0x68   : > { %954 = vmatmul.msk.f32.gmra.mxu2 %vm319_vm1, %v285_v43  ;;  %970 = vmatmul.msk.f32.gmra.mxu3 %vm319_vm1, %v301_v44 }
  0x6a   : > { %922 = vmatmul.msk.f32.gmra.mxu0 %vm319_vm1, %v253_v45  ;;  %938 = vmatmul.msk.f32.gmra.mxu1 %vm319_vm1, %v269_v46 }
  0x70   : > { %955 = vmatmul.msk.f32.gmra.mxu2 %vm319_vm1, %v286_v47  ;;  %971 = vmatmul.msk.f32.gmra.mxu3 %vm319_vm1, %v302_v48 }
  0x72   : > { %923 = vmatmul.msk.f32.gmra.mxu0 %vm319_vm1, %v254_v49  ;;  %939 = vmatmul.msk.f32.gmra.mxu1 %vm319_vm1, %v270_v50 }
  0x78   : > { %956 = vmatmul.msk.f32.gmra.mxu2 %vm319_vm1, %v287_v51  ;;  %972 = vmatmul.msk.f32.gmra.mxu3 %vm319_vm1, %v303_v52 }
  0x7a   : > { %924 = vmatmul.msk.f32.gmra.mxu0 %vm319_vm1, %v255_v53  ;;  %940 = vmatmul.msk.f32.gmra.mxu1 %vm319_vm1, %v271_v54 }
  0x80   : > { %957 = vmatmul.msk.f32.gmra.mxu2 %vm319_vm1, %v288_v55  ;;  %973 = vmatmul.msk.f32.gmra.mxu3 %vm319_vm1, %v304_v56 }
  0x82   : > { %925 = vmatmul.msk.f32.gmra.mxu0 %vm319_vm1, %v256_v57  ;;  %941 = vmatmul.msk.f32.gmra.mxu1 %vm319_vm1, %v272_v58 }
  0x88   : > { %958 = vmatmul.msk.f32.gmra.mxu2 %vm319_vm1, %v289_v59  ;;  %974 = vmatmul.msk.f32.gmra.mxu3 %vm319_vm1, %v305_v60 }
  0x8a   : > { %926 = vmatmul.msk.f32.gmra.mxu0 %vm319_vm1, %v257_v61  ;;  %942 = vmatmul.msk.f32.gmra.mxu1 %vm319_vm1, %v273_v62 }
  0x90   : > { %959 = vmatmul.msk.f32.gmra.mxu2 %vm319_vm1, %v290_v63  ;;  %975 = vmatmul.msk.f32.gmra.mxu3 %vm319_vm1, %v306_v0 }
  0x92   : > { %927 = vmatmul.msk.f32.gmra.mxu0 %vm319_vm1, %v258_v1  ;;  %943 = vmatmul.msk.f32.gmra.mxu1 %vm319_vm1, %v274_v2 }
  0x98   : > { %960 = vmatmul.msk.f32.gmra.mxu2 %vm319_vm1, %v291_v3  ;;  %976 = vmatmul.msk.f32.gmra.mxu3 %vm319_vm1, %v307_v4 }
  0x9a   : > { %928 = vmatmul.msk.f32.gmra.mxu0 %vm319_vm1, %v259_v5  ;;  %944 = vmatmul.msk.f32.gmra.mxu1 %vm319_vm1, %v275_v6 }
  0x9f   : > { %v533_v8 = vpop.f32.mrf.mxu0  ;;  %v581_v9 = vpop.f32.mrf.mxu1 }
  0xa0   : > { %v534_v10 = vadd.f32 %v1286_v7, %v533_v8  ;;  %v582_v11 = vadd.f32 %v1286_v7, %v581_v9 }
  0xa2   : > { %725 = vst [vmem:[%s1293_s10] sm:$0xff] %v534_v10 }
  0xa3   : > { %741 = vst [vmem:[%s1293_s10 + $0x80] sm:$0xff] %v582_v11  ;;  %v629_v12 = vpop.f32.mrf.mxu2  ;;  %v677_v13 = vpop.f32.mrf.mxu3 }
  0xa4   : > { %v630_v14 = vadd.f32 %v1286_v7, %v629_v12  ;;  %v678_v15 = vadd.f32 %v1286_v7, %v677_v13 }
  0xa6   : > { %757 = vst [vmem:[%s1293_s10 + $0x100] sm:$0xff] %v630_v14 }
  0xa7   : > { %773 = vst [vmem:[%s1293_s10 + $0x180] sm:$0xff] %v678_v15  ;;  %v536_v16 = vpop.f32.mrf.mxu0  ;;  %v584_v17 = vpop.f32.mrf.mxu1 }
  0xa8   : > { %v537_v18 = vadd.f32 %v1286_v7, %v536_v16  ;;  %v585_v19 = vadd.f32 %v1286_v7, %v584_v17 }
  0xaa   : > { %726 = vst [vmem:[%s1293_s10 + $0x8] sm:$0xff] %v537_v18 }
  0xab   : > { %742 = vst [vmem:[%s1293_s10 + $0x88] sm:$0xff] %v585_v19  ;;  %v632_v20 = vpop.f32.mrf.mxu2  ;;  %v680_v21 = vpop.f32.mrf.mxu3 }
  0xac   : > { %v633_v22 = vadd.f32 %v1286_v7, %v632_v20  ;;  %v681_v23 = vadd.f32 %v1286_v7, %v680_v21 }
  0xae   : > { %758 = vst [vmem:[%s1293_s10 + $0x108] sm:$0xff] %v633_v22 }
  0xaf   : > { %774 = vst [vmem:[%s1293_s10 + $0x188] sm:$0xff] %v681_v23  ;;  %v539_v24 = vpop.f32.mrf.mxu0  ;;  %v587_v25 = vpop.f32.mrf.mxu1 }
  0xb0   : > { %v540_v26 = vadd.f32 %v1286_v7, %v539_v24  ;;  %v588_v27 = vadd.f32 %v1286_v7, %v587_v25 }
  0xb2   : > { %727 = vst [vmem:[%s1293_s10 + $0x10] sm:$0xff] %v540_v26 }
  0xb3   : > { %743 = vst [vmem:[%s1293_s10 + $0x90] sm:$0xff] %v588_v27  ;;  %v635_v28 = vpop.f32.mrf.mxu2  ;;  %v683_v29 = vpop.f32.mrf.mxu3 }
  0xb4   : > { %v636_v30 = vadd.f32 %v1286_v7, %v635_v28  ;;  %v684_v31 = vadd.f32 %v1286_v7, %v683_v29 }
  0xb6   : > { %759 = vst [vmem:[%s1293_s10 + $0x110] sm:$0xff] %v636_v30 }
  0xb7   : > { %775 = vst [vmem:[%s1293_s10 + $0x190] sm:$0xff] %v684_v31  ;;  %v542_v32 = vpop.f32.mrf.mxu0  ;;  %v590_v33 = vpop.f32.mrf.mxu1 }
  0xb8   : > { %v543_v34 = vadd.f32 %v1286_v7, %v542_v32  ;;  %v591_v35 = vadd.f32 %v1286_v7, %v590_v33 }
  0xba   : > { %728 = vst [vmem:[%s1293_s10 + $0x18] sm:$0xff] %v543_v34 }
  0xbb   : > { %744 = vst [vmem:[%s1293_s10 + $0x98] sm:$0xff] %v591_v35  ;;  %v638_v36 = vpop.f32.mrf.mxu2  ;;  %v686_v37 = vpop.f32.mrf.mxu3 }
  0xbc   : > { %v639_v38 = vadd.f32 %v1286_v7, %v638_v36  ;;  %v687_v39 = vadd.f32 %v1286_v7, %v686_v37 }
  0xbe   : > { %760 = vst [vmem:[%s1293_s10 + $0x118] sm:$0xff] %v639_v38 }
  0xbf   : > { %776 = vst [vmem:[%s1293_s10 + $0x198] sm:$0xff] %v687_v39  ;;  %v545_v40 = vpop.f32.mrf.mxu0  ;;  %v593_v41 = vpop.f32.mrf.mxu1 }
  0xc0   : > { %v546_v42 = vadd.f32 %v1286_v7, %v545_v40  ;;  %v594_v43 = vadd.f32 %v1286_v7, %v593_v41 }
  0xc2   : > { %729 = vst [vmem:[%s1293_s10 + $0x20] sm:$0xff] %v546_v42 }
  0xc3   : > { %745 = vst [vmem:[%s1293_s10 + $0xa0] sm:$0xff] %v594_v43  ;;  %v641_v44 = vpop.f32.mrf.mxu2  ;;  %v689_v45 = vpop.f32.mrf.mxu3 }
  0xc4   : > { %v642_v46 = vadd.f32 %v1286_v7, %v641_v44  ;;  %v690_v47 = vadd.f32 %v1286_v7, %v689_v45 }
  0xc6   : > { %761 = vst [vmem:[%s1293_s10 + $0x120] sm:$0xff] %v642_v46 }
  0xc7   : > { %777 = vst [vmem:[%s1293_s10 + $0x1a0] sm:$0xff] %v690_v47  ;;  %v548_v48 = vpop.f32.mrf.mxu0  ;;  %v596_v49 = vpop.f32.mrf.mxu1 }
  0xc8   : > { %v549_v50 = vadd.f32 %v1286_v7, %v548_v48  ;;  %v597_v51 = vadd.f32 %v1286_v7, %v596_v49 }
  0xca   : > { %730 = vst [vmem:[%s1293_s10 + $0x28] sm:$0xff] %v549_v50 }
  0xcb   : > { %746 = vst [vmem:[%s1293_s10 + $0xa8] sm:$0xff] %v597_v51  ;;  %v644_v52 = vpop.f32.mrf.mxu2  ;;  %v692_v53 = vpop.f32.mrf.mxu3 }
  0xcc   : > { %v645_v54 = vadd.f32 %v1286_v7, %v644_v52  ;;  %v693_v55 = vadd.f32 %v1286_v7, %v692_v53 }
  0xce   : > { %762 = vst [vmem:[%s1293_s10 + $0x128] sm:$0xff] %v645_v54 }
  0xcf   : > { %778 = vst [vmem:[%s1293_s10 + $0x1a8] sm:$0xff] %v693_v55  ;;  %v551_v56 = vpop.f32.mrf.mxu0  ;;  %v599_v57 = vpop.f32.mrf.mxu1 }
  0xd0   : > { %v552_v58 = vadd.f32 %v1286_v7, %v551_v56  ;;  %v600_v59 = vadd.f32 %v1286_v7, %v599_v57 }
  0xd2   : > { %731 = vst [vmem:[%s1293_s10 + $0x30] sm:$0xff] %v552_v58 }
  0xd3   : > { %747 = vst [vmem:[%s1293_s10 + $0xb0] sm:$0xff] %v600_v59  ;;  %v647_v60 = vpop.f32.mrf.mxu2  ;;  %v695_v61 = vpop.f32.mrf.mxu3 }
  0xd4   : > { %v648_v62 = vadd.f32 %v1286_v7, %v647_v60  ;;  %v696_v63 = vadd.f32 %v1286_v7, %v695_v61 }
  0xd6   : > { %763 = vst [vmem:[%s1293_s10 + $0x130] sm:$0xff] %v648_v62 }
  0xd7   : > { %779 = vst [vmem:[%s1293_s10 + $0x1b0] sm:$0xff] %v696_v63  ;;  %v554_v0 = vpop.f32.mrf.mxu0  ;;  %v602_v1 = vpop.f32.mrf.mxu1 }
  0xd8   : > { %v555_v2 = vadd.f32 %v1286_v7, %v554_v0  ;;  %v603_v3 = vadd.f32 %v1286_v7, %v602_v1 }
  0xda   : > { %732 = vst [vmem:[%s1293_s10 + $0x38] sm:$0xff] %v555_v2 }
  0xdb   : > { %748 = vst [vmem:[%s1293_s10 + $0xb8] sm:$0xff] %v603_v3  ;;  %v650_v4 = vpop.f32.mrf.mxu2  ;;  %v698_v5 = vpop.f32.mrf.mxu3 }
  0xdc   : > { %v651_v6 = vadd.f32 %v1286_v7, %v650_v4  ;;  %v699_v8 = vadd.f32 %v1286_v7, %v698_v5 }
  0xde   : > { %764 = vst [vmem:[%s1293_s10 + $0x138] sm:$0xff] %v651_v6 }
  0xdf   : > { %780 = vst [vmem:[%s1293_s10 + $0x1b8] sm:$0xff] %v699_v8  ;;  %v557_v9 = vpop.f32.mrf.mxu0  ;;  %v605_v10 = vpop.f32.mrf.mxu1 }
  0xe0   : > { %v558_v11 = vadd.f32 %v1286_v7, %v557_v9  ;;  %v606_v12 = vadd.f32 %v1286_v7, %v605_v10 }
  0xe2   : > { %733 = vst [vmem:[%s1293_s10 + $0x40] sm:$0xff] %v558_v11 }
  0xe3   : > { %749 = vst [vmem:[%s1293_s10 + $0xc0] sm:$0xff] %v606_v12  ;;  %v653_v13 = vpop.f32.mrf.mxu2  ;;  %v701_v14 = vpop.f32.mrf.mxu3 }
  0xe4   : > { %v654_v15 = vadd.f32 %v1286_v7, %v653_v13  ;;  %v702_v16 = vadd.f32 %v1286_v7, %v701_v14 }
  0xe6   : > { %765 = vst [vmem:[%s1293_s10 + $0x140] sm:$0xff] %v654_v15 }
  0xe7   : > { %781 = vst [vmem:[%s1293_s10 + $0x1c0] sm:$0xff] %v702_v16  ;;  %v560_v17 = vpop.f32.mrf.mxu0  ;;  %v608_v18 = vpop.f32.mrf.mxu1 }
  0xe8   : > { %v561_v19 = vadd.f32 %v1286_v7, %v560_v17  ;;  %v609_v20 = vadd.f32 %v1286_v7, %v608_v18 }
  0xea   : > { %734 = vst [vmem:[%s1293_s10 + $0x48] sm:$0xff] %v561_v19 }
  0xeb   : > { %750 = vst [vmem:[%s1293_s10 + $0xc8] sm:$0xff] %v609_v20  ;;  %v656_v21 = vpop.f32.mrf.mxu2  ;;  %v704_v22 = vpop.f32.mrf.mxu3 }
  0xec   : > { %v657_v23 = vadd.f32 %v1286_v7, %v656_v21  ;;  %v705_v24 = vadd.f32 %v1286_v7, %v704_v22 }
  0xee   : > { %766 = vst [vmem:[%s1293_s10 + $0x148] sm:$0xff] %v657_v23 }
  0xef   : > { %782 = vst [vmem:[%s1293_s10 + $0x1c8] sm:$0xff] %v705_v24  ;;  %v563_v25 = vpop.f32.mrf.mxu0  ;;  %v611_v26 = vpop.f32.mrf.mxu1 }
  0xf0   : > { %v564_v27 = vadd.f32 %v1286_v7, %v563_v25  ;;  %v612_v28 = vadd.f32 %v1286_v7, %v611_v26 }
  0xf2   : > { %735 = vst [vmem:[%s1293_s10 + $0x50] sm:$0xff] %v564_v27 }
  0xf3   : > { %751 = vst [vmem:[%s1293_s10 + $0xd0] sm:$0xff] %v612_v28  ;;  %v659_v29 = vpop.f32.mrf.mxu2  ;;  %v707_v30 = vpop.f32.mrf.mxu3 }
  0xf4   : > { %v660_v31 = vadd.f32 %v1286_v7, %v659_v29  ;;  %v708_v32 = vadd.f32 %v1286_v7, %v707_v30 }
  0xf6   : > { %767 = vst [vmem:[%s1293_s10 + $0x150] sm:$0xff] %v660_v31 }
  0xf7   : > { %783 = vst [vmem:[%s1293_s10 + $0x1d0] sm:$0xff] %v708_v32  ;;  %v566_v33 = vpop.f32.mrf.mxu0  ;;  %v614_v34 = vpop.f32.mrf.mxu1 }
  0xf8   : > { %v567_v35 = vadd.f32 %v1286_v7, %v566_v33  ;;  %v615_v36 = vadd.f32 %v1286_v7, %v614_v34 }
  0xfa   : > { %736 = vst [vmem:[%s1293_s10 + $0x58] sm:$0xff] %v567_v35 }
  0xfb   : > { %752 = vst [vmem:[%s1293_s10 + $0xd8] sm:$0xff] %v615_v36  ;;  %v662_v37 = vpop.f32.mrf.mxu2  ;;  %v710_v38 = vpop.f32.mrf.mxu3 }
  0xfc   : > { %v663_v39 = vadd.f32 %v1286_v7, %v662_v37  ;;  %v711_v40 = vadd.f32 %v1286_v7, %v710_v38 }
  0xfe   : > { %768 = vst [vmem:[%s1293_s10 + $0x158] sm:$0xff] %v663_v39 }
  0xff   : > { %784 = vst [vmem:[%s1293_s10 + $0x1d8] sm:$0xff] %v711_v40  ;;  %v569_v41 = vpop.f32.mrf.mxu0  ;;  %v617_v42 = vpop.f32.mrf.mxu1 }
 0x100   : > { %v570_v43 = vadd.f32 %v1286_v7, %v569_v41  ;;  %v618_v44 = vadd.f32 %v1286_v7, %v617_v42 }
 0x102   : > { %737 = vst [vmem:[%s1293_s10 + $0x60] sm:$0xff] %v570_v43 }
 0x103   : > { %753 = vst [vmem:[%s1293_s10 + $0xe0] sm:$0xff] %v618_v44  ;;  %v665_v45 = vpop.f32.mrf.mxu2  ;;  %v713_v46 = vpop.f32.mrf.mxu3 }
 0x104   : > { %v666_v47 = vadd.f32 %v1286_v7, %v665_v45  ;;  %v714_v48 = vadd.f32 %v1286_v7, %v713_v46 }
 0x106   : > { %769 = vst [vmem:[%s1293_s10 + $0x160] sm:$0xff] %v666_v47 }
 0x107   : > { %785 = vst [vmem:[%s1293_s10 + $0x1e0] sm:$0xff] %v714_v48  ;;  %v572_v49 = vpop.f32.mrf.mxu0  ;;  %v620_v50 = vpop.f32.mrf.mxu1 }
 0x108   : > { %v573_v51 = vadd.f32 %v1286_v7, %v572_v49  ;;  %v621_v52 = vadd.f32 %v1286_v7, %v620_v50 }
 0x10a   : > { %738 = vst [vmem:[%s1293_s10 + $0x68] sm:$0xff] %v573_v51 }
 0x10b   : > { %754 = vst [vmem:[%s1293_s10 + $0xe8] sm:$0xff] %v621_v52  ;;  %v668_v53 = vpop.f32.mrf.mxu2  ;;  %v716_v54 = vpop.f32.mrf.mxu3 }
 0x10c   : > { %v669_v55 = vadd.f32 %v1286_v7, %v668_v53  ;;  %v717_v56 = vadd.f32 %v1286_v7, %v716_v54 }
 0x10e   : > { %770 = vst [vmem:[%s1293_s10 + $0x168] sm:$0xff] %v669_v55 }
 0x10f   : > { %786 = vst [vmem:[%s1293_s10 + $0x1e8] sm:$0xff] %v717_v56  ;;  %v575_v57 = vpop.f32.mrf.mxu0  ;;  %v623_v58 = vpop.f32.mrf.mxu1 }
 0x110   : > { %v576_v59 = vadd.f32 %v1286_v7, %v575_v57  ;;  %v624_v60 = vadd.f32 %v1286_v7, %v623_v58 }
 0x112   : > { %739 = vst [vmem:[%s1293_s10 + $0x70] sm:$0xff] %v576_v59 }
 0x113   : > { %755 = vst [vmem:[%s1293_s10 + $0xf0] sm:$0xff] %v624_v60  ;;  %v671_v61 = vpop.f32.mrf.mxu2  ;;  %v719_v62 = vpop.f32.mrf.mxu3 }
 0x114   : > { %v672_v63 = vadd.f32 %v1286_v7, %v671_v61  ;;  %v720_v0 = vadd.f32 %v1286_v7, %v719_v62 }
 0x116   : > { %771 = vst [vmem:[%s1293_s10 + $0x170] sm:$0xff] %v672_v63 }
 0x117   : > { %787 = vst [vmem:[%s1293_s10 + $0x1f0] sm:$0xff] %v720_v0  ;;  %v578_v1 = vpop.f32.mrf.mxu0  ;;  %v626_v2 = vpop.f32.mrf.mxu1 }
 0x118   : > { %v579_v3 = vadd.f32 %v1286_v7, %v578_v1  ;;  %v627_v4 = vadd.f32 %v1286_v7, %v626_v2 }
 0x11a   : > { %740 = vst [vmem:[%s1293_s10 + $0x78] sm:$0xff] %v579_v3 }
 0x11b   : > { %756 = vst [vmem:[%s1293_s10 + $0xf8] sm:$0xff] %v627_v4  ;;  %v674_v5 = vpop.f32.mrf.mxu2  ;;  %v722_v6 = vpop.f32.mrf.mxu3 }
 0x11c   : > { %v675_v8 = vadd.f32 %v1286_v7, %v674_v5  ;;  %v723_v9 = vadd.f32 %v1286_v7, %v722_v6 }
 0x11e   : > { %772 = vst [vmem:[%s1293_s10 + $0x178] sm:$0xff] %v675_v8 }
 0x11f   : > { %788 = vst [vmem:[%s1293_s10 + $0x1f8] sm:$0xff] %v723_v9 }
 0x120 PF: > { %s13_s16 = sadd.s32 1, %s1080_s16   ;;  %s1442_s12 = smov %s1072_s14 }
 0x121   : > { %p10_p7 = scmp.ge.s32.totalorder %s13_s16, 26   ;;  %s1443_s13 = smov %s1076_s15 }
 0x122   : > { %s1444_s14 = smov %s1447_s17  ;;  %s1445_s15 = smov %s1451_s18 }
 0x123   :  { %12 = sbr.rel (!%p10_p7) target bundleno = 3 (0x3), region = 68 }

</bundles_post_ra>
